<compile_context>
chip_gen: v7x
topology: tpu7x:2x2x1
jax: 0.10.0
libtpu: 0.0.40
codegen_flags: <defaults>
</compile_context>

<pallas_src>
import jax
import jax.numpy as jnp
from jax.experimental import pallas as pl
from jax.experimental.pallas import tpu as pltpu

LANE = 128


def yolo_params(version):
    if version == 'n':
        return (1 / 3, 1 / 4, 2.0)
    elif version == 's':
        return (1 / 3, 1 / 2, 2.0)
    elif version == 'm':
        return (2 / 3, 3 / 4, 1.5)
    elif version == 'l':
        return (1.0, 1.0, 1.0)
    elif version == 'x':
        return (1.0, 1.25, 1.0)


def _round_up(x, m=LANE):
    return ((x + m - 1) // m) * m


# ----------------------------- Pallas kernels ------------------------------

def _make_conv_kernel(num_chunks):
    """out = SiLU( sum_i chunk_i @ w_i + bias ); f32 accumulate, bf16 store."""
    def kernel(*refs):
        x_refs = refs[:num_chunks]
        w_refs = refs[num_chunks:2 * num_chunks]
        b_ref = refs[2 * num_chunks]
        o_ref = refs[2 * num_chunks + 1]
        acc = jnp.dot(x_refs[0][...], w_refs[0][...],
                      preferred_element_type=jnp.float32)
        for i in range(1, num_chunks):
            acc = acc + jnp.dot(x_refs[i][...], w_refs[i][...],
                                preferred_element_type=jnp.float32)
        y = acc + b_ref[...]                                   # folded-BN bias
        sig = pl.reciprocal(1.0 + jnp.exp(-y), approx=True)    # sigmoid via EUP
        o_ref[...] = (y * sig).astype(o_ref.dtype)             # SiLU
    return kernel


def fused_conv_bn_silu(chunks, w_chunks, bias, tile_m=512):
    """chunks: list of (M, K_i) bf16; w_chunks: list of (K_i, Npad) bf16 with BN
    scale folded in and K/N zero-padded; bias: (1, Npad) f32 -> (M, Npad) bf16."""
    assert len(chunks) == len(w_chunks)
    num_chunks = len(chunks)
    m = chunks[0].shape[0]
    n_pad = w_chunks[0].shape[1]
    tm = m if m < tile_m else tile_m
    grid = (pl.cdiv(m, tm),)

    in_specs = []
    for ch in chunks:                                       # M-tiled activations
        in_specs.append(pl.BlockSpec((tm, ch.shape[1]), lambda i: (i, 0)))
    for wc in w_chunks:                                     # weights stay resident
        in_specs.append(pl.BlockSpec((wc.shape[0], n_pad), lambda i: (0, 0)))
    in_specs.append(pl.BlockSpec((1, n_pad), lambda i: (0, 0)))   # bias

    return pl.pallas_call(
        _make_conv_kernel(num_chunks),
        out_shape=jax.ShapeDtypeStruct((m, n_pad), jnp.bfloat16),
        grid=grid,
        in_specs=in_specs,
        out_specs=pl.BlockSpec((tm, n_pad), lambda i: (i, 0)),
        compiler_params=pltpu.CompilerParams(
            dimension_semantics=("parallel",),
            vmem_limit_bytes=32 * 1024 * 1024),
    )(*chunks, *w_chunks, bias)


def _sppf_pool_kernel(x_ref, y1_ref, y2_ref, y3_ref, hpad_ref, wpad_ref):
    """Three chained MaxPool2d(k=5, s=1, p=2), separable (5-tap H, then 5-tap W)."""
    n, h, w, c = x_ref.shape
    neg = jnp.float32(-3.0e38)

    def pool_once(v):
        # 5-tap running max along H via a -BIG padded VMEM scratch
        hpad_ref[...] = jnp.full(hpad_ref.shape, neg, jnp.float32)
        hpad_ref[:, 2:2 + h, :, :] = v
        m = hpad_ref[:, 0:h, :, :]
        for d in range(1, 5):
            m = jnp.maximum(m, hpad_ref[:, d:d + h, :, :])
        # 5-tap running max along W
        wpad_ref[...] = jnp.full(wpad_ref.shape, neg, jnp.float32)
        wpad_ref[:, :, 2:2 + w, :] = m
        m = wpad_ref[:, :, 0:w, :]
        for d in range(1, 5):
            m = jnp.maximum(m, wpad_ref[:, :, d:d + w, :])
        return m

    y1 = pool_once(x_ref[...].astype(jnp.float32))
    y1_ref[...] = y1.astype(y1_ref.dtype)
    y2 = pool_once(y1)
    y2_ref[...] = y2.astype(y2_ref.dtype)
    y3 = pool_once(y2)
    y3_ref[...] = y3.astype(y3_ref.dtype)


def sppf_pools(x):
    n, h, w, c = x.shape
    vmem = pl.BlockSpec(memory_space=pltpu.MemorySpace.VMEM)
    return pl.pallas_call(
        _sppf_pool_kernel,
        out_shape=(jax.ShapeDtypeStruct((n, h, w, c), x.dtype),) * 3,
        in_specs=[vmem],
        out_specs=(vmem, vmem, vmem),
        scratch_shapes=[pltpu.VMEM((n, h + 4, w, c), jnp.float32),
                        pltpu.VMEM((n, h, w + 4, c), jnp.float32)],
        compiler_params=pltpu.CompilerParams(
            vmem_limit_bytes=32 * 1024 * 1024),
    )(x)


# ------------------------------ model blocks -------------------------------

def conv_block(x, p, k, stride, pad):
    """Conv(k, stride, pad, bias=False) + folded BN + SiLU on padded-NHWC."""
    n, h, w, c = x.shape
    if pad > 0:
        x = jnp.pad(x, ((0, 0), (pad, pad), (pad, pad), (0, 0)))
    ho = (h + 2 * pad - k) // stride + 1
    wo = (w + 2 * pad - k) // stride + 1
    chunks = []
    for di in range(k):
        for dj in range(k):
            t = x[:, di:di + stride * (ho - 1) + 1:stride,
                     dj:dj + stride * (wo - 1) + 1:stride, :]
            chunks.append(t.reshape(n * ho * wo, c))
    if len(p['w']) == 1 and len(chunks) > 1:
        # single-chunk im2col path (used only when cin is tiny, e.g. the RGB stem)
        chunks = [jnp.concatenate(chunks, axis=-1)]
    out2d = fused_conv_bn_silu(chunks, p['w'], p['bias'])
    return out2d.reshape(n, ho, wo, p['cout_pad'])


def c2f_block(x, p, num_bottlenecks):
    x = conv_block(x, p['conv1'], 1, 1, 0)
    n, h, w, _ = x.shape
    mid = p['mid']
    x1 = x[..., :mid]
    x2 = x[..., mid:2 * mid]
    pieces = [x1, x2]
    for _ in range(num_bottlenecks):
        # Reference Bottleneck.forward discards conv1/conv2 outputs; with
        # shortcut=True it returns x_in + x == 2*x.  Reproduce exactly that.
        x1 = x1 + x1
        pieces.insert(0, x1)
    # torch.cat fused into conv2: one weight slice (K-chunk) per concat piece.
    chunks = [t.reshape(n * h * w, mid) for t in pieces]
    out2d = fused_conv_bn_silu(chunks, p['conv2']['w'], p['conv2']['bias'])
    return out2d.reshape(n, h, w, p['conv2']['cout_pad'])


def sppf_block(x, p):
    x = conv_block(x, p['conv1'], 1, 1, 0)
    y1, y2, y3 = sppf_pools(x)            # three pools fused into one kernel
    n, h, w, c = x.shape
    chunks = [t.reshape(n * h * w, c) for t in (x, y1, y2, y3)]
    out2d = fused_conv_bn_silu(chunks, p['conv2']['w'], p['conv2']['bias'])
    return out2d.reshape(n, h, w, p['conv2']['cout_pad'])


# --------------------------- parameter creation ----------------------------

def make_conv_params(key, chunk_specs, cout, k=1, single_chunk=False):
    """chunk_specs: [(true_cin_i, carried_cin_i)] per K-chunk of the fused matmul.
    For k>1 there is a single spec and each of the k*k taps becomes one chunk
    (or all taps are concatenated into one chunk when single_chunk=True)."""
    assert k == 1 or len(chunk_specs) == 1
    cin_true = sum(ct for ct, _ in chunk_specs)
    kw, kg, kb, km, kv = jax.random.split(key, 5)
    w = jax.random.normal(kw, (k, k, cin_true, cout), jnp.float32)
    w = w * (1.0 / jnp.sqrt(float(k * k * cin_true)))
    gamma = 1.0 + 0.1 * jax.random.normal(kg, (cout,), jnp.float32)
    beta = 0.1 * jax.random.normal(kb, (cout,), jnp.float32)
    mean = 0.1 * jax.random.normal(km, (cout,), jnp.float32)
    var = jax.random.uniform(kv, (cout,), jnp.float32, minval=0.5, maxval=1.5)
    scale = gamma / jnp.sqrt(var + 1e-5)
    bias = beta - mean * scale
    wf = w * scale                       # fold BN scale into the conv weights
    cout_pad = _round_up(cout)

    w_chunks = []
    if k == 1:
        off = 0
        for ct, cc in chunk_specs:
            ws = wf[0, 0, off:off + ct, :]
            ws = jnp.pad(ws, ((0, cc - ct), (0, cout_pad - cout)))
            w_chunks.append(ws.astype(jnp.bfloat16))
            off += ct
    else:
        ct, cc = chunk_specs[0]
        taps = []
        for di in range(k):
            for dj in range(k):
                ws = jnp.pad(wf[di, dj], ((0, cc - ct), (0, cout_pad - cout)))
                taps.append(ws.astype(jnp.bfloat16))
        w_chunks = [jnp.concatenate(taps, axis=0)] if single_chunk else taps

    bias_p = jnp.pad(bias, (0, cout_pad - cout)).reshape(1, cout_pad)
    return {'w': w_chunks, 'bias': bias_p, 'cout': cout, 'cout_pad': cout_pad}


def make_backbone_params(key, version='n', in_channels=3):
    d, w, r = yolo_params(version)
    c64, c128 = int(64 * w), int(128 * w)
    c256, c512 = int(256 * w), int(512 * w)
    c512r = int(512 * w * r)
    nb3, nb6 = int(3 * d), int(6 * d)
    keys = iter(jax.random.split(key, 32))

    def c2f_params(cin_true, cin_carry, cout, nb):
        mid = cout // 2
        return {
            'conv1': make_conv_params(next(keys), [(cin_true, cin_carry)], cout, k=1),
            'conv2': make_conv_params(next(keys), [(mid, mid)] * (nb + 2), cout, k=1),
            'mid': mid,
        }

    hidden = c512r // 2
    return {
        'conv_0': make_conv_params(next(keys), [(in_channels, in_channels)],
                                   c64, k=3, single_chunk=True),
        'conv_1': make_conv_params(next(keys), [(c64, _round_up(c64))], c128, k=3),
        'c2f_2': c2f_params(c128, _round_up(c128), c128, nb3),
        'conv_3': make_conv_params(next(keys), [(c128, _round_up(c128))], c256, k=3),
        'c2f_4': c2f_params(c256, _round_up(c256), c256, nb6),
        'conv_5': make_conv_params(next(keys), [(c256, _round_up(c256))], c512, k=3),
        'c2f_6': c2f_params(c512, _round_up(c512), c512, nb6),
        'conv_7': make_conv_params(next(keys), [(c512, _round_up(c512))], c512r, k=3),
        'c2f_8': c2f_params(c512r, _round_up(c512r), c512r, nb3),
        'sppf': {
            'conv1': make_conv_params(next(keys), [(c512r, _round_up(c512r))], hidden, k=1),
            'conv2': make_conv_params(next(keys), [(hidden, _round_up(hidden))] * 4, c512r, k=1),
        },
        'nb3': nb3, 'nb6': nb6,
    }


# --------------------------------- forward ---------------------------------

def backbone_forward(x_nchw, params):
    x = jnp.transpose(x_nchw, (0, 2, 3, 1)).astype(jnp.bfloat16)  # NCHW -> NHWC bf16
    x = conv_block(x, params['conv_0'], 3, 2, 1)
    x = conv_block(x, params['conv_1'], 3, 2, 1)
    x = c2f_block(x, params['c2f_2'], params['nb3'])
    x = conv_block(x, params['conv_3'], 3, 2, 1)
    out1 = c2f_block(x, params['c2f_4'], params['nb6'])
    x = conv_block(out1, params['conv_5'], 3, 2, 1)
    out2 = c2f_block(x, params['c2f_6'], params['nb6'])
    x = conv_block(out2, params['conv_7'], 3, 2, 1)
    x = c2f_block(x, params['c2f_8'], params['nb3'])
    out3 = sppf_block(x, params['sppf'])

    def to_public(t, cout):   # drop channel padding, NHWC -> NCHW, f32 like PyTorch
        return jnp.transpose(t[..., :cout], (0, 3, 1, 2)).astype(jnp.float32)

    return (to_public(out1, params['c2f_4']['conv2']['cout']),
            to_public(out2, params['c2f_6']['conv2']['cout']),
            to_public(out3, params['sppf']['conv2']['cout']))


if __name__ == "__main__":
    key = jax.random.PRNGKey(0)
    kp, kx = jax.random.split(key)
    params = make_backbone_params(kp, version='n', in_channels=3)

    # small input consistent with the module (5 stride-2 downsamples): 64x64 -> 2x2
    x = jax.random.uniform(kx, (1, 3, 64, 64), jnp.float32)

    fwd = jax.jit(lambda inp: backbone_forward(inp, params))
    out1, out2, out3 = fwd(x)
    jax.block_until_ready((out1, out2, out3))

    assert out1.shape == (1, 64, 8, 8), out1.shape     # int(256*w) = 64
    assert out2.shape == (1, 128, 4, 4), out2.shape    # int(512*w) = 128
    assert out3.shape == (1, 256, 2, 2), out3.shape    # int(512*w*r) = 256
    assert out1.dtype == out2.dtype == out3.dtype == jnp.float32

    print("KERNEL_OK")
</pallas_src>

<mosaic_0001>
module attributes {stable_mosaic.version = 11 : i64} {
  func.func @kernel(%arg0: i32, %arg1: memref<512x27xbf16, #tpu.memory_space<vmem>>, %arg2: memref<27x128xbf16, #tpu.memory_space<vmem>>, %arg3: memref<1x128xf32, #tpu.memory_space<vmem>>, %arg4: memref<512x128xbf16, #tpu.memory_space<vmem>>) attributes {dimension_semantics = [#tpu.dimension_semantics<parallel>], iteration_bounds = array<i64: 2>, scalar_prefetch = 0 : i64, scratch_operands = 0 : i64, tpu.core_type = #tpu.core_type<tc>, window_params = [{transform_indices = @transform_0, window_bounds = array<i64: 512, 27>}, {pipeline_mode = #tpu.pipeline_mode<synchronous>, transform_indices = @transform_1, window_bounds = array<i64: 27, 128>}, {pipeline_mode = #tpu.pipeline_mode<synchronous>, transform_indices = @transform_2, window_bounds = array<i64: 1, 128>}, {transform_indices = @transform_3, window_bounds = array<i64: 512, 128>}]} {
    %c0 = arith.constant 0 : index
    %c0_0 = arith.constant 0 : index
    %0 = vector.load %arg1[%c0, %c0_0] : memref<512x27xbf16, #tpu.memory_space<vmem>>, vector<512x27xbf16>
    %c0_1 = arith.constant 0 : index
    %c0_2 = arith.constant 0 : index
    %1 = vector.load %arg2[%c0_1, %c0_2] : memref<27x128xbf16, #tpu.memory_space<vmem>>, vector<27x128xbf16>
    %cst = arith.constant dense<0.000000e+00> : vector<512x128xf32>
    %2 = tpu.matmul %0, %1, %cst {dimension_numbers = #tpu.dot_dimension_numbers<[1], [0], [0], [1], [0, 0, 1, 1], [], []>} : vector<512x27xbf16>, vector<27x128xbf16>, vector<512x128xf32> -> vector<512x128xf32>
    %c0_3 = arith.constant 0 : index
    %c0_4 = arith.constant 0 : index
    %3 = vector.load %arg3[%c0_3, %c0_4] : memref<1x128xf32, #tpu.memory_space<vmem>>, vector<1x128xf32>
    %4 = vector.broadcast %3 : vector<1x128xf32> to vector<512x128xf32>
    %5 = arith.addf %2, %4 : vector<512x128xf32>
    %cst_5 = arith.constant 0.000000e+00 : f32
    %6 = vector.broadcast %cst_5 : f32 to vector<512x128xf32>
    %7 = arith.subf %6, %5 : vector<512x128xf32>
    %8 = math.exp %7 : vector<512x128xf32>
    %cst_6 = arith.constant 1.000000e+00 : f32
    %9 = vector.broadcast %cst_6 : f32 to vector<512x128xf32>
    %10 = arith.addf %9, %8 : vector<512x128xf32>
    %11 = tpu.reciprocal %10 {approx = true} : vector<512x128xf32> -> vector<512x128xf32>
    %12 = arith.mulf %5, %11 : vector<512x128xf32>
    %13 = arith.truncf %12 : vector<512x128xf32> to vector<512x128xbf16>
    %c0_7 = arith.constant 0 : index
    %c0_8 = arith.constant 0 : index
    %14 = vector.load %arg4[%c0_7, %c0_8] : memref<512x128xbf16, #tpu.memory_space<vmem>>, vector<512x128xbf16>
    tpu.vector_store %arg4[%c0_7, %c0_8], %13 {strides = array<i32>} : memref<512x128xbf16, #tpu.memory_space<vmem>>, vector<512x128xbf16>,
    return
  }
  func.func @transform_0(%arg0: i32) -> (i32, i32) {
    %c0_i32 = arith.constant 0 : i32
    %c0_i32_0 = arith.constant 0 : i32
    return %arg0, %c0_i32 : i32, i32
  }
  func.func @transform_1(%arg0: i32) -> (i32, i32) {
    %c0_i32 = arith.constant 0 : i32
    %c0_i32_0 = arith.constant 0 : i32
    %c0_i32_1 = arith.constant 0 : i32
    return %c0_i32, %c0_i32_0 : i32, i32
  }
  func.func @transform_2(%arg0: i32) -> (i32, i32) {
    %c0_i32 = arith.constant 0 : i32
    %c0_i32_0 = arith.constant 0 : i32
    %c0_i32_1 = arith.constant 0 : i32
    return %c0_i32, %c0_i32_0 : i32, i32
  }
  func.func @transform_3(%arg0: i32) -> (i32, i32) {
    %c0_i32 = arith.constant 0 : i32
    %c0_i32_0 = arith.constant 0 : i32
    return %arg0, %c0_i32 : i32, i32
  }
}

module attributes {stable_mosaic.version = 11 : i64} {
  func.func @kernel(%arg0: i32, %arg1: memref<256x128xbf16, #tpu.memory_space<vmem>>, %arg2: memref<128x128xbf16, #tpu.memory_space<vmem>>, %arg3: memref<1x128xf32, #tpu.memory_space<vmem>>, %arg4: memref<256x128xbf16, #tpu.memory_space<vmem>>) attributes {dimension_semantics = [#tpu.dimension_semantics<parallel>], iteration_bounds = array<i64: 1>, scalar_prefetch = 0 : i64, scratch_operands = 0 : i64, tpu.core_type = #tpu.core_type<tc>, window_params = [{transform_indices = @transform_0, window_bounds = array<i64: 256, 128>}, {pipeline_mode = #tpu.pipeline_mode<synchronous>, transform_indices = @transform_1, window_bounds = array<i64: 128, 128>}, {pipeline_mode = #tpu.pipeline_mode<synchronous>, transform_indices = @transform_2, window_bounds = array<i64: 1, 128>}, {transform_indices = @transform_3, window_bounds = array<i64: 256, 128>}]} {
    %c0 = arith.constant 0 : index
    %c0_0 = arith.constant 0 : index
    %0 = vector.load %arg1[%c0, %c0_0] : memref<256x128xbf16, #tpu.memory_space<vmem>>, vector<256x128xbf16>
    %c0_1 = arith.constant 0 : index
    %c0_2 = arith.constant 0 : index
    %1 = vector.load %arg2[%c0_1, %c0_2] : memref<128x128xbf16, #tpu.memory_space<vmem>>, vector<128x128xbf16>
    %cst = arith.constant dense<0.000000e+00> : vector<256x128xf32>
    %2 = tpu.matmul %0, %1, %cst {dimension_numbers = #tpu.dot_dimension_numbers<[1], [0], [0], [1], [0, 0, 1, 1], [], []>} : vector<256x128xbf16>, vector<128x128xbf16>, vector<256x128xf32> -> vector<256x128xf32>
    %c0_3 = arith.constant 0 : index
    %c0_4 = arith.constant 0 : index
    %3 = vector.load %arg3[%c0_3, %c0_4] : memref<1x128xf32, #tpu.memory_space<vmem>>, vector<1x128xf32>
    %4 = vector.broadcast %3 : vector<1x128xf32> to vector<256x128xf32>
    %5 = arith.addf %2, %4 : vector<256x128xf32>
    %cst_5 = arith.constant 0.000000e+00 : f32
    %6 = vector.broadcast %cst_5 : f32 to vector<256x128xf32>
    %7 = arith.subf %6, %5 : vector<256x128xf32>
    %8 = math.exp %7 : vector<256x128xf32>
    %cst_6 = arith.constant 1.000000e+00 : f32
    %9 = vector.broadcast %cst_6 : f32 to vector<256x128xf32>
    %10 = arith.addf %9, %8 : vector<256x128xf32>
    %11 = tpu.reciprocal %10 {approx = true} : vector<256x128xf32> -> vector<256x128xf32>
    %12 = arith.mulf %5, %11 : vector<256x128xf32>
    %13 = arith.truncf %12 : vector<256x128xf32> to vector<256x128xbf16>
    %c0_7 = arith.constant 0 : index
    %c0_8 = arith.constant 0 : index
    %14 = vector.load %arg4[%c0_7, %c0_8] : memref<256x128xbf16, #tpu.memory_space<vmem>>, vector<256x128xbf16>
    tpu.vector_store %arg4[%c0_7, %c0_8], %13 {strides = array<i32>} : memref<256x128xbf16, #tpu.memory_space<vmem>>, vector<256x128xbf16>,
    return
  }
  func.func @transform_0(%arg0: i32) -> (i32, i32) {
    %c0_i32 = arith.constant 0 : i32
    %c0_i32_0 = arith.constant 0 : i32
    return %arg0, %c0_i32 : i32, i32
  }
  func.func @transform_1(%arg0: i32) -> (i32, i32) {
    %c0_i32 = arith.constant 0 : i32
    %c0_i32_0 = arith.constant 0 : i32
    %c0_i32_1 = arith.constant 0 : i32
    return %c0_i32, %c0_i32_0 : i32, i32
  }
  func.func @transform_2(%arg0: i32) -> (i32, i32) {
    %c0_i32 = arith.constant 0 : i32
    %c0_i32_0 = arith.constant 0 : i32
    %c0_i32_1 = arith.constant 0 : i32
    return %c0_i32, %c0_i32_0 : i32, i32
  }
  func.func @transform_3(%arg0: i32) -> (i32, i32) {
    %c0_i32 = arith.constant 0 : i32
    %c0_i32_0 = arith.constant 0 : i32
    return %arg0, %c0_i32 : i32, i32
  }
}

module attributes {stable_mosaic.version = 11 : i64} {
  func.func @kernel(%arg0: i32, %arg1: memref<256x128xbf16, #tpu.memory_space<vmem>>, %arg2: memref<256x128xbf16, #tpu.memory_space<vmem>>, %arg3: memref<256x128xbf16, #tpu.memory_space<vmem>>, %arg4: memref<256x128xbf16, #tpu.memory_space<vmem>>, %arg5: memref<256x128xbf16, #tpu.memory_space<vmem>>, %arg6: memref<256x128xbf16, #tpu.memory_space<vmem>>, %arg7: memref<256x128xbf16, #tpu.memory_space<vmem>>, %arg8: memref<256x128xbf16, #tpu.memory_space<vmem>>, %arg9: memref<256x128xbf16, #tpu.memory_space<vmem>>, %arg10: memref<128x128xbf16, #tpu.memory_space<vmem>>, %arg11: memref<128x128xbf16, #tpu.memory_space<vmem>>, %arg12: memref<128x128xbf16, #tpu.memory_space<vmem>>, %arg13: memref<128x128xbf16, #tpu.memory_space<vmem>>, %arg14: memref<128x128xbf16, #tpu.memory_space<vmem>>, %arg15: memref<128x128xbf16, #tpu.memory_space<vmem>>, %arg16: memref<128x128xbf16, #tpu.memory_space<vmem>>, %arg17: memref<128x128xbf16, #tpu.memory_space<vmem>>, %arg18: memref<128x128xbf16, #tpu.memory_space<vmem>>, %arg19: memref<1x128xf32, #tpu.memory_space<vmem>>, %arg20: memref<256x128xbf16, #tpu.memory_space<vmem>>) attributes {dimension_semantics = [#tpu.dimension_semantics<parallel>], iteration_bounds = array<i64: 1>, scalar_prefetch = 0 : i64, scratch_operands = 0 : i64, tpu.core_type = #tpu.core_type<tc>, window_params = [{transform_indices = @transform_0, window_bounds = array<i64: 256, 128>}, {transform_indices = @transform_1, window_bounds = array<i64: 256, 128>}, {transform_indices = @transform_2, window_bounds = array<i64: 256, 128>}, {transform_indices = @transform_3, window_bounds = array<i64: 256, 128>}, {transform_indices = @transform_4, window_bounds = array<i64: 256, 128>}, {transform_indices = @transform_5, window_bounds = array<i64: 256, 128>}, {transform_indices = @transform_6, window_bounds = array<i64: 256, 128>}, {transform_indices = @transform_7, window_bounds = array<i64: 256, 128>}, {transform_indices = @transform_8, window_bounds = array<i64: 256, 128>}, {pipeline_mode = #tpu.pipeline_mode<synchronous>, transform_indices = @transform_9, window_bounds = array<i64: 128, 128>}, {pipeline_mode = #tpu.pipeline_mode<synchronous>, transform_indices = @transform_10, window_bounds = array<i64: 128, 128>}, {pipeline_mode = #tpu.pipeline_mode<synchronous>, transform_indices = @transform_11, window_bounds = array<i64: 128, 128>}, {pipeline_mode = #tpu.pipeline_mode<synchronous>, transform_indices = @transform_12, window_bounds = array<i64: 128, 128>}, {pipeline_mode = #tpu.pipeline_mode<synchronous>, transform_indices = @transform_13, window_bounds = array<i64: 128, 128>}, {pipeline_mode = #tpu.pipeline_mode<synchronous>, transform_indices = @transform_14, window_bounds = array<i64: 128, 128>}, {pipeline_mode = #tpu.pipeline_mode<synchronous>, transform_indices = @transform_15, window_bounds = array<i64: 128, 128>}, {pipeline_mode = #tpu.pipeline_mode<synchronous>, transform_indices = @transform_16, window_bounds = array<i64: 128, 128>}, {pipeline_mode = #tpu.pipeline_mode<synchronous>, transform_indices = @transform_17, window_bounds = array<i64: 128, 128>}, {pipeline_mode = #tpu.pipeline_mode<synchronous>, transform_indices = @transform_18, window_bounds = array<i64: 1, 128>}, {transform_indices = @transform_19, window_bounds = array<i64: 256, 128>}]} {
    %c0 = arith.constant 0 : index
    %c0_0 = arith.constant 0 : index
    %0 = vector.load %arg1[%c0, %c0_0] : memref<256x128xbf16, #tpu.memory_space<vmem>>, vector<256x128xbf16>
    %c0_1 = arith.constant 0 : index
    %c0_2 = arith.constant 0 : index
    %1 = vector.load %arg10[%c0_1, %c0_2] : memref<128x128xbf16, #tpu.memory_space<vmem>>, vector<128x128xbf16>
    %cst = arith.constant dense<0.000000e+00> : vector<256x128xf32>
    %2 = tpu.matmul %0, %1, %cst {dimension_numbers = #tpu.dot_dimension_numbers<[1], [0], [0], [1], [0, 0, 1, 1], [], []>} : vector<256x128xbf16>, vector<128x128xbf16>, vector<256x128xf32> -> vector<256x128xf32>
    %c0_3 = arith.constant 0 : index
    %c0_4 = arith.constant 0 : index
    %3 = vector.load %arg2[%c0_3, %c0_4] : memref<256x128xbf16, #tpu.memory_space<vmem>>, vector<256x128xbf16>
    %c0_5 = arith.constant 0 : index
    %c0_6 = arith.constant 0 : index
    %4 = vector.load %arg11[%c0_5, %c0_6] : memref<128x128xbf16, #tpu.memory_space<vmem>>, vector<128x128xbf16>
    %cst_7 = arith.constant dense<0.000000e+00> : vector<256x128xf32>
    %5 = tpu.matmul %3, %4, %cst_7 {dimension_numbers = #tpu.dot_dimension_numbers<[1], [0], [0], [1], [0, 0, 1, 1], [], []>} : vector<256x128xbf16>, vector<128x128xbf16>, vector<256x128xf32> -> vector<256x128xf32>
    %6 = arith.addf %2, %5 : vector<256x128xf32>
    %c0_8 = arith.constant 0 : index
    %c0_9 = arith.constant 0 : index
    %7 = vector.load %arg3[%c0_8, %c0_9] : memref<256x128xbf16, #tpu.memory_space<vmem>>, vector<256x128xbf16>
    %c0_10 = arith.constant 0 : index
    %c0_11 = arith.constant 0 : index
    %8 = vector.load %arg12[%c0_10, %c0_11] : memref<128x128xbf16, #tpu.memory_space<vmem>>, vector<128x128xbf16>
    %cst_12 = arith.constant dense<0.000000e+00> : vector<256x128xf32>
    %9 = tpu.matmul %7, %8, %cst_12 {dimension_numbers = #tpu.dot_dimension_numbers<[1], [0], [0], [1], [0, 0, 1, 1], [], []>} : vector<256x128xbf16>, vector<128x128xbf16>, vector<256x128xf32> -> vector<256x128xf32>
    %10 = arith.addf %6, %9 : vector<256x128xf32>
    %c0_13 = arith.constant 0 : index
    %c0_14 = arith.constant 0 : index
    %11 = vector.load %arg4[%c0_13, %c0_14] : memref<256x128xbf16, #tpu.memory_space<vmem>>, vector<256x128xbf16>
    %c0_15 = arith.constant 0 : index
    %c0_16 = arith.constant 0 : index
    %12 = vector.load %arg13[%c0_15, %c0_16] : memref<128x128xbf16, #tpu.memory_space<vmem>>, vector<128x128xbf16>
    %cst_17 = arith.constant dense<0.000000e+00> : vector<256x128xf32>
    %13 = tpu.matmul %11, %12, %cst_17 {dimension_numbers = #tpu.dot_dimension_numbers<[1], [0], [0], [1], [0, 0, 1, 1], [], []>} : vector<256x128xbf16>, vector<128x128xbf16>, vector<256x128xf32> -> vector<256x128xf32>
    %14 = arith.addf %10, %13 : vector<256x128xf32>
    %c0_18 = arith.constant 0 : index
    %c0_19 = arith.constant 0 : index
    %15 = vector.load %arg5[%c0_18, %c0_19] : memref<256x128xbf16, #tpu.memory_space<vmem>>, vector<256x128xbf16>
    %c0_20 = arith.constant 0 : index
    %c0_21 = arith.constant 0 : index
    %16 = vector.load %arg14[%c0_20, %c0_21] : memref<128x128xbf16, #tpu.memory_space<vmem>>, vector<128x128xbf16>
    %cst_22 = arith.constant dense<0.000000e+00> : vector<256x128xf32>
    %17 = tpu.matmul %15, %16, %cst_22 {dimension_numbers = #tpu.dot_dimension_numbers<[1], [0], [0], [1], [0, 0, 1, 1], [], []>} : vector<256x128xbf16>, vector<128x128xbf16>, vector<256x128xf32> -> vector<256x128xf32>
    %18 = arith.addf %14, %17 : vector<256x128xf32>
    %c0_23 = arith.constant 0 : index
    %c0_24 = arith.constant 0 : index
    %19 = vector.load %arg6[%c0_23, %c0_24] : memref<256x128xbf16, #tpu.memory_space<vmem>>, vector<256x128xbf16>
    %c0_25 = arith.constant 0 : index
    %c0_26 = arith.constant 0 : index
    %20 = vector.load %arg15[%c0_25, %c0_26] : memref<128x128xbf16, #tpu.memory_space<vmem>>, vector<128x128xbf16>
    %cst_27 = arith.constant dense<0.000000e+00> : vector<256x128xf32>
    %21 = tpu.matmul %19, %20, %cst_27 {dimension_numbers = #tpu.dot_dimension_numbers<[1], [0], [0], [1], [0, 0, 1, 1], [], []>} : vector<256x128xbf16>, vector<128x128xbf16>, vector<256x128xf32> -> vector<256x128xf32>
    %22 = arith.addf %18, %21 : vector<256x128xf32>
    %c0_28 = arith.constant 0 : index
    %c0_29 = arith.constant 0 : index
    %23 = vector.load %arg7[%c0_28, %c0_29] : memref<256x128xbf16, #tpu.memory_space<vmem>>, vector<256x128xbf16>
    %c0_30 = arith.constant 0 : index
    %c0_31 = arith.constant 0 : index
    %24 = vector.load %arg16[%c0_30, %c0_31] : memref<128x128xbf16, #tpu.memory_space<vmem>>, vector<128x128xbf16>
    %cst_32 = arith.constant dense<0.000000e+00> : vector<256x128xf32>
    %25 = tpu.matmul %23, %24, %cst_32 {dimension_numbers = #tpu.dot_dimension_numbers<[1], [0], [0], [1], [0, 0, 1, 1], [], []>} : vector<256x128xbf16>, vector<128x128xbf16>, vector<256x128xf32> -> vector<256x128xf32>
    %26 = arith.addf %22, %25 : vector<256x128xf32>
    %c0_33 = arith.constant 0 : index
    %c0_34 = arith.constant 0 : index
    %27 = vector.load %arg8[%c0_33, %c0_34] : memref<256x128xbf16, #tpu.memory_space<vmem>>, vector<256x128xbf16>
    %c0_35 = arith.constant 0 : index
    %c0_36 = arith.constant 0 : index
    %28 = vector.load %arg17[%c0_35, %c0_36] : memref<128x128xbf16, #tpu.memory_space<vmem>>, vector<128x128xbf16>
    %cst_37 = arith.constant dense<0.000000e+00> : vector<256x128xf32>
    %29 = tpu.matmul %27, %28, %cst_37 {dimension_numbers = #tpu.dot_dimension_numbers<[1], [0], [0], [1], [0, 0, 1, 1], [], []>} : vector<256x128xbf16>, vector<128x128xbf16>, vector<256x128xf32> -> vector<256x128xf32>
    %30 = arith.addf %26, %29 : vector<256x128xf32>
    %c0_38 = arith.constant 0 : index
    %c0_39 = arith.constant 0 : index
    %31 = vector.load %arg9[%c0_38, %c0_39] : memref<256x128xbf16, #tpu.memory_space<vmem>>, vector<256x128xbf16>
    %c0_40 = arith.constant 0 : index
    %c0_41 = arith.constant 0 : index
    %32 = vector.load %arg18[%c0_40, %c0_41] : memref<128x128xbf16, #tpu.memory_space<vmem>>, vector<128x128xbf16>
    %cst_42 = arith.constant dense<0.000000e+00> : vector<256x128xf32>
    %33 = tpu.matmul %31, %32, %cst_42 {dimension_numbers = #tpu.dot_dimension_numbers<[1], [0], [0], [1], [0, 0, 1, 1], [], []>} : vector<256x128xbf16>, vector<128x128xbf16>, vector<256x128xf32> -> vector<256x128xf32>
    %34 = arith.addf %30, %33 : vector<256x128xf32>
    %c0_43 = arith.constant 0 : index
    %c0_44 = arith.constant 0 : index
    %35 = vector.load %arg19[%c0_43, %c0_44] : memref<1x128xf32, #tpu.memory_space<vmem>>, vector<1x128xf32>
    %36 = vector.broadcast %35 : vector<1x128xf32> to vector<256x128xf32>
    %37 = arith.addf %34, %36 : vector<256x128xf32>
    %cst_45 = arith.constant 0.000000e+00 : f32
    %38 = vector.broadcast %cst_45 : f32 to vector<256x128xf32>
    %39 = arith.subf %38, %37 : vector<256x128xf32>
    %40 = math.exp %39 : vector<256x128xf32>
    %cst_46 = arith.constant 1.000000e+00 : f32
    %41 = vector.broadcast %cst_46 : f32 to vector<256x128xf32>
    %42 = arith.addf %41, %40 : vector<256x128xf32>
    %43 = tpu.reciprocal %42 {approx = true} : vector<256x128xf32> -> vector<256x128xf32>
    %44 = arith.mulf %37, %43 : vector<256x128xf32>
    %45 = arith.truncf %44 : vector<256x128xf32> to vector<256x128xbf16>
    %c0_47 = arith.constant 0 : index
    %c0_48 = arith.constant 0 : index
    %46 = vector.load %arg20[%c0_47, %c0_48] : memref<256x128xbf16, #tpu.memory_space<vmem>>, vector<256x128xbf16>
    tpu.vector_store %arg20[%c0_47, %c0_48], %45 {strides = array<i32>} : memref<256x128xbf16, #tpu.memory_space<vmem>>, vector<256x128xbf16>,
    return
  }
  func.func @transform_0(%arg0: i32) -> (i32, i32) {
    %c0_i32 = arith.constant 0 : i32
    %c0_i32_0 = arith.constant 0 : i32
    return %arg0, %c0_i32 : i32, i32
  }
  func.func @transform_1(%arg0: i32) -> (i32, i32) {
    %c0_i32 = arith.constant 0 : i32
    %c0_i32_0 = arith.constant 0 : i32
    return %arg0, %c0_i32 : i32, i32
  }
  func.func @transform_2(%arg0: i32) -> (i32, i32) {
    %c0_i32 = arith.constant 0 : i32
    %c0_i32_0 = arith.constant 0 : i32
    return %arg0, %c0_i32 : i32, i32
  }
  func.func @transform_3(%arg0: i32) -> (i32, i32) {
    %c0_i32 = arith.constant 0 : i32
    %c0_i32_0 = arith.constant 0 : i32
    return %arg0, %c0_i32 : i32, i32
  }
  func.func @transform_4(%arg0: i32) -> (i32, i32) {
    %c0_i32 = arith.constant 0 : i32
    %c0_i32_0 = arith.constant 0 : i32
    return %arg0, %c0_i32 : i32, i32
  }
  func.func @transform_5(%arg0: i32) -> (i32, i32) {
    %c0_i32 = arith.constant 0 : i32
    %c0_i32_0 = arith.constant 0 : i32
    return %arg0, %c0_i32 : i32, i32
  }
  func.func @transform_6(%arg0: i32) -> (i32, i32) {
    %c0_i32 = arith.constant 0 : i32
    %c0_i32_0 = arith.constant 0 : i32
    return %arg0, %c0_i32 : i32, i32
  }
  func.func @transform_7(%arg0: i32) -> (i32, i32) {
    %c0_i32 = arith.constant 0 : i32
    %c0_i32_0 = arith.constant 0 : i32
    return %arg0, %c0_i32 : i32, i32
  }
  func.func @transform_8(%arg0: i32) -> (i32, i32) {
    %c0_i32 = arith.constant 0 : i32
    %c0_i32_0 = arith.constant 0 : i32
    return %arg0, %c0_i32 : i32, i32
  }
  func.func @transform_9(%arg0: i32) -> (i32, i32) {
    %c0_i32 = arith.constant 0 : i32
    %c0_i32_0 = arith.constant 0 : i32
    %c0_i32_1 = arith.constant 0 : i32
    return %c0_i32, %c0_i32_0 : i32, i32
  }
  func.func @transform_10(%arg0: i32) -> (i32, i32) {
    %c0_i32 = arith.constant 0 : i32
    %c0_i32_0 = arith.constant 0 : i32
    %c0_i32_1 = arith.constant 0 : i32
    return %c0_i32, %c0_i32_0 : i32, i32
  }
  func.func @transform_11(%arg0: i32) -> (i32, i32) {
    %c0_i32 = arith.constant 0 : i32
    %c0_i32_0 = arith.constant 0 : i32
    %c0_i32_1 = arith.constant 0 : i32
    return %c0_i32, %c0_i32_0 : i32, i32
  }
  func.func @transform_12(%arg0: i32) -> (i32, i32) {
    %c0_i32 = arith.constant 0 : i32
    %c0_i32_0 = arith.constant 0 : i32
    %c0_i32_1 = arith.constant 0 : i32
    return %c0_i32, %c0_i32_0 : i32, i32
  }
  func.func @transform_13(%arg0: i32) -> (i32, i32) {
    %c0_i32 = arith.constant 0 : i32
    %c0_i32_0 = arith.constant 0 : i32
    %c0_i32_1 = arith.constant 0 : i32
    return %c0_i32, %c0_i32_0 : i32, i32
  }
  func.func @transform_14(%arg0: i32) -> (i32, i32) {
    %c0_i32 = arith.constant 0 : i32
    %c0_i32_0 = arith.constant 0 : i32
    %c0_i32_1 = arith.constant 0 : i32
    return %c0_i32, %c0_i32_0 : i32, i32
  }
  func.func @transform_15(%arg0: i32) -> (i32, i32) {
    %c0_i32 = arith.constant 0 : i32
    %c0_i32_0 = arith.constant 0 : i32
    %c0_i32_1 = arith.constant 0 : i32
    return %c0_i32, %c0_i32_0 : i32, i32
  }
  func.func @transform_16(%arg0: i32) -> (i32, i32) {
    %c0_i32 = arith.constant 0 : i32
    %c0_i32_0 = arith.constant 0 : i32
    %c0_i32_1 = arith.constant 0 : i32
    return %c0_i32, %c0_i32_0 : i32, i32
  }
  func.func @transform_17(%arg0: i32) -> (i32, i32) {
    %c0_i32 = arith.constant 0 : i32
    %c0_i32_0 = arith.constant 0 : i32
    %c0_i32_1 = arith.constant 0 : i32
    return %c0_i32, %c0_i32_0 : i32, i32
  }
  func.func @transform_18(%arg0: i32) -> (i32, i32) {
    %c0_i32 = arith.constant 0 : i32
    %c0_i32_0 = arith.constant 0 : i32
    %c0_i32_1 = arith.constant 0 : i32
    return %c0_i32, %c0_i32_0 : i32, i32
  }
  func.func @transform_19(%arg0: i32) -> (i32, i32) {
    %c0_i32 = arith.constant 0 : i32
    %c0_i32_0 = arith.constant 0 : i32
    return %arg0, %c0_i32 : i32, i32
  }
}

module attributes {stable_mosaic.version = 11 : i64} {
  func.func @kernel(%arg0: i32, %arg1: memref<256x16xbf16, #tpu.memory_space<vmem>>, %arg2: memref<256x16xbf16, #tpu.memory_space<vmem>>, %arg3: memref<256x16xbf16, #tpu.memory_space<vmem>>, %arg4: memref<16x128xbf16, #tpu.memory_space<vmem>>, %arg5: memref<16x128xbf16, #tpu.memory_space<vmem>>, %arg6: memref<16x128xbf16, #tpu.memory_space<vmem>>, %arg7: memref<1x128xf32, #tpu.memory_space<vmem>>, %arg8: memref<256x128xbf16, #tpu.memory_space<vmem>>) attributes {dimension_semantics = [#tpu.dimension_semantics<parallel>], iteration_bounds = array<i64: 1>, scalar_prefetch = 0 : i64, scratch_operands = 0 : i64, tpu.core_type = #tpu.core_type<tc>, window_params = [{transform_indices = @transform_0, window_bounds = array<i64: 256, 16>}, {transform_indices = @transform_1, window_bounds = array<i64: 256, 16>}, {transform_indices = @transform_2, window_bounds = array<i64: 256, 16>}, {pipeline_mode = #tpu.pipeline_mode<synchronous>, transform_indices = @transform_3, window_bounds = array<i64: 16, 128>}, {pipeline_mode = #tpu.pipeline_mode<synchronous>, transform_indices = @transform_4, window_bounds = array<i64: 16, 128>}, {pipeline_mode = #tpu.pipeline_mode<synchronous>, transform_indices = @transform_5, window_bounds = array<i64: 16, 128>}, {pipeline_mode = #tpu.pipeline_mode<synchronous>, transform_indices = @transform_6, window_bounds = array<i64: 1, 128>}, {transform_indices = @transform_7, window_bounds = array<i64: 256, 128>}]} {
    %c0 = arith.constant 0 : index
    %c0_0 = arith.constant 0 : index
    %0 = vector.load %arg1[%c0, %c0_0] : memref<256x16xbf16, #tpu.memory_space<vmem>>, vector<256x16xbf16>
    %c0_1 = arith.constant 0 : index
    %c0_2 = arith.constant 0 : index
    %1 = vector.load %arg4[%c0_1, %c0_2] : memref<16x128xbf16, #tpu.memory_space<vmem>>, vector<16x128xbf16>
    %cst = arith.constant dense<0.000000e+00> : vector<256x128xf32>
    %2 = tpu.matmul %0, %1, %cst {dimension_numbers = #tpu.dot_dimension_numbers<[1], [0], [0], [1], [0, 0, 1, 1], [], []>} : vector<256x16xbf16>, vector<16x128xbf16>, vector<256x128xf32> -> vector<256x128xf32>
    %c0_3 = arith.constant 0 : index
    %c0_4 = arith.constant 0 : index
    %3 = vector.load %arg2[%c0_3, %c0_4] : memref<256x16xbf16, #tpu.memory_space<vmem>>, vector<256x16xbf16>
    %c0_5 = arith.constant 0 : index
    %c0_6 = arith.constant 0 : index
    %4 = vector.load %arg5[%c0_5, %c0_6] : memref<16x128xbf16, #tpu.memory_space<vmem>>, vector<16x128xbf16>
    %cst_7 = arith.constant dense<0.000000e+00> : vector<256x128xf32>
    %5 = tpu.matmul %3, %4, %cst_7 {dimension_numbers = #tpu.dot_dimension_numbers<[1], [0], [0], [1], [0, 0, 1, 1], [], []>} : vector<256x16xbf16>, vector<16x128xbf16>, vector<256x128xf32> -> vector<256x128xf32>
    %6 = arith.addf %2, %5 : vector<256x128xf32>
    %c0_8 = arith.constant 0 : index
    %c0_9 = arith.constant 0 : index
    %7 = vector.load %arg3[%c0_8, %c0_9] : memref<256x16xbf16, #tpu.memory_space<vmem>>, vector<256x16xbf16>
    %c0_10 = arith.constant 0 : index
    %c0_11 = arith.constant 0 : index
    %8 = vector.load %arg6[%c0_10, %c0_11] : memref<16x128xbf16, #tpu.memory_space<vmem>>, vector<16x128xbf16>
    %cst_12 = arith.constant dense<0.000000e+00> : vector<256x128xf32>
    %9 = tpu.matmul %7, %8, %cst_12 {dimension_numbers = #tpu.dot_dimension_numbers<[1], [0], [0], [1], [0, 0, 1, 1], [], []>} : vector<256x16xbf16>, vector<16x128xbf16>, vector<256x128xf32> -> vector<256x128xf32>
    %10 = arith.addf %6, %9 : vector<256x128xf32>
    %c0_13 = arith.constant 0 : index
    %c0_14 = arith.constant 0 : index
    %11 = vector.load %arg7[%c0_13, %c0_14] : memref<1x128xf32, #tpu.memory_space<vmem>>, vector<1x128xf32>
    %12 = vector.broadcast %11 : vector<1x128xf32> to vector<256x128xf32>
    %13 = arith.addf %10, %12 : vector<256x128xf32>
    %cst_15 = arith.constant 0.000000e+00 : f32
    %14 = vector.broadcast %cst_15 : f32 to vector<256x128xf32>
    %15 = arith.subf %14, %13 : vector<256x128xf32>
    %16 = math.exp %15 : vector<256x128xf32>
    %cst_16 = arith.constant 1.000000e+00 : f32
    %17 = vector.broadcast %cst_16 : f32 to vector<256x128xf32>
    %18 = arith.addf %17, %16 : vector<256x128xf32>
    %19 = tpu.reciprocal %18 {approx = true} : vector<256x128xf32> -> vector<256x128xf32>
    %20 = arith.mulf %13, %19 : vector<256x128xf32>
    %21 = arith.truncf %20 : vector<256x128xf32> to vector<256x128xbf16>
    %c0_17 = arith.constant 0 : index
    %c0_18 = arith.constant 0 : index
    %22 = vector.load %arg8[%c0_17, %c0_18] : memref<256x128xbf16, #tpu.memory_space<vmem>>, vector<256x128xbf16>
    tpu.vector_store %arg8[%c0_17, %c0_18], %21 {strides = array<i32>} : memref<256x128xbf16, #tpu.memory_space<vmem>>, vector<256x128xbf16>,
    return
  }
  func.func @transform_0(%arg0: i32) -> (i32, i32) {
    %c0_i32 = arith.constant 0 : i32
    %c0_i32_0 = arith.constant 0 : i32
    return %arg0, %c0_i32 : i32, i32
  }
  func.func @transform_1(%arg0: i32) -> (i32, i32) {
    %c0_i32 = arith.constant 0 : i32
    %c0_i32_0 = arith.constant 0 : i32
    return %arg0, %c0_i32 : i32, i32
  }
  func.func @transform_2(%arg0: i32) -> (i32, i32) {
    %c0_i32 = arith.constant 0 : i32
    %c0_i32_0 = arith.constant 0 : i32
    return %arg0, %c0_i32 : i32, i32
  }
  func.func @transform_3(%arg0: i32) -> (i32, i32) {
    %c0_i32 = arith.constant 0 : i32
    %c0_i32_0 = arith.constant 0 : i32
    %c0_i32_1 = arith.constant 0 : i32
    return %c0_i32, %c0_i32_0 : i32, i32
  }
  func.func @transform_4(%arg0: i32) -> (i32, i32) {
    %c0_i32 = arith.constant 0 : i32
    %c0_i32_0 = arith.constant 0 : i32
    %c0_i32_1 = arith.constant 0 : i32
    return %c0_i32, %c0_i32_0 : i32, i32
  }
  func.func @transform_5(%arg0: i32) -> (i32, i32) {
    %c0_i32 = arith.constant 0 : i32
    %c0_i32_0 = arith.constant 0 : i32
    %c0_i32_1 = arith.constant 0 : i32
    return %c0_i32, %c0_i32_0 : i32, i32
  }
  func.func @transform_6(%arg0: i32) -> (i32, i32) {
    %c0_i32 = arith.constant 0 : i32
    %c0_i32_0 = arith.constant 0 : i32
    %c0_i32_1 = arith.constant 0 : i32
    return %c0_i32, %c0_i32_0 : i32, i32
  }
  func.func @transform_7(%arg0: i32) -> (i32, i32) {
    %c0_i32 = arith.constant 0 : i32
    %c0_i32_0 = arith.constant 0 : i32
    return %arg0, %c0_i32 : i32, i32
  }
}

module attributes {stable_mosaic.version = 11 : i64} {
  func.func @kernel(%arg0: i32, %arg1: memref<64x128xbf16, #tpu.memory_space<vmem>>, %arg2: memref<128x128xbf16, #tpu.memory_space<vmem>>, %arg3: memref<1x128xf32, #tpu.memory_space<vmem>>, %arg4: memref<64x128xbf16, #tpu.memory_space<vmem>>) attributes {dimension_semantics = [#tpu.dimension_semantics<parallel>], iteration_bounds = array<i64: 1>, scalar_prefetch = 0 : i64, scratch_operands = 0 : i64, tpu.core_type = #tpu.core_type<tc>, window_params = [{transform_indices = @transform_0, window_bounds = array<i64: 64, 128>}, {pipeline_mode = #tpu.pipeline_mode<synchronous>, transform_indices = @transform_1, window_bounds = array<i64: 128, 128>}, {pipeline_mode = #tpu.pipeline_mode<synchronous>, transform_indices = @transform_2, window_bounds = array<i64: 1, 128>}, {transform_indices = @transform_3, window_bounds = array<i64: 64, 128>}]} {
    %c0 = arith.constant 0 : index
    %c0_0 = arith.constant 0 : index
    %0 = vector.load %arg1[%c0, %c0_0] : memref<64x128xbf16, #tpu.memory_space<vmem>>, vector<64x128xbf16>
    %c0_1 = arith.constant 0 : index
    %c0_2 = arith.constant 0 : index
    %1 = vector.load %arg2[%c0_1, %c0_2] : memref<128x128xbf16, #tpu.memory_space<vmem>>, vector<128x128xbf16>
    %cst = arith.constant dense<0.000000e+00> : vector<64x128xf32>
    %2 = tpu.matmul %0, %1, %cst {dimension_numbers = #tpu.dot_dimension_numbers<[1], [0], [0], [1], [0, 0, 1, 1], [], []>} : vector<64x128xbf16>, vector<128x128xbf16>, vector<64x128xf32> -> vector<64x128xf32>
    %c0_3 = arith.constant 0 : index
    %c0_4 = arith.constant 0 : index
    %3 = vector.load %arg3[%c0_3, %c0_4] : memref<1x128xf32, #tpu.memory_space<vmem>>, vector<1x128xf32>
    %4 = vector.broadcast %3 : vector<1x128xf32> to vector<64x128xf32>
    %5 = arith.addf %2, %4 : vector<64x128xf32>
    %cst_5 = arith.constant 0.000000e+00 : f32
    %6 = vector.broadcast %cst_5 : f32 to vector<64x128xf32>
    %7 = arith.subf %6, %5 : vector<64x128xf32>
    %8 = math.exp %7 : vector<64x128xf32>
    %cst_6 = arith.constant 1.000000e+00 : f32
    %9 = vector.broadcast %cst_6 : f32 to vector<64x128xf32>
    %10 = arith.addf %9, %8 : vector<64x128xf32>
    %11 = tpu.reciprocal %10 {approx = true} : vector<64x128xf32> -> vector<64x128xf32>
    %12 = arith.mulf %5, %11 : vector<64x128xf32>
    %13 = arith.truncf %12 : vector<64x128xf32> to vector<64x128xbf16>
    %c0_7 = arith.constant 0 : index
    %c0_8 = arith.constant 0 : index
    %14 = vector.load %arg4[%c0_7, %c0_8] : memref<64x128xbf16, #tpu.memory_space<vmem>>, vector<64x128xbf16>
    tpu.vector_store %arg4[%c0_7, %c0_8], %13 {strides = array<i32>} : memref<64x128xbf16, #tpu.memory_space<vmem>>, vector<64x128xbf16>,
    return
  }
  func.func @transform_0(%arg0: i32) -> (i32, i32) {
    %c0_i32 = arith.constant 0 : i32
    %c0_i32_0 = arith.constant 0 : i32
    return %arg0, %c0_i32 : i32, i32
  }
  func.func @transform_1(%arg0: i32) -> (i32, i32) {
    %c0_i32 = arith.constant 0 : i32
    %c0_i32_0 = arith.constant 0 : i32
    %c0_i32_1 = arith.constant 0 : i32
    return %c0_i32, %c0_i32_0 : i32, i32
  }
  func.func @transform_2(%arg0: i32) -> (i32, i32) {
    %c0_i32 = arith.constant 0 : i32
    %c0_i32_0 = arith.constant 0 : i32
    %c0_i32_1 = arith.constant 0 : i32
    return %c0_i32, %c0_i32_0 : i32, i32
  }
  func.func @transform_3(%arg0: i32) -> (i32, i32) {
    %c0_i32 = arith.constant 0 : i32
    %c0_i32_0 = arith.constant 0 : i32
    return %arg0, %c0_i32 : i32, i32
  }
}

module attributes {stable_mosaic.version = 11 : i64} {
  func.func @kernel(%arg0: i32, %arg1: memref<64x128xbf16, #tpu.memory_space<vmem>>, %arg2: memref<64x128xbf16, #tpu.memory_space<vmem>>, %arg3: memref<64x128xbf16, #tpu.memory_space<vmem>>, %arg4: memref<64x128xbf16, #tpu.memory_space<vmem>>, %arg5: memref<64x128xbf16, #tpu.memory_space<vmem>>, %arg6: memref<64x128xbf16, #tpu.memory_space<vmem>>, %arg7: memref<64x128xbf16, #tpu.memory_space<vmem>>, %arg8: memref<64x128xbf16, #tpu.memory_space<vmem>>, %arg9: memref<64x128xbf16, #tpu.memory_space<vmem>>, %arg10: memref<128x128xbf16, #tpu.memory_space<vmem>>, %arg11: memref<128x128xbf16, #tpu.memory_space<vmem>>, %arg12: memref<128x128xbf16, #tpu.memory_space<vmem>>, %arg13: memref<128x128xbf16, #tpu.memory_space<vmem>>, %arg14: memref<128x128xbf16, #tpu.memory_space<vmem>>, %arg15: memref<128x128xbf16, #tpu.memory_space<vmem>>, %arg16: memref<128x128xbf16, #tpu.memory_space<vmem>>, %arg17: memref<128x128xbf16, #tpu.memory_space<vmem>>, %arg18: memref<128x128xbf16, #tpu.memory_space<vmem>>, %arg19: memref<1x128xf32, #tpu.memory_space<vmem>>, %arg20: memref<64x128xbf16, #tpu.memory_space<vmem>>) attributes {dimension_semantics = [#tpu.dimension_semantics<parallel>], iteration_bounds = array<i64: 1>, scalar_prefetch = 0 : i64, scratch_operands = 0 : i64, tpu.core_type = #tpu.core_type<tc>, window_params = [{transform_indices = @transform_0, window_bounds = array<i64: 64, 128>}, {transform_indices = @transform_1, window_bounds = array<i64: 64, 128>}, {transform_indices = @transform_2, window_bounds = array<i64: 64, 128>}, {transform_indices = @transform_3, window_bounds = array<i64: 64, 128>}, {transform_indices = @transform_4, window_bounds = array<i64: 64, 128>}, {transform_indices = @transform_5, window_bounds = array<i64: 64, 128>}, {transform_indices = @transform_6, window_bounds = array<i64: 64, 128>}, {transform_indices = @transform_7, window_bounds = array<i64: 64, 128>}, {transform_indices = @transform_8, window_bounds = array<i64: 64, 128>}, {pipeline_mode = #tpu.pipeline_mode<synchronous>, transform_indices = @transform_9, window_bounds = array<i64: 128, 128>}, {pipeline_mode = #tpu.pipeline_mode<synchronous>, transform_indices = @transform_10, window_bounds = array<i64: 128, 128>}, {pipeline_mode = #tpu.pipeline_mode<synchronous>, transform_indices = @transform_11, window_bounds = array<i64: 128, 128>}, {pipeline_mode = #tpu.pipeline_mode<synchronous>, transform_indices = @transform_12, window_bounds = array<i64: 128, 128>}, {pipeline_mode = #tpu.pipeline_mode<synchronous>, transform_indices = @transform_13, window_bounds = array<i64: 128, 128>}, {pipeline_mode = #tpu.pipeline_mode<synchronous>, transform_indices = @transform_14, window_bounds = array<i64: 128, 128>}, {pipeline_mode = #tpu.pipeline_mode<synchronous>, transform_indices = @transform_15, window_bounds = array<i64: 128, 128>}, {pipeline_mode = #tpu.pipeline_mode<synchronous>, transform_indices = @transform_16, window_bounds = array<i64: 128, 128>}, {pipeline_mode = #tpu.pipeline_mode<synchronous>, transform_indices = @transform_17, window_bounds = array<i64: 128, 128>}, {pipeline_mode = #tpu.pipeline_mode<synchronous>, transform_indices = @transform_18, window_bounds = array<i64: 1, 128>}, {transform_indices = @transform_19, window_bounds = array<i64: 64, 128>}]} {
    %c0 = arith.constant 0 : index
    %c0_0 = arith.constant 0 : index
    %0 = vector.load %arg1[%c0, %c0_0] : memref<64x128xbf16, #tpu.memory_space<vmem>>, vector<64x128xbf16>
    %c0_1 = arith.constant 0 : index
    %c0_2 = arith.constant 0 : index
    %1 = vector.load %arg10[%c0_1, %c0_2] : memref<128x128xbf16, #tpu.memory_space<vmem>>, vector<128x128xbf16>
    %cst = arith.constant dense<0.000000e+00> : vector<64x128xf32>
    %2 = tpu.matmul %0, %1, %cst {dimension_numbers = #tpu.dot_dimension_numbers<[1], [0], [0], [1], [0, 0, 1, 1], [], []>} : vector<64x128xbf16>, vector<128x128xbf16>, vector<64x128xf32> -> vector<64x128xf32>
    %c0_3 = arith.constant 0 : index
    %c0_4 = arith.constant 0 : index
    %3 = vector.load %arg2[%c0_3, %c0_4] : memref<64x128xbf16, #tpu.memory_space<vmem>>, vector<64x128xbf16>
    %c0_5 = arith.constant 0 : index
    %c0_6 = arith.constant 0 : index
    %4 = vector.load %arg11[%c0_5, %c0_6] : memref<128x128xbf16, #tpu.memory_space<vmem>>, vector<128x128xbf16>
    %cst_7 = arith.constant dense<0.000000e+00> : vector<64x128xf32>
    %5 = tpu.matmul %3, %4, %cst_7 {dimension_numbers = #tpu.dot_dimension_numbers<[1], [0], [0], [1], [0, 0, 1, 1], [], []>} : vector<64x128xbf16>, vector<128x128xbf16>, vector<64x128xf32> -> vector<64x128xf32>
    %6 = arith.addf %2, %5 : vector<64x128xf32>
    %c0_8 = arith.constant 0 : index
    %c0_9 = arith.constant 0 : index
    %7 = vector.load %arg3[%c0_8, %c0_9] : memref<64x128xbf16, #tpu.memory_space<vmem>>, vector<64x128xbf16>
    %c0_10 = arith.constant 0 : index
    %c0_11 = arith.constant 0 : index
    %8 = vector.load %arg12[%c0_10, %c0_11] : memref<128x128xbf16, #tpu.memory_space<vmem>>, vector<128x128xbf16>
    %cst_12 = arith.constant dense<0.000000e+00> : vector<64x128xf32>
    %9 = tpu.matmul %7, %8, %cst_12 {dimension_numbers = #tpu.dot_dimension_numbers<[1], [0], [0], [1], [0, 0, 1, 1], [], []>} : vector<64x128xbf16>, vector<128x128xbf16>, vector<64x128xf32> -> vector<64x128xf32>
    %10 = arith.addf %6, %9 : vector<64x128xf32>
    %c0_13 = arith.constant 0 : index
    %c0_14 = arith.constant 0 : index
    %11 = vector.load %arg4[%c0_13, %c0_14] : memref<64x128xbf16, #tpu.memory_space<vmem>>, vector<64x128xbf16>
    %c0_15 = arith.constant 0 : index
    %c0_16 = arith.constant 0 : index
    %12 = vector.load %arg13[%c0_15, %c0_16] : memref<128x128xbf16, #tpu.memory_space<vmem>>, vector<128x128xbf16>
    %cst_17 = arith.constant dense<0.000000e+00> : vector<64x128xf32>
    %13 = tpu.matmul %11, %12, %cst_17 {dimension_numbers = #tpu.dot_dimension_numbers<[1], [0], [0], [1], [0, 0, 1, 1], [], []>} : vector<64x128xbf16>, vector<128x128xbf16>, vector<64x128xf32> -> vector<64x128xf32>
    %14 = arith.addf %10, %13 : vector<64x128xf32>
    %c0_18 = arith.constant 0 : index
    %c0_19 = arith.constant 0 : index
    %15 = vector.load %arg5[%c0_18, %c0_19] : memref<64x128xbf16, #tpu.memory_space<vmem>>, vector<64x128xbf16>
    %c0_20 = arith.constant 0 : index
    %c0_21 = arith.constant 0 : index
    %16 = vector.load %arg14[%c0_20, %c0_21] : memref<128x128xbf16, #tpu.memory_space<vmem>>, vector<128x128xbf16>
    %cst_22 = arith.constant dense<0.000000e+00> : vector<64x128xf32>
    %17 = tpu.matmul %15, %16, %cst_22 {dimension_numbers = #tpu.dot_dimension_numbers<[1], [0], [0], [1], [0, 0, 1, 1], [], []>} : vector<64x128xbf16>, vector<128x128xbf16>, vector<64x128xf32> -> vector<64x128xf32>
    %18 = arith.addf %14, %17 : vector<64x128xf32>
    %c0_23 = arith.constant 0 : index
    %c0_24 = arith.constant 0 : index
    %19 = vector.load %arg6[%c0_23, %c0_24] : memref<64x128xbf16, #tpu.memory_space<vmem>>, vector<64x128xbf16>
    %c0_25 = arith.constant 0 : index
    %c0_26 = arith.constant 0 : index
    %20 = vector.load %arg15[%c0_25, %c0_26] : memref<128x128xbf16, #tpu.memory_space<vmem>>, vector<128x128xbf16>
    %cst_27 = arith.constant dense<0.000000e+00> : vector<64x128xf32>
    %21 = tpu.matmul %19, %20, %cst_27 {dimension_numbers = #tpu.dot_dimension_numbers<[1], [0], [0], [1], [0, 0, 1, 1], [], []>} : vector<64x128xbf16>, vector<128x128xbf16>, vector<64x128xf32> -> vector<64x128xf32>
    %22 = arith.addf %18, %21 : vector<64x128xf32>
    %c0_28 = arith.constant 0 : index
    %c0_29 = arith.constant 0 : index
    %23 = vector.load %arg7[%c0_28, %c0_29] : memref<64x128xbf16, #tpu.memory_space<vmem>>, vector<64x128xbf16>
    %c0_30 = arith.constant 0 : index
    %c0_31 = arith.constant 0 : index
    %24 = vector.load %arg16[%c0_30, %c0_31] : memref<128x128xbf16, #tpu.memory_space<vmem>>, vector<128x128xbf16>
    %cst_32 = arith.constant dense<0.000000e+00> : vector<64x128xf32>
    %25 = tpu.matmul %23, %24, %cst_32 {dimension_numbers = #tpu.dot_dimension_numbers<[1], [0], [0], [1], [0, 0, 1, 1], [], []>} : vector<64x128xbf16>, vector<128x128xbf16>, vector<64x128xf32> -> vector<64x128xf32>
    %26 = arith.addf %22, %25 : vector<64x128xf32>
    %c0_33 = arith.constant 0 : index
    %c0_34 = arith.constant 0 : index
    %27 = vector.load %arg8[%c0_33, %c0_34] : memref<64x128xbf16, #tpu.memory_space<vmem>>, vector<64x128xbf16>
    %c0_35 = arith.constant 0 : index
    %c0_36 = arith.constant 0 : index
    %28 = vector.load %arg17[%c0_35, %c0_36] : memref<128x128xbf16, #tpu.memory_space<vmem>>, vector<128x128xbf16>
    %cst_37 = arith.constant dense<0.000000e+00> : vector<64x128xf32>
    %29 = tpu.matmul %27, %28, %cst_37 {dimension_numbers = #tpu.dot_dimension_numbers<[1], [0], [0], [1], [0, 0, 1, 1], [], []>} : vector<64x128xbf16>, vector<128x128xbf16>, vector<64x128xf32> -> vector<64x128xf32>
    %30 = arith.addf %26, %29 : vector<64x128xf32>
    %c0_38 = arith.constant 0 : index
    %c0_39 = arith.constant 0 : index
    %31 = vector.load %arg9[%c0_38, %c0_39] : memref<64x128xbf16, #tpu.memory_space<vmem>>, vector<64x128xbf16>
    %c0_40 = arith.constant 0 : index
    %c0_41 = arith.constant 0 : index
    %32 = vector.load %arg18[%c0_40, %c0_41] : memref<128x128xbf16, #tpu.memory_space<vmem>>, vector<128x128xbf16>
    %cst_42 = arith.constant dense<0.000000e+00> : vector<64x128xf32>
    %33 = tpu.matmul %31, %32, %cst_42 {dimension_numbers = #tpu.dot_dimension_numbers<[1], [0], [0], [1], [0, 0, 1, 1], [], []>} : vector<64x128xbf16>, vector<128x128xbf16>, vector<64x128xf32> -> vector<64x128xf32>
    %34 = arith.addf %30, %33 : vector<64x128xf32>
    %c0_43 = arith.constant 0 : index
    %c0_44 = arith.constant 0 : index
    %35 = vector.load %arg19[%c0_43, %c0_44] : memref<1x128xf32, #tpu.memory_space<vmem>>, vector<1x128xf32>
    %36 = vector.broadcast %35 : vector<1x128xf32> to vector<64x128xf32>
    %37 = arith.addf %34, %36 : vector<64x128xf32>
    %cst_45 = arith.constant 0.000000e+00 : f32
    %38 = vector.broadcast %cst_45 : f32 to vector<64x128xf32>
    %39 = arith.subf %38, %37 : vector<64x128xf32>
    %40 = math.exp %39 : vector<64x128xf32>
    %cst_46 = arith.constant 1.000000e+00 : f32
    %41 = vector.broadcast %cst_46 : f32 to vector<64x128xf32>
    %42 = arith.addf %41, %40 : vector<64x128xf32>
    %43 = tpu.reciprocal %42 {approx = true} : vector<64x128xf32> -> vector<64x128xf32>
    %44 = arith.mulf %37, %43 : vector<64x128xf32>
    %45 = arith.truncf %44 : vector<64x128xf32> to vector<64x128xbf16>
    %c0_47 = arith.constant 0 : index
    %c0_48 = arith.constant 0 : index
    %46 = vector.load %arg20[%c0_47, %c0_48] : memref<64x128xbf16, #tpu.memory_space<vmem>>, vector<64x128xbf16>
    tpu.vector_store %arg20[%c0_47, %c0_48], %45 {strides = array<i32>} : memref<64x128xbf16, #tpu.memory_space<vmem>>, vector<64x128xbf16>,
    return
  }
  func.func @transform_0(%arg0: i32) -> (i32, i32) {
    %c0_i32 = arith.constant 0 : i32
    %c0_i32_0 = arith.constant 0 : i32
    return %arg0, %c0_i32 : i32, i32
  }
  func.func @transform_1(%arg0: i32) -> (i32, i32) {
    %c0_i32 = arith.constant 0 : i32
    %c0_i32_0 = arith.constant 0 : i32
    return %arg0, %c0_i32 : i32, i32
  }
  func.func @transform_2(%arg0: i32) -> (i32, i32) {
    %c0_i32 = arith.constant 0 : i32
    %c0_i32_0 = arith.constant 0 : i32
    return %arg0, %c0_i32 : i32, i32
  }
  func.func @transform_3(%arg0: i32) -> (i32, i32) {
    %c0_i32 = arith.constant 0 : i32
    %c0_i32_0 = arith.constant 0 : i32
    return %arg0, %c0_i32 : i32, i32
  }
  func.func @transform_4(%arg0: i32) -> (i32, i32) {
    %c0_i32 = arith.constant 0 : i32
    %c0_i32_0 = arith.constant 0 : i32
    return %arg0, %c0_i32 : i32, i32
  }
  func.func @transform_5(%arg0: i32) -> (i32, i32) {
    %c0_i32 = arith.constant 0 : i32
    %c0_i32_0 = arith.constant 0 : i32
    return %arg0, %c0_i32 : i32, i32
  }
  func.func @transform_6(%arg0: i32) -> (i32, i32) {
    %c0_i32 = arith.constant 0 : i32
    %c0_i32_0 = arith.constant 0 : i32
    return %arg0, %c0_i32 : i32, i32
  }
  func.func @transform_7(%arg0: i32) -> (i32, i32) {
    %c0_i32 = arith.constant 0 : i32
    %c0_i32_0 = arith.constant 0 : i32
    return %arg0, %c0_i32 : i32, i32
  }
  func.func @transform_8(%arg0: i32) -> (i32, i32) {
    %c0_i32 = arith.constant 0 : i32
    %c0_i32_0 = arith.constant 0 : i32
    return %arg0, %c0_i32 : i32, i32
  }
  func.func @transform_9(%arg0: i32) -> (i32, i32) {
    %c0_i32 = arith.constant 0 : i32
    %c0_i32_0 = arith.constant 0 : i32
    %c0_i32_1 = arith.constant 0 : i32
    return %c0_i32, %c0_i32_0 : i32, i32
  }
  func.func @transform_10(%arg0: i32) -> (i32, i32) {
    %c0_i32 = arith.constant 0 : i32
    %c0_i32_0 = arith.constant 0 : i32
    %c0_i32_1 = arith.constant 0 : i32
    return %c0_i32, %c0_i32_0 : i32, i32
  }
  func.func @transform_11(%arg0: i32) -> (i32, i32) {
    %c0_i32 = arith.constant 0 : i32
    %c0_i32_0 = arith.constant 0 : i32
    %c0_i32_1 = arith.constant 0 : i32
    return %c0_i32, %c0_i32_0 : i32, i32
  }
  func.func @transform_12(%arg0: i32) -> (i32, i32) {
    %c0_i32 = arith.constant 0 : i32
    %c0_i32_0 = arith.constant 0 : i32
    %c0_i32_1 = arith.constant 0 : i32
    return %c0_i32, %c0_i32_0 : i32, i32
  }
  func.func @transform_13(%arg0: i32) -> (i32, i32) {
    %c0_i32 = arith.constant 0 : i32
    %c0_i32_0 = arith.constant 0 : i32
    %c0_i32_1 = arith.constant 0 : i32
    return %c0_i32, %c0_i32_0 : i32, i32
  }
  func.func @transform_14(%arg0: i32) -> (i32, i32) {
    %c0_i32 = arith.constant 0 : i32
    %c0_i32_0 = arith.constant 0 : i32
    %c0_i32_1 = arith.constant 0 : i32
    return %c0_i32, %c0_i32_0 : i32, i32
  }
  func.func @transform_15(%arg0: i32) -> (i32, i32) {
    %c0_i32 = arith.constant 0 : i32
    %c0_i32_0 = arith.constant 0 : i32
    %c0_i32_1 = arith.constant 0 : i32
    return %c0_i32, %c0_i32_0 : i32, i32
  }
  func.func @transform_16(%arg0: i32) -> (i32, i32) {
    %c0_i32 = arith.constant 0 : i32
    %c0_i32_0 = arith.constant 0 : i32
    %c0_i32_1 = arith.constant 0 : i32
    return %c0_i32, %c0_i32_0 : i32, i32
  }
  func.func @transform_17(%arg0: i32) -> (i32, i32) {
    %c0_i32 = arith.constant 0 : i32
    %c0_i32_0 = arith.constant 0 : i32
    %c0_i32_1 = arith.constant 0 : i32
    return %c0_i32, %c0_i32_0 : i32, i32
  }
  func.func @transform_18(%arg0: i32) -> (i32, i32) {
    %c0_i32 = arith.constant 0 : i32
    %c0_i32_0 = arith.constant 0 : i32
    %c0_i32_1 = arith.constant 0 : i32
    return %c0_i32, %c0_i32_0 : i32, i32
  }
  func.func @transform_19(%arg0: i32) -> (i32, i32) {
    %c0_i32 = arith.constant 0 : i32
    %c0_i32_0 = arith.constant 0 : i32
    return %arg0, %c0_i32 : i32, i32
  }
}

module attributes {stable_mosaic.version = 11 : i64} {
  func.func @kernel(%arg0: i32, %arg1: memref<64x32xbf16, #tpu.memory_space<vmem>>, %arg2: memref<64x32xbf16, #tpu.memory_space<vmem>>, %arg3: memref<64x32xbf16, #tpu.memory_space<vmem>>, %arg4: memref<64x32xbf16, #tpu.memory_space<vmem>>, %arg5: memref<32x128xbf16, #tpu.memory_space<vmem>>, %arg6: memref<32x128xbf16, #tpu.memory_space<vmem>>, %arg7: memref<32x128xbf16, #tpu.memory_space<vmem>>, %arg8: memref<32x128xbf16, #tpu.memory_space<vmem>>, %arg9: memref<1x128xf32, #tpu.memory_space<vmem>>, %arg10: memref<64x128xbf16, #tpu.memory_space<vmem>>) attributes {dimension_semantics = [#tpu.dimension_semantics<parallel>], iteration_bounds = array<i64: 1>, scalar_prefetch = 0 : i64, scratch_operands = 0 : i64, tpu.core_type = #tpu.core_type<tc>, window_params = [{transform_indices = @transform_0, window_bounds = array<i64: 64, 32>}, {transform_indices = @transform_1, window_bounds = array<i64: 64, 32>}, {transform_indices = @transform_2, window_bounds = array<i64: 64, 32>}, {transform_indices = @transform_3, window_bounds = array<i64: 64, 32>}, {pipeline_mode = #tpu.pipeline_mode<synchronous>, transform_indices = @transform_4, window_bounds = array<i64: 32, 128>}, {pipeline_mode = #tpu.pipeline_mode<synchronous>, transform_indices = @transform_5, window_bounds = array<i64: 32, 128>}, {pipeline_mode = #tpu.pipeline_mode<synchronous>, transform_indices = @transform_6, window_bounds = array<i64: 32, 128>}, {pipeline_mode = #tpu.pipeline_mode<synchronous>, transform_indices = @transform_7, window_bounds = array<i64: 32, 128>}, {pipeline_mode = #tpu.pipeline_mode<synchronous>, transform_indices = @transform_8, window_bounds = array<i64: 1, 128>}, {transform_indices = @transform_9, window_bounds = array<i64: 64, 128>}]} {
    %c0 = arith.constant 0 : index
    %c0_0 = arith.constant 0 : index
    %0 = vector.load %arg1[%c0, %c0_0] : memref<64x32xbf16, #tpu.memory_space<vmem>>, vector<64x32xbf16>
    %c0_1 = arith.constant 0 : index
    %c0_2 = arith.constant 0 : index
    %1 = vector.load %arg5[%c0_1, %c0_2] : memref<32x128xbf16, #tpu.memory_space<vmem>>, vector<32x128xbf16>
    %cst = arith.constant dense<0.000000e+00> : vector<64x128xf32>
    %2 = tpu.matmul %0, %1, %cst {dimension_numbers = #tpu.dot_dimension_numbers<[1], [0], [0], [1], [0, 0, 1, 1], [], []>} : vector<64x32xbf16>, vector<32x128xbf16>, vector<64x128xf32> -> vector<64x128xf32>
    %c0_3 = arith.constant 0 : index
    %c0_4 = arith.constant 0 : index
    %3 = vector.load %arg2[%c0_3, %c0_4] : memref<64x32xbf16, #tpu.memory_space<vmem>>, vector<64x32xbf16>
    %c0_5 = arith.constant 0 : index
    %c0_6 = arith.constant 0 : index
    %4 = vector.load %arg6[%c0_5, %c0_6] : memref<32x128xbf16, #tpu.memory_space<vmem>>, vector<32x128xbf16>
    %cst_7 = arith.constant dense<0.000000e+00> : vector<64x128xf32>
    %5 = tpu.matmul %3, %4, %cst_7 {dimension_numbers = #tpu.dot_dimension_numbers<[1], [0], [0], [1], [0, 0, 1, 1], [], []>} : vector<64x32xbf16>, vector<32x128xbf16>, vector<64x128xf32> -> vector<64x128xf32>
    %6 = arith.addf %2, %5 : vector<64x128xf32>
    %c0_8 = arith.constant 0 : index
    %c0_9 = arith.constant 0 : index
    %7 = vector.load %arg3[%c0_8, %c0_9] : memref<64x32xbf16, #tpu.memory_space<vmem>>, vector<64x32xbf16>
    %c0_10 = arith.constant 0 : index
    %c0_11 = arith.constant 0 : index
    %8 = vector.load %arg7[%c0_10, %c0_11] : memref<32x128xbf16, #tpu.memory_space<vmem>>, vector<32x128xbf16>
    %cst_12 = arith.constant dense<0.000000e+00> : vector<64x128xf32>
    %9 = tpu.matmul %7, %8, %cst_12 {dimension_numbers = #tpu.dot_dimension_numbers<[1], [0], [0], [1], [0, 0, 1, 1], [], []>} : vector<64x32xbf16>, vector<32x128xbf16>, vector<64x128xf32> -> vector<64x128xf32>
    %10 = arith.addf %6, %9 : vector<64x128xf32>
    %c0_13 = arith.constant 0 : index
    %c0_14 = arith.constant 0 : index
    %11 = vector.load %arg4[%c0_13, %c0_14] : memref<64x32xbf16, #tpu.memory_space<vmem>>, vector<64x32xbf16>
    %c0_15 = arith.constant 0 : index
    %c0_16 = arith.constant 0 : index
    %12 = vector.load %arg8[%c0_15, %c0_16] : memref<32x128xbf16, #tpu.memory_space<vmem>>, vector<32x128xbf16>
    %cst_17 = arith.constant dense<0.000000e+00> : vector<64x128xf32>
    %13 = tpu.matmul %11, %12, %cst_17 {dimension_numbers = #tpu.dot_dimension_numbers<[1], [0], [0], [1], [0, 0, 1, 1], [], []>} : vector<64x32xbf16>, vector<32x128xbf16>, vector<64x128xf32> -> vector<64x128xf32>
    %14 = arith.addf %10, %13 : vector<64x128xf32>
    %c0_18 = arith.constant 0 : index
    %c0_19 = arith.constant 0 : index
    %15 = vector.load %arg9[%c0_18, %c0_19] : memref<1x128xf32, #tpu.memory_space<vmem>>, vector<1x128xf32>
    %16 = vector.broadcast %15 : vector<1x128xf32> to vector<64x128xf32>
    %17 = arith.addf %14, %16 : vector<64x128xf32>
    %cst_20 = arith.constant 0.000000e+00 : f32
    %18 = vector.broadcast %cst_20 : f32 to vector<64x128xf32>
    %19 = arith.subf %18, %17 : vector<64x128xf32>
    %20 = math.exp %19 : vector<64x128xf32>
    %cst_21 = arith.constant 1.000000e+00 : f32
    %21 = vector.broadcast %cst_21 : f32 to vector<64x128xf32>
    %22 = arith.addf %21, %20 : vector<64x128xf32>
    %23 = tpu.reciprocal %22 {approx = true} : vector<64x128xf32> -> vector<64x128xf32>
    %24 = arith.mulf %17, %23 : vector<64x128xf32>
    %25 = arith.truncf %24 : vector<64x128xf32> to vector<64x128xbf16>
    %c0_22 = arith.constant 0 : index
    %c0_23 = arith.constant 0 : index
    %26 = vector.load %arg10[%c0_22, %c0_23] : memref<64x128xbf16, #tpu.memory_space<vmem>>, vector<64x128xbf16>
    tpu.vector_store %arg10[%c0_22, %c0_23], %25 {strides = array<i32>} : memref<64x128xbf16, #tpu.memory_space<vmem>>, vector<64x128xbf16>,
    return
  }
  func.func @transform_0(%arg0: i32) -> (i32, i32) {
    %c0_i32 = arith.constant 0 : i32
    %c0_i32_0 = arith.constant 0 : i32
    return %arg0, %c0_i32 : i32, i32
  }
  func.func @transform_1(%arg0: i32) -> (i32, i32) {
    %c0_i32 = arith.constant 0 : i32
    %c0_i32_0 = arith.constant 0 : i32
    return %arg0, %c0_i32 : i32, i32
  }
  func.func @transform_2(%arg0: i32) -> (i32, i32) {
    %c0_i32 = arith.constant 0 : i32
    %c0_i32_0 = arith.constant 0 : i32
    return %arg0, %c0_i32 : i32, i32
  }
  func.func @transform_3(%arg0: i32) -> (i32, i32) {
    %c0_i32 = arith.constant 0 : i32
    %c0_i32_0 = arith.constant 0 : i32
    return %arg0, %c0_i32 : i32, i32
  }
  func.func @transform_4(%arg0: i32) -> (i32, i32) {
    %c0_i32 = arith.constant 0 : i32
    %c0_i32_0 = arith.constant 0 : i32
    %c0_i32_1 = arith.constant 0 : i32
    return %c0_i32, %c0_i32_0 : i32, i32
  }
  func.func @transform_5(%arg0: i32) -> (i32, i32) {
    %c0_i32 = arith.constant 0 : i32
    %c0_i32_0 = arith.constant 0 : i32
    %c0_i32_1 = arith.constant 0 : i32
    return %c0_i32, %c0_i32_0 : i32, i32
  }
  func.func @transform_6(%arg0: i32) -> (i32, i32) {
    %c0_i32 = arith.constant 0 : i32
    %c0_i32_0 = arith.constant 0 : i32
    %c0_i32_1 = arith.constant 0 : i32
    return %c0_i32, %c0_i32_0 : i32, i32
  }
  func.func @transform_7(%arg0: i32) -> (i32, i32) {
    %c0_i32 = arith.constant 0 : i32
    %c0_i32_0 = arith.constant 0 : i32
    %c0_i32_1 = arith.constant 0 : i32
    return %c0_i32, %c0_i32_0 : i32, i32
  }
  func.func @transform_8(%arg0: i32) -> (i32, i32) {
    %c0_i32 = arith.constant 0 : i32
    %c0_i32_0 = arith.constant 0 : i32
    %c0_i32_1 = arith.constant 0 : i32
    return %c0_i32, %c0_i32_0 : i32, i32
  }
  func.func @transform_9(%arg0: i32) -> (i32, i32) {
    %c0_i32 = arith.constant 0 : i32
    %c0_i32_0 = arith.constant 0 : i32
    return %arg0, %c0_i32 : i32, i32
  }
}

module attributes {stable_mosaic.version = 11 : i64} {
  func.func @kernel(%arg0: i32, %arg1: memref<16x128xbf16, #tpu.memory_space<vmem>>, %arg2: memref<16x128xbf16, #tpu.memory_space<vmem>>, %arg3: memref<16x128xbf16, #tpu.memory_space<vmem>>, %arg4: memref<16x128xbf16, #tpu.memory_space<vmem>>, %arg5: memref<16x128xbf16, #tpu.memory_space<vmem>>, %arg6: memref<16x128xbf16, #tpu.memory_space<vmem>>, %arg7: memref<16x128xbf16, #tpu.memory_space<vmem>>, %arg8: memref<16x128xbf16, #tpu.memory_space<vmem>>, %arg9: memref<16x128xbf16, #tpu.memory_space<vmem>>, %arg10: memref<128x128xbf16, #tpu.memory_space<vmem>>, %arg11: memref<128x128xbf16, #tpu.memory_space<vmem>>, %arg12: memref<128x128xbf16, #tpu.memory_space<vmem>>, %arg13: memref<128x128xbf16, #tpu.memory_space<vmem>>, %arg14: memref<128x128xbf16, #tpu.memory_space<vmem>>, %arg15: memref<128x128xbf16, #tpu.memory_space<vmem>>, %arg16: memref<128x128xbf16, #tpu.memory_space<vmem>>, %arg17: memref<128x128xbf16, #tpu.memory_space<vmem>>, %arg18: memref<128x128xbf16, #tpu.memory_space<vmem>>, %arg19: memref<1x128xf32, #tpu.memory_space<vmem>>, %arg20: memref<16x128xbf16, #tpu.memory_space<vmem>>) attributes {dimension_semantics = [#tpu.dimension_semantics<parallel>], iteration_bounds = array<i64: 1>, scalar_prefetch = 0 : i64, scratch_operands = 0 : i64, tpu.core_type = #tpu.core_type<tc>, window_params = [{transform_indices = @transform_0, window_bounds = array<i64: 16, 128>}, {transform_indices = @transform_1, window_bounds = array<i64: 16, 128>}, {transform_indices = @transform_2, window_bounds = array<i64: 16, 128>}, {transform_indices = @transform_3, window_bounds = array<i64: 16, 128>}, {transform_indices = @transform_4, window_bounds = array<i64: 16, 128>}, {transform_indices = @transform_5, window_bounds = array<i64: 16, 128>}, {transform_indices = @transform_6, window_bounds = array<i64: 16, 128>}, {transform_indices = @transform_7, window_bounds = array<i64: 16, 128>}, {transform_indices = @transform_8, window_bounds = array<i64: 16, 128>}, {pipeline_mode = #tpu.pipeline_mode<synchronous>, transform_indices = @transform_9, window_bounds = array<i64: 128, 128>}, {pipeline_mode = #tpu.pipeline_mode<synchronous>, transform_indices = @transform_10, window_bounds = array<i64: 128, 128>}, {pipeline_mode = #tpu.pipeline_mode<synchronous>, transform_indices = @transform_11, window_bounds = array<i64: 128, 128>}, {pipeline_mode = #tpu.pipeline_mode<synchronous>, transform_indices = @transform_12, window_bounds = array<i64: 128, 128>}, {pipeline_mode = #tpu.pipeline_mode<synchronous>, transform_indices = @transform_13, window_bounds = array<i64: 128, 128>}, {pipeline_mode = #tpu.pipeline_mode<synchronous>, transform_indices = @transform_14, window_bounds = array<i64: 128, 128>}, {pipeline_mode = #tpu.pipeline_mode<synchronous>, transform_indices = @transform_15, window_bounds = array<i64: 128, 128>}, {pipeline_mode = #tpu.pipeline_mode<synchronous>, transform_indices = @transform_16, window_bounds = array<i64: 128, 128>}, {pipeline_mode = #tpu.pipeline_mode<synchronous>, transform_indices = @transform_17, window_bounds = array<i64: 128, 128>}, {pipeline_mode = #tpu.pipeline_mode<synchronous>, transform_indices = @transform_18, window_bounds = array<i64: 1, 128>}, {transform_indices = @transform_19, window_bounds = array<i64: 16, 128>}]} {
    %c0 = arith.constant 0 : index
    %c0_0 = arith.constant 0 : index
    %0 = vector.load %arg1[%c0, %c0_0] : memref<16x128xbf16, #tpu.memory_space<vmem>>, vector<16x128xbf16>
    %c0_1 = arith.constant 0 : index
    %c0_2 = arith.constant 0 : index
    %1 = vector.load %arg10[%c0_1, %c0_2] : memref<128x128xbf16, #tpu.memory_space<vmem>>, vector<128x128xbf16>
    %cst = arith.constant dense<0.000000e+00> : vector<16x128xf32>
    %2 = tpu.matmul %0, %1, %cst {dimension_numbers = #tpu.dot_dimension_numbers<[1], [0], [0], [1], [0, 0, 1, 1], [], []>} : vector<16x128xbf16>, vector<128x128xbf16>, vector<16x128xf32> -> vector<16x128xf32>
    %c0_3 = arith.constant 0 : index
    %c0_4 = arith.constant 0 : index
    %3 = vector.load %arg2[%c0_3, %c0_4] : memref<16x128xbf16, #tpu.memory_space<vmem>>, vector<16x128xbf16>
    %c0_5 = arith.constant 0 : index
    %c0_6 = arith.constant 0 : index
    %4 = vector.load %arg11[%c0_5, %c0_6] : memref<128x128xbf16, #tpu.memory_space<vmem>>, vector<128x128xbf16>
    %cst_7 = arith.constant dense<0.000000e+00> : vector<16x128xf32>
    %5 = tpu.matmul %3, %4, %cst_7 {dimension_numbers = #tpu.dot_dimension_numbers<[1], [0], [0], [1], [0, 0, 1, 1], [], []>} : vector<16x128xbf16>, vector<128x128xbf16>, vector<16x128xf32> -> vector<16x128xf32>
    %6 = arith.addf %2, %5 : vector<16x128xf32>
    %c0_8 = arith.constant 0 : index
    %c0_9 = arith.constant 0 : index
    %7 = vector.load %arg3[%c0_8, %c0_9] : memref<16x128xbf16, #tpu.memory_space<vmem>>, vector<16x128xbf16>
    %c0_10 = arith.constant 0 : index
    %c0_11 = arith.constant 0 : index
    %8 = vector.load %arg12[%c0_10, %c0_11] : memref<128x128xbf16, #tpu.memory_space<vmem>>, vector<128x128xbf16>
    %cst_12 = arith.constant dense<0.000000e+00> : vector<16x128xf32>
    %9 = tpu.matmul %7, %8, %cst_12 {dimension_numbers = #tpu.dot_dimension_numbers<[1], [0], [0], [1], [0, 0, 1, 1], [], []>} : vector<16x128xbf16>, vector<128x128xbf16>, vector<16x128xf32> -> vector<16x128xf32>
    %10 = arith.addf %6, %9 : vector<16x128xf32>
    %c0_13 = arith.constant 0 : index
    %c0_14 = arith.constant 0 : index
    %11 = vector.load %arg4[%c0_13, %c0_14] : memref<16x128xbf16, #tpu.memory_space<vmem>>, vector<16x128xbf16>
    %c0_15 = arith.constant 0 : index
    %c0_16 = arith.constant 0 : index
    %12 = vector.load %arg13[%c0_15, %c0_16] : memref<128x128xbf16, #tpu.memory_space<vmem>>, vector<128x128xbf16>
    %cst_17 = arith.constant dense<0.000000e+00> : vector<16x128xf32>
    %13 = tpu.matmul %11, %12, %cst_17 {dimension_numbers = #tpu.dot_dimension_numbers<[1], [0], [0], [1], [0, 0, 1, 1], [], []>} : vector<16x128xbf16>, vector<128x128xbf16>, vector<16x128xf32> -> vector<16x128xf32>
    %14 = arith.addf %10, %13 : vector<16x128xf32>
    %c0_18 = arith.constant 0 : index
    %c0_19 = arith.constant 0 : index
    %15 = vector.load %arg5[%c0_18, %c0_19] : memref<16x128xbf16, #tpu.memory_space<vmem>>, vector<16x128xbf16>
    %c0_20 = arith.constant 0 : index
    %c0_21 = arith.constant 0 : index
    %16 = vector.load %arg14[%c0_20, %c0_21] : memref<128x128xbf16, #tpu.memory_space<vmem>>, vector<128x128xbf16>
    %cst_22 = arith.constant dense<0.000000e+00> : vector<16x128xf32>
    %17 = tpu.matmul %15, %16, %cst_22 {dimension_numbers = #tpu.dot_dimension_numbers<[1], [0], [0], [1], [0, 0, 1, 1], [], []>} : vector<16x128xbf16>, vector<128x128xbf16>, vector<16x128xf32> -> vector<16x128xf32>
    %18 = arith.addf %14, %17 : vector<16x128xf32>
    %c0_23 = arith.constant 0 : index
    %c0_24 = arith.constant 0 : index
    %19 = vector.load %arg6[%c0_23, %c0_24] : memref<16x128xbf16, #tpu.memory_space<vmem>>, vector<16x128xbf16>
    %c0_25 = arith.constant 0 : index
    %c0_26 = arith.constant 0 : index
    %20 = vector.load %arg15[%c0_25, %c0_26] : memref<128x128xbf16, #tpu.memory_space<vmem>>, vector<128x128xbf16>
    %cst_27 = arith.constant dense<0.000000e+00> : vector<16x128xf32>
    %21 = tpu.matmul %19, %20, %cst_27 {dimension_numbers = #tpu.dot_dimension_numbers<[1], [0], [0], [1], [0, 0, 1, 1], [], []>} : vector<16x128xbf16>, vector<128x128xbf16>, vector<16x128xf32> -> vector<16x128xf32>
    %22 = arith.addf %18, %21 : vector<16x128xf32>
    %c0_28 = arith.constant 0 : index
    %c0_29 = arith.constant 0 : index
    %23 = vector.load %arg7[%c0_28, %c0_29] : memref<16x128xbf16, #tpu.memory_space<vmem>>, vector<16x128xbf16>
    %c0_30 = arith.constant 0 : index
    %c0_31 = arith.constant 0 : index
    %24 = vector.load %arg16[%c0_30, %c0_31] : memref<128x128xbf16, #tpu.memory_space<vmem>>, vector<128x128xbf16>
    %cst_32 = arith.constant dense<0.000000e+00> : vector<16x128xf32>
    %25 = tpu.matmul %23, %24, %cst_32 {dimension_numbers = #tpu.dot_dimension_numbers<[1], [0], [0], [1], [0, 0, 1, 1], [], []>} : vector<16x128xbf16>, vector<128x128xbf16>, vector<16x128xf32> -> vector<16x128xf32>
    %26 = arith.addf %22, %25 : vector<16x128xf32>
    %c0_33 = arith.constant 0 : index
    %c0_34 = arith.constant 0 : index
    %27 = vector.load %arg8[%c0_33, %c0_34] : memref<16x128xbf16, #tpu.memory_space<vmem>>, vector<16x128xbf16>
    %c0_35 = arith.constant 0 : index
    %c0_36 = arith.constant 0 : index
    %28 = vector.load %arg17[%c0_35, %c0_36] : memref<128x128xbf16, #tpu.memory_space<vmem>>, vector<128x128xbf16>
    %cst_37 = arith.constant dense<0.000000e+00> : vector<16x128xf32>
    %29 = tpu.matmul %27, %28, %cst_37 {dimension_numbers = #tpu.dot_dimension_numbers<[1], [0], [0], [1], [0, 0, 1, 1], [], []>} : vector<16x128xbf16>, vector<128x128xbf16>, vector<16x128xf32> -> vector<16x128xf32>
    %30 = arith.addf %26, %29 : vector<16x128xf32>
    %c0_38 = arith.constant 0 : index
    %c0_39 = arith.constant 0 : index
    %31 = vector.load %arg9[%c0_38, %c0_39] : memref<16x128xbf16, #tpu.memory_space<vmem>>, vector<16x128xbf16>
    %c0_40 = arith.constant 0 : index
    %c0_41 = arith.constant 0 : index
    %32 = vector.load %arg18[%c0_40, %c0_41] : memref<128x128xbf16, #tpu.memory_space<vmem>>, vector<128x128xbf16>
    %cst_42 = arith.constant dense<0.000000e+00> : vector<16x128xf32>
    %33 = tpu.matmul %31, %32, %cst_42 {dimension_numbers = #tpu.dot_dimension_numbers<[1], [0], [0], [1], [0, 0, 1, 1], [], []>} : vector<16x128xbf16>, vector<128x128xbf16>, vector<16x128xf32> -> vector<16x128xf32>
    %34 = arith.addf %30, %33 : vector<16x128xf32>
    %c0_43 = arith.constant 0 : index
    %c0_44 = arith.constant 0 : index
    %35 = vector.load %arg19[%c0_43, %c0_44] : memref<1x128xf32, #tpu.memory_space<vmem>>, vector<1x128xf32>
    %36 = vector.broadcast %35 : vector<1x128xf32> to vector<16x128xf32>
    %37 = arith.addf %34, %36 : vector<16x128xf32>
    %cst_45 = arith.constant 0.000000e+00 : f32
    %38 = vector.broadcast %cst_45 : f32 to vector<16x128xf32>
    %39 = arith.subf %38, %37 : vector<16x128xf32>
    %40 = math.exp %39 : vector<16x128xf32>
    %cst_46 = arith.constant 1.000000e+00 : f32
    %41 = vector.broadcast %cst_46 : f32 to vector<16x128xf32>
    %42 = arith.addf %41, %40 : vector<16x128xf32>
    %43 = tpu.reciprocal %42 {approx = true} : vector<16x128xf32> -> vector<16x128xf32>
    %44 = arith.mulf %37, %43 : vector<16x128xf32>
    %45 = arith.truncf %44 : vector<16x128xf32> to vector<16x128xbf16>
    %c0_47 = arith.constant 0 : index
    %c0_48 = arith.constant 0 : index
    %46 = vector.load %arg20[%c0_47, %c0_48] : memref<16x128xbf16, #tpu.memory_space<vmem>>, vector<16x128xbf16>
    tpu.vector_store %arg20[%c0_47, %c0_48], %45 {strides = array<i32>} : memref<16x128xbf16, #tpu.memory_space<vmem>>, vector<16x128xbf16>,
    return
  }
  func.func @transform_0(%arg0: i32) -> (i32, i32) {
    %c0_i32 = arith.constant 0 : i32
    %c0_i32_0 = arith.constant 0 : i32
    return %arg0, %c0_i32 : i32, i32
  }
  func.func @transform_1(%arg0: i32) -> (i32, i32) {
    %c0_i32 = arith.constant 0 : i32
    %c0_i32_0 = arith.constant 0 : i32
    return %arg0, %c0_i32 : i32, i32
  }
  func.func @transform_2(%arg0: i32) -> (i32, i32) {
    %c0_i32 = arith.constant 0 : i32
    %c0_i32_0 = arith.constant 0 : i32
    return %arg0, %c0_i32 : i32, i32
  }
  func.func @transform_3(%arg0: i32) -> (i32, i32) {
    %c0_i32 = arith.constant 0 : i32
    %c0_i32_0 = arith.constant 0 : i32
    return %arg0, %c0_i32 : i32, i32
  }
  func.func @transform_4(%arg0: i32) -> (i32, i32) {
    %c0_i32 = arith.constant 0 : i32
    %c0_i32_0 = arith.constant 0 : i32
    return %arg0, %c0_i32 : i32, i32
  }
  func.func @transform_5(%arg0: i32) -> (i32, i32) {
    %c0_i32 = arith.constant 0 : i32
    %c0_i32_0 = arith.constant 0 : i32
    return %arg0, %c0_i32 : i32, i32
  }
  func.func @transform_6(%arg0: i32) -> (i32, i32) {
    %c0_i32 = arith.constant 0 : i32
    %c0_i32_0 = arith.constant 0 : i32
    return %arg0, %c0_i32 : i32, i32
  }
  func.func @transform_7(%arg0: i32) -> (i32, i32) {
    %c0_i32 = arith.constant 0 : i32
    %c0_i32_0 = arith.constant 0 : i32
    return %arg0, %c0_i32 : i32, i32
  }
  func.func @transform_8(%arg0: i32) -> (i32, i32) {
    %c0_i32 = arith.constant 0 : i32
    %c0_i32_0 = arith.constant 0 : i32
    return %arg0, %c0_i32 : i32, i32
  }
  func.func @transform_9(%arg0: i32) -> (i32, i32) {
    %c0_i32 = arith.constant 0 : i32
    %c0_i32_0 = arith.constant 0 : i32
    %c0_i32_1 = arith.constant 0 : i32
    return %c0_i32, %c0_i32_0 : i32, i32
  }
  func.func @transform_10(%arg0: i32) -> (i32, i32) {
    %c0_i32 = arith.constant 0 : i32
    %c0_i32_0 = arith.constant 0 : i32
    %c0_i32_1 = arith.constant 0 : i32
    return %c0_i32, %c0_i32_0 : i32, i32
  }
  func.func @transform_11(%arg0: i32) -> (i32, i32) {
    %c0_i32 = arith.constant 0 : i32
    %c0_i32_0 = arith.constant 0 : i32
    %c0_i32_1 = arith.constant 0 : i32
    return %c0_i32, %c0_i32_0 : i32, i32
  }
  func.func @transform_12(%arg0: i32) -> (i32, i32) {
    %c0_i32 = arith.constant 0 : i32
    %c0_i32_0 = arith.constant 0 : i32
    %c0_i32_1 = arith.constant 0 : i32
    return %c0_i32, %c0_i32_0 : i32, i32
  }
  func.func @transform_13(%arg0: i32) -> (i32, i32) {
    %c0_i32 = arith.constant 0 : i32
    %c0_i32_0 = arith.constant 0 : i32
    %c0_i32_1 = arith.constant 0 : i32
    return %c0_i32, %c0_i32_0 : i32, i32
  }
  func.func @transform_14(%arg0: i32) -> (i32, i32) {
    %c0_i32 = arith.constant 0 : i32
    %c0_i32_0 = arith.constant 0 : i32
    %c0_i32_1 = arith.constant 0 : i32
    return %c0_i32, %c0_i32_0 : i32, i32
  }
  func.func @transform_15(%arg0: i32) -> (i32, i32) {
    %c0_i32 = arith.constant 0 : i32
    %c0_i32_0 = arith.constant 0 : i32
    %c0_i32_1 = arith.constant 0 : i32
    return %c0_i32, %c0_i32_0 : i32, i32
  }
  func.func @transform_16(%arg0: i32) -> (i32, i32) {
    %c0_i32 = arith.constant 0 : i32
    %c0_i32_0 = arith.constant 0 : i32
    %c0_i32_1 = arith.constant 0 : i32
    return %c0_i32, %c0_i32_0 : i32, i32
  }
  func.func @transform_17(%arg0: i32) -> (i32, i32) {
    %c0_i32 = arith.constant 0 : i32
    %c0_i32_0 = arith.constant 0 : i32
    %c0_i32_1 = arith.constant 0 : i32
    return %c0_i32, %c0_i32_0 : i32, i32
  }
  func.func @transform_18(%arg0: i32) -> (i32, i32) {
    %c0_i32 = arith.constant 0 : i32
    %c0_i32_0 = arith.constant 0 : i32
    %c0_i32_1 = arith.constant 0 : i32
    return %c0_i32, %c0_i32_0 : i32, i32
  }
  func.func @transform_19(%arg0: i32) -> (i32, i32) {
    %c0_i32 = arith.constant 0 : i32
    %c0_i32_0 = arith.constant 0 : i32
    return %arg0, %c0_i32 : i32, i32
  }
}

module attributes {stable_mosaic.version = 11 : i64} {
  func.func @kernel(%arg0: i32, %arg1: memref<16x128xbf16, #tpu.memory_space<vmem>>, %arg2: memref<128x128xbf16, #tpu.memory_space<vmem>>, %arg3: memref<1x128xf32, #tpu.memory_space<vmem>>, %arg4: memref<16x128xbf16, #tpu.memory_space<vmem>>) attributes {dimension_semantics = [#tpu.dimension_semantics<parallel>], iteration_bounds = array<i64: 1>, scalar_prefetch = 0 : i64, scratch_operands = 0 : i64, tpu.core_type = #tpu.core_type<tc>, window_params = [{transform_indices = @transform_0, window_bounds = array<i64: 16, 128>}, {pipeline_mode = #tpu.pipeline_mode<synchronous>, transform_indices = @transform_1, window_bounds = array<i64: 128, 128>}, {pipeline_mode = #tpu.pipeline_mode<synchronous>, transform_indices = @transform_2, window_bounds = array<i64: 1, 128>}, {transform_indices = @transform_3, window_bounds = array<i64: 16, 128>}]} {
    %c0 = arith.constant 0 : index
    %c0_0 = arith.constant 0 : index
    %0 = vector.load %arg1[%c0, %c0_0] : memref<16x128xbf16, #tpu.memory_space<vmem>>, vector<16x128xbf16>
    %c0_1 = arith.constant 0 : index
    %c0_2 = arith.constant 0 : index
    %1 = vector.load %arg2[%c0_1, %c0_2] : memref<128x128xbf16, #tpu.memory_space<vmem>>, vector<128x128xbf16>
    %cst = arith.constant dense<0.000000e+00> : vector<16x128xf32>
    %2 = tpu.matmul %0, %1, %cst {dimension_numbers = #tpu.dot_dimension_numbers<[1], [0], [0], [1], [0, 0, 1, 1], [], []>} : vector<16x128xbf16>, vector<128x128xbf16>, vector<16x128xf32> -> vector<16x128xf32>
    %c0_3 = arith.constant 0 : index
    %c0_4 = arith.constant 0 : index
    %3 = vector.load %arg3[%c0_3, %c0_4] : memref<1x128xf32, #tpu.memory_space<vmem>>, vector<1x128xf32>
    %4 = vector.broadcast %3 : vector<1x128xf32> to vector<16x128xf32>
    %5 = arith.addf %2, %4 : vector<16x128xf32>
    %cst_5 = arith.constant 0.000000e+00 : f32
    %6 = vector.broadcast %cst_5 : f32 to vector<16x128xf32>
    %7 = arith.subf %6, %5 : vector<16x128xf32>
    %8 = math.exp %7 : vector<16x128xf32>
    %cst_6 = arith.constant 1.000000e+00 : f32
    %9 = vector.broadcast %cst_6 : f32 to vector<16x128xf32>
    %10 = arith.addf %9, %8 : vector<16x128xf32>
    %11 = tpu.reciprocal %10 {approx = true} : vector<16x128xf32> -> vector<16x128xf32>
    %12 = arith.mulf %5, %11 : vector<16x128xf32>
    %13 = arith.truncf %12 : vector<16x128xf32> to vector<16x128xbf16>
    %c0_7 = arith.constant 0 : index
    %c0_8 = arith.constant 0 : index
    %14 = vector.load %arg4[%c0_7, %c0_8] : memref<16x128xbf16, #tpu.memory_space<vmem>>, vector<16x128xbf16>
    tpu.vector_store %arg4[%c0_7, %c0_8], %13 {strides = array<i32>} : memref<16x128xbf16, #tpu.memory_space<vmem>>, vector<16x128xbf16>,
    return
  }
  func.func @transform_0(%arg0: i32) -> (i32, i32) {
    %c0_i32 = arith.constant 0 : i32
    %c0_i32_0 = arith.constant 0 : i32
    return %arg0, %c0_i32 : i32, i32
  }
  func.func @transform_1(%arg0: i32) -> (i32, i32) {
    %c0_i32 = arith.constant 0 : i32
    %c0_i32_0 = arith.constant 0 : i32
    %c0_i32_1 = arith.constant 0 : i32
    return %c0_i32, %c0_i32_0 : i32, i32
  }
  func.func @transform_2(%arg0: i32) -> (i32, i32) {
    %c0_i32 = arith.constant 0 : i32
    %c0_i32_0 = arith.constant 0 : i32
    %c0_i32_1 = arith.constant 0 : i32
    return %c0_i32, %c0_i32_0 : i32, i32
  }
  func.func @transform_3(%arg0: i32) -> (i32, i32) {
    %c0_i32 = arith.constant 0 : i32
    %c0_i32_0 = arith.constant 0 : i32
    return %arg0, %c0_i32 : i32, i32
  }
}

module attributes {stable_mosaic.version = 11 : i64} {
  func.func @kernel(%arg0: i32, %arg1: memref<16x64xbf16, #tpu.memory_space<vmem>>, %arg2: memref<16x64xbf16, #tpu.memory_space<vmem>>, %arg3: memref<16x64xbf16, #tpu.memory_space<vmem>>, %arg4: memref<16x64xbf16, #tpu.memory_space<vmem>>, %arg5: memref<64x128xbf16, #tpu.memory_space<vmem>>, %arg6: memref<64x128xbf16, #tpu.memory_space<vmem>>, %arg7: memref<64x128xbf16, #tpu.memory_space<vmem>>, %arg8: memref<64x128xbf16, #tpu.memory_space<vmem>>, %arg9: memref<1x128xf32, #tpu.memory_space<vmem>>, %arg10: memref<16x128xbf16, #tpu.memory_space<vmem>>) attributes {dimension_semantics = [#tpu.dimension_semantics<parallel>], iteration_bounds = array<i64: 1>, scalar_prefetch = 0 : i64, scratch_operands = 0 : i64, tpu.core_type = #tpu.core_type<tc>, window_params = [{transform_indices = @transform_0, window_bounds = array<i64: 16, 64>}, {transform_indices = @transform_1, window_bounds = array<i64: 16, 64>}, {transform_indices = @transform_2, window_bounds = array<i64: 16, 64>}, {transform_indices = @transform_3, window_bounds = array<i64: 16, 64>}, {pipeline_mode = #tpu.pipeline_mode<synchronous>, transform_indices = @transform_4, window_bounds = array<i64: 64, 128>}, {pipeline_mode = #tpu.pipeline_mode<synchronous>, transform_indices = @transform_5, window_bounds = array<i64: 64, 128>}, {pipeline_mode = #tpu.pipeline_mode<synchronous>, transform_indices = @transform_6, window_bounds = array<i64: 64, 128>}, {pipeline_mode = #tpu.pipeline_mode<synchronous>, transform_indices = @transform_7, window_bounds = array<i64: 64, 128>}, {pipeline_mode = #tpu.pipeline_mode<synchronous>, transform_indices = @transform_8, window_bounds = array<i64: 1, 128>}, {transform_indices = @transform_9, window_bounds = array<i64: 16, 128>}]} {
    %c0 = arith.constant 0 : index
    %c0_0 = arith.constant 0 : index
    %0 = vector.load %arg1[%c0, %c0_0] : memref<16x64xbf16, #tpu.memory_space<vmem>>, vector<16x64xbf16>
    %c0_1 = arith.constant 0 : index
    %c0_2 = arith.constant 0 : index
    %1 = vector.load %arg5[%c0_1, %c0_2] : memref<64x128xbf16, #tpu.memory_space<vmem>>, vector<64x128xbf16>
    %cst = arith.constant dense<0.000000e+00> : vector<16x128xf32>
    %2 = tpu.matmul %0, %1, %cst {dimension_numbers = #tpu.dot_dimension_numbers<[1], [0], [0], [1], [0, 0, 1, 1], [], []>} : vector<16x64xbf16>, vector<64x128xbf16>, vector<16x128xf32> -> vector<16x128xf32>
    %c0_3 = arith.constant 0 : index
    %c0_4 = arith.constant 0 : index
    %3 = vector.load %arg2[%c0_3, %c0_4] : memref<16x64xbf16, #tpu.memory_space<vmem>>, vector<16x64xbf16>
    %c0_5 = arith.constant 0 : index
    %c0_6 = arith.constant 0 : index
    %4 = vector.load %arg6[%c0_5, %c0_6] : memref<64x128xbf16, #tpu.memory_space<vmem>>, vector<64x128xbf16>
    %cst_7 = arith.constant dense<0.000000e+00> : vector<16x128xf32>
    %5 = tpu.matmul %3, %4, %cst_7 {dimension_numbers = #tpu.dot_dimension_numbers<[1], [0], [0], [1], [0, 0, 1, 1], [], []>} : vector<16x64xbf16>, vector<64x128xbf16>, vector<16x128xf32> -> vector<16x128xf32>
    %6 = arith.addf %2, %5 : vector<16x128xf32>
    %c0_8 = arith.constant 0 : index
    %c0_9 = arith.constant 0 : index
    %7 = vector.load %arg3[%c0_8, %c0_9] : memref<16x64xbf16, #tpu.memory_space<vmem>>, vector<16x64xbf16>
    %c0_10 = arith.constant 0 : index
    %c0_11 = arith.constant 0 : index
    %8 = vector.load %arg7[%c0_10, %c0_11] : memref<64x128xbf16, #tpu.memory_space<vmem>>, vector<64x128xbf16>
    %cst_12 = arith.constant dense<0.000000e+00> : vector<16x128xf32>
    %9 = tpu.matmul %7, %8, %cst_12 {dimension_numbers = #tpu.dot_dimension_numbers<[1], [0], [0], [1], [0, 0, 1, 1], [], []>} : vector<16x64xbf16>, vector<64x128xbf16>, vector<16x128xf32> -> vector<16x128xf32>
    %10 = arith.addf %6, %9 : vector<16x128xf32>
    %c0_13 = arith.constant 0 : index
    %c0_14 = arith.constant 0 : index
    %11 = vector.load %arg4[%c0_13, %c0_14] : memref<16x64xbf16, #tpu.memory_space<vmem>>, vector<16x64xbf16>
    %c0_15 = arith.constant 0 : index
    %c0_16 = arith.constant 0 : index
    %12 = vector.load %arg8[%c0_15, %c0_16] : memref<64x128xbf16, #tpu.memory_space<vmem>>, vector<64x128xbf16>
    %cst_17 = arith.constant dense<0.000000e+00> : vector<16x128xf32>
    %13 = tpu.matmul %11, %12, %cst_17 {dimension_numbers = #tpu.dot_dimension_numbers<[1], [0], [0], [1], [0, 0, 1, 1], [], []>} : vector<16x64xbf16>, vector<64x128xbf16>, vector<16x128xf32> -> vector<16x128xf32>
    %14 = arith.addf %10, %13 : vector<16x128xf32>
    %c0_18 = arith.constant 0 : index
    %c0_19 = arith.constant 0 : index
    %15 = vector.load %arg9[%c0_18, %c0_19] : memref<1x128xf32, #tpu.memory_space<vmem>>, vector<1x128xf32>
    %16 = vector.broadcast %15 : vector<1x128xf32> to vector<16x128xf32>
    %17 = arith.addf %14, %16 : vector<16x128xf32>
    %cst_20 = arith.constant 0.000000e+00 : f32
    %18 = vector.broadcast %cst_20 : f32 to vector<16x128xf32>
    %19 = arith.subf %18, %17 : vector<16x128xf32>
    %20 = math.exp %19 : vector<16x128xf32>
    %cst_21 = arith.constant 1.000000e+00 : f32
    %21 = vector.broadcast %cst_21 : f32 to vector<16x128xf32>
    %22 = arith.addf %21, %20 : vector<16x128xf32>
    %23 = tpu.reciprocal %22 {approx = true} : vector<16x128xf32> -> vector<16x128xf32>
    %24 = arith.mulf %17, %23 : vector<16x128xf32>
    %25 = arith.truncf %24 : vector<16x128xf32> to vector<16x128xbf16>
    %c0_22 = arith.constant 0 : index
    %c0_23 = arith.constant 0 : index
    %26 = vector.load %arg10[%c0_22, %c0_23] : memref<16x128xbf16, #tpu.memory_space<vmem>>, vector<16x128xbf16>
    tpu.vector_store %arg10[%c0_22, %c0_23], %25 {strides = array<i32>} : memref<16x128xbf16, #tpu.memory_space<vmem>>, vector<16x128xbf16>,
    return
  }
  func.func @transform_0(%arg0: i32) -> (i32, i32) {
    %c0_i32 = arith.constant 0 : i32
    %c0_i32_0 = arith.constant 0 : i32
    return %arg0, %c0_i32 : i32, i32
  }
  func.func @transform_1(%arg0: i32) -> (i32, i32) {
    %c0_i32 = arith.constant 0 : i32
    %c0_i32_0 = arith.constant 0 : i32
    return %arg0, %c0_i32 : i32, i32
  }
  func.func @transform_2(%arg0: i32) -> (i32, i32) {
    %c0_i32 = arith.constant 0 : i32
    %c0_i32_0 = arith.constant 0 : i32
    return %arg0, %c0_i32 : i32, i32
  }
  func.func @transform_3(%arg0: i32) -> (i32, i32) {
    %c0_i32 = arith.constant 0 : i32
    %c0_i32_0 = arith.constant 0 : i32
    return %arg0, %c0_i32 : i32, i32
  }
  func.func @transform_4(%arg0: i32) -> (i32, i32) {
    %c0_i32 = arith.constant 0 : i32
    %c0_i32_0 = arith.constant 0 : i32
    %c0_i32_1 = arith.constant 0 : i32
    return %c0_i32, %c0_i32_0 : i32, i32
  }
  func.func @transform_5(%arg0: i32) -> (i32, i32) {
    %c0_i32 = arith.constant 0 : i32
    %c0_i32_0 = arith.constant 0 : i32
    %c0_i32_1 = arith.constant 0 : i32
    return %c0_i32, %c0_i32_0 : i32, i32
  }
  func.func @transform_6(%arg0: i32) -> (i32, i32) {
    %c0_i32 = arith.constant 0 : i32
    %c0_i32_0 = arith.constant 0 : i32
    %c0_i32_1 = arith.constant 0 : i32
    return %c0_i32, %c0_i32_0 : i32, i32
  }
  func.func @transform_7(%arg0: i32) -> (i32, i32) {
    %c0_i32 = arith.constant 0 : i32
    %c0_i32_0 = arith.constant 0 : i32
    %c0_i32_1 = arith.constant 0 : i32
    return %c0_i32, %c0_i32_0 : i32, i32
  }
  func.func @transform_8(%arg0: i32) -> (i32, i32) {
    %c0_i32 = arith.constant 0 : i32
    %c0_i32_0 = arith.constant 0 : i32
    %c0_i32_1 = arith.constant 0 : i32
    return %c0_i32, %c0_i32_0 : i32, i32
  }
  func.func @transform_9(%arg0: i32) -> (i32, i32) {
    %c0_i32 = arith.constant 0 : i32
    %c0_i32_0 = arith.constant 0 : i32
    return %arg0, %c0_i32 : i32, i32
  }
}

module attributes {stable_mosaic.version = 11 : i64} {
  func.func @kernel(%arg0: i32, %arg1: memref<4x128xbf16, #tpu.memory_space<vmem>>, %arg2: memref<4x128xbf16, #tpu.memory_space<vmem>>, %arg3: memref<4x128xbf16, #tpu.memory_space<vmem>>, %arg4: memref<4x128xbf16, #tpu.memory_space<vmem>>, %arg5: memref<4x128xbf16, #tpu.memory_space<vmem>>, %arg6: memref<4x128xbf16, #tpu.memory_space<vmem>>, %arg7: memref<4x128xbf16, #tpu.memory_space<vmem>>, %arg8: memref<4x128xbf16, #tpu.memory_space<vmem>>, %arg9: memref<4x128xbf16, #tpu.memory_space<vmem>>, %arg10: memref<128x256xbf16, #tpu.memory_space<vmem>>, %arg11: memref<128x256xbf16, #tpu.memory_space<vmem>>, %arg12: memref<128x256xbf16, #tpu.memory_space<vmem>>, %arg13: memref<128x256xbf16, #tpu.memory_space<vmem>>, %arg14: memref<128x256xbf16, #tpu.memory_space<vmem>>, %arg15: memref<128x256xbf16, #tpu.memory_space<vmem>>, %arg16: memref<128x256xbf16, #tpu.memory_space<vmem>>, %arg17: memref<128x256xbf16, #tpu.memory_space<vmem>>, %arg18: memref<128x256xbf16, #tpu.memory_space<vmem>>, %arg19: memref<1x256xf32, #tpu.memory_space<vmem>>, %arg20: memref<4x256xbf16, #tpu.memory_space<vmem>>) attributes {dimension_semantics = [#tpu.dimension_semantics<parallel>], iteration_bounds = array<i64: 1>, scalar_prefetch = 0 : i64, scratch_operands = 0 : i64, tpu.core_type = #tpu.core_type<tc>, window_params = [{transform_indices = @transform_0, window_bounds = array<i64: 4, 128>}, {transform_indices = @transform_1, window_bounds = array<i64: 4, 128>}, {transform_indices = @transform_2, window_bounds = array<i64: 4, 128>}, {transform_indices = @transform_3, window_bounds = array<i64: 4, 128>}, {transform_indices = @transform_4, window_bounds = array<i64: 4, 128>}, {transform_indices = @transform_5, window_bounds = array<i64: 4, 128>}, {transform_indices = @transform_6, window_bounds = array<i64: 4, 128>}, {transform_indices = @transform_7, window_bounds = array<i64: 4, 128>}, {transform_indices = @transform_8, window_bounds = array<i64: 4, 128>}, {pipeline_mode = #tpu.pipeline_mode<synchronous>, transform_indices = @transform_9, window_bounds = array<i64: 128, 256>}, {pipeline_mode = #tpu.pipeline_mode<synchronous>, transform_indices = @transform_10, window_bounds = array<i64: 128, 256>}, {pipeline_mode = #tpu.pipeline_mode<synchronous>, transform_indices = @transform_11, window_bounds = array<i64: 128, 256>}, {pipeline_mode = #tpu.pipeline_mode<synchronous>, transform_indices = @transform_12, window_bounds = array<i64: 128, 256>}, {pipeline_mode = #tpu.pipeline_mode<synchronous>, transform_indices = @transform_13, window_bounds = array<i64: 128, 256>}, {pipeline_mode = #tpu.pipeline_mode<synchronous>, transform_indices = @transform_14, window_bounds = array<i64: 128, 256>}, {pipeline_mode = #tpu.pipeline_mode<synchronous>, transform_indices = @transform_15, window_bounds = array<i64: 128, 256>}, {pipeline_mode = #tpu.pipeline_mode<synchronous>, transform_indices = @transform_16, window_bounds = array<i64: 128, 256>}, {pipeline_mode = #tpu.pipeline_mode<synchronous>, transform_indices = @transform_17, window_bounds = array<i64: 128, 256>}, {pipeline_mode = #tpu.pipeline_mode<synchronous>, transform_indices = @transform_18, window_bounds = array<i64: 1, 256>}, {transform_indices = @transform_19, window_bounds = array<i64: 4, 256>}]} {
    %c0 = arith.constant 0 : index
    %c0_0 = arith.constant 0 : index
    %0 = vector.load %arg1[%c0, %c0_0] : memref<4x128xbf16, #tpu.memory_space<vmem>>, vector<4x128xbf16>
    %c0_1 = arith.constant 0 : index
    %c0_2 = arith.constant 0 : index
    %1 = vector.load %arg10[%c0_1, %c0_2] : memref<128x256xbf16, #tpu.memory_space<vmem>>, vector<128x256xbf16>
    %cst = arith.constant dense<0.000000e+00> : vector<4x256xf32>
    %2 = tpu.matmul %0, %1, %cst {dimension_numbers = #tpu.dot_dimension_numbers<[1], [0], [0], [1], [0, 0, 1, 1], [], []>} : vector<4x128xbf16>, vector<128x256xbf16>, vector<4x256xf32> -> vector<4x256xf32>
    %c0_3 = arith.constant 0 : index
    %c0_4 = arith.constant 0 : index
    %3 = vector.load %arg2[%c0_3, %c0_4] : memref<4x128xbf16, #tpu.memory_space<vmem>>, vector<4x128xbf16>
    %c0_5 = arith.constant 0 : index
    %c0_6 = arith.constant 0 : index
    %4 = vector.load %arg11[%c0_5, %c0_6] : memref<128x256xbf16, #tpu.memory_space<vmem>>, vector<128x256xbf16>
    %cst_7 = arith.constant dense<0.000000e+00> : vector<4x256xf32>
    %5 = tpu.matmul %3, %4, %cst_7 {dimension_numbers = #tpu.dot_dimension_numbers<[1], [0], [0], [1], [0, 0, 1, 1], [], []>} : vector<4x128xbf16>, vector<128x256xbf16>, vector<4x256xf32> -> vector<4x256xf32>
    %6 = arith.addf %2, %5 : vector<4x256xf32>
    %c0_8 = arith.constant 0 : index
    %c0_9 = arith.constant 0 : index
    %7 = vector.load %arg3[%c0_8, %c0_9] : memref<4x128xbf16, #tpu.memory_space<vmem>>, vector<4x128xbf16>
    %c0_10 = arith.constant 0 : index
    %c0_11 = arith.constant 0 : index
    %8 = vector.load %arg12[%c0_10, %c0_11] : memref<128x256xbf16, #tpu.memory_space<vmem>>, vector<128x256xbf16>
    %cst_12 = arith.constant dense<0.000000e+00> : vector<4x256xf32>
    %9 = tpu.matmul %7, %8, %cst_12 {dimension_numbers = #tpu.dot_dimension_numbers<[1], [0], [0], [1], [0, 0, 1, 1], [], []>} : vector<4x128xbf16>, vector<128x256xbf16>, vector<4x256xf32> -> vector<4x256xf32>
    %10 = arith.addf %6, %9 : vector<4x256xf32>
    %c0_13 = arith.constant 0 : index
    %c0_14 = arith.constant 0 : index
    %11 = vector.load %arg4[%c0_13, %c0_14] : memref<4x128xbf16, #tpu.memory_space<vmem>>, vector<4x128xbf16>
    %c0_15 = arith.constant 0 : index
    %c0_16 = arith.constant 0 : index
    %12 = vector.load %arg13[%c0_15, %c0_16] : memref<128x256xbf16, #tpu.memory_space<vmem>>, vector<128x256xbf16>
    %cst_17 = arith.constant dense<0.000000e+00> : vector<4x256xf32>
    %13 = tpu.matmul %11, %12, %cst_17 {dimension_numbers = #tpu.dot_dimension_numbers<[1], [0], [0], [1], [0, 0, 1, 1], [], []>} : vector<4x128xbf16>, vector<128x256xbf16>, vector<4x256xf32> -> vector<4x256xf32>
    %14 = arith.addf %10, %13 : vector<4x256xf32>
    %c0_18 = arith.constant 0 : index
    %c0_19 = arith.constant 0 : index
    %15 = vector.load %arg5[%c0_18, %c0_19] : memref<4x128xbf16, #tpu.memory_space<vmem>>, vector<4x128xbf16>
    %c0_20 = arith.constant 0 : index
    %c0_21 = arith.constant 0 : index
    %16 = vector.load %arg14[%c0_20, %c0_21] : memref<128x256xbf16, #tpu.memory_space<vmem>>, vector<128x256xbf16>
    %cst_22 = arith.constant dense<0.000000e+00> : vector<4x256xf32>
    %17 = tpu.matmul %15, %16, %cst_22 {dimension_numbers = #tpu.dot_dimension_numbers<[1], [0], [0], [1], [0, 0, 1, 1], [], []>} : vector<4x128xbf16>, vector<128x256xbf16>, vector<4x256xf32> -> vector<4x256xf32>
    %18 = arith.addf %14, %17 : vector<4x256xf32>
    %c0_23 = arith.constant 0 : index
    %c0_24 = arith.constant 0 : index
    %19 = vector.load %arg6[%c0_23, %c0_24] : memref<4x128xbf16, #tpu.memory_space<vmem>>, vector<4x128xbf16>
    %c0_25 = arith.constant 0 : index
    %c0_26 = arith.constant 0 : index
    %20 = vector.load %arg15[%c0_25, %c0_26] : memref<128x256xbf16, #tpu.memory_space<vmem>>, vector<128x256xbf16>
    %cst_27 = arith.constant dense<0.000000e+00> : vector<4x256xf32>
    %21 = tpu.matmul %19, %20, %cst_27 {dimension_numbers = #tpu.dot_dimension_numbers<[1], [0], [0], [1], [0, 0, 1, 1], [], []>} : vector<4x128xbf16>, vector<128x256xbf16>, vector<4x256xf32> -> vector<4x256xf32>
    %22 = arith.addf %18, %21 : vector<4x256xf32>
    %c0_28 = arith.constant 0 : index
    %c0_29 = arith.constant 0 : index
    %23 = vector.load %arg7[%c0_28, %c0_29] : memref<4x128xbf16, #tpu.memory_space<vmem>>, vector<4x128xbf16>
    %c0_30 = arith.constant 0 : index
    %c0_31 = arith.constant 0 : index
    %24 = vector.load %arg16[%c0_30, %c0_31] : memref<128x256xbf16, #tpu.memory_space<vmem>>, vector<128x256xbf16>
    %cst_32 = arith.constant dense<0.000000e+00> : vector<4x256xf32>
    %25 = tpu.matmul %23, %24, %cst_32 {dimension_numbers = #tpu.dot_dimension_numbers<[1], [0], [0], [1], [0, 0, 1, 1], [], []>} : vector<4x128xbf16>, vector<128x256xbf16>, vector<4x256xf32> -> vector<4x256xf32>
    %26 = arith.addf %22, %25 : vector<4x256xf32>
    %c0_33 = arith.constant 0 : index
    %c0_34 = arith.constant 0 : index
    %27 = vector.load %arg8[%c0_33, %c0_34] : memref<4x128xbf16, #tpu.memory_space<vmem>>, vector<4x128xbf16>
    %c0_35 = arith.constant 0 : index
    %c0_36 = arith.constant 0 : index
    %28 = vector.load %arg17[%c0_35, %c0_36] : memref<128x256xbf16, #tpu.memory_space<vmem>>, vector<128x256xbf16>
    %cst_37 = arith.constant dense<0.000000e+00> : vector<4x256xf32>
    %29 = tpu.matmul %27, %28, %cst_37 {dimension_numbers = #tpu.dot_dimension_numbers<[1], [0], [0], [1], [0, 0, 1, 1], [], []>} : vector<4x128xbf16>, vector<128x256xbf16>, vector<4x256xf32> -> vector<4x256xf32>
    %30 = arith.addf %26, %29 : vector<4x256xf32>
    %c0_38 = arith.constant 0 : index
    %c0_39 = arith.constant 0 : index
    %31 = vector.load %arg9[%c0_38, %c0_39] : memref<4x128xbf16, #tpu.memory_space<vmem>>, vector<4x128xbf16>
    %c0_40 = arith.constant 0 : index
    %c0_41 = arith.constant 0 : index
    %32 = vector.load %arg18[%c0_40, %c0_41] : memref<128x256xbf16, #tpu.memory_space<vmem>>, vector<128x256xbf16>
    %cst_42 = arith.constant dense<0.000000e+00> : vector<4x256xf32>
    %33 = tpu.matmul %31, %32, %cst_42 {dimension_numbers = #tpu.dot_dimension_numbers<[1], [0], [0], [1], [0, 0, 1, 1], [], []>} : vector<4x128xbf16>, vector<128x256xbf16>, vector<4x256xf32> -> vector<4x256xf32>
    %34 = arith.addf %30, %33 : vector<4x256xf32>
    %c0_43 = arith.constant 0 : index
    %c0_44 = arith.constant 0 : index
    %35 = vector.load %arg19[%c0_43, %c0_44] : memref<1x256xf32, #tpu.memory_space<vmem>>, vector<1x256xf32>
    %36 = vector.broadcast %35 : vector<1x256xf32> to vector<4x256xf32>
    %37 = arith.addf %34, %36 : vector<4x256xf32>
    %cst_45 = arith.constant 0.000000e+00 : f32
    %38 = vector.broadcast %cst_45 : f32 to vector<4x256xf32>
    %39 = arith.subf %38, %37 : vector<4x256xf32>
    %40 = math.exp %39 : vector<4x256xf32>
    %cst_46 = arith.constant 1.000000e+00 : f32
    %41 = vector.broadcast %cst_46 : f32 to vector<4x256xf32>
    %42 = arith.addf %41, %40 : vector<4x256xf32>
    %43 = tpu.reciprocal %42 {approx = true} : vector<4x256xf32> -> vector<4x256xf32>
    %44 = arith.mulf %37, %43 : vector<4x256xf32>
    %45 = arith.truncf %44 : vector<4x256xf32> to vector<4x256xbf16>
    %c0_47 = arith.constant 0 : index
    %c0_48 = arith.constant 0 : index
    %46 = vector.load %arg20[%c0_47, %c0_48] : memref<4x256xbf16, #tpu.memory_space<vmem>>, vector<4x256xbf16>
    tpu.vector_store %arg20[%c0_47, %c0_48], %45 {strides = array<i32>} : memref<4x256xbf16, #tpu.memory_space<vmem>>, vector<4x256xbf16>,
    return
  }
  func.func @transform_0(%arg0: i32) -> (i32, i32) {
    %c0_i32 = arith.constant 0 : i32
    %c0_i32_0 = arith.constant 0 : i32
    return %arg0, %c0_i32 : i32, i32
  }
  func.func @transform_1(%arg0: i32) -> (i32, i32) {
    %c0_i32 = arith.constant 0 : i32
    %c0_i32_0 = arith.constant 0 : i32
    return %arg0, %c0_i32 : i32, i32
  }
  func.func @transform_2(%arg0: i32) -> (i32, i32) {
    %c0_i32 = arith.constant 0 : i32
    %c0_i32_0 = arith.constant 0 : i32
    return %arg0, %c0_i32 : i32, i32
  }
  func.func @transform_3(%arg0: i32) -> (i32, i32) {
    %c0_i32 = arith.constant 0 : i32
    %c0_i32_0 = arith.constant 0 : i32
    return %arg0, %c0_i32 : i32, i32
  }
  func.func @transform_4(%arg0: i32) -> (i32, i32) {
    %c0_i32 = arith.constant 0 : i32
    %c0_i32_0 = arith.constant 0 : i32
    return %arg0, %c0_i32 : i32, i32
  }
  func.func @transform_5(%arg0: i32) -> (i32, i32) {
    %c0_i32 = arith.constant 0 : i32
    %c0_i32_0 = arith.constant 0 : i32
    return %arg0, %c0_i32 : i32, i32
  }
  func.func @transform_6(%arg0: i32) -> (i32, i32) {
    %c0_i32 = arith.constant 0 : i32
    %c0_i32_0 = arith.constant 0 : i32
    return %arg0, %c0_i32 : i32, i32
  }
  func.func @transform_7(%arg0: i32) -> (i32, i32) {
    %c0_i32 = arith.constant 0 : i32
    %c0_i32_0 = arith.constant 0 : i32
    return %arg0, %c0_i32 : i32, i32
  }
  func.func @transform_8(%arg0: i32) -> (i32, i32) {
    %c0_i32 = arith.constant 0 : i32
    %c0_i32_0 = arith.constant 0 : i32
    return %arg0, %c0_i32 : i32, i32
  }
  func.func @transform_9(%arg0: i32) -> (i32, i32) {
    %c0_i32 = arith.constant 0 : i32
    %c0_i32_0 = arith.constant 0 : i32
    %c0_i32_1 = arith.constant 0 : i32
    return %c0_i32, %c0_i32_0 : i32, i32
  }
  func.func @transform_10(%arg0: i32) -> (i32, i32) {
    %c0_i32 = arith.constant 0 : i32
    %c0_i32_0 = arith.constant 0 : i32
    %c0_i32_1 = arith.constant 0 : i32
    return %c0_i32, %c0_i32_0 : i32, i32
  }
  func.func @transform_11(%arg0: i32) -> (i32, i32) {
    %c0_i32 = arith.constant 0 : i32
    %c0_i32_0 = arith.constant 0 : i32
    %c0_i32_1 = arith.constant 0 : i32
    return %c0_i32, %c0_i32_0 : i32, i32
  }
  func.func @transform_12(%arg0: i32) -> (i32, i32) {
    %c0_i32 = arith.constant 0 : i32
    %c0_i32_0 = arith.constant 0 : i32
    %c0_i32_1 = arith.constant 0 : i32
    return %c0_i32, %c0_i32_0 : i32, i32
  }
  func.func @transform_13(%arg0: i32) -> (i32, i32) {
    %c0_i32 = arith.constant 0 : i32
    %c0_i32_0 = arith.constant 0 : i32
    %c0_i32_1 = arith.constant 0 : i32
    return %c0_i32, %c0_i32_0 : i32, i32
  }
  func.func @transform_14(%arg0: i32) -> (i32, i32) {
    %c0_i32 = arith.constant 0 : i32
    %c0_i32_0 = arith.constant 0 : i32
    %c0_i32_1 = arith.constant 0 : i32
    return %c0_i32, %c0_i32_0 : i32, i32
  }
  func.func @transform_15(%arg0: i32) -> (i32, i32) {
    %c0_i32 = arith.constant 0 : i32
    %c0_i32_0 = arith.constant 0 : i32
    %c0_i32_1 = arith.constant 0 : i32
    return %c0_i32, %c0_i32_0 : i32, i32
  }
  func.func @transform_16(%arg0: i32) -> (i32, i32) {
    %c0_i32 = arith.constant 0 : i32
    %c0_i32_0 = arith.constant 0 : i32
    %c0_i32_1 = arith.constant 0 : i32
    return %c0_i32, %c0_i32_0 : i32, i32
  }
  func.func @transform_17(%arg0: i32) -> (i32, i32) {
    %c0_i32 = arith.constant 0 : i32
    %c0_i32_0 = arith.constant 0 : i32
    %c0_i32_1 = arith.constant 0 : i32
    return %c0_i32, %c0_i32_0 : i32, i32
  }
  func.func @transform_18(%arg0: i32) -> (i32, i32) {
    %c0_i32 = arith.constant 0 : i32
    %c0_i32_0 = arith.constant 0 : i32
    %c0_i32_1 = arith.constant 0 : i32
    return %c0_i32, %c0_i32_0 : i32, i32
  }
  func.func @transform_19(%arg0: i32) -> (i32, i32) {
    %c0_i32 = arith.constant 0 : i32
    %c0_i32_0 = arith.constant 0 : i32
    return %arg0, %c0_i32 : i32, i32
  }
}

module attributes {stable_mosaic.version = 11 : i64} {
  func.func @kernel(%arg0: i32, %arg1: memref<4x256xbf16, #tpu.memory_space<vmem>>, %arg2: memref<256x256xbf16, #tpu.memory_space<vmem>>, %arg3: memref<1x256xf32, #tpu.memory_space<vmem>>, %arg4: memref<4x256xbf16, #tpu.memory_space<vmem>>) attributes {dimension_semantics = [#tpu.dimension_semantics<parallel>], iteration_bounds = array<i64: 1>, scalar_prefetch = 0 : i64, scratch_operands = 0 : i64, tpu.core_type = #tpu.core_type<tc>, window_params = [{transform_indices = @transform_0, window_bounds = array<i64: 4, 256>}, {pipeline_mode = #tpu.pipeline_mode<synchronous>, transform_indices = @transform_1, window_bounds = array<i64: 256, 256>}, {pipeline_mode = #tpu.pipeline_mode<synchronous>, transform_indices = @transform_2, window_bounds = array<i64: 1, 256>}, {transform_indices = @transform_3, window_bounds = array<i64: 4, 256>}]} {
    %c0 = arith.constant 0 : index
    %c0_0 = arith.constant 0 : index
    %0 = vector.load %arg1[%c0, %c0_0] : memref<4x256xbf16, #tpu.memory_space<vmem>>, vector<4x256xbf16>
    %c0_1 = arith.constant 0 : index
    %c0_2 = arith.constant 0 : index
    %1 = vector.load %arg2[%c0_1, %c0_2] : memref<256x256xbf16, #tpu.memory_space<vmem>>, vector<256x256xbf16>
    %cst = arith.constant dense<0.000000e+00> : vector<4x256xf32>
    %2 = tpu.matmul %0, %1, %cst {dimension_numbers = #tpu.dot_dimension_numbers<[1], [0], [0], [1], [0, 0, 1, 1], [], []>} : vector<4x256xbf16>, vector<256x256xbf16>, vector<4x256xf32> -> vector<4x256xf32>
    %c0_3 = arith.constant 0 : index
    %c0_4 = arith.constant 0 : index
    %3 = vector.load %arg3[%c0_3, %c0_4] : memref<1x256xf32, #tpu.memory_space<vmem>>, vector<1x256xf32>
    %4 = vector.broadcast %3 : vector<1x256xf32> to vector<4x256xf32>
    %5 = arith.addf %2, %4 : vector<4x256xf32>
    %cst_5 = arith.constant 0.000000e+00 : f32
    %6 = vector.broadcast %cst_5 : f32 to vector<4x256xf32>
    %7 = arith.subf %6, %5 : vector<4x256xf32>
    %8 = math.exp %7 : vector<4x256xf32>
    %cst_6 = arith.constant 1.000000e+00 : f32
    %9 = vector.broadcast %cst_6 : f32 to vector<4x256xf32>
    %10 = arith.addf %9, %8 : vector<4x256xf32>
    %11 = tpu.reciprocal %10 {approx = true} : vector<4x256xf32> -> vector<4x256xf32>
    %12 = arith.mulf %5, %11 : vector<4x256xf32>
    %13 = arith.truncf %12 : vector<4x256xf32> to vector<4x256xbf16>
    %c0_7 = arith.constant 0 : index
    %c0_8 = arith.constant 0 : index
    %14 = vector.load %arg4[%c0_7, %c0_8] : memref<4x256xbf16, #tpu.memory_space<vmem>>, vector<4x256xbf16>
    tpu.vector_store %arg4[%c0_7, %c0_8], %13 {strides = array<i32>} : memref<4x256xbf16, #tpu.memory_space<vmem>>, vector<4x256xbf16>,
    return
  }
  func.func @transform_0(%arg0: i32) -> (i32, i32) {
    %c0_i32 = arith.constant 0 : i32
    %c0_i32_0 = arith.constant 0 : i32
    return %arg0, %c0_i32 : i32, i32
  }
  func.func @transform_1(%arg0: i32) -> (i32, i32) {
    %c0_i32 = arith.constant 0 : i32
    %c0_i32_0 = arith.constant 0 : i32
    %c0_i32_1 = arith.constant 0 : i32
    return %c0_i32, %c0_i32_0 : i32, i32
  }
  func.func @transform_2(%arg0: i32) -> (i32, i32) {
    %c0_i32 = arith.constant 0 : i32
    %c0_i32_0 = arith.constant 0 : i32
    %c0_i32_1 = arith.constant 0 : i32
    return %c0_i32, %c0_i32_0 : i32, i32
  }
  func.func @transform_3(%arg0: i32) -> (i32, i32) {
    %c0_i32 = arith.constant 0 : i32
    %c0_i32_0 = arith.constant 0 : i32
    return %arg0, %c0_i32 : i32, i32
  }
}

module attributes {stable_mosaic.version = 11 : i64} {
  func.func @kernel(%arg0: i32, %arg1: memref<4x256xbf16, #tpu.memory_space<vmem>>, %arg2: memref<256x128xbf16, #tpu.memory_space<vmem>>, %arg3: memref<1x128xf32, #tpu.memory_space<vmem>>, %arg4: memref<4x128xbf16, #tpu.memory_space<vmem>>) attributes {dimension_semantics = [#tpu.dimension_semantics<parallel>], iteration_bounds = array<i64: 1>, scalar_prefetch = 0 : i64, scratch_operands = 0 : i64, tpu.core_type = #tpu.core_type<tc>, window_params = [{transform_indices = @transform_0, window_bounds = array<i64: 4, 256>}, {pipeline_mode = #tpu.pipeline_mode<synchronous>, transform_indices = @transform_1, window_bounds = array<i64: 256, 128>}, {pipeline_mode = #tpu.pipeline_mode<synchronous>, transform_indices = @transform_2, window_bounds = array<i64: 1, 128>}, {transform_indices = @transform_3, window_bounds = array<i64: 4, 128>}]} {
    %c0 = arith.constant 0 : index
    %c0_0 = arith.constant 0 : index
    %0 = vector.load %arg1[%c0, %c0_0] : memref<4x256xbf16, #tpu.memory_space<vmem>>, vector<4x256xbf16>
    %c0_1 = arith.constant 0 : index
    %c0_2 = arith.constant 0 : index
    %1 = vector.load %arg2[%c0_1, %c0_2] : memref<256x128xbf16, #tpu.memory_space<vmem>>, vector<256x128xbf16>
    %cst = arith.constant dense<0.000000e+00> : vector<4x128xf32>
    %2 = tpu.matmul %0, %1, %cst {dimension_numbers = #tpu.dot_dimension_numbers<[1], [0], [0], [1], [0, 0, 1, 1], [], []>} : vector<4x256xbf16>, vector<256x128xbf16>, vector<4x128xf32> -> vector<4x128xf32>
    %c0_3 = arith.constant 0 : index
    %c0_4 = arith.constant 0 : index
    %3 = vector.load %arg3[%c0_3, %c0_4] : memref<1x128xf32, #tpu.memory_space<vmem>>, vector<1x128xf32>
    %4 = vector.broadcast %3 : vector<1x128xf32> to vector<4x128xf32>
    %5 = arith.addf %2, %4 : vector<4x128xf32>
    %cst_5 = arith.constant 0.000000e+00 : f32
    %6 = vector.broadcast %cst_5 : f32 to vector<4x128xf32>
    %7 = arith.subf %6, %5 : vector<4x128xf32>
    %8 = math.exp %7 : vector<4x128xf32>
    %cst_6 = arith.constant 1.000000e+00 : f32
    %9 = vector.broadcast %cst_6 : f32 to vector<4x128xf32>
    %10 = arith.addf %9, %8 : vector<4x128xf32>
    %11 = tpu.reciprocal %10 {approx = true} : vector<4x128xf32> -> vector<4x128xf32>
    %12 = arith.mulf %5, %11 : vector<4x128xf32>
    %13 = arith.truncf %12 : vector<4x128xf32> to vector<4x128xbf16>
    %c0_7 = arith.constant 0 : index
    %c0_8 = arith.constant 0 : index
    %14 = vector.load %arg4[%c0_7, %c0_8] : memref<4x128xbf16, #tpu.memory_space<vmem>>, vector<4x128xbf16>
    tpu.vector_store %arg4[%c0_7, %c0_8], %13 {strides = array<i32>} : memref<4x128xbf16, #tpu.memory_space<vmem>>, vector<4x128xbf16>,
    return
  }
  func.func @transform_0(%arg0: i32) -> (i32, i32) {
    %c0_i32 = arith.constant 0 : i32
    %c0_i32_0 = arith.constant 0 : i32
    return %arg0, %c0_i32 : i32, i32
  }
  func.func @transform_1(%arg0: i32) -> (i32, i32) {
    %c0_i32 = arith.constant 0 : i32
    %c0_i32_0 = arith.constant 0 : i32
    %c0_i32_1 = arith.constant 0 : i32
    return %c0_i32, %c0_i32_0 : i32, i32
  }
  func.func @transform_2(%arg0: i32) -> (i32, i32) {
    %c0_i32 = arith.constant 0 : i32
    %c0_i32_0 = arith.constant 0 : i32
    %c0_i32_1 = arith.constant 0 : i32
    return %c0_i32, %c0_i32_0 : i32, i32
  }
  func.func @transform_3(%arg0: i32) -> (i32, i32) {
    %c0_i32 = arith.constant 0 : i32
    %c0_i32_0 = arith.constant 0 : i32
    return %arg0, %c0_i32 : i32, i32
  }
}

module attributes {stable_mosaic.version = 11 : i64} {
  func.func @kernel(%arg0: i32, %arg1: memref<4x128xbf16, #tpu.memory_space<vmem>>, %arg2: memref<4x128xbf16, #tpu.memory_space<vmem>>, %arg3: memref<4x128xbf16, #tpu.memory_space<vmem>>, %arg4: memref<128x256xbf16, #tpu.memory_space<vmem>>, %arg5: memref<128x256xbf16, #tpu.memory_space<vmem>>, %arg6: memref<128x256xbf16, #tpu.memory_space<vmem>>, %arg7: memref<1x256xf32, #tpu.memory_space<vmem>>, %arg8: memref<4x256xbf16, #tpu.memory_space<vmem>>) attributes {dimension_semantics = [#tpu.dimension_semantics<parallel>], iteration_bounds = array<i64: 1>, scalar_prefetch = 0 : i64, scratch_operands = 0 : i64, tpu.core_type = #tpu.core_type<tc>, window_params = [{transform_indices = @transform_0, window_bounds = array<i64: 4, 128>}, {transform_indices = @transform_1, window_bounds = array<i64: 4, 128>}, {transform_indices = @transform_2, window_bounds = array<i64: 4, 128>}, {pipeline_mode = #tpu.pipeline_mode<synchronous>, transform_indices = @transform_3, window_bounds = array<i64: 128, 256>}, {pipeline_mode = #tpu.pipeline_mode<synchronous>, transform_indices = @transform_4, window_bounds = array<i64: 128, 256>}, {pipeline_mode = #tpu.pipeline_mode<synchronous>, transform_indices = @transform_5, window_bounds = array<i64: 128, 256>}, {pipeline_mode = #tpu.pipeline_mode<synchronous>, transform_indices = @transform_6, window_bounds = array<i64: 1, 256>}, {transform_indices = @transform_7, window_bounds = array<i64: 4, 256>}]} {
    %c0 = arith.constant 0 : index
    %c0_0 = arith.constant 0 : index
    %0 = vector.load %arg1[%c0, %c0_0] : memref<4x128xbf16, #tpu.memory_space<vmem>>, vector<4x128xbf16>
    %c0_1 = arith.constant 0 : index
    %c0_2 = arith.constant 0 : index
    %1 = vector.load %arg4[%c0_1, %c0_2] : memref<128x256xbf16, #tpu.memory_space<vmem>>, vector<128x256xbf16>
    %cst = arith.constant dense<0.000000e+00> : vector<4x256xf32>
    %2 = tpu.matmul %0, %1, %cst {dimension_numbers = #tpu.dot_dimension_numbers<[1], [0], [0], [1], [0, 0, 1, 1], [], []>} : vector<4x128xbf16>, vector<128x256xbf16>, vector<4x256xf32> -> vector<4x256xf32>
    %c0_3 = arith.constant 0 : index
    %c0_4 = arith.constant 0 : index
    %3 = vector.load %arg2[%c0_3, %c0_4] : memref<4x128xbf16, #tpu.memory_space<vmem>>, vector<4x128xbf16>
    %c0_5 = arith.constant 0 : index
    %c0_6 = arith.constant 0 : index
    %4 = vector.load %arg5[%c0_5, %c0_6] : memref<128x256xbf16, #tpu.memory_space<vmem>>, vector<128x256xbf16>
    %cst_7 = arith.constant dense<0.000000e+00> : vector<4x256xf32>
    %5 = tpu.matmul %3, %4, %cst_7 {dimension_numbers = #tpu.dot_dimension_numbers<[1], [0], [0], [1], [0, 0, 1, 1], [], []>} : vector<4x128xbf16>, vector<128x256xbf16>, vector<4x256xf32> -> vector<4x256xf32>
    %6 = arith.addf %2, %5 : vector<4x256xf32>
    %c0_8 = arith.constant 0 : index
    %c0_9 = arith.constant 0 : index
    %7 = vector.load %arg3[%c0_8, %c0_9] : memref<4x128xbf16, #tpu.memory_space<vmem>>, vector<4x128xbf16>
    %c0_10 = arith.constant 0 : index
    %c0_11 = arith.constant 0 : index
    %8 = vector.load %arg6[%c0_10, %c0_11] : memref<128x256xbf16, #tpu.memory_space<vmem>>, vector<128x256xbf16>
    %cst_12 = arith.constant dense<0.000000e+00> : vector<4x256xf32>
    %9 = tpu.matmul %7, %8, %cst_12 {dimension_numbers = #tpu.dot_dimension_numbers<[1], [0], [0], [1], [0, 0, 1, 1], [], []>} : vector<4x128xbf16>, vector<128x256xbf16>, vector<4x256xf32> -> vector<4x256xf32>
    %10 = arith.addf %6, %9 : vector<4x256xf32>
    %c0_13 = arith.constant 0 : index
    %c0_14 = arith.constant 0 : index
    %11 = vector.load %arg7[%c0_13, %c0_14] : memref<1x256xf32, #tpu.memory_space<vmem>>, vector<1x256xf32>
    %12 = vector.broadcast %11 : vector<1x256xf32> to vector<4x256xf32>
    %13 = arith.addf %10, %12 : vector<4x256xf32>
    %cst_15 = arith.constant 0.000000e+00 : f32
    %14 = vector.broadcast %cst_15 : f32 to vector<4x256xf32>
    %15 = arith.subf %14, %13 : vector<4x256xf32>
    %16 = math.exp %15 : vector<4x256xf32>
    %cst_16 = arith.constant 1.000000e+00 : f32
    %17 = vector.broadcast %cst_16 : f32 to vector<4x256xf32>
    %18 = arith.addf %17, %16 : vector<4x256xf32>
    %19 = tpu.reciprocal %18 {approx = true} : vector<4x256xf32> -> vector<4x256xf32>
    %20 = arith.mulf %13, %19 : vector<4x256xf32>
    %21 = arith.truncf %20 : vector<4x256xf32> to vector<4x256xbf16>
    %c0_17 = arith.constant 0 : index
    %c0_18 = arith.constant 0 : index
    %22 = vector.load %arg8[%c0_17, %c0_18] : memref<4x256xbf16, #tpu.memory_space<vmem>>, vector<4x256xbf16>
    tpu.vector_store %arg8[%c0_17, %c0_18], %21 {strides = array<i32>} : memref<4x256xbf16, #tpu.memory_space<vmem>>, vector<4x256xbf16>,
    return
  }
  func.func @transform_0(%arg0: i32) -> (i32, i32) {
    %c0_i32 = arith.constant 0 : i32
    %c0_i32_0 = arith.constant 0 : i32
    return %arg0, %c0_i32 : i32, i32
  }
  func.func @transform_1(%arg0: i32) -> (i32, i32) {
    %c0_i32 = arith.constant 0 : i32
    %c0_i32_0 = arith.constant 0 : i32
    return %arg0, %c0_i32 : i32, i32
  }
  func.func @transform_2(%arg0: i32) -> (i32, i32) {
    %c0_i32 = arith.constant 0 : i32
    %c0_i32_0 = arith.constant 0 : i32
    return %arg0, %c0_i32 : i32, i32
  }
  func.func @transform_3(%arg0: i32) -> (i32, i32) {
    %c0_i32 = arith.constant 0 : i32
    %c0_i32_0 = arith.constant 0 : i32
    %c0_i32_1 = arith.constant 0 : i32
    return %c0_i32, %c0_i32_0 : i32, i32
  }
  func.func @transform_4(%arg0: i32) -> (i32, i32) {
    %c0_i32 = arith.constant 0 : i32
    %c0_i32_0 = arith.constant 0 : i32
    %c0_i32_1 = arith.constant 0 : i32
    return %c0_i32, %c0_i32_0 : i32, i32
  }
  func.func @transform_5(%arg0: i32) -> (i32, i32) {
    %c0_i32 = arith.constant 0 : i32
    %c0_i32_0 = arith.constant 0 : i32
    %c0_i32_1 = arith.constant 0 : i32
    return %c0_i32, %c0_i32_0 : i32, i32
  }
  func.func @transform_6(%arg0: i32) -> (i32, i32) {
    %c0_i32 = arith.constant 0 : i32
    %c0_i32_0 = arith.constant 0 : i32
    %c0_i32_1 = arith.constant 0 : i32
    return %c0_i32, %c0_i32_0 : i32, i32
  }
  func.func @transform_7(%arg0: i32) -> (i32, i32) {
    %c0_i32 = arith.constant 0 : i32
    %c0_i32_0 = arith.constant 0 : i32
    return %arg0, %c0_i32 : i32, i32
  }
}

module attributes {stable_mosaic.version = 11 : i64} {
  func.func @_sppf_pool_kernel(%arg0: memref<1x2x2x128xbf16, #tpu.memory_space<vmem>>, %arg1: memref<1x2x2x128xbf16, #tpu.memory_space<vmem>>, %arg2: memref<1x2x2x128xbf16, #tpu.memory_space<vmem>>, %arg3: memref<1x2x2x128xbf16, #tpu.memory_space<vmem>>, %arg4: memref<1x6x2x128xf32, #tpu.memory_space<vmem>>, %arg5: memref<1x2x6x128xf32, #tpu.memory_space<vmem>>) attributes {dimension_semantics = [], scalar_prefetch = 0 : i64, scratch_operands = 2 : i64, tpu.core_type = #tpu.core_type<tc>} {
    %c0 = arith.constant 0 : index
    %c0_0 = arith.constant 0 : index
    %c0_1 = arith.constant 0 : index
    %c0_2 = arith.constant 0 : index
    %0 = vector.load %arg0[%c0, %c0_0, %c0_1, %c0_2] : memref<1x2x2x128xbf16, #tpu.memory_space<vmem>>, vector<1x2x2x128xbf16>
    %1 = arith.extf %0 : vector<1x2x2x128xbf16> to vector<1x2x2x128xf32>
    %cst = arith.constant -3.000000e+38 : f32
    %2 = vector.broadcast %cst : f32 to vector<1x6x2x128xf32>
    %c0_3 = arith.constant 0 : index
    %c0_4 = arith.constant 0 : index
    %c0_5 = arith.constant 0 : index
    %c0_6 = arith.constant 0 : index
    %3 = vector.load %arg4[%c0_3, %c0_4, %c0_5, %c0_6] : memref<1x6x2x128xf32, #tpu.memory_space<vmem>>, vector<1x6x2x128xf32>
    tpu.vector_store %arg4[%c0_3, %c0_4, %c0_5, %c0_6], %2 {strides = array<i32>} : memref<1x6x2x128xf32, #tpu.memory_space<vmem>>, vector<1x6x2x128xf32>,
    %c0_7 = arith.constant 0 : index
    %c2 = arith.constant 2 : index
    %c0_8 = arith.constant 0 : index
    %c0_9 = arith.constant 0 : index
    %4 = vector.load %arg4[%c0_7, %c2, %c0_8, %c0_9] : memref<1x6x2x128xf32, #tpu.memory_space<vmem>>, vector<1x2x2x128xf32>
    tpu.vector_store %arg4[%c0_7, %c2, %c0_8, %c0_9], %1 {strides = array<i32>} : memref<1x6x2x128xf32, #tpu.memory_space<vmem>>, vector<1x2x2x128xf32>,
    %c0_10 = arith.constant 0 : index
    %c0_11 = arith.constant 0 : index
    %c0_12 = arith.constant 0 : index
    %c0_13 = arith.constant 0 : index
    %5 = vector.load %arg4[%c0_10, %c0_11, %c0_12, %c0_13] : memref<1x6x2x128xf32, #tpu.memory_space<vmem>>, vector<1x2x2x128xf32>
    %c0_14 = arith.constant 0 : index
    %c1 = arith.constant 1 : index
    %c0_15 = arith.constant 0 : index
    %c0_16 = arith.constant 0 : index
    %6 = vector.load %arg4[%c0_14, %c1, %c0_15, %c0_16] : memref<1x6x2x128xf32, #tpu.memory_space<vmem>>, vector<1x2x2x128xf32>
    %7 = arith.maximumf %5, %6 : vector<1x2x2x128xf32>
    %c0_17 = arith.constant 0 : index
    %c2_18 = arith.constant 2 : index
    %c0_19 = arith.constant 0 : index
    %c0_20 = arith.constant 0 : index
    %8 = vector.load %arg4[%c0_17, %c2_18, %c0_19, %c0_20] : memref<1x6x2x128xf32, #tpu.memory_space<vmem>>, vector<1x2x2x128xf32>
    %9 = arith.maximumf %7, %8 : vector<1x2x2x128xf32>
    %c0_21 = arith.constant 0 : index
    %c3 = arith.constant 3 : index
    %c0_22 = arith.constant 0 : index
    %c0_23 = arith.constant 0 : index
    %10 = vector.load %arg4[%c0_21, %c3, %c0_22, %c0_23] : memref<1x6x2x128xf32, #tpu.memory_space<vmem>>, vector<1x2x2x128xf32>
    %11 = arith.maximumf %9, %10 : vector<1x2x2x128xf32>
    %c0_24 = arith.constant 0 : index
    %c4 = arith.constant 4 : index
    %c0_25 = arith.constant 0 : index
    %c0_26 = arith.constant 0 : index
    %12 = vector.load %arg4[%c0_24, %c4, %c0_25, %c0_26] : memref<1x6x2x128xf32, #tpu.memory_space<vmem>>, vector<1x2x2x128xf32>
    %13 = arith.maximumf %11, %12 : vector<1x2x2x128xf32>
    %cst_27 = arith.constant -3.000000e+38 : f32
    %14 = vector.broadcast %cst_27 : f32 to vector<1x2x6x128xf32>
    %c0_28 = arith.constant 0 : index
    %c0_29 = arith.constant 0 : index
    %c0_30 = arith.constant 0 : index
    %c0_31 = arith.constant 0 : index
    %15 = vector.load %arg5[%c0_28, %c0_29, %c0_30, %c0_31] : memref<1x2x6x128xf32, #tpu.memory_space<vmem>>, vector<1x2x6x128xf32>
    tpu.vector_store %arg5[%c0_28, %c0_29, %c0_30, %c0_31], %14 {strides = array<i32>} : memref<1x2x6x128xf32, #tpu.memory_space<vmem>>, vector<1x2x6x128xf32>,
    %c0_32 = arith.constant 0 : index
    %c0_33 = arith.constant 0 : index
    %c2_34 = arith.constant 2 : index
    %c0_35 = arith.constant 0 : index
    %16 = vector.load %arg5[%c0_32, %c0_33, %c2_34, %c0_35] : memref<1x2x6x128xf32, #tpu.memory_space<vmem>>, vector<1x2x2x128xf32>
    tpu.vector_store %arg5[%c0_32, %c0_33, %c2_34, %c0_35], %13 {strides = array<i32>} : memref<1x2x6x128xf32, #tpu.memory_space<vmem>>, vector<1x2x2x128xf32>,
    %c0_36 = arith.constant 0 : index
    %c0_37 = arith.constant 0 : index
    %c0_38 = arith.constant 0 : index
    %c0_39 = arith.constant 0 : index
    %17 = vector.load %arg5[%c0_36, %c0_37, %c0_38, %c0_39] : memref<1x2x6x128xf32, #tpu.memory_space<vmem>>, vector<1x2x2x128xf32>
    %c0_40 = arith.constant 0 : index
    %c0_41 = arith.constant 0 : index
    %c1_42 = arith.constant 1 : index
    %c0_43 = arith.constant 0 : index
    %18 = vector.load %arg5[%c0_40, %c0_41, %c1_42, %c0_43] : memref<1x2x6x128xf32, #tpu.memory_space<vmem>>, vector<1x2x2x128xf32>
    %19 = arith.maximumf %17, %18 : vector<1x2x2x128xf32>
    %c0_44 = arith.constant 0 : index
    %c0_45 = arith.constant 0 : index
    %c2_46 = arith.constant 2 : index
    %c0_47 = arith.constant 0 : index
    %20 = vector.load %arg5[%c0_44, %c0_45, %c2_46, %c0_47] : memref<1x2x6x128xf32, #tpu.memory_space<vmem>>, vector<1x2x2x128xf32>
    %21 = arith.maximumf %19, %20 : vector<1x2x2x128xf32>
    %c0_48 = arith.constant 0 : index
    %c0_49 = arith.constant 0 : index
    %c3_50 = arith.constant 3 : index
    %c0_51 = arith.constant 0 : index
    %22 = vector.load %arg5[%c0_48, %c0_49, %c3_50, %c0_51] : memref<1x2x6x128xf32, #tpu.memory_space<vmem>>, vector<1x2x2x128xf32>
    %23 = arith.maximumf %21, %22 : vector<1x2x2x128xf32>
    %c0_52 = arith.constant 0 : index
    %c0_53 = arith.constant 0 : index
    %c4_54 = arith.constant 4 : index
    %c0_55 = arith.constant 0 : index
    %24 = vector.load %arg5[%c0_52, %c0_53, %c4_54, %c0_55] : memref<1x2x6x128xf32, #tpu.memory_space<vmem>>, vector<1x2x2x128xf32>
    %25 = arith.maximumf %23, %24 : vector<1x2x2x128xf32>
    %26 = arith.truncf %25 : vector<1x2x2x128xf32> to vector<1x2x2x128xbf16>
    %c0_56 = arith.constant 0 : index
    %c0_57 = arith.constant 0 : index
    %c0_58 = arith.constant 0 : index
    %c0_59 = arith.constant 0 : index
    %27 = vector.load %arg1[%c0_56, %c0_57, %c0_58, %c0_59] : memref<1x2x2x128xbf16, #tpu.memory_space<vmem>>, vector<1x2x2x128xbf16>
    tpu.vector_store %arg1[%c0_56, %c0_57, %c0_58, %c0_59], %26 {strides = array<i32>} : memref<1x2x2x128xbf16, #tpu.memory_space<vmem>>, vector<1x2x2x128xbf16>,
    %cst_60 = arith.constant -3.000000e+38 : f32
    %28 = vector.broadcast %cst_60 : f32 to vector<1x6x2x128xf32>
    %c0_61 = arith.constant 0 : index
    %c0_62 = arith.constant 0 : index
    %c0_63 = arith.constant 0 : index
    %c0_64 = arith.constant 0 : index
    %29 = vector.load %arg4[%c0_61, %c0_62, %c0_63, %c0_64] : memref<1x6x2x128xf32, #tpu.memory_space<vmem>>, vector<1x6x2x128xf32>
    tpu.vector_store %arg4[%c0_61, %c0_62, %c0_63, %c0_64], %28 {strides = array<i32>} : memref<1x6x2x128xf32, #tpu.memory_space<vmem>>, vector<1x6x2x128xf32>,
    %c0_65 = arith.constant 0 : index
    %c2_66 = arith.constant 2 : index
    %c0_67 = arith.constant 0 : index
    %c0_68 = arith.constant 0 : index
    %30 = vector.load %arg4[%c0_65, %c2_66, %c0_67, %c0_68] : memref<1x6x2x128xf32, #tpu.memory_space<vmem>>, vector<1x2x2x128xf32>
    tpu.vector_store %arg4[%c0_65, %c2_66, %c0_67, %c0_68], %25 {strides = array<i32>} : memref<1x6x2x128xf32, #tpu.memory_space<vmem>>, vector<1x2x2x128xf32>,
    %c0_69 = arith.constant 0 : index
    %c0_70 = arith.constant 0 : index
    %c0_71 = arith.constant 0 : index
    %c0_72 = arith.constant 0 : index
    %31 = vector.load %arg4[%c0_69, %c0_70, %c0_71, %c0_72] : memref<1x6x2x128xf32, #tpu.memory_space<vmem>>, vector<1x2x2x128xf32>
    %c0_73 = arith.constant 0 : index
    %c1_74 = arith.constant 1 : index
    %c0_75 = arith.constant 0 : index
    %c0_76 = arith.constant 0 : index
    %32 = vector.load %arg4[%c0_73, %c1_74, %c0_75, %c0_76] : memref<1x6x2x128xf32, #tpu.memory_space<vmem>>, vector<1x2x2x128xf32>
    %33 = arith.maximumf %31, %32 : vector<1x2x2x128xf32>
    %c0_77 = arith.constant 0 : index
    %c2_78 = arith.constant 2 : index
    %c0_79 = arith.constant 0 : index
    %c0_80 = arith.constant 0 : index
    %34 = vector.load %arg4[%c0_77, %c2_78, %c0_79, %c0_80] : memref<1x6x2x128xf32, #tpu.memory_space<vmem>>, vector<1x2x2x128xf32>
    %35 = arith.maximumf %33, %34 : vector<1x2x2x128xf32>
    %c0_81 = arith.constant 0 : index
    %c3_82 = arith.constant 3 : index
    %c0_83 = arith.constant 0 : index
    %c0_84 = arith.constant 0 : index
    %36 = vector.load %arg4[%c0_81, %c3_82, %c0_83, %c0_84] : memref<1x6x2x128xf32, #tpu.memory_space<vmem>>, vector<1x2x2x128xf32>
    %37 = arith.maximumf %35, %36 : vector<1x2x2x128xf32>
    %c0_85 = arith.constant 0 : index
    %c4_86 = arith.constant 4 : index
    %c0_87 = arith.constant 0 : index
    %c0_88 = arith.constant 0 : index
    %38 = vector.load %arg4[%c0_85, %c4_86, %c0_87, %c0_88] : memref<1x6x2x128xf32, #tpu.memory_space<vmem>>, vector<1x2x2x128xf32>
    %39 = arith.maximumf %37, %38 : vector<1x2x2x128xf32>
    %cst_89 = arith.constant -3.000000e+38 : f32
    %40 = vector.broadcast %cst_89 : f32 to vector<1x2x6x128xf32>
    %c0_90 = arith.constant 0 : index
    %c0_91 = arith.constant 0 : index
    %c0_92 = arith.constant 0 : index
    %c0_93 = arith.constant 0 : index
    %41 = vector.load %arg5[%c0_90, %c0_91, %c0_92, %c0_93] : memref<1x2x6x128xf32, #tpu.memory_space<vmem>>, vector<1x2x6x128xf32>
    tpu.vector_store %arg5[%c0_90, %c0_91, %c0_92, %c0_93], %40 {strides = array<i32>} : memref<1x2x6x128xf32, #tpu.memory_space<vmem>>, vector<1x2x6x128xf32>,
    %c0_94 = arith.constant 0 : index
    %c0_95 = arith.constant 0 : index
    %c2_96 = arith.constant 2 : index
    %c0_97 = arith.constant 0 : index
    %42 = vector.load %arg5[%c0_94, %c0_95, %c2_96, %c0_97] : memref<1x2x6x128xf32, #tpu.memory_space<vmem>>, vector<1x2x2x128xf32>
    tpu.vector_store %arg5[%c0_94, %c0_95, %c2_96, %c0_97], %39 {strides = array<i32>} : memref<1x2x6x128xf32, #tpu.memory_space<vmem>>, vector<1x2x2x128xf32>,
    %c0_98 = arith.constant 0 : index
    %c0_99 = arith.constant 0 : index
    %c0_100 = arith.constant 0 : index
    %c0_101 = arith.constant 0 : index
    %43 = vector.load %arg5[%c0_98, %c0_99, %c0_100, %c0_101] : memref<1x2x6x128xf32, #tpu.memory_space<vmem>>, vector<1x2x2x128xf32>
    %c0_102 = arith.constant 0 : index
    %c0_103 = arith.constant 0 : index
    %c1_104 = arith.constant 1 : index
    %c0_105 = arith.constant 0 : index
    %44 = vector.load %arg5[%c0_102, %c0_103, %c1_104, %c0_105] : memref<1x2x6x128xf32, #tpu.memory_space<vmem>>, vector<1x2x2x128xf32>
    %45 = arith.maximumf %43, %44 : vector<1x2x2x128xf32>
    %c0_106 = arith.constant 0 : index
    %c0_107 = arith.constant 0 : index
    %c2_108 = arith.constant 2 : index
    %c0_109 = arith.constant 0 : index
    %46 = vector.load %arg5[%c0_106, %c0_107, %c2_108, %c0_109] : memref<1x2x6x128xf32, #tpu.memory_space<vmem>>, vector<1x2x2x128xf32>
    %47 = arith.maximumf %45, %46 : vector<1x2x2x128xf32>
    %c0_110 = arith.constant 0 : index
    %c0_111 = arith.constant 0 : index
    %c3_112 = arith.constant 3 : index
    %c0_113 = arith.constant 0 : index
    %48 = vector.load %arg5[%c0_110, %c0_111, %c3_112, %c0_113] : memref<1x2x6x128xf32, #tpu.memory_space<vmem>>, vector<1x2x2x128xf32>
    %49 = arith.maximumf %47, %48 : vector<1x2x2x128xf32>
    %c0_114 = arith.constant 0 : index
    %c0_115 = arith.constant 0 : index
    %c4_116 = arith.constant 4 : index
    %c0_117 = arith.constant 0 : index
    %50 = vector.load %arg5[%c0_114, %c0_115, %c4_116, %c0_117] : memref<1x2x6x128xf32, #tpu.memory_space<vmem>>, vector<1x2x2x128xf32>
    %51 = arith.maximumf %49, %50 : vector<1x2x2x128xf32>
    %52 = arith.truncf %51 : vector<1x2x2x128xf32> to vector<1x2x2x128xbf16>
    %c0_118 = arith.constant 0 : index
    %c0_119 = arith.constant 0 : index
    %c0_120 = arith.constant 0 : index
    %c0_121 = arith.constant 0 : index
    %53 = vector.load %arg2[%c0_118, %c0_119, %c0_120, %c0_121] : memref<1x2x2x128xbf16, #tpu.memory_space<vmem>>, vector<1x2x2x128xbf16>
    tpu.vector_store %arg2[%c0_118, %c0_119, %c0_120, %c0_121], %52 {strides = array<i32>} : memref<1x2x2x128xbf16, #tpu.memory_space<vmem>>, vector<1x2x2x128xbf16>,
    %cst_122 = arith.constant -3.000000e+38 : f32
    %54 = vector.broadcast %cst_122 : f32 to vector<1x6x2x128xf32>
    %c0_123 = arith.constant 0 : index
    %c0_124 = arith.constant 0 : index
    %c0_125 = arith.constant 0 : index
    %c0_126 = arith.constant 0 : index
    %55 = vector.load %arg4[%c0_123, %c0_124, %c0_125, %c0_126] : memref<1x6x2x128xf32, #tpu.memory_space<vmem>>, vector<1x6x2x128xf32>
    tpu.vector_store %arg4[%c0_123, %c0_124, %c0_125, %c0_126], %54 {strides = array<i32>} : memref<1x6x2x128xf32, #tpu.memory_space<vmem>>, vector<1x6x2x128xf32>,
    %c0_127 = arith.constant 0 : index
    %c2_128 = arith.constant 2 : index
    %c0_129 = arith.constant 0 : index
    %c0_130 = arith.constant 0 : index
    %56 = vector.load %arg4[%c0_127, %c2_128, %c0_129, %c0_130] : memref<1x6x2x128xf32, #tpu.memory_space<vmem>>, vector<1x2x2x128xf32>
    tpu.vector_store %arg4[%c0_127, %c2_128, %c0_129, %c0_130], %51 {strides = array<i32>} : memref<1x6x2x128xf32, #tpu.memory_space<vmem>>, vector<1x2x2x128xf32>,
    %c0_131 = arith.constant 0 : index
    %c0_132 = arith.constant 0 : index
    %c0_133 = arith.constant 0 : index
    %c0_134 = arith.constant 0 : index
    %57 = vector.load %arg4[%c0_131, %c0_132, %c0_133, %c0_134] : memref<1x6x2x128xf32, #tpu.memory_space<vmem>>, vector<1x2x2x128xf32>
    %c0_135 = arith.constant 0 : index
    %c1_136 = arith.constant 1 : index
    %c0_137 = arith.constant 0 : index
    %c0_138 = arith.constant 0 : index
    %58 = vector.load %arg4[%c0_135, %c1_136, %c0_137, %c0_138] : memref<1x6x2x128xf32, #tpu.memory_space<vmem>>, vector<1x2x2x128xf32>
    %59 = arith.maximumf %57, %58 : vector<1x2x2x128xf32>
    %c0_139 = arith.constant 0 : index
    %c2_140 = arith.constant 2 : index
    %c0_141 = arith.constant 0 : index
    %c0_142 = arith.constant 0 : index
    %60 = vector.load %arg4[%c0_139, %c2_140, %c0_141, %c0_142] : memref<1x6x2x128xf32, #tpu.memory_space<vmem>>, vector<1x2x2x128xf32>
    %61 = arith.maximumf %59, %60 : vector<1x2x2x128xf32>
    %c0_143 = arith.constant 0 : index
    %c3_144 = arith.constant 3 : index
    %c0_145 = arith.constant 0 : index
    %c0_146 = arith.constant 0 : index
    %62 = vector.load %arg4[%c0_143, %c3_144, %c0_145, %c0_146] : memref<1x6x2x128xf32, #tpu.memory_space<vmem>>, vector<1x2x2x128xf32>
    %63 = arith.maximumf %61, %62 : vector<1x2x2x128xf32>
    %c0_147 = arith.constant 0 : index
    %c4_148 = arith.constant 4 : index
    %c0_149 = arith.constant 0 : index
    %c0_150 = arith.constant 0 : index
    %64 = vector.load %arg4[%c0_147, %c4_148, %c0_149, %c0_150] : memref<1x6x2x128xf32, #tpu.memory_space<vmem>>, vector<1x2x2x128xf32>
    %65 = arith.maximumf %63, %64 : vector<1x2x2x128xf32>
    %cst_151 = arith.constant -3.000000e+38 : f32
    %66 = vector.broadcast %cst_151 : f32 to vector<1x2x6x128xf32>
    %c0_152 = arith.constant 0 : index
    %c0_153 = arith.constant 0 : index
    %c0_154 = arith.constant 0 : index
    %c0_155 = arith.constant 0 : index
    %67 = vector.load %arg5[%c0_152, %c0_153, %c0_154, %c0_155] : memref<1x2x6x128xf32, #tpu.memory_space<vmem>>, vector<1x2x6x128xf32>
    tpu.vector_store %arg5[%c0_152, %c0_153, %c0_154, %c0_155], %66 {strides = array<i32>} : memref<1x2x6x128xf32, #tpu.memory_space<vmem>>, vector<1x2x6x128xf32>,
    %c0_156 = arith.constant 0 : index
    %c0_157 = arith.constant 0 : index
    %c2_158 = arith.constant 2 : index
    %c0_159 = arith.constant 0 : index
    %68 = vector.load %arg5[%c0_156, %c0_157, %c2_158, %c0_159] : memref<1x2x6x128xf32, #tpu.memory_space<vmem>>, vector<1x2x2x128xf32>
    tpu.vector_store %arg5[%c0_156, %c0_157, %c2_158, %c0_159], %65 {strides = array<i32>} : memref<1x2x6x128xf32, #tpu.memory_space<vmem>>, vector<1x2x2x128xf32>,
    %c0_160 = arith.constant 0 : index
    %c0_161 = arith.constant 0 : index
    %c0_162 = arith.constant 0 : index
    %c0_163 = arith.constant 0 : index
    %69 = vector.load %arg5[%c0_160, %c0_161, %c0_162, %c0_163] : memref<1x2x6x128xf32, #tpu.memory_space<vmem>>, vector<1x2x2x128xf32>
    %c0_164 = arith.constant 0 : index
    %c0_165 = arith.constant 0 : index
    %c1_166 = arith.constant 1 : index
    %c0_167 = arith.constant 0 : index
    %70 = vector.load %arg5[%c0_164, %c0_165, %c1_166, %c0_167] : memref<1x2x6x128xf32, #tpu.memory_space<vmem>>, vector<1x2x2x128xf32>
    %71 = arith.maximumf %69, %70 : vector<1x2x2x128xf32>
    %c0_168 = arith.constant 0 : index
    %c0_169 = arith.constant 0 : index
    %c2_170 = arith.constant 2 : index
    %c0_171 = arith.constant 0 : index
    %72 = vector.load %arg5[%c0_168, %c0_169, %c2_170, %c0_171] : memref<1x2x6x128xf32, #tpu.memory_space<vmem>>, vector<1x2x2x128xf32>
    %73 = arith.maximumf %71, %72 : vector<1x2x2x128xf32>
    %c0_172 = arith.constant 0 : index
    %c0_173 = arith.constant 0 : index
    %c3_174 = arith.constant 3 : index
    %c0_175 = arith.constant 0 : index
    %74 = vector.load %arg5[%c0_172, %c0_173, %c3_174, %c0_175] : memref<1x2x6x128xf32, #tpu.memory_space<vmem>>, vector<1x2x2x128xf32>
    %75 = arith.maximumf %73, %74 : vector<1x2x2x128xf32>
    %c0_176 = arith.constant 0 : index
    %c0_177 = arith.constant 0 : index
    %c4_178 = arith.constant 4 : index
    %c0_179 = arith.constant 0 : index
    %76 = vector.load %arg5[%c0_176, %c0_177, %c4_178, %c0_179] : memref<1x2x6x128xf32, #tpu.memory_space<vmem>>, vector<1x2x2x128xf32>
    %77 = arith.maximumf %75, %76 : vector<1x2x2x128xf32>
    %78 = arith.truncf %77 : vector<1x2x2x128xf32> to vector<1x2x2x128xbf16>
    %c0_180 = arith.constant 0 : index
    %c0_181 = arith.constant 0 : index
    %c0_182 = arith.constant 0 : index
    %c0_183 = arith.constant 0 : index
    %79 = vector.load %arg3[%c0_180, %c0_181, %c0_182, %c0_183] : memref<1x2x2x128xbf16, #tpu.memory_space<vmem>>, vector<1x2x2x128xbf16>
    tpu.vector_store %arg3[%c0_180, %c0_181, %c0_182, %c0_183], %78 {strides = array<i32>} : memref<1x2x2x128xbf16, #tpu.memory_space<vmem>>, vector<1x2x2x128xbf16>,
    return
  }
}

module attributes {stable_mosaic.version = 11 : i64} {
  func.func @kernel(%arg0: i32, %arg1: memref<4x128xbf16, #tpu.memory_space<vmem>>, %arg2: memref<4x128xbf16, #tpu.memory_space<vmem>>, %arg3: memref<4x128xbf16, #tpu.memory_space<vmem>>, %arg4: memref<4x128xbf16, #tpu.memory_space<vmem>>, %arg5: memref<128x256xbf16, #tpu.memory_space<vmem>>, %arg6: memref<128x256xbf16, #tpu.memory_space<vmem>>, %arg7: memref<128x256xbf16, #tpu.memory_space<vmem>>, %arg8: memref<128x256xbf16, #tpu.memory_space<vmem>>, %arg9: memref<1x256xf32, #tpu.memory_space<vmem>>, %arg10: memref<4x256xbf16, #tpu.memory_space<vmem>>) attributes {dimension_semantics = [#tpu.dimension_semantics<parallel>], iteration_bounds = array<i64: 1>, scalar_prefetch = 0 : i64, scratch_operands = 0 : i64, tpu.core_type = #tpu.core_type<tc>, window_params = [{transform_indices = @transform_0, window_bounds = array<i64: 4, 128>}, {transform_indices = @transform_1, window_bounds = array<i64: 4, 128>}, {transform_indices = @transform_2, window_bounds = array<i64: 4, 128>}, {transform_indices = @transform_3, window_bounds = array<i64: 4, 128>}, {pipeline_mode = #tpu.pipeline_mode<synchronous>, transform_indices = @transform_4, window_bounds = array<i64: 128, 256>}, {pipeline_mode = #tpu.pipeline_mode<synchronous>, transform_indices = @transform_5, window_bounds = array<i64: 128, 256>}, {pipeline_mode = #tpu.pipeline_mode<synchronous>, transform_indices = @transform_6, window_bounds = array<i64: 128, 256>}, {pipeline_mode = #tpu.pipeline_mode<synchronous>, transform_indices = @transform_7, window_bounds = array<i64: 128, 256>}, {pipeline_mode = #tpu.pipeline_mode<synchronous>, transform_indices = @transform_8, window_bounds = array<i64: 1, 256>}, {transform_indices = @transform_9, window_bounds = array<i64: 4, 256>}]} {
    %c0 = arith.constant 0 : index
    %c0_0 = arith.constant 0 : index
    %0 = vector.load %arg1[%c0, %c0_0] : memref<4x128xbf16, #tpu.memory_space<vmem>>, vector<4x128xbf16>
    %c0_1 = arith.constant 0 : index
    %c0_2 = arith.constant 0 : index
    %1 = vector.load %arg5[%c0_1, %c0_2] : memref<128x256xbf16, #tpu.memory_space<vmem>>, vector<128x256xbf16>
    %cst = arith.constant dense<0.000000e+00> : vector<4x256xf32>
    %2 = tpu.matmul %0, %1, %cst {dimension_numbers = #tpu.dot_dimension_numbers<[1], [0], [0], [1], [0, 0, 1, 1], [], []>} : vector<4x128xbf16>, vector<128x256xbf16>, vector<4x256xf32> -> vector<4x256xf32>
    %c0_3 = arith.constant 0 : index
    %c0_4 = arith.constant 0 : index
    %3 = vector.load %arg2[%c0_3, %c0_4] : memref<4x128xbf16, #tpu.memory_space<vmem>>, vector<4x128xbf16>
    %c0_5 = arith.constant 0 : index
    %c0_6 = arith.constant 0 : index
    %4 = vector.load %arg6[%c0_5, %c0_6] : memref<128x256xbf16, #tpu.memory_space<vmem>>, vector<128x256xbf16>
    %cst_7 = arith.constant dense<0.000000e+00> : vector<4x256xf32>
    %5 = tpu.matmul %3, %4, %cst_7 {dimension_numbers = #tpu.dot_dimension_numbers<[1], [0], [0], [1], [0, 0, 1, 1], [], []>} : vector<4x128xbf16>, vector<128x256xbf16>, vector<4x256xf32> -> vector<4x256xf32>
    %6 = arith.addf %2, %5 : vector<4x256xf32>
    %c0_8 = arith.constant 0 : index
    %c0_9 = arith.constant 0 : index
    %7 = vector.load %arg3[%c0_8, %c0_9] : memref<4x128xbf16, #tpu.memory_space<vmem>>, vector<4x128xbf16>
    %c0_10 = arith.constant 0 : index
    %c0_11 = arith.constant 0 : index
    %8 = vector.load %arg7[%c0_10, %c0_11] : memref<128x256xbf16, #tpu.memory_space<vmem>>, vector<128x256xbf16>
    %cst_12 = arith.constant dense<0.000000e+00> : vector<4x256xf32>
    %9 = tpu.matmul %7, %8, %cst_12 {dimension_numbers = #tpu.dot_dimension_numbers<[1], [0], [0], [1], [0, 0, 1, 1], [], []>} : vector<4x128xbf16>, vector<128x256xbf16>, vector<4x256xf32> -> vector<4x256xf32>
    %10 = arith.addf %6, %9 : vector<4x256xf32>
    %c0_13 = arith.constant 0 : index
    %c0_14 = arith.constant 0 : index
    %11 = vector.load %arg4[%c0_13, %c0_14] : memref<4x128xbf16, #tpu.memory_space<vmem>>, vector<4x128xbf16>
    %c0_15 = arith.constant 0 : index
    %c0_16 = arith.constant 0 : index
    %12 = vector.load %arg8[%c0_15, %c0_16] : memref<128x256xbf16, #tpu.memory_space<vmem>>, vector<128x256xbf16>
    %cst_17 = arith.constant dense<0.000000e+00> : vector<4x256xf32>
    %13 = tpu.matmul %11, %12, %cst_17 {dimension_numbers = #tpu.dot_dimension_numbers<[1], [0], [0], [1], [0, 0, 1, 1], [], []>} : vector<4x128xbf16>, vector<128x256xbf16>, vector<4x256xf32> -> vector<4x256xf32>
    %14 = arith.addf %10, %13 : vector<4x256xf32>
    %c0_18 = arith.constant 0 : index
    %c0_19 = arith.constant 0 : index
    %15 = vector.load %arg9[%c0_18, %c0_19] : memref<1x256xf32, #tpu.memory_space<vmem>>, vector<1x256xf32>
    %16 = vector.broadcast %15 : vector<1x256xf32> to vector<4x256xf32>
    %17 = arith.addf %14, %16 : vector<4x256xf32>
    %cst_20 = arith.constant 0.000000e+00 : f32
    %18 = vector.broadcast %cst_20 : f32 to vector<4x256xf32>
    %19 = arith.subf %18, %17 : vector<4x256xf32>
    %20 = math.exp %19 : vector<4x256xf32>
    %cst_21 = arith.constant 1.000000e+00 : f32
    %21 = vector.broadcast %cst_21 : f32 to vector<4x256xf32>
    %22 = arith.addf %21, %20 : vector<4x256xf32>
    %23 = tpu.reciprocal %22 {approx = true} : vector<4x256xf32> -> vector<4x256xf32>
    %24 = arith.mulf %17, %23 : vector<4x256xf32>
    %25 = arith.truncf %24 : vector<4x256xf32> to vector<4x256xbf16>
    %c0_22 = arith.constant 0 : index
    %c0_23 = arith.constant 0 : index
    %26 = vector.load %arg10[%c0_22, %c0_23] : memref<4x256xbf16, #tpu.memory_space<vmem>>, vector<4x256xbf16>
    tpu.vector_store %arg10[%c0_22, %c0_23], %25 {strides = array<i32>} : memref<4x256xbf16, #tpu.memory_space<vmem>>, vector<4x256xbf16>,
    return
  }
  func.func @transform_0(%arg0: i32) -> (i32, i32) {
    %c0_i32 = arith.constant 0 : i32
    %c0_i32_0 = arith.constant 0 : i32
    return %arg0, %c0_i32 : i32, i32
  }
  func.func @transform_1(%arg0: i32) -> (i32, i32) {
    %c0_i32 = arith.constant 0 : i32
    %c0_i32_0 = arith.constant 0 : i32
    return %arg0, %c0_i32 : i32, i32
  }
  func.func @transform_2(%arg0: i32) -> (i32, i32) {
    %c0_i32 = arith.constant 0 : i32
    %c0_i32_0 = arith.constant 0 : i32
    return %arg0, %c0_i32 : i32, i32
  }
  func.func @transform_3(%arg0: i32) -> (i32, i32) {
    %c0_i32 = arith.constant 0 : i32
    %c0_i32_0 = arith.constant 0 : i32
    return %arg0, %c0_i32 : i32, i32
  }
  func.func @transform_4(%arg0: i32) -> (i32, i32) {
    %c0_i32 = arith.constant 0 : i32
    %c0_i32_0 = arith.constant 0 : i32
    %c0_i32_1 = arith.constant 0 : i32
    return %c0_i32, %c0_i32_0 : i32, i32
  }
  func.func @transform_5(%arg0: i32) -> (i32, i32) {
    %c0_i32 = arith.constant 0 : i32
    %c0_i32_0 = arith.constant 0 : i32
    %c0_i32_1 = arith.constant 0 : i32
    return %c0_i32, %c0_i32_0 : i32, i32
  }
  func.func @transform_6(%arg0: i32) -> (i32, i32) {
    %c0_i32 = arith.constant 0 : i32
    %c0_i32_0 = arith.constant 0 : i32
    %c0_i32_1 = arith.constant 0 : i32
    return %c0_i32, %c0_i32_0 : i32, i32
  }
  func.func @transform_7(%arg0: i32) -> (i32, i32) {
    %c0_i32 = arith.constant 0 : i32
    %c0_i32_0 = arith.constant 0 : i32
    %c0_i32_1 = arith.constant 0 : i32
    return %c0_i32, %c0_i32_0 : i32, i32
  }
  func.func @transform_8(%arg0: i32) -> (i32, i32) {
    %c0_i32 = arith.constant 0 : i32
    %c0_i32_0 = arith.constant 0 : i32
    %c0_i32_1 = arith.constant 0 : i32
    return %c0_i32, %c0_i32_0 : i32, i32
  }
  func.func @transform_9(%arg0: i32) -> (i32, i32) {
    %c0_i32 = arith.constant 0 : i32
    %c0_i32_0 = arith.constant 0 : i32
    return %arg0, %c0_i32 : i32, i32
  }
}

</mosaic_0001>

<bundles_post_ra>
// kernel: _lambda_.16
= control target key start
LH: loop header
LB: loop body
LE: loop exit
PB: predicated region body
PF: predicated region fallthrough
CT: control target
= control target key end

     0   :  { %s2406_s12 = smov 0   ;;  %s2995_s0 = inlined_call_operand.vmem [shape: bf16[1024,27], index: 0, kind: input, shape index: {}]   ;;  %s2996_s1 = inlined_call_operand.vmem [shape: bf16[27,128], index: 1, kind: input, shape index: {}]   ;;  %s2997_s2 = inlined_call_operand.vmem [shape: f32[1,128], index: 2, kind: input, shape index: {}]   ;;  %s2998_s3 = inlined_call_operand.vmem [shape: bf16[1024,128], index: 3, kind: output, shape index: {}]  }
   0x1 LB: > { %s1574_s13 = sadd.s32 4294967295, %s2383_s12   ;;  %p1578_p0 = scmp.ge.s32.totalorder %s2383_s12, 1  ;;  %s2383_s12 = sphi %s2406_s12, %s13_s12  }
   0x2   : > { %p138_p1 = scmp.lt.s32.totalorder %s2383_s12, 3 }
   0x4   : > { %p139_p2 = pnand %p1578_p0, %p138_p1 }
   0x6   : > { %142 = sbr.rel (%p139_p2) target bundleno = 386 (0x182), region = 32 }
   0xd   : > { %v2086_v0 = vld [vmem:[%s2996_s1] sm:$0xff]   ;;  %vm518_vm0 = vcmask 1044480   ;;  %v2087_v1 = vld [vmem:[%s2996_s1 + $0x8] sm:$0x3f]   ;;  %vm519_vm1 = vcmask 1045504   ;;  %s1579_s18 = sshll.u32 %s1574_s13, 6 }
   0xe   : > { %2005 = vmatprep.subr.bf16.mxu0 %v2086_v0  ;;  %2073 = vmatprep.subr.bf16.mxu1 %v2086_v0  ;;  %v2385_v2 = vmov 65535   ;;  %p163_p3 = scmp.lt.s32.totalorder %s1579_s18, 127  ;;  %vm421_vm2 = vcmask 220160   ;;  %v2497_v38 = vld [vmem:[%s2997_s2] ss:$0 sm:$0xff] }
   0xf   : > { %2006 = vmatpush3.bf16.msra.mxu0 %v2086_v0  ;;  %2075 = vmatpush3.bf16.msra.mxu1 %v2086_v0  ;;  %v520_v3 = vsel %vm518_vm0, 4294967295, %v2385_v2 }
  0x10   : > { %v521_v4 = vsel %vm519_vm1, %v520_v3, 0  ;;  %s3026_s18 = smov (!%p163_p3, %s1579_s18), 127 }
  0x11   : > { %v523_v5 = vand.u32 %v2087_v1, %v521_v4  ;;  %s1580_s19 = sshll.u32 %s3026_s18, 2 }
  0x12   : > { %s2428_s22 = scalar_lea.vmem %s2995_s0, %s1580_s19  ;;  %s2636_s27 = scalar_lea.vmem %s2998_s3, %s1580_s19 }
  0x13   : > { %2007 = vmatprep.subr.bf16.mxu0 %v523_v5  ;;  %2074 = vmatprep.subr.bf16.mxu1 %v523_v5  ;;  %v2088_v6 = vld [vmem:[%s2428_s22] sm:$0xff]   ;;  %v2090_v8 = vld [vmem:[%s2428_s22 + $0x8] sm:$0xff]   ;;  %v2092_v10 = vld [vmem:[%s2428_s22 + $0x10] sm:$0xff]  }
  0x14   : > { %2008 = vmatpush3.bf16.msra.mxu0 %v523_v5  ;;  %2076 = vmatpush3.bf16.msra.mxu1 %v523_v5  ;;  %v2089_v7 = vld [vmem:[%s2428_s22 + $0x80] sm:$0xff]   ;;  %v2091_v9 = vld [vmem:[%s2428_s22 + $0x88] sm:$0xff]   ;;  %v2093_v11 = vld [vmem:[%s2428_s22 + $0x90] sm:$0xff]  }
  0x15   : > { %2009 = vmatprep.mubr.msk.bf16.mxu0 %vm421_vm2, %v2088_v6  ;;  %2041 = vmatprep.mubr.msk.bf16.mxu1 %vm421_vm2, %v2089_v7  ;;  %v2094_v12 = vld [vmem:[%s2428_s22 + $0x18] sm:$0xff]   ;;  %v2096_v14 = vld [vmem:[%s2428_s22 + $0x20] sm:$0xff]   ;;  %v2098_v16 = vld [vmem:[%s2428_s22 + $0x28] sm:$0xff]  }
  0x16   : > { %v2095_v13 = vld [vmem:[%s2428_s22 + $0x98] sm:$0xff]   ;;  %v2097_v15 = vld [vmem:[%s2428_s22 + $0xa0] sm:$0xff]   ;;  %v2099_v17 = vld [vmem:[%s2428_s22 + $0xa8] sm:$0xff]  }
  0x17   : > { %2010 = vmatmul.mubr.msk.bf16.vlgmr.msra.gmra.mrb[0].mxu0 %vm421_vm2, %v2090_v8  ;;  %2042 = vmatmul.mubr.msk.bf16.vlgmr.msra.gmra.mrb[0].mxu1 %vm421_vm2, %v2091_v9  ;;  %v2100_v18 = vld [vmem:[%s2428_s22 + $0x30] sm:$0xff]   ;;  %v2102_v20 = vld [vmem:[%s2428_s22 + $0x38] sm:$0xff]   ;;  %v2104_v22 = vld [vmem:[%s2428_s22 + $0x40] sm:$0xff]  }
  0x18   : > { %2013 = vmatprep.mubr.msk.bf16.mxu0 %vm421_vm2, %v2092_v10  ;;  %2045 = vmatprep.mubr.msk.bf16.mxu1 %vm421_vm2, %v2093_v11  ;;  %v2101_v19 = vld [vmem:[%s2428_s22 + $0xb0] sm:$0xff]   ;;  %v2103_v21 = vld [vmem:[%s2428_s22 + $0xb8] sm:$0xff]   ;;  %v2105_v23 = vld [vmem:[%s2428_s22 + $0xc0] sm:$0xff]  }
  0x19   : > { %v2106_v24 = vld [vmem:[%s2428_s22 + $0x48] sm:$0xff]   ;;  %v2108_v26 = vld [vmem:[%s2428_s22 + $0x50] sm:$0xff]   ;;  %v2110_v28 = vld [vmem:[%s2428_s22 + $0x58] sm:$0xff]  }
  0x1a   : > { %v2107_v25 = vld [vmem:[%s2428_s22 + $0xc8] sm:$0xff]   ;;  %v2109_v27 = vld [vmem:[%s2428_s22 + $0xd0] sm:$0xff]   ;;  %v2111_v29 = vld [vmem:[%s2428_s22 + $0xd8] sm:$0xff]  }
  0x1b   : > { %v2112_v30 = vld [vmem:[%s2428_s22 + $0x60] sm:$0xff]   ;;  %v2114_v32 = vld [vmem:[%s2428_s22 + $0x68] sm:$0xff]   ;;  %v2116_v34 = vld [vmem:[%s2428_s22 + $0x70] sm:$0xff]  }
  0x1c   : > { %v2113_v31 = vld [vmem:[%s2428_s22 + $0xe0] sm:$0xff]   ;;  %v2115_v33 = vld [vmem:[%s2428_s22 + $0xe8] sm:$0xff]   ;;  %v2117_v35 = vld [vmem:[%s2428_s22 + $0xf0] sm:$0xff]  }
  0x1d   : > { %v2118_v36 = vld [vmem:[%s2428_s22 + $0x78] sm:$0xff]  }
  0x1e   : > { %v2119_v37 = vld [vmem:[%s2428_s22 + $0xf8] sm:$0xff]  }
  0x1f   : > { %2014 = vmatmul.mubr.msk.bf16.gmra.mrb[4].mxu0 %vm421_vm2, %v2094_v12  ;;  %2046 = vmatmul.mubr.msk.bf16.gmra.mrb[4].mxu1 %vm421_vm2, %v2095_v13 }
  0x20   : > { %2017 = vmatprep.mubr.msk.bf16.mxu0 %vm421_vm2, %v2096_v14  ;;  %2049 = vmatprep.mubr.msk.bf16.mxu1 %vm421_vm2, %v2097_v15 }
  0x27   : > { %2018 = vmatmul.mubr.msk.bf16.gmra.mrb[8].mxu0 %vm421_vm2, %v2098_v16  ;;  %2050 = vmatmul.mubr.msk.bf16.gmra.mrb[8].mxu1 %vm421_vm2, %v2099_v17 }
  0x28   : > { %2021 = vmatprep.mubr.msk.bf16.mxu0 %vm421_vm2, %v2100_v18  ;;  %2053 = vmatprep.mubr.msk.bf16.mxu1 %vm421_vm2, %v2101_v19 }
  0x2f   : > { %2022 = vmatmul.mubr.msk.bf16.gmra.mrb[12].mxu0 %vm421_vm2, %v2102_v20  ;;  %2054 = vmatmul.mubr.msk.bf16.gmra.mrb[12].mxu1 %vm421_vm2, %v2103_v21 }
  0x30   : > { %2025 = vmatprep.mubr.msk.bf16.mxu0 %vm421_vm2, %v2104_v22  ;;  %2057 = vmatprep.mubr.msk.bf16.mxu1 %vm421_vm2, %v2105_v23 }
  0x37   : > { %2026 = vmatmul.mubr.msk.bf16.gmra.mrb[16].mxu0 %vm421_vm2, %v2106_v24  ;;  %2058 = vmatmul.mubr.msk.bf16.gmra.mrb[16].mxu1 %vm421_vm2, %v2107_v25 }
  0x38   : > { %2029 = vmatprep.mubr.msk.bf16.mxu0 %vm421_vm2, %v2108_v26  ;;  %2061 = vmatprep.mubr.msk.bf16.mxu1 %vm421_vm2, %v2109_v27 }
  0x3f   : > { %2030 = vmatmul.mubr.msk.bf16.gmra.mrb[20].mxu0 %vm421_vm2, %v2110_v28  ;;  %2062 = vmatmul.mubr.msk.bf16.gmra.mrb[20].mxu1 %vm421_vm2, %v2111_v29 }
  0x40   : > { %2033 = vmatprep.mubr.msk.bf16.mxu0 %vm421_vm2, %v2112_v30  ;;  %2065 = vmatprep.mubr.msk.bf16.mxu1 %vm421_vm2, %v2113_v31 }
  0x47   : > { %2034 = vmatmul.mubr.msk.bf16.gmra.mrb[24].mxu0 %vm421_vm2, %v2114_v32  ;;  %2066 = vmatmul.mubr.msk.bf16.gmra.mrb[24].mxu1 %vm421_vm2, %v2115_v33 }
  0x48   : > { %2037 = vmatprep.mubr.msk.bf16.mxu0 %vm421_vm2, %v2116_v34  ;;  %2069 = vmatprep.mubr.msk.bf16.mxu1 %vm421_vm2, %v2117_v35 }
  0x4f   : > { %2038 = vmatmul.mubr.msk.bf16.gmra.mrb[28].mxu0 %vm421_vm2, %v2118_v36  ;;  %2070 = vmatmul.mubr.msk.bf16.gmra.mrb[28].mxu1 %vm421_vm2, %v2119_v37 }
  0xea   : > { %v2011_v39 = vpop.f32.mrb[0].mxu0  ;;  %v2043_v41 = vpop.f32.mrb[0].mxu1 }
  0xeb   : > { %v2500_v40 = vadd.f32 %v2011_v39, %v2497_v38  ;;  %v559_v42 = vpop.f32.mrb[1].mxu0  ;;  %v2503_v43 = vadd.f32 %v2043_v41, %v2497_v38  ;;  %v687_v45 = vpop.f32.mrb[1].mxu1 }
  0xec   : > { %v2506_v44 = vadd.f32 %v2497_v38, %v559_v42  ;;  %v2012_v46 = vpop.f32.mrb[2].mxu0  ;;  %v2510_v48 = vadd.f32 %v2497_v38, %v687_v45  ;;  %v2044_v50 = vpop.f32.mrb[2].mxu1 }
  0xed   : > { %v816_v47 = vsub.f32 0.0, %v2500_v40  ;;  %v2513_v49 = vadd.f32 %v2012_v46, %v2497_v38  ;;  %v562_v51 = vpop.f32.mrb[3].mxu0  ;;  %v848_v52 = vsub.f32 0.0, %v2503_v43  ;;  %v2518_v54 = vadd.f32 %v2044_v50, %v2497_v38  ;;  %v690_v56 = vpop.f32.mrb[3].mxu1 }
  0xee   : > { %v814_v53 = vsub.f32 0.0, %v2506_v44  ;;  %v2521_v55 = vadd.f32 %v2497_v38, %v562_v51  ;;  %v846_v58 = vsub.f32 0.0, %v2510_v48  ;;  %v2526_v60 = vadd.f32 %v2497_v38, %v690_v56 }
  0xef   : > { %v882_v57 = vmul.f32 1.442695, %v816_v47  ;;  %v817_v59 = vsub.f32 0.0, %v2513_v49  ;;  %v946_v61 = vmul.f32 1.442695, %v848_v52  ;;  %v849_v63 = vsub.f32 0.0, %v2518_v54 }
  0xf0   : > { %v878_v62 = vmul.f32 1.442695, %v814_v53  ;;  %v815_v0 = vsub.f32 0.0, %v2521_v55  ;;  %v942_v1 = vmul.f32 1.442695, %v846_v58  ;;  %v847_v3 = vsub.f32 0.0, %v2526_v60 }
  0xf1   : > { %2120 = vpow2.f32 %v882_v57  ;;  %v884_v2 = vmul.f32 1.442695, %v817_v59  ;;  %v948_v4 = vmul.f32 1.442695, %v849_v63 }
  0xf2   : > { %2122 = vpow2.f32 %v946_v61  ;;  %v2015_v5 = vpop.f32.mrb[4].mxu0  ;;  %v880_v6 = vmul.f32 1.442695, %v815_v0  ;;  %v2047_v8 = vpop.f32.mrb[4].mxu1  ;;  %v944_v10 = vmul.f32 1.442695, %v847_v3 }
  0xf3   : > { %2124 = vpow2.f32 %v878_v62  ;;  %v2532_v7 = vadd.f32 %v2015_v5, %v2497_v38  ;;  %v575_v9 = vpop.f32.mrb[5].mxu0  ;;  %v2535_v11 = vadd.f32 %v2047_v8, %v2497_v38  ;;  %v703_v13 = vpop.f32.mrb[5].mxu1 }
  0xf4   : > { %2126 = vpow2.f32 %v942_v1  ;;  %v2538_v12 = vadd.f32 %v2497_v38, %v575_v9  ;;  %v2016_v14 = vpop.f32.mrb[6].mxu0  ;;  %v2542_v16 = vadd.f32 %v2497_v38, %v703_v13  ;;  %v2048_v18 = vpop.f32.mrb[6].mxu1 }
  0xf5   : > { %2128 = vpow2.f32 %v884_v2  ;;  %v820_v15 = vsub.f32 0.0, %v2532_v7  ;;  %v2545_v17 = vadd.f32 %v2016_v14, %v2497_v38  ;;  %v578_v19 = vpop.f32.mrb[7].mxu0  ;;  %v852_v20 = vsub.f32 0.0, %v2535_v11  ;;  %v706_v22 = vpop.f32.mrb[7].mxu1 }
  0xf6   : > { %2130 = vpow2.f32 %v948_v4  ;;  %v818_v21 = vsub.f32 0.0, %v2538_v12  ;;  %v850_v24 = vsub.f32 0.0, %v2542_v16  ;;  %v2552_v28 = vadd.f32 %v2048_v18, %v2497_v38 }
  0xf7   : > { %2132 = vpow2.f32 %v880_v6  ;;  %v890_v23 = vmul.f32 1.442695, %v820_v15  ;;  %v821_v25 = vsub.f32 0.0, %v2545_v17  ;;  %v954_v26 = vmul.f32 1.442695, %v852_v20 }
  0xf8   : > { %2134 = vpow2.f32 %v944_v10  ;;  %v886_v27 = vmul.f32 1.442695, %v818_v21  ;;  %v950_v29 = vmul.f32 1.442695, %v850_v24  ;;  %v2555_v31 = vadd.f32 %v2497_v38, %v578_v19 }
  0xf9   : > { %2136 = vpow2.f32 %v890_v23  ;;  %v892_v30 = vmul.f32 1.442695, %v821_v25  ;;  %v853_v39 = vsub.f32 0.0, %v2552_v28  ;;  %v2559_v47 = vadd.f32 %v2497_v38, %v706_v22 }
  0xfa   : > { %2138 = vpow2.f32 %v954_v26  ;;  %v2019_v32 = vpop.f32.mrb[8].mxu0  ;;  %v2051_v34 = vpop.f32.mrb[8].mxu1  ;;  %v819_v56 = vsub.f32 0.0, %v2555_v31 }
  0xfb   : > { %v2121_v33 = vpop.eup %2120  ;;  %2140 = vpow2.f32 %v886_v27  ;;  %v591_v35 = vpop.f32.mrb[9].mxu0  ;;  %v956_v63 = vmul.f32 1.442695, %v853_v39  ;;  %v2563_v0 = vadd.f32 %v2019_v32, %v2497_v38  ;;  %v851_v3 = vsub.f32 0.0, %v2559_v47 }
  0xfc   : > { %v2123_v36 = vpop.eup %2122  ;;  %v1008_v37 = vadd.f32 1.0, %v2121_v33  ;;  %2142 = vpow2.f32 %v950_v29  ;;  %v719_v41 = vpop.f32.mrb[9].mxu1  ;;  %v2567_v4 = vadd.f32 %v2051_v34, %v2497_v38  ;;  %v888_v8 = vmul.f32 1.442695, %v819_v56 }
  0xfd   : > { %v2020_v42 = vpop.f32.mrb[10].mxu0  ;;  %v2125_v45 = vpop.eup %2124  ;;  %v1040_v46 = vadd.f32 1.0, %v2123_v36  ;;  %2144 = vpow2.f32 %v892_v30  ;;  %v2570_v9 = vadd.f32 %v2497_v38, %v591_v35  ;;  %v2573_v15 = vadd.f32 %v2497_v38, %v719_v41 }
  0xfe   : > { %v2052_v50 = vpop.f32.mrb[10].mxu1  ;;  %v594_v51 = vpop.f32.mrb[11].mxu0  ;;  %2146 = vrcp.f32 %v1008_v37  ;;  %v1006_v53 = vadd.f32 1.0, %v2125_v45  ;;  %v2576_v18 = vadd.f32 %v2020_v42, %v2497_v38  ;;  %v824_v23 = vsub.f32 0.0, %v2563_v0 }
  0xff   : > { %v2127_v52 = vpop.eup %2126  ;;  %v722_v57 = vpop.f32.mrb[11].mxu1  ;;  %2148 = vrcp.f32 %v1040_v46  ;;  %v2582_v24 = vadd.f32 %v2052_v50, %v2497_v38  ;;  %v952_v30 = vmul.f32 1.442695, %v851_v3  ;;  %v2589_v32 = vadd.f32 %v2497_v38, %v594_v51 }
 0x100   : > { %v2129_v58 = vpop.eup %2128  ;;  %v1038_v59 = vadd.f32 1.0, %v2127_v52  ;;  %2150 = vrcp.f32 %v1006_v53  ;;  %v856_v37 = vsub.f32 0.0, %v2567_v4  ;;  %v822_v39 = vsub.f32 0.0, %v2570_v9 }
 0x101   : > { %v2131_v61 = vpop.eup %2130  ;;  %v1009_v62 = vadd.f32 1.0, %v2129_v58  ;;  %v854_v46 = vsub.f32 0.0, %v2573_v15  ;;  %v825_v50 = vsub.f32 0.0, %v2576_v18  ;;  %v857_v53 = vsub.f32 0.0, %v2582_v24 }
 0x102   : > { %v2133_v1 = vpop.eup %2132  ;;  %2152 = vrcp.f32 %v1038_v59  ;;  %v1041_v2 = vadd.f32 1.0, %v2131_v61  ;;  %v2023_v10 = vpop.f32.mrb[12].mxu0  ;;  %v2603_v56 = vadd.f32 %v2497_v38, %v722_v57  ;;  %v898_v59 = vmul.f32 1.442695, %v824_v23 }
 0x103   : > { %v2135_v5 = vpop.eup %2134  ;;  %2154 = vrcp.f32 %v1009_v62  ;;  %v1007_v6 = vadd.f32 1.0, %v2133_v1  ;;  %v2055_v19 = vpop.f32.mrb[12].mxu1  ;;  %v823_v61 = vsub.f32 0.0, %v2589_v32  ;;  %v2607_v62 = vadd.f32 %v2023_v10, %v2497_v38 }
 0x104   : > { %v2137_v13 = vpop.eup %2136  ;;  %2156 = vrcp.f32 %v1041_v2  ;;  %v1039_v14 = vadd.f32 1.0, %v2135_v5  ;;  %v2578_v20 = vpop.f32.mrb[13].mxu0  ;;  %v962_v2 = vmul.f32 1.442695, %v856_v37  ;;  %v894_v3 = vmul.f32 1.442695, %v822_v39 }
 0x105   : > { %v2139_v21 = vpop.eup %2138  ;;  %2158 = vrcp.f32 %v1007_v6  ;;  %v1012_v22 = vadd.f32 1.0, %v2137_v13  ;;  %v2584_v25 = vpop.f32.mrb[13].mxu1  ;;  %v2610_v5 = vadd.f32 %v2055_v19, %v2497_v38  ;;  %v958_v57 = vmul.f32 1.442695, %v854_v46 }
 0x106   : > { %v2586_v26 = vpop.f32.mrb[14].mxu0  ;;  %v2141_v27 = vpop.eup %2140  ;;  %2160 = vrcp.f32 %v1039_v14  ;;  %v1044_v29 = vadd.f32 1.0, %v2139_v21  ;;  %v900_v14 = vmul.f32 1.442695, %v825_v50  ;;  %v896_v37 = vmul.f32 1.442695, %v823_v61 }
 0x107   : > { %v2591_v33 = vpop.f32.mrb[14].mxu1  ;;  %v2593_v34 = vpop.f32.mrb[15].mxu0  ;;  %2162 = vrcp.f32 %v1012_v22  ;;  %v1010_v36 = vadd.f32 1.0, %v2141_v27  ;;  %v964_v27 = vmul.f32 1.442695, %v857_v53  ;;  %v828_v39 = vsub.f32 0.0, %v2607_v62 }
 0x108   : > { %v2143_v35 = vpop.eup %2142  ;;  %v2597_v41 = vpop.f32.mrb[15].mxu1  ;;  %2164 = vrcp.f32 %v1044_v29  ;;  %v855_v29 = vsub.f32 0.0, %v2603_v56 }
 0x109   : > { %v2145_v42 = vpop.eup %2144  ;;  %v1042_v45 = vadd.f32 1.0, %v2143_v35  ;;  %2166 = vrcp.f32 %v1010_v36 }
 0x10a   : > { %v2147_v51 = vpop.eup %2146  ;;  %v1013_v52 = vadd.f32 1.0, %v2145_v42  ;;  %v2612_v6 = vpop.f32.mrb[16].mxu0 }
 0x10b   : > { %v2149_v58 = vpop.eup %2148  ;;  %2168 = vrcp.f32 %v1042_v45  ;;  %v2614_v21 = vpop.f32.mrb[16].mxu1  ;;  %v1136_v10 = vmul.f32 %v2147_v51, %v2500_v40 }
 0x10c   : > { %v2151_v1 = vpop.eup %2150  ;;  %2170 = vrcp.f32 %v1013_v52  ;;  %v2616_v22 = vpop.f32.mrb[17].mxu0 }
 0x10d   : > { %v2153_v13 = vpop.eup %2152  ;;  %2172 = vpow2.f32 %v956_v63  ;;  %v2620_v19 = vpop.f32.mrb[17].mxu1  ;;  %v1134_v51 = vmul.f32 %v2151_v1, %v2506_v44  ;;  %v2649_v44 = vadd.f32 %v2497_v38, %v2578_v20 }
 0x10e   : > { %v2155_v23 = vpop.eup %2154  ;;  %2174 = vpow2.f32 %v888_v8  ;;  %v2622_v35 = vpop.f32.mrb[18].mxu0  ;;  %v1168_v8 = vmul.f32 %v2149_v58, %v2503_v43  ;;  %v1166_v58 = vmul.f32 %v2153_v13, %v2510_v48  ;;  %v906_v48 = vmul.f32 1.442695, %v828_v39 }
 0x10f   : > { %v2157_v36 = vpop.eup %2156  ;;  %v1137_v63 = vmul.f32 %v2155_v23, %v2513_v49  ;;  %2176 = vpow2.f32 %v952_v30  ;;  %v2626_v42 = vpop.f32.mrb[18].mxu1  ;;  %v860_v30 = vsub.f32 0.0, %v2610_v5 }
 0x110   : > { %v2628_v45 = vpop.f32.mrb[19].mxu0  ;;  %v2159_v40 = vpop.eup %2158  ;;  %v1169_v49 = vmul.f32 %v2157_v36, %v2518_v54  ;;  %2178 = vpow2.f32 %v898_v59  ;;  %v960_v36 = vmul.f32 1.442695, %v855_v29 }
 0x111   : > { %v2640_v46 = vpop.f32.mrb[19].mxu1  ;;  %v2161_v50 = vpop.eup %2160  ;;  %v1788_v52 = vpack.c.bf16 %v1137_v63, %v1136_v10  ;;  %v1135_v43 = vmul.f32 %v2159_v40, %v2521_v55  ;;  %2180 = vpow2.f32 %v962_v2  ;;  %v970_v13 = vmul.f32 1.442695, %v860_v30 }
 0x112   : > { %v2163_v53 = vpop.eup %2162  ;;  %v1868_v61 = vpack.c.bf16 %v1169_v49, %v1168_v8  ;;  %v1167_v23 = vmul.f32 %v2161_v50, %v2526_v60  ;;  %2182 = vpow2.f32 %v894_v3  ;;  %v2654_v60 = vadd.f32 %v2497_v38, %v2584_v25  ;;  %v2656_v2 = vpop.f32.mrb[20].mxu0 }
 0x113   : > { %v2165_v54 = vpop.eup %2164  ;;  %1940 = vst [vmem:[%s2636_s27 + $0x8] sm:$0xff] %v1788_v52   ;;  %v1783_v59 = vpack.c.bf16 %v1135_v43, %v1134_v51  ;;  %2184 = vpow2.f32 %v958_v57  ;;  %v2659_v57 = vpop.f32.mrb[20].mxu1  ;;  %v1140_v39 = vmul.f32 %v2163_v53, %v2532_v7  ;;  %v826_v40 = vsub.f32 0.0, %v2649_v44 }
 0x114   : > { %v2167_v55 = vpop.eup %2166  ;;  %1956 = vst [vmem:[%s2636_s27 + $0x88] sm:$0xff] %v1868_v61   ;;  %v1863_v1 = vpack.c.bf16 %v1167_v23, %v1166_v58  ;;  %2186 = vpow2.f32 %v900_v14  ;;  %v2661_v10 = vpop.f32.mrb[21].mxu0  ;;  %v2666_v14 = vadd.f32 %v2586_v26, %v2497_v38  ;;  %v858_v30 = vsub.f32 0.0, %v2654_v60 }
 0x115   : > { %v2169_v3 = vpop.eup %2168  ;;  %1784 = vst [vmem:[%s2636_s27] sm:$0xff] %v1783_v59   ;;  %2188 = vpow2.f32 %v964_v27  ;;  %v2668_v29 = vpop.f32.mrb[21].mxu1  ;;  %v2682_v50 = vadd.f32 %v2591_v33, %v2497_v38  ;;  %v2688_v59 = vmul.f32 1.442695, %v826_v40  ;;  %v2692_v33 = vadd.f32 %v2497_v38, %v2593_v34 }
 0x116   : > { %v2171_v20 = vpop.eup %2170  ;;  %1955 = vst [vmem:[%s2636_s27 + $0x80] sm:$0xff] %v1863_v1   ;;  %2190 = vpow2.f32 %v896_v37  ;;  %v2670_v25 = vpop.f32.mrb[22].mxu0  ;;  %v829_v58 = vsub.f32 0.0, %v2666_v14  ;;  %v2704_v40 = vadd.f32 %v2497_v38, %v2597_v41  ;;  %v2720_v41 = vmul.f32 %v2169_v3, %v2542_v16 }
 0x117   : > { %v2173_v63 = vpop.eup %2172  ;;  %v1141_v27 = vmul.f32 %v2171_v20, %v2545_v17  ;;  %2192 = vpow2.f32 %v960_v36  ;;  %v2675_v8 = vpop.f32.mrb[22].mxu1 }
 0x118   : > { %v2677_v49 = vpop.f32.mrb[23].mxu0  ;;  %v2175_v37 = vpop.eup %2174  ;;  %v1045_v26 = vadd.f32 1.0, %v2173_v63  ;;  %2194 = vpow2.f32 %v906_v48  ;;  %v2694_v48 = vmul.f32 1.442695, %v858_v30  ;;  %v2711_v30 = vmul.f32 %v2167_v55, %v2538_v12 }
 0x119   : > { %v2684_v7 = vpop.f32.mrb[23].mxu1  ;;  %v2177_v17 = vpop.eup %2176  ;;  %v1798_v51 = vpack.c.bf16 %v1141_v27, %v1140_v39  ;;  %v1011_v52 = vadd.f32 1.0, %v2175_v37  ;;  %2196 = vpow2.f32 %v970_v13  ;;  %v861_v13 = vsub.f32 0.0, %v2682_v50 }
 0x11a   : > { %v2179_v43 = vpop.eup %2178  ;;  %2198 = vrcp.f32 %v1045_v26  ;;  %v1043_v53 = vadd.f32 1.0, %v2177_v17  ;;  %v2697_v20 = vpop.f32.mrb[24].mxu0  ;;  %v2700_v39 = vmul.f32 %v2165_v54, %v2535_v11 }
 0x11b   : > { %v2181_v61 = vpop.eup %2180  ;;  %1942 = vst [vmem:[%s2636_s27 + $0x18] sm:$0xff] %v1798_v51   ;;  %2200 = vrcp.f32 %v1011_v52  ;;  %v1016_v23 = vadd.f32 1.0, %v2179_v43  ;;  %v2706_v34 = vpop.f32.mrb[24].mxu1  ;;  %v2713_v51 = vmul.f32 1.442695, %v829_v58 }
 0x11c   : > { %v2183_v36 = vpop.eup %2182  ;;  %2202 = vrcp.f32 %v1043_v53  ;;  %v1048_v1 = vadd.f32 1.0, %v2181_v61  ;;  %v2708_v37 = vpop.f32.mrb[25].mxu0  ;;  %v827_v53 = vsub.f32 0.0, %v2692_v33 }
 0x11d   : > { %v2185_v63 = vpop.eup %2184  ;;  %2204 = vrcp.f32 %v1016_v23  ;;  %v1014_v27 = vadd.f32 1.0, %v2183_v36  ;;  %v2715_v11 = vpop.f32.mrb[25].mxu1  ;;  %v972_v23 = vmul.f32 1.442695, %v861_v13  ;;  %v2729_v36 = vadd.f32 %v2612_v6, %v2497_v38 }
 0x11e   : > { %v2187_v26 = vpop.eup %2186  ;;  %2206 = vrcp.f32 %v1048_v1  ;;  %v1046_v17 = vadd.f32 1.0, %v2185_v63  ;;  %v2717_v54 = vpop.f32.mrb[26].mxu0  ;;  %v859_v63 = vsub.f32 0.0, %v2704_v40  ;;  %v2740_v13 = vadd.f32 %v2497_v38, %v2616_v22 }
 0x11f   : > { %v2189_v52 = vpop.eup %2188  ;;  %2208 = vrcp.f32 %v1014_v27  ;;  %v1017_v43 = vadd.f32 1.0, %v2187_v26  ;;  %v2723_v61 = vpop.f32.mrb[26].mxu1  ;;  %3002 = vst [vmem:[#allocation3_spill] sm:$0xff] %v2729_v36  ;;  %v2736_v27 = vadd.f32 %v2614_v21, %v2497_v38  ;;  %v2744_v6 = vadd.f32 %v2497_v38, %v2620_v19 }
 0x120   : > { %v2725_v12 = vpop.f32.mrb[27].mxu0  ;;  %v2191_v55 = vpop.eup %2190  ;;  %2210 = vrcp.f32 %v1046_v17  ;;  %v1049_v58 = vadd.f32 1.0, %v2189_v52  ;;  %v2753_v22 = vadd.f32 %v2626_v42, %v2497_v38 }
 0x121   : > { %3001 = vst [vmem:[#allocation2_spill] sm:$0xff] %v2725_v12  ;;  %v2731_v1 = vpop.f32.mrb[27].mxu1  ;;  %v2193_v16 = vpop.eup %2192  ;;  %2212 = vrcp.f32 %v1017_v43  ;;  %v1015_v3 = vadd.f32 1.0, %v2191_v55  ;;  %3004 = vst [vmem:[#allocation5_spill] sm:$0xff] %v2744_v6  ;;  %v904_v55 = vmul.f32 1.442695, %v827_v53 }
 0x122   : > { %3003 = vst [vmem:[#allocation4_spill] sm:$0xff] %v2731_v1  ;;  %v2195_v26 = vpop.eup %2194  ;;  %2214 = vrcp.f32 %v1049_v58  ;;  %v1047_v17 = vadd.f32 1.0, %v2193_v16  ;;  %v2748_v1 = vadd.f32 %v2622_v35, %v2497_v38  ;;  %v832_v16 = vsub.f32 0.0, %v2729_v36  ;;  %v2755_v12 = vpop.f32.mrb[28].mxu0 }
 0x123   : > { %v2197_v52 = vpop.eup %2196  ;;  %2216 = vrcp.f32 %v1015_v3  ;;  %v1020_v43 = vadd.f32 1.0, %v2195_v26  ;;  %3005 = vst [vmem:[#allocation6_spill] sm:$0xff] %v2755_v12  ;;  %v864_v53 = vsub.f32 0.0, %v2736_v27  ;;  %v2761_v35 = vadd.f32 %v2497_v38, %v2628_v45  ;;  %v2763_v26 = vpop.f32.mrb[28].mxu1 }
 0x124   : > { %v2199_v21 = vpop.eup %2198  ;;  %2218 = vrcp.f32 %v1047_v17  ;;  %v1052_v58 = vadd.f32 1.0, %v2197_v52  ;;  %3006 = vst [vmem:[#allocation7_spill] sm:$0xff] %v2763_v26  ;;  %v2765_v17 = vpop.f32.mrb[29].mxu0  ;;  %v830_v12 = vsub.f32 0.0, %v2740_v13  ;;  %v862_v36 = vsub.f32 0.0, %v2744_v6 }
 0x125   : > { %v2201_v19 = vpop.eup %2200  ;;  %v1173_v3 = vmul.f32 %v2199_v21, %v2552_v28  ;;  %2220 = vrcp.f32 %v1020_v43  ;;  %3007 = vst [vmem:[#allocation8_spill] sm:$0xff] %v2765_v17  ;;  %v2770_v28 = vpop.f32.mrb[29].mxu1  ;;  %v833_v17 = vsub.f32 0.0, %v2748_v1 }
 0x126   : > { %v2203_v52 = vpop.eup %2202  ;;  %v1139_v42 = vmul.f32 %v2201_v19, %v2555_v31  ;;  %2222 = vrcp.f32 %v1052_v58  ;;  %3008 = vst [vmem:[#allocation9_spill] sm:$0xff] %v2770_v28  ;;  %v2772_v43 = vpop.f32.mrb[30].mxu0 }
 0x127   : > { %3009 = vst [vmem:[#allocation10_spill] sm:$0xff] %v2772_v43  ;;  %v2205_v21 = vpop.eup %2204  ;;  %v1878_v45 = vpack.c.bf16 %v1173_v3, %v2700_v39  ;;  %v1171_v26 = vmul.f32 %v2203_v52, %v2559_v47  ;;  %2224 = vpow2.f32 %v2688_v59  ;;  %v2778_v31 = vpop.f32.mrb[30].mxu1  ;;  %v968_v43 = vmul.f32 1.442695, %v859_v63 }
 0x128   : > { %3010 = vst [vmem:[#allocation11_spill] sm:$0xff] %v2778_v31  ;;  %v2780_v58 = vpop.f32.mrb[31].mxu0  ;;  %v2207_v19 = vpop.eup %2206  ;;  %v1793_v6 = vpack.c.bf16 %v1139_v42, %v2711_v30  ;;  %2226 = vpow2.f32 %v2694_v48  ;;  %v865_v39 = vsub.f32 0.0, %v2753_v22  ;;  %v914_v52 = vmul.f32 1.442695, %v832_v16 }
 0x129   : > { %3011 = vst [vmem:[#allocation12_spill] sm:$0xff] %v2780_v58  ;;  %v2785_v3 = vpop.f32.mrb[31].mxu1  ;;  %v2209_v47 = vpop.eup %2208  ;;  %1958 = vst [vmem:[%s2636_s27 + $0x98] sm:$0xff] %v1878_v45   ;;  %v1873_v59 = vpack.c.bf16 %v1171_v26, %v2720_v41  ;;  %2228 = vpow2.f32 %v2713_v51  ;;  %v831_v58 = vsub.f32 0.0, %v2761_v35  ;;  %v978_v30 = vmul.f32 1.442695, %v864_v53 }
 0x12a   : > { %3012 = vst [vmem:[#allocation13_spill] sm:$0xff] %v2785_v3  ;;  %v2211_v31 = vpop.eup %2210  ;;  %1941 = vst [vmem:[%s2636_s27 + $0x10] sm:$0xff] %v1793_v6   ;;  %2230 = vpow2.f32 %v972_v23  ;;  %v910_v48 = vmul.f32 1.442695, %v830_v12  ;;  %v974_v63 = vmul.f32 1.442695, %v862_v36  ;;  %v1144_v45 = vmul.f32 %v2205_v21, %v2563_v0 }
 0x12b   : > { %v2213_v42 = vpop.eup %2212  ;;  %1957 = vst [vmem:[%s2636_s27 + $0x90] sm:$0xff] %v1873_v59   ;;  %2232 = vpow2.f32 %v904_v55  ;;  %v916_v28 = vmul.f32 1.442695, %v833_v17  ;;  %v980_v51 = vmul.f32 1.442695, %v865_v39  ;;  %v1176_v26 = vmul.f32 %v2207_v19, %v2567_v4 }
 0x12c   : > { %v2215_v3 = vpop.eup %2214  ;;  %v1145_v41 = vmul.f32 %v2213_v42, %v2576_v18  ;;  %2234 = vpow2.f32 %v968_v43  ;;  %v912_v6 = vmul.f32 1.442695, %v831_v58  ;;  %v1142_v12 = vmul.f32 %v2209_v47, %v2570_v9 }
 0x12d   : > { %v2217_v16 = vpop.eup %2216  ;;  %v1177_v23 = vmul.f32 %v2215_v3, %v2582_v24  ;;  %2236 = vpow2.f32 %v914_v52  ;;  %v1174_v18 = vmul.f32 %v2211_v31, %v2573_v15  ;;  %v2808_v9 = vadd.f32 %v2497_v38, %v2640_v46 }
 0x12e   : > { %v2219_v53 = vpop.eup %2218  ;;  %v1808_v36 = vpack.c.bf16 %v1145_v41, %v1144_v45  ;;  %v1143_v55 = vmul.f32 %v2217_v16, %v2589_v32  ;;  %2238 = vpow2.f32 %v978_v30  ;;  %v2812_v32 = vadd.f32 %v2656_v2, %v2497_v38 }
 0x12f   : > { %v2799_v0 = vpop.eup %2220  ;;  %v1888_v17 = vpack.c.bf16 %v1177_v23, %v1176_v26  ;;  %v1175_v4 = vmul.f32 %v2219_v53, %v2603_v56  ;;  %2240 = vpow2.f32 %v910_v48  ;;  %v2817_v56 = vadd.f32 %v2659_v57, %v2497_v38 }
 0x130   : > { %v2803_v24 = vpop.eup %2222  ;;  %1944 = vst [vmem:[%s2636_s27 + $0x28] sm:$0xff] %v1808_v36   ;;  %v1803_v43 = vpack.c.bf16 %v1143_v55, %v1142_v12  ;;  %2242 = vpow2.f32 %v974_v63  ;;  %v2823_v2 = vadd.f32 %v2497_v38, %v2661_v10  ;;  %v836_v57 = vsub.f32 0.0, %v2812_v32 }
 0x131   : > { %v2225_v15 = vpop.eup %2224  ;;  %1960 = vst [vmem:[%s2636_s27 + $0xa8] sm:$0xff] %v1888_v17   ;;  %v1883_v21 = vpack.c.bf16 %v1175_v4, %v1174_v18  ;;  %2244 = vpow2.f32 %v916_v28  ;;  %v863_v28 = vsub.f32 0.0, %v2808_v9  ;;  %v868_v52 = vsub.f32 0.0, %v2817_v56 }
 0x132   : > { %v2227_v31 = vpop.eup %2226  ;;  %1943 = vst [vmem:[%s2636_s27 + $0x20] sm:$0xff] %v1803_v43   ;;  %v1018_v58 = vadd.f32 1.0, %v2225_v15  ;;  %2246 = vpow2.f32 %v980_v51  ;;  %v2830_v30 = vadd.f32 %v2497_v38, %v2668_v29  ;;  %v2834_v48 = vadd.f32 %v2670_v25, %v2497_v38 }
 0x133   : > { %v2229_v19 = vpop.eup %2228  ;;  %1959 = vst [vmem:[%s2636_s27 + $0xa0] sm:$0xff] %v1883_v21   ;;  %v1050_v46 = vadd.f32 1.0, %v2227_v31  ;;  %2248 = vpow2.f32 %v912_v6  ;;  %v834_v41 = vsub.f32 0.0, %v2823_v2  ;;  %v2839_v51 = vadd.f32 %v2675_v8, %v2497_v38 }
 0x134   : > { %v2231_v39 = vpop.eup %2230  ;;  %2250 = vrcp.f32 %v1018_v58  ;;  %v1021_v3 = vadd.f32 1.0, %v2229_v19  ;;  %v976_v26 = vmul.f32 1.442695, %v863_v28  ;;  %v922_v23 = vmul.f32 1.442695, %v836_v57 }
 0x135   : > { %v2233_v47 = vpop.eup %2232  ;;  %2252 = vrcp.f32 %v1050_v46  ;;  %v1053_v59 = vadd.f32 1.0, %v2231_v39  ;;  %v986_v12 = vmul.f32 1.442695, %v868_v52  ;;  %v866_v25 = vsub.f32 0.0, %v2830_v30 }
 0x136   : > { %v2235_v42 = vpop.eup %2234  ;;  %2254 = vrcp.f32 %v1021_v3  ;;  %v1019_v10 = vadd.f32 1.0, %v2233_v47  ;;  %v837_v18 = vsub.f32 0.0, %v2834_v48  ;;  %v2845_v8 = vadd.f32 %v2497_v38, %v2677_v49 }
 0x137   : > { %v2237_v63 = vpop.eup %2236  ;;  %2256 = vrcp.f32 %v1053_v59  ;;  %v1051_v45 = vadd.f32 1.0, %v2235_v42  ;;  %v918_v43 = vmul.f32 1.442695, %v834_v41  ;;  %v869_v15 = vsub.f32 0.0, %v2839_v51 }
 0x138   : > { %v2239_v16 = vpop.eup %2238  ;;  %2258 = vrcp.f32 %v1019_v10  ;;  %v1024_v29 = vadd.f32 1.0, %v2237_v63  ;;  %v2850_v58 = vadd.f32 %v2497_v38, %v2684_v7  ;;  %v2854_v19 = vadd.f32 %v2697_v20, %v2497_v38 }
 0x139   : > { %v2241_v6 = vpop.eup %2240  ;;  %2260 = vrcp.f32 %v1051_v45  ;;  %v1056_v53 = vadd.f32 1.0, %v2239_v16  ;;  %v982_v39 = vmul.f32 1.442695, %v866_v25  ;;  %v2858_v3 = vadd.f32 %v2706_v34, %v2497_v38 }
 0x13a   : > { %v2243_v36 = vpop.eup %2242  ;;  %2262 = vrcp.f32 %v1024_v29  ;;  %v1022_v55 = vadd.f32 1.0, %v2241_v6  ;;  %v835_v47 = vsub.f32 0.0, %v2845_v8  ;;  %v2863_v7 = vadd.f32 %v2497_v38, %v2708_v37 }
 0x13b   : > { %v2245_v17 = vpop.eup %2244  ;;  %2264 = vrcp.f32 %v1056_v53  ;;  %v1054_v4 = vadd.f32 1.0, %v2243_v36  ;;  %v1148_v20 = vmul.f32 %v2799_v0, %v2607_v62  ;;  %v1180_v52 = vmul.f32 %v2803_v24, %v2610_v5 }
 0x13c   : > { %v2247_v21 = vpop.eup %2246  ;;  %2266 = vrcp.f32 %v1022_v55  ;;  %v1025_v31 = vadd.f32 1.0, %v2245_v17  ;;  %v924_v42 = vmul.f32 1.442695, %v837_v18  ;;  %v988_v10 = vmul.f32 1.442695, %v869_v15 }
 0x13d   : > { %v2249_v46 = vpop.eup %2248  ;;  %2268 = vrcp.f32 %v1054_v4  ;;  %v1057_v49 = vadd.f32 1.0, %v2247_v21  ;;  %v867_v63 = vsub.f32 0.0, %v2850_v58  ;;  %v840_v45 = vsub.f32 0.0, %v2854_v19 }
 0x13e   : > { %v2251_v28 = vpop.eup %2250  ;;  %2270 = vrcp.f32 %v1025_v31  ;;  %v1023_v57 = vadd.f32 1.0, %v2249_v46  ;;  %v872_v16 = vsub.f32 0.0, %v2858_v3  ;;  %v2875_v62 = vadd.f32 %v2497_v38, %v2715_v11  ;;  %v3013_v46 = vld [vmem:[#allocation3_spill] sm:$0xff] }
 0x13f   : > { %v2253_v59 = vpop.eup %2252  ;;  %2272 = vrcp.f32 %v1057_v49  ;;  %v920_v24 = vmul.f32 1.442695, %v835_v47  ;;  %v838_v29 = vsub.f32 0.0, %v2863_v7  ;;  %v1146_v53 = vmul.f32 %v2251_v28, %v2649_v44 }
 0x140   : > { %v2255_v34 = vpop.eup %2254  ;;  %2274 = vrcp.f32 %v1023_v57  ;;  %v1178_v11 = vmul.f32 %v2253_v59, %v2654_v60  ;;  %v984_v18 = vmul.f32 1.442695, %v867_v63  ;;  %v870_v44 = vsub.f32 0.0, %v2875_v62 }
 0x141   : > { %v2257_v41 = vpop.eup %2256  ;;  %v1149_v37 = vmul.f32 %v2255_v34, %v2666_v14  ;;  %2276 = vpow2.f32 %v976_v26  ;;  %v994_v60 = vmul.f32 1.442695, %v872_v16  ;;  %v2892_v15 = vadd.f32 %v2717_v54, %v2497_v38  ;;  %v3014_v16 = vld [vmem:[#allocation2_spill] sm:$0xff] }
 0x142   : > { %v2259_v5 = vpop.eup %2258  ;;  %v1181_v0 = vmul.f32 %v2257_v41, %v2682_v50  ;;  %2278 = vpow2.f32 %v922_v23  ;;  %v2896_v21 = vadd.f32 %v2723_v61, %v2497_v38  ;;  %v990_v28 = vmul.f32 1.442695, %v870_v44 }
 0x143   : > { %v2261_v6 = vpop.eup %2260  ;;  %v1818_v14 = vpack.c.bf16 %v1149_v37, %v1148_v20  ;;  %v1147_v26 = vmul.f32 %v2259_v5, %v2692_v33  ;;  %2280 = vpow2.f32 %v986_v12  ;;  %v930_v12 = vmul.f32 1.442695, %v840_v45  ;;  %v2376_v37 = vld [vmem:[%s2997_s2] ss:$0 sm:$0xff] }
 0x144   : > { %v2263_v25 = vpop.eup %2262  ;;  %v1898_v36 = vpack.c.bf16 %v1181_v0, %v1180_v52  ;;  %v1179_v55 = vmul.f32 %v2261_v6, %v2704_v40  ;;  %2282 = vpow2.f32 %v918_v43  ;;  %v926_v43 = vmul.f32 1.442695, %v838_v29 }
 0x145   : > { %v2265_v50 = vpop.eup %2264  ;;  %1946 = vst [vmem:[%s2636_s27 + $0x38] sm:$0xff] %v1818_v14   ;;  %v1813_v23 = vpack.c.bf16 %v1147_v26, %v1146_v53  ;;  %2284 = vpow2.f32 %v982_v39  ;;  %v1152_v49 = vmul.f32 %v2263_v25, %v3013_v46  ;;  %v841_v34 = vsub.f32 0.0, %v2892_v15 }
 0x146   : > { %v2267_v17 = vpop.eup %2266  ;;  %1962 = vst [vmem:[%s2636_s27 + $0xb8] sm:$0xff] %v1898_v36   ;;  %v1893_v33 = vpack.c.bf16 %v1179_v55, %v1178_v11  ;;  %2286 = vpow2.f32 %v924_v42  ;;  %v1184_v47 = vmul.f32 %v2265_v50, %v2736_v27  ;;  %v873_v63 = vsub.f32 0.0, %v2896_v21  ;;  %v3015_v11 = vld [vmem:[#allocation4_spill] sm:$0xff]  ;;  %v3016_v55 = vld [vmem:[#allocation6_spill] sm:$0xff] }
 0x147   : > { %v2886_v4 = vpop.eup %2268  ;;  %1945 = vst [vmem:[%s2636_s27 + $0x30] sm:$0xff] %v1813_v23   ;;  %2288 = vpow2.f32 %v988_v10  ;;  %v1150_v20 = vmul.f32 %v2267_v17, %v2740_v13  ;;  %v2913_v5 = vadd.f32 %v2376_v37, %v3014_v16  ;;  %v932_v53 = vmul.f32 1.442695, %v841_v34  ;;  %v3017_v17 = vld [vmem:[#allocation7_spill] sm:$0xff] }
 0x148   : > { %v2271_v40 = vpop.eup %2270  ;;  %1961 = vst [vmem:[%s2636_s27 + $0xb0] sm:$0xff] %v1893_v33   ;;  %2290 = vpow2.f32 %v920_v24  ;;  %v996_v14 = vmul.f32 1.442695, %v873_v63  ;;  %v2916_v36 = vadd.f32 %v2376_v37, %v3015_v11  ;;  %v2919_v50 = vadd.f32 %v2376_v37, %v3016_v55  ;;  %v3023_v63 = vld [vmem:[#allocation5_spill] sm:$0xff] }
 0x149   : > { %v2273_v31 = vpop.eup %2272  ;;  %v1153_v39 = vmul.f32 %v2271_v40, %v2748_v1  ;;  %2292 = vpow2.f32 %v984_v18  ;;  %v839_v44 = vsub.f32 0.0, %v2913_v5  ;;  %v2923_v33 = vadd.f32 %v2376_v37, %v3017_v17  ;;  %v3018_v40 = vld [vmem:[#allocation8_spill] sm:$0xff] }
 0x14a   : > { %v2275_v57 = vpop.eup %2274  ;;  %v1185_v59 = vmul.f32 %v2273_v31, %v2753_v22  ;;  %2294 = vpow2.f32 %v930_v12  ;;  %v3019_v31 = vld [vmem:[#allocation9_spill] sm:$0xff] }
 0x14b   : > { %v2277_v54 = vpop.eup %2276  ;;  %v1828_v38 = vpack.c.bf16 %v1153_v39, %v1152_v49  ;;  %v1151_v61 = vmul.f32 %v2275_v57, %v2761_v35  ;;  %2296 = vpow2.f32 %v994_v60  ;;  %v2929_v46 = vadd.f32 %v2376_v37, %v3019_v31 }
 0x14c   : > { %v2279_v52 = vpop.eup %2278  ;;  %v1908_v1 = vpack.c.bf16 %v1185_v59, %v1184_v47  ;;  %v1055_v42 = vadd.f32 1.0, %v2277_v54  ;;  %2298 = vpow2.f32 %v926_v43  ;;  %v2926_v43 = vadd.f32 %v2376_v37, %v3018_v40  ;;  %v3021_v47 = vld [vmem:[#allocation11_spill] sm:$0xff] }
 0x14d   : > { %v2281_v10 = vpop.eup %2280  ;;  %1948 = vst [vmem:[%s2636_s27 + $0x48] sm:$0xff] %v1828_v38   ;;  %v1823_v27 = vpack.c.bf16 %v1151_v61, %v1150_v20  ;;  %v1028_v22 = vadd.f32 1.0, %v2279_v52  ;;  %2300 = vpow2.f32 %v990_v28  ;;  %v3020_v28 = vld [vmem:[#allocation10_spill] sm:$0xff]  ;;  %v2935_v59 = vadd.f32 %v2376_v37, %v3021_v47 }
 0x14e   : > { %v2283_v13 = vpop.eup %2282  ;;  %1964 = vst [vmem:[%s2636_s27 + $0xc8] sm:$0xff] %v1908_v1   ;;  %2302 = vrcp.f32 %v1055_v42  ;;  %v1060_v45 = vadd.f32 1.0, %v2281_v10  ;;  %v2932_v57 = vadd.f32 %v2376_v37, %v3020_v28  ;;  %v871_v38 = vsub.f32 0.0, %v2916_v36  ;;  %v3022_v10 = vld [vmem:[#allocation12_spill] sm:$0xff] }
 0x14f   : > { %v2285_v35 = vpop.eup %2284  ;;  %1947 = vst [vmem:[%s2636_s27 + $0x40] sm:$0xff] %v1823_v27   ;;  %2304 = vrcp.f32 %v1028_v22  ;;  %v1026_v41 = vadd.f32 1.0, %v2283_v13  ;;  %v844_v61 = vsub.f32 0.0, %v2919_v50  ;;  %v928_v42 = vmul.f32 1.442695, %v839_v44 }
 0x150   : > { %v2287_v0 = vpop.eup %2286  ;;  %2306 = vrcp.f32 %v1060_v45  ;;  %v1058_v24 = vadd.f32 1.0, %v2285_v35  ;;  %v876_v34 = vsub.f32 0.0, %v2923_v33  ;;  %v2941_v27 = vadd.f32 %v2376_v37, %v3022_v10 }
 0x151   : > { %v2289_v29 = vpop.eup %2288  ;;  %2308 = vrcp.f32 %v1026_v41  ;;  %v1029_v6 = vadd.f32 1.0, %v2287_v0  ;;  %v1182_v13 = vmul.f32 %v2886_v4, %v3023_v63  ;;  %v842_v45 = vsub.f32 0.0, %v2926_v43 }
 0x152   : > { %v2291_v26 = vpop.eup %2290  ;;  %2310 = vrcp.f32 %v1058_v24  ;;  %v1061_v25 = vadd.f32 1.0, %v2289_v29  ;;  %v874_v35 = vsub.f32 0.0, %v2929_v46  ;;  %v845_v0 = vsub.f32 0.0, %v2932_v57 }
 0x153   : > { %v2293_v23 = vpop.eup %2292  ;;  %2312 = vrcp.f32 %v1029_v6  ;;  %v1027_v18 = vadd.f32 1.0, %v2291_v26  ;;  %v877_v24 = vsub.f32 0.0, %v2935_v59  ;;  %v992_v6 = vmul.f32 1.442695, %v871_v38  ;;  %v3024_v26 = vld [vmem:[#allocation13_spill] sm:$0xff] }
 0x154   : > { %v2295_v12 = vpop.eup %2294  ;;  %2314 = vrcp.f32 %v1061_v25  ;;  %v1059_v60 = vadd.f32 1.0, %v2293_v23  ;;  %v2951_v25 = vadd.f32 %v2376_v37, %v3024_v26  ;;  %v938_v55 = vmul.f32 1.442695, %v844_v61 }
 0x155   : > { %v2297_v49 = vpop.eup %2296  ;;  %2316 = vrcp.f32 %v1027_v18  ;;  %v1032_v39 = vadd.f32 1.0, %v2295_v12  ;;  %v843_v23 = vsub.f32 0.0, %v2941_v27  ;;  %v934_v44 = vmul.f32 1.442695, %v842_v45 }
 0x156   : > { %v2299_v54 = vpop.eup %2298  ;;  %2318 = vrcp.f32 %v1059_v60  ;;  %v1064_v20 = vadd.f32 1.0, %v2297_v49  ;;  %v998_v12 = vmul.f32 1.442695, %v874_v35  ;;  %v940_v60 = vmul.f32 1.442695, %v845_v0 }
 0x157   : > { %v2301_v52 = vpop.eup %2300  ;;  %v1030_v1 = vadd.f32 1.0, %v2299_v54  ;;  %2320 = vrcp.f32 %v1032_v39  ;;  %v1004_v40 = vmul.f32 1.442695, %v877_v24  ;;  %v936_v47 = vmul.f32 1.442695, %v843_v23 }
 0x158   : > { %v2303_v22 = vpop.eup %2302  ;;  %2322 = vrcp.f32 %v1064_v20  ;;  %v1062_v10 = vadd.f32 1.0, %v2301_v52 }
 0x159   : > { %v2305_v41 = vpop.eup %2304  ;;  %v1183_v16 = vmul.f32 %v2303_v22, %v2808_v9  ;;  %2324 = vrcp.f32 %v1030_v1  ;;  %v1002_v9 = vmul.f32 1.442695, %v876_v34 }
 0x15a   : > { %v2307_v29 = vpop.eup %2306  ;;  %2326 = vpow2.f32 %v932_v53  ;;  %v1156_v37 = vmul.f32 %v2305_v41, %v2812_v32  ;;  %v875_v53 = vsub.f32 0.0, %v2951_v25 }
 0x15b   : > { %v2309_v4 = vpop.eup %2308  ;;  %v1903_v11 = vpack.c.bf16 %v1183_v16, %v1182_v13  ;;  %2328 = vpow2.f32 %v996_v14  ;;  %v1188_v14 = vmul.f32 %v2307_v29, %v2817_v56 }
 0x15c   : > { %v2311_v18 = vpop.eup %2310  ;;  %2330 = vpow2.f32 %v928_v42  ;;  %v1154_v20 = vmul.f32 %v2309_v4, %v2823_v2  ;;  %v1000_v42 = vmul.f32 1.442695, %v875_v53 }
 0x15d   : > { %v2313_v17 = vpop.eup %2312  ;;  %1963 = vst [vmem:[%s2636_s27 + $0xc0] sm:$0xff] %v1903_v11   ;;  %2332 = vpow2.f32 %v992_v6 }
 0x15e   : > { %v2315_v31 = vpop.eup %2314  ;;  %v1157_v49 = vmul.f32 %v2313_v17, %v2834_v48  ;;  %2334 = vpow2.f32 %v938_v55  ;;  %v1186_v48 = vmul.f32 %v2311_v18, %v2830_v30 }
 0x15f   : > { %v2317_v39 = vpop.eup %2316  ;;  %v1189_v28 = vmul.f32 %v2315_v31, %v2839_v51  ;;  %2336 = vpow2.f32 %v1002_v9 }
 0x160   : > { %v2319_v54 = vpop.eup %2318  ;;  %v1838_v38 = vpack.c.bf16 %v1157_v49, %v1156_v37  ;;  %v1155_v32 = vmul.f32 %v2317_v39, %v2845_v8  ;;  %2338 = vpow2.f32 %v934_v44 }
 0x161   : > { %v1918_v61 = vpack.c.bf16 %v1189_v28, %v1188_v14  ;;  %v1187_v1 = vmul.f32 %v2319_v54, %v2850_v58  ;;  %v2321_v56 = vpop.eup %2320  ;;  %2340 = vpow2.f32 %v998_v12 }
 0x162   : > { %1950 = vst [vmem:[%s2636_s27 + $0x58] sm:$0xff] %v1838_v38   ;;  %v1833_v51 = vpack.c.bf16 %v1155_v32, %v1154_v20  ;;  %v2323_v34 = vpop.eup %2322  ;;  %2342 = vpow2.f32 %v940_v60  ;;  %v1160_v37 = vmul.f32 %v2321_v56, %v2854_v19 }
 0x163   : > { %1966 = vst [vmem:[%s2636_s27 + $0xd8] sm:$0xff] %v1918_v61   ;;  %v1913_v2 = vpack.c.bf16 %v1187_v1, %v1186_v48  ;;  %v2325_v8 = vpop.eup %2324  ;;  %2344 = vpow2.f32 %v1004_v40  ;;  %v1192_v39 = vmul.f32 %v2323_v34, %v2858_v3 }
 0x164   : > { %1949 = vst [vmem:[%s2636_s27 + $0x50] sm:$0xff] %v1833_v51   ;;  %v2327_v22 = vpop.eup %2326  ;;  %2346 = vpow2.f32 %v936_v47  ;;  %v1158_v47 = vmul.f32 %v2325_v8, %v2863_v7 }
 0x165   : > { %1965 = vst [vmem:[%s2636_s27 + $0xd0] sm:$0xff] %v1913_v2   ;;  %v2329_v30 = vpop.eup %2328  ;;  %v1033_v58 = vadd.f32 1.0, %v2327_v22  ;;  %2348 = vpow2.f32 %v1000_v42 }
 0x166   : > { %v2331_v63 = vpop.eup %2330  ;;  %2350 = vrcp.f32 %v1062_v10  ;;  %v1065_v13 = vadd.f32 1.0, %v2329_v30 }
 0x167   : > { %v2333_v45 = vpop.eup %2332  ;;  %2352 = vrcp.f32 %v1033_v58  ;;  %v1031_v35 = vadd.f32 1.0, %v2331_v63 }
 0x168   : > { %v2335_v41 = vpop.eup %2334  ;;  %2354 = vrcp.f32 %v1065_v13  ;;  %v1063_v16 = vadd.f32 1.0, %v2333_v45 }
 0x169   : > { %v2337_v52 = vpop.eup %2336  ;;  %2356 = vrcp.f32 %v1031_v35  ;;  %v1036_v0 = vadd.f32 1.0, %v2335_v41 }
 0x16a   : > { %v2339_v24 = vpop.eup %2338  ;;  %2358 = vrcp.f32 %v1063_v16  ;;  %v1068_v29 = vadd.f32 1.0, %v2337_v52 }
 0x16b   : > { %v2341_v6 = vpop.eup %2340  ;;  %2360 = vrcp.f32 %v1036_v0  ;;  %v1034_v26 = vadd.f32 1.0, %v2339_v24 }
 0x16c   : > { %v2343_v4 = vpop.eup %2342  ;;  %2362 = vrcp.f32 %v1068_v29  ;;  %v1066_v11 = vadd.f32 1.0, %v2341_v6 }
 0x16d   : > { %v2345_v55 = vpop.eup %2344  ;;  %2364 = vrcp.f32 %v1034_v26  ;;  %v1037_v23 = vadd.f32 1.0, %v2343_v4 }
 0x16e   : > { %v2347_v18 = vpop.eup %2346  ;;  %2366 = vrcp.f32 %v1066_v11  ;;  %v1069_v9 = vadd.f32 1.0, %v2345_v55 }
 0x16f   : > { %v2349_v44 = vpop.eup %2348  ;;  %2368 = vrcp.f32 %v1037_v23  ;;  %v1035_v17 = vadd.f32 1.0, %v2347_v18 }
 0x170   : > { %v2351_v12 = vpop.eup %2350  ;;  %2370 = vrcp.f32 %v1069_v9  ;;  %v1067_v60 = vadd.f32 1.0, %v2349_v44 }
 0x171   : > { %v2353_v40 = vpop.eup %2352  ;;  %2372 = vrcp.f32 %v1035_v17  ;;  %v1190_v19 = vmul.f32 %v2351_v12, %v2875_v62 }
 0x172   : > { %v2355_v31 = vpop.eup %2354  ;;  %v1161_v49 = vmul.f32 %v2353_v40, %v2892_v15  ;;  %2374 = vrcp.f32 %v1067_v60 }
 0x173   : > { %v2357_v53 = vpop.eup %2356  ;;  %v1193_v14 = vmul.f32 %v2355_v31, %v2896_v21 }
 0x174   : > { %v2359_v28 = vpop.eup %2358  ;;  %v1848_v54 = vpack.c.bf16 %v1161_v49, %v1160_v37  ;;  %v1159_v20 = vmul.f32 %v2357_v53, %v2913_v5 }
 0x175   : > { %v2361_v38 = vpop.eup %2360  ;;  %v1928_v32 = vpack.c.bf16 %v1193_v14, %v1192_v39  ;;  %v1191_v15 = vmul.f32 %v2359_v28, %v2916_v36 }
 0x176   : > { %v2363_v48 = vpop.eup %2362  ;;  %1952 = vst [vmem:[%s2636_s27 + $0x68] sm:$0xff] %v1848_v54   ;;  %v1843_v61 = vpack.c.bf16 %v1159_v20, %v1158_v47  ;;  %v1164_v5 = vmul.f32 %v2361_v38, %v2919_v50 }
 0x177   : > { %v2365_v3 = vpop.eup %2364  ;;  %1968 = vst [vmem:[%s2636_s27 + $0xe8] sm:$0xff] %v1928_v32   ;;  %v1923_v21 = vpack.c.bf16 %v1191_v15, %v1190_v19  ;;  %v1196_v51 = vmul.f32 %v2363_v48, %v2923_v33 }
 0x178   : > { %v2367_v1 = vpop.eup %2366  ;;  %1951 = vst [vmem:[%s2636_s27 + $0x60] sm:$0xff] %v1843_v61   ;;  %v1162_v2 = vmul.f32 %v2365_v3, %v2926_v43 }
 0x179   : > { %v2369_v7 = vpop.eup %2368  ;;  %1967 = vst [vmem:[%s2636_s27 + $0xe0] sm:$0xff] %v1923_v21   ;;  %v1194_v22 = vmul.f32 %v2367_v1, %v2929_v46 }
 0x17a   : > { %v2371_v56 = vpop.eup %2370  ;;  %v1165_v62 = vmul.f32 %v2369_v7, %v2932_v57 }
 0x17b   : > { %v2373_v36 = vpop.eup %2372  ;;  %v1197_v42 = vmul.f32 %v2371_v56, %v2935_v59 }
 0x17c   : > { %v2375_v34 = vpop.eup %2374  ;;  %v1858_v10 = vpack.c.bf16 %v1165_v62, %v1164_v5  ;;  %v1163_v8 = vmul.f32 %v2373_v36, %v2941_v27 }
 0x17d   : > { %v1938_v30 = vpack.c.bf16 %v1197_v42, %v1196_v51  ;;  %v1195_v50 = vmul.f32 %v2375_v34, %v2951_v25 }
 0x17e   : > { %1954 = vst [vmem:[%s2636_s27 + $0x78] sm:$0xff] %v1858_v10   ;;  %v1853_v58 = vpack.c.bf16 %v1163_v8, %v1162_v2 }
 0x17f   : > { %1970 = vst [vmem:[%s2636_s27 + $0xf8] sm:$0xff] %v1938_v30   ;;  %v1933_v57 = vpack.c.bf16 %v1195_v50, %v1194_v22 }
 0x180   : > { %1953 = vst [vmem:[%s2636_s27 + $0x70] sm:$0xff] %v1853_v58  }
 0x181   : > { %1969 = vst [vmem:[%s2636_s27 + $0xf0] sm:$0xff] %v1933_v57  }
 0x182 PF: > { %s13_s12 = sadd.s32 1, %s2383_s12  }
 0x183   : > { %p10_p4 = scmp.ge.s32.totalorder %s13_s12, 4  }
 0x185   :  { %12 = sbr.rel (!%p10_p4) target bundleno = 1 (0x1), region = 62 }

// kernel: _lambda_.18
= control target key start
LH: loop header
LB: loop body
LE: loop exit
PB: predicated region body
PF: predicated region fallthrough
CT: control target
= control target key end

     0   :  { %s1490_s1 = inlined_call_operand.vmem [shape: bf16[128,128], index: 1, kind: input, shape index: {}]   ;;  %s1491_s0 = inlined_call_operand.vmem [shape: bf16[256,128], index: 0, kind: input, shape index: {}]   ;;  %s1492_s2 = inlined_call_operand.vmem [shape: f32[1,128], index: 2, kind: input, shape index: {}]   ;;  %s1493_s3 = inlined_call_operand.vmem [shape: bf16[256,128], index: 3, kind: output, shape index: {}]  }
   0x1   :  { %v1003_v0 = vld [vmem:[%s1490_s1] sm:$0xff]   ;;  %v1004_v1 = vld [vmem:[%s1490_s1 + $0x8] sm:$0xff]   ;;  %v1005_v2 = vld [vmem:[%s1490_s1 + $0x10] sm:$0xff]  }
   0x2   :  { %939 = vmatprep.subr.bf16.mxu0 %v1003_v0  ;;  %987 = vmatprep.subr.bf16.mxu1 %v1003_v0  ;;  %v1006_v3 = vld [vmem:[%s1490_s1 + $0x18] sm:$0xff]   ;;  %v1011_v4 = vld [vmem:[%s1491_s0] sm:$0xff]   ;;  %v1008_v7 = vld [vmem:[%s1490_s1 + $0x28] sm:$0xff]  }
   0x3   :  { %940 = vmatpush3.bf16.msra.mxu0 %v1003_v0  ;;  %995 = vmatpush3.bf16.msra.mxu1 %v1003_v0  ;;  %v1012_v5 = vld [vmem:[%s1491_s0 + $0x40] sm:$0xff]   ;;  %v1009_v8 = vld [vmem:[%s1490_s1 + $0x30] sm:$0xff]   ;;  %v1010_v9 = vld [vmem:[%s1490_s1 + $0x38] sm:$0xff]  }
   0x4   :  { %941 = vmatprep.subr.bf16.mxu0 %v1004_v1  ;;  %988 = vmatprep.subr.bf16.mxu1 %v1004_v1  ;;  %v1007_v6 = vld [vmem:[%s1490_s1 + $0x20] sm:$0xff]   ;;  %v1013_v10 = vld [vmem:[%s1491_s0 + $0x8] sm:$0xff]   ;;  %v1015_v12 = vld [vmem:[%s1491_s0 + $0x10] sm:$0xff]  }
   0x5   :  { %955 = vmatprep.mubr.bf16.mxu0 %v1011_v4  ;;  %971 = vmatprep.mubr.bf16.mxu1 %v1012_v5  ;;  %v1014_v11 = vld [vmem:[%s1491_s0 + $0x48] sm:$0xff]   ;;  %v1016_v13 = vld [vmem:[%s1491_s0 + $0x50] sm:$0xff]   ;;  %v1017_v14 = vld [vmem:[%s1491_s0 + $0x18] sm:$0xff]  }
   0x6   :  { %v1018_v15 = vld [vmem:[%s1491_s0 + $0x58] sm:$0xff]   ;;  %v1019_v16 = vld [vmem:[%s1491_s0 + $0x20] sm:$0xff]   ;;  %v1021_v18 = vld [vmem:[%s1491_s0 + $0x28] sm:$0xff]  }
   0x7   :  { %942 = vmatpush3.bf16.msra.mxu0 %v1004_v1  ;;  %996 = vmatpush3.bf16.msra.mxu1 %v1004_v1  ;;  %v1020_v17 = vld [vmem:[%s1491_s0 + $0x60] sm:$0xff]   ;;  %v1022_v19 = vld [vmem:[%s1491_s0 + $0x68] sm:$0xff]   ;;  %v1023_v20 = vld [vmem:[%s1491_s0 + $0x30] sm:$0xff]  }
   0x8   :  { %943 = vmatprep.subr.bf16.mxu0 %v1005_v2  ;;  %989 = vmatprep.subr.bf16.mxu1 %v1005_v2  ;;  %v1024_v21 = vld [vmem:[%s1491_s0 + $0x70] sm:$0xff]   ;;  %v1025_v22 = vld [vmem:[%s1491_s0 + $0x38] sm:$0xff]   ;;  %v1250_v24 = vld [vmem:[%s1492_s2] ss:$0 sm:$0xff] }
   0x9   :  { %v1026_v23 = vld [vmem:[%s1491_s0 + $0x78] sm:$0xff]  }
   0xb   :  { %944 = vmatpush3.bf16.msra.mxu0 %v1005_v2  ;;  %997 = vmatpush3.bf16.msra.mxu1 %v1005_v2 }
   0xc   :  { %945 = vmatprep.subr.bf16.mxu0 %v1006_v3  ;;  %990 = vmatprep.subr.bf16.mxu1 %v1006_v3 }
   0xf   :  { %946 = vmatpush3.bf16.msra.mxu0 %v1006_v3  ;;  %998 = vmatpush3.bf16.msra.mxu1 %v1006_v3 }
  0x10   :  { %947 = vmatprep.subr.bf16.mxu0 %v1007_v6  ;;  %991 = vmatprep.subr.bf16.mxu1 %v1007_v6 }
  0x13   :  { %948 = vmatpush3.bf16.msra.mxu0 %v1007_v6  ;;  %999 = vmatpush3.bf16.msra.mxu1 %v1007_v6 }
  0x14   :  { %949 = vmatprep.subr.bf16.mxu0 %v1008_v7  ;;  %992 = vmatprep.subr.bf16.mxu1 %v1008_v7 }
  0x17   :  { %950 = vmatpush3.bf16.msra.mxu0 %v1008_v7  ;;  %1000 = vmatpush3.bf16.msra.mxu1 %v1008_v7 }
  0x18   :  { %951 = vmatprep.subr.bf16.mxu0 %v1009_v8  ;;  %993 = vmatprep.subr.bf16.mxu1 %v1009_v8 }
  0x1b   :  { %952 = vmatpush3.bf16.msra.mxu0 %v1009_v8  ;;  %1001 = vmatpush3.bf16.msra.mxu1 %v1009_v8 }
  0x1c   :  { %953 = vmatprep.subr.bf16.mxu0 %v1010_v9  ;;  %994 = vmatprep.subr.bf16.mxu1 %v1010_v9 }
  0x1f   :  { %954 = vmatpush3.bf16.msra.mxu0 %v1010_v9  ;;  %1002 = vmatpush3.bf16.msra.mxu1 %v1010_v9 }
  0x22   :  { %956 = vmatmul.mubr.bf16.vlgmr.msra.gmra.mrb[0].mxu0 %v1013_v10  ;;  %972 = vmatmul.mubr.bf16.vlgmr.msra.gmra.mrb[0].mxu1 %v1014_v11 }
  0x23   :  { %959 = vmatprep.mubr.bf16.mxu0 %v1015_v12  ;;  %975 = vmatprep.mubr.bf16.mxu1 %v1016_v13 }
  0x2a   :  { %960 = vmatmul.mubr.bf16.gmra.mrb[4].mxu0 %v1017_v14  ;;  %976 = vmatmul.mubr.bf16.gmra.mrb[4].mxu1 %v1018_v15 }
  0x2b   :  { %963 = vmatprep.mubr.bf16.mxu0 %v1019_v16  ;;  %979 = vmatprep.mubr.bf16.mxu1 %v1020_v17 }
  0x32   :  { %964 = vmatmul.mubr.bf16.gmra.mrb[8].mxu0 %v1021_v18  ;;  %980 = vmatmul.mubr.bf16.gmra.mrb[8].mxu1 %v1022_v19 }
  0x33   :  { %967 = vmatprep.mubr.bf16.mxu0 %v1023_v20  ;;  %983 = vmatprep.mubr.bf16.mxu1 %v1024_v21 }
  0x3a   :  { %968 = vmatmul.mubr.bf16.gmra.mrb[12].mxu0 %v1025_v22  ;;  %984 = vmatmul.mubr.bf16.gmra.mrb[12].mxu1 %v1026_v23 }
  0xf5   :  { %v957_v25 = vpop.f32.mrb[0].mxu0  ;;  %v973_v26 = vpop.f32.mrb[0].mxu1 }
  0xf6   :  { %v1253_v27 = vadd.f32 %v957_v25, %v1250_v24  ;;  %v1256_v28 = vadd.f32 %v973_v26, %v1250_v24  ;;  %v248_v29 = vpop.f32.mrb[1].mxu0  ;;  %v312_v30 = vpop.f32.mrb[1].mxu1 }
  0xf7   :  { %v1259_v31 = vadd.f32 %v1250_v24, %v248_v29  ;;  %v1262_v32 = vadd.f32 %v1250_v24, %v312_v30  ;;  %v958_v33 = vpop.f32.mrb[2].mxu0  ;;  %v974_v34 = vpop.f32.mrb[2].mxu1 }
  0xf8   :  { %v377_v35 = vsub.f32 0.0, %v1253_v27  ;;  %v393_v36 = vsub.f32 0.0, %v1256_v28  ;;  %v1267_v37 = vadd.f32 %v958_v33, %v1250_v24  ;;  %v1270_v38 = vadd.f32 %v974_v34, %v1250_v24  ;;  %v251_v39 = vpop.f32.mrb[3].mxu0  ;;  %v315_v40 = vpop.f32.mrb[3].mxu1 }
  0xf9   :  { %v375_v41 = vsub.f32 0.0, %v1259_v31  ;;  %v391_v42 = vsub.f32 0.0, %v1262_v32  ;;  %v1275_v43 = vadd.f32 %v1250_v24, %v251_v39  ;;  %v1278_v44 = vadd.f32 %v1250_v24, %v315_v40 }
  0xfa   :  { %v411_v45 = vmul.f32 1.442695, %v377_v35  ;;  %v443_v46 = vmul.f32 1.442695, %v393_v36  ;;  %v378_v47 = vsub.f32 0.0, %v1267_v37  ;;  %v394_v48 = vsub.f32 0.0, %v1270_v38 }
  0xfb   :  { %v407_v49 = vmul.f32 1.442695, %v375_v41  ;;  %v439_v50 = vmul.f32 1.442695, %v391_v42  ;;  %v376_v51 = vsub.f32 0.0, %v1275_v43  ;;  %v392_v52 = vsub.f32 0.0, %v1278_v44 }
  0xfc   :  { %1027 = vpow2.f32 %v411_v45  ;;  %v413_v53 = vmul.f32 1.442695, %v378_v47  ;;  %v445_v54 = vmul.f32 1.442695, %v394_v48 }
  0xfd   :  { %1029 = vpow2.f32 %v443_v46  ;;  %v961_v55 = vpop.f32.mrb[4].mxu0  ;;  %v977_v56 = vpop.f32.mrb[4].mxu1  ;;  %v409_v57 = vmul.f32 1.442695, %v376_v51  ;;  %v441_v62 = vmul.f32 1.442695, %v392_v52 }
  0xfe   :  { %1031 = vpow2.f32 %v407_v49  ;;  %v1285_v58 = vadd.f32 %v961_v55, %v1250_v24  ;;  %v1288_v59 = vadd.f32 %v977_v56, %v1250_v24  ;;  %v264_v60 = vpop.f32.mrb[5].mxu0  ;;  %v328_v61 = vpop.f32.mrb[5].mxu1 }
  0xff   :  { %1033 = vpow2.f32 %v439_v50  ;;  %v1291_v63 = vadd.f32 %v1250_v24, %v264_v60  ;;  %v1294_v0 = vadd.f32 %v1250_v24, %v328_v61  ;;  %v962_v1 = vpop.f32.mrb[6].mxu0  ;;  %v978_v2 = vpop.f32.mrb[6].mxu1 }
 0x100   :  { %1035 = vpow2.f32 %v413_v53  ;;  %v381_v3 = vsub.f32 0.0, %v1285_v58  ;;  %v397_v4 = vsub.f32 0.0, %v1288_v59  ;;  %v1299_v5 = vadd.f32 %v962_v1, %v1250_v24  ;;  %v267_v6 = vpop.f32.mrb[7].mxu0  ;;  %v331_v7 = vpop.f32.mrb[7].mxu1 }
 0x101   :  { %1037 = vpow2.f32 %v445_v54  ;;  %v379_v8 = vsub.f32 0.0, %v1291_v63  ;;  %v395_v9 = vsub.f32 0.0, %v1294_v0  ;;  %v1304_v10 = vadd.f32 %v978_v2, %v1250_v24 }
 0x102   :  { %1039 = vpow2.f32 %v409_v57  ;;  %v419_v11 = vmul.f32 1.442695, %v381_v3  ;;  %v451_v12 = vmul.f32 1.442695, %v397_v4  ;;  %v382_v13 = vsub.f32 0.0, %v1299_v5 }
 0x103   :  { %1041 = vpow2.f32 %v441_v62  ;;  %v415_v14 = vmul.f32 1.442695, %v379_v8  ;;  %v447_v15 = vmul.f32 1.442695, %v395_v9  ;;  %v398_v20 = vsub.f32 0.0, %v1304_v10 }
 0x104   :  { %1043 = vpow2.f32 %v419_v11  ;;  %v421_v16 = vmul.f32 1.442695, %v382_v13  ;;  %v1309_v26 = vadd.f32 %v1250_v24, %v267_v6  ;;  %v1312_v29 = vadd.f32 %v1250_v24, %v331_v7 }
 0x105   :  { %1045 = vpow2.f32 %v451_v12  ;;  %v965_v17 = vpop.f32.mrb[8].mxu0  ;;  %v981_v18 = vpop.f32.mrb[8].mxu1  ;;  %v1314_v46 = vmul.f32 1.442695, %v398_v20 }
 0x106   :  { %v1028_v19 = vpop.eup %1027  ;;  %1047 = vpow2.f32 %v415_v14  ;;  %v280_v21 = vpop.f32.mrb[9].mxu0  ;;  %v380_v49 = vsub.f32 0.0, %v1309_v26  ;;  %v396_v50 = vsub.f32 0.0, %v1312_v29  ;;  %v1319_v53 = vadd.f32 %v965_v17, %v1250_v24 }
 0x107   :  { %v344_v22 = vpop.f32.mrb[9].mxu1  ;;  %v1030_v23 = vpop.eup %1029  ;;  %v473_v25 = vadd.f32 1.0, %v1028_v19  ;;  %1049 = vpow2.f32 %v447_v15  ;;  %v1322_v54 = vadd.f32 %v981_v18, %v1250_v24  ;;  %v1325_v57 = vadd.f32 %v1250_v24, %v280_v21 }
 0x108   :  { %v966_v30 = vpop.f32.mrb[10].mxu0  ;;  %v982_v33 = vpop.f32.mrb[10].mxu1  ;;  %v489_v35 = vadd.f32 1.0, %v1030_v23  ;;  %1051 = vpow2.f32 %v421_v16  ;;  %v1328_v60 = vadd.f32 %v1250_v24, %v344_v22  ;;  %v417_v11 = vmul.f32 1.442695, %v380_v49 }
 0x109   :  { %v1032_v34 = vpop.eup %1031  ;;  %v283_v36 = vpop.f32.mrb[11].mxu0  ;;  %1053 = vrcp.f32 %v473_v25  ;;  %v1331_v3 = vadd.f32 %v966_v30, %v1250_v24  ;;  %v1334_v4 = vadd.f32 %v982_v33, %v1250_v24  ;;  %v385_v17 = vsub.f32 0.0, %v1319_v53 }
 0x10a   :  { %v1034_v39 = vpop.eup %1033  ;;  %v471_v40 = vadd.f32 1.0, %v1032_v34  ;;  %v347_v41 = vpop.f32.mrb[11].mxu1  ;;  %1055 = vrcp.f32 %v489_v35  ;;  %v1341_v12 = vadd.f32 %v1250_v24, %v283_v36  ;;  %v401_v18 = vsub.f32 0.0, %v1322_v54 }
 0x10b   :  { %v1036_v42 = vpop.eup %1035  ;;  %v487_v45 = vadd.f32 1.0, %v1034_v39  ;;  %v383_v23 = vsub.f32 0.0, %v1325_v57  ;;  %v399_v25 = vsub.f32 0.0, %v1328_v60  ;;  %v386_v34 = vsub.f32 0.0, %v1331_v3 }
 0x10c   :  { %v1038_v47 = vpop.eup %1037  ;;  %1057 = vrcp.f32 %v471_v40  ;;  %v474_v48 = vadd.f32 1.0, %v1036_v42  ;;  %v402_v35 = vsub.f32 0.0, %v1334_v4  ;;  %v384_v40 = vsub.f32 0.0, %v1341_v12 }
 0x10d   :  { %v1040_v51 = vpop.eup %1039  ;;  %1059 = vrcp.f32 %v487_v45  ;;  %v490_v52 = vadd.f32 1.0, %v1038_v47  ;;  %v969_v61 = vpop.f32.mrb[12].mxu0  ;;  %v1359_v42 = vadd.f32 %v1250_v24, %v347_v41  ;;  %v449_v47 = vmul.f32 1.442695, %v396_v50 }
 0x10e   :  { %v1042_v55 = vpop.eup %1041  ;;  %1061 = vrcp.f32 %v474_v48  ;;  %v472_v56 = vadd.f32 1.0, %v1040_v51  ;;  %v985_v62 = vpop.f32.mrb[12].mxu1  ;;  %v427_v48 = vmul.f32 1.442695, %v385_v17  ;;  %v459_v51 = vmul.f32 1.442695, %v401_v18 }
 0x10f   :  { %v1044_v1 = vpop.eup %1043  ;;  %1063 = vrcp.f32 %v490_v52  ;;  %v488_v2 = vadd.f32 1.0, %v1042_v55  ;;  %v1336_v6 = vpop.f32.mrb[13].mxu0  ;;  %v1362_v52 = vadd.f32 %v969_v61, %v1250_v24  ;;  %v1365_v55 = vadd.f32 %v985_v62, %v1250_v24 }
 0x110   :  { %v1338_v7 = vpop.f32.mrb[13].mxu1  ;;  %v1046_v8 = vpop.eup %1045  ;;  %1065 = vrcp.f32 %v472_v56  ;;  %v477_v9 = vadd.f32 1.0, %v1044_v1  ;;  %v423_v1 = vmul.f32 1.442695, %v383_v23  ;;  %v429_v41 = vmul.f32 1.442695, %v386_v34 }
 0x111   :  { %v1343_v13 = vpop.f32.mrb[14].mxu0  ;;  %v1345_v14 = vpop.f32.mrb[14].mxu1  ;;  %1067 = vrcp.f32 %v488_v2  ;;  %v493_v16 = vadd.f32 1.0, %v1046_v8  ;;  %v455_v2 = vmul.f32 1.442695, %v399_v25 }
 0x112   :  { %v1048_v15 = vpop.eup %1047  ;;  %v1349_v19 = vpop.f32.mrb[15].mxu0  ;;  %1069 = vrcp.f32 %v477_v9  ;;  %v461_v9 = vmul.f32 1.442695, %v402_v35  ;;  %v425_v50 = vmul.f32 1.442695, %v384_v40 }
 0x113   :  { %v1351_v20 = vpop.f32.mrb[15].mxu1  ;;  %v1050_v21 = vpop.eup %1049  ;;  %v475_v22 = vadd.f32 1.0, %v1048_v15  ;;  %1071 = vrcp.f32 %v493_v16  ;;  %v400_v15 = vsub.f32 0.0, %v1359_v42 }
 0x114   :  { %v1052_v30 = vpop.eup %1051  ;;  %v491_v33 = vadd.f32 1.0, %v1050_v21  ;;  %v389_v21 = vsub.f32 0.0, %v1362_v52 }
 0x115   :  { %v1054_v36 = vpop.eup %1053  ;;  %1073 = vrcp.f32 %v475_v22  ;;  %v478_v39 = vadd.f32 1.0, %v1052_v30 }
 0x116   :  { %v1056_v45 = vpop.eup %1055  ;;  %1075 = vrcp.f32 %v491_v33  ;;  %v537_v17 = vmul.f32 %v1054_v36, %v1253_v27 }
 0x117   :  { %v1058_v49 = vpop.eup %1057  ;;  %1077 = vrcp.f32 %v478_v39  ;;  %v553_v61 = vmul.f32 %v1056_v45, %v1256_v28 }
 0x118   :  { %v1060_v56 = vpop.eup %1059  ;;  %1079 = vpow2.f32 %v1314_v46  ;;  %v535_v23 = vmul.f32 %v1058_v49, %v1259_v31  ;;  %v457_v31 = vmul.f32 1.442695, %v400_v15  ;;  %v1408_v15 = vadd.f32 %v1250_v24, %v1338_v7 }
 0x119   :  { %v1062_v8 = vpop.eup %1061  ;;  %1081 = vpow2.f32 %v417_v11  ;;  %v405_v11 = vsub.f32 0.0, %v1365_v55  ;;  %v551_v28 = vmul.f32 %v1060_v56, %v1262_v32 }
 0x11a   :  { %v1064_v16 = vpop.eup %1063  ;;  %v538_v62 = vmul.f32 %v1062_v8, %v1267_v37  ;;  %1083 = vpow2.f32 %v449_v47 }
 0x11b   :  { %v1066_v18 = vpop.eup %1065  ;;  %v554_v46 = vmul.f32 %v1064_v16, %v1270_v38  ;;  %1085 = vpow2.f32 %v427_v48  ;;  %v467_v36 = vmul.f32 1.442695, %v405_v11  ;;  %v1421_v11 = vadd.f32 %v1250_v24, %v1349_v19 }
 0x11c   :  { %v1068_v22 = vpop.eup %1067  ;;  %v828_v25 = vpack.c.bf16 %v538_v62, %v537_v17  ;;  %v536_v30 = vmul.f32 %v1066_v18, %v1275_v43  ;;  %1087 = vpow2.f32 %v459_v51  ;;  %v435_v43 = vmul.f32 1.442695, %v389_v21 }
 0x11d   :  { %v1070_v27 = vpop.eup %1069  ;;  %v868_v37 = vpack.c.bf16 %v554_v46, %v553_v61  ;;  %v552_v33 = vmul.f32 %v1068_v22, %v1278_v44  ;;  %1089 = vpow2.f32 %v423_v1  ;;  %v1412_v61 = vadd.f32 %v1343_v13, %v1250_v24 }
 0x11e   :  { %v1379_v38 = vpop.eup %1071  ;;  %900 = vst [vmem:[%s1493_s3 + $0x8] sm:$0xff] %v828_v25   ;;  %v823_v34 = vpack.c.bf16 %v536_v30, %v535_v23  ;;  %1091 = vpow2.f32 %v455_v2  ;;  %v541_v45 = vmul.f32 %v1070_v27, %v1285_v58  ;;  %v403_v23 = vsub.f32 0.0, %v1408_v15 }
 0x11f   :  { %v1384_v35 = vpop.eup %1073  ;;  %908 = vst [vmem:[%s1493_s3 + $0x48] sm:$0xff] %v868_v37   ;;  %v863_v32 = vpack.c.bf16 %v552_v33, %v551_v28  ;;  %1093 = vpow2.f32 %v429_v41  ;;  %v1426_v25 = vadd.f32 %v1250_v24, %v1351_v20  ;;  %v390_v27 = vsub.f32 0.0, %v1412_v61 }
 0x120   :  { %v1389_v44 = vpop.eup %1075  ;;  %824 = vst [vmem:[%s1493_s3] sm:$0xff] %v823_v34   ;;  %1095 = vpow2.f32 %v461_v9 }
 0x121   :  { %v1078_v39 = vpop.eup %1077  ;;  %907 = vst [vmem:[%s1493_s3 + $0x40] sm:$0xff] %v863_v32   ;;  %1097 = vpow2.f32 %v425_v50 }
 0x122   :  { %v1080_v40 = vpop.eup %1079  ;;  %v542_v47 = vmul.f32 %v1078_v39, %v1299_v5  ;;  %1099 = vpow2.f32 %v457_v31  ;;  %v1404_v5 = vadd.f32 %v1250_v24, %v1336_v6  ;;  %v1416_v6 = vadd.f32 %v1345_v14, %v1250_v24 }
 0x123   :  { %v1082_v48 = vpop.eup %1081  ;;  %v494_v49 = vadd.f32 1.0, %v1080_v40  ;;  %1101 = vpow2.f32 %v435_v43  ;;  %v388_v31 = vsub.f32 0.0, %v1421_v11  ;;  %v463_v43 = vmul.f32 1.442695, %v403_v23 }
 0x124   :  { %v1084_v51 = vpop.eup %1083  ;;  %v838_v56 = vpack.c.bf16 %v542_v47, %v541_v45  ;;  %v476_v1 = vadd.f32 1.0, %v1082_v48  ;;  %1103 = vpow2.f32 %v467_v36  ;;  %v387_v7 = vsub.f32 0.0, %v1404_v5 }
 0x125   :  { %v1086_v2 = vpop.eup %1085  ;;  %1105 = vrcp.f32 %v494_v49  ;;  %v492_v41 = vadd.f32 1.0, %v1084_v51  ;;  %v406_v19 = vsub.f32 0.0, %v1416_v6  ;;  %v404_v24 = vsub.f32 0.0, %v1426_v25 }
 0x126   :  { %v1088_v8 = vpop.eup %1087  ;;  %902 = vst [vmem:[%s1493_s3 + $0x18] sm:$0xff] %v838_v56   ;;  %1107 = vrcp.f32 %v476_v1  ;;  %v481_v58 = vadd.f32 1.0, %v1086_v2  ;;  %v431_v34 = vmul.f32 1.442695, %v387_v7  ;;  %v557_v36 = vmul.f32 %v1379_v38, %v1288_v59 }
 0x127   :  { %v1090_v9 = vpop.eup %1089  ;;  %1109 = vrcp.f32 %v492_v41  ;;  %v497_v50 = vadd.f32 1.0, %v1088_v8  ;;  %v437_v40 = vmul.f32 1.442695, %v390_v27  ;;  %v539_v47 = vmul.f32 %v1384_v35, %v1291_v63 }
 0x128   :  { %v1092_v16 = vpop.eup %1091  ;;  %1111 = vrcp.f32 %v481_v58  ;;  %v479_v17 = vadd.f32 1.0, %v1090_v9  ;;  %v555_v48 = vmul.f32 %v1389_v44, %v1294_v0  ;;  %v469_v51 = vmul.f32 1.442695, %v406_v19 }
 0x129   :  { %v1094_v62 = vpop.eup %1093  ;;  %1113 = vrcp.f32 %v497_v50  ;;  %v495_v18 = vadd.f32 1.0, %v1092_v16  ;;  %v433_v41 = vmul.f32 1.442695, %v388_v31 }
 0x12a   :  { %v1096_v46 = vpop.eup %1095  ;;  %1115 = vrcp.f32 %v479_v17  ;;  %v482_v21 = vadd.f32 1.0, %v1094_v62 }
 0x12b   :  { %v1098_v22 = vpop.eup %1097  ;;  %1117 = vrcp.f32 %v495_v18  ;;  %v498_v13 = vadd.f32 1.0, %v1096_v46 }
 0x12c   :  { %v1100_v14 = vpop.eup %1099  ;;  %1119 = vrcp.f32 %v482_v21  ;;  %v480_v30 = vadd.f32 1.0, %v1098_v22 }
 0x12d   :  { %v1102_v28 = vpop.eup %1101  ;;  %1121 = vrcp.f32 %v498_v13  ;;  %v496_v37 = vadd.f32 1.0, %v1100_v14 }
 0x12e   :  { %v1104_v33 = vpop.eup %1103  ;;  %1123 = vrcp.f32 %v480_v30  ;;  %v485_v46 = vadd.f32 1.0, %v1102_v28 }
 0x12f   :  { %v1106_v32 = vpop.eup %1105  ;;  %1125 = vrcp.f32 %v496_v37  ;;  %v501_v22 = vadd.f32 1.0, %v1104_v33 }
 0x130   :  { %v1108_v20 = vpop.eup %1107  ;;  %v558_v39 = vmul.f32 %v1106_v32, %v1304_v10  ;;  %1127 = vpow2.f32 %v431_v34  ;;  %v465_v10 = vmul.f32 1.442695, %v404_v24 }
 0x131   :  { %v1110_v45 = vpop.eup %1109  ;;  %v540_v49 = vmul.f32 %v1108_v20, %v1309_v26  ;;  %1129 = vpow2.f32 %v463_v43 }
 0x132   :  { %v1112_v56 = vpop.eup %1111  ;;  %v878_v1 = vpack.c.bf16 %v558_v39, %v557_v36  ;;  %v556_v2 = vmul.f32 %v1110_v45, %v1312_v29  ;;  %1131 = vpow2.f32 %v437_v40 }
 0x133   :  { %v1114_v59 = vpop.eup %1113  ;;  %v833_v38 = vpack.c.bf16 %v540_v49, %v539_v47  ;;  %1133 = vpow2.f32 %v469_v51  ;;  %v545_v35 = vmul.f32 %v1112_v56, %v1319_v53 }
 0x134   :  { %v1116_v8 = vpop.eup %1115  ;;  %910 = vst [vmem:[%s1493_s3 + $0x58] sm:$0xff] %v878_v1   ;;  %v873_v63 = vpack.c.bf16 %v556_v2, %v555_v48  ;;  %1135 = vpow2.f32 %v433_v41  ;;  %v561_v9 = vmul.f32 %v1114_v59, %v1322_v54 }
 0x135   :  { %v1118_v0 = vpop.eup %1117  ;;  %901 = vst [vmem:[%s1493_s3 + $0x10] sm:$0xff] %v833_v38   ;;  %1137 = vpow2.f32 %v465_v10  ;;  %v543_v17 = vmul.f32 %v1116_v8, %v1325_v57 }
 0x136   :  { %v1120_v26 = vpop.eup %1119  ;;  %909 = vst [vmem:[%s1493_s3 + $0x50] sm:$0xff] %v873_v63   ;;  %v559_v21 = vmul.f32 %v1118_v0, %v1328_v60  ;;  %1139 = vrcp.f32 %v485_v46 }
 0x137   :  { %v1122_v29 = vpop.eup %1121  ;;  %v546_v44 = vmul.f32 %v1120_v26, %v1331_v3  ;;  %1141 = vrcp.f32 %v501_v22 }
 0x138   :  { %v1124_v58 = vpop.eup %1123  ;;  %v562_v50 = vmul.f32 %v1122_v29, %v1334_v4 }
 0x139   :  { %v1126_v16 = vpop.eup %1125  ;;  %v848_v62 = vpack.c.bf16 %v546_v44, %v545_v35  ;;  %v544_v18 = vmul.f32 %v1124_v58, %v1341_v12 }
 0x13a   :  { %v888_v7 = vpack.c.bf16 %v562_v50, %v561_v9  ;;  %v560_v53 = vmul.f32 %v1126_v16, %v1359_v42  ;;  %v1128_v3 = vpop.eup %1127 }
 0x13b   :  { %904 = vst [vmem:[%s1493_s3 + $0x28] sm:$0xff] %v848_v62   ;;  %v843_v54 = vpack.c.bf16 %v544_v18, %v543_v17  ;;  %v1130_v4 = vpop.eup %1129  ;;  %v483_v60 = vadd.f32 1.0, %v1128_v3 }
 0x13c   :  { %912 = vst [vmem:[%s1493_s3 + $0x68] sm:$0xff] %v888_v7   ;;  %v883_v57 = vpack.c.bf16 %v560_v53, %v559_v21  ;;  %v1132_v12 = vpop.eup %1131  ;;  %v499_v42 = vadd.f32 1.0, %v1130_v4 }
 0x13d   :  { %903 = vst [vmem:[%s1493_s3 + $0x20] sm:$0xff] %v843_v54   ;;  %v1134_v13 = vpop.eup %1133  ;;  %1143 = vrcp.f32 %v483_v60  ;;  %v486_v23 = vadd.f32 1.0, %v1132_v12 }
 0x13e   :  { %911 = vst [vmem:[%s1493_s3 + $0x60] sm:$0xff] %v883_v57   ;;  %v1136_v14 = vpop.eup %1135  ;;  %1145 = vrcp.f32 %v499_v42  ;;  %v502_v30 = vadd.f32 1.0, %v1134_v13 }
 0x13f   :  { %v1138_v27 = vpop.eup %1137  ;;  %1147 = vrcp.f32 %v486_v23  ;;  %v484_v28 = vadd.f32 1.0, %v1136_v14 }
 0x140   :  { %1149 = vrcp.f32 %v502_v30  ;;  %v500_v37 = vadd.f32 1.0, %v1138_v27  ;;  %v1140_v19 = vpop.eup %1139 }
 0x141   :  { %1151 = vrcp.f32 %v484_v28  ;;  %v1142_v33 = vpop.eup %1141  ;;  %v549_v24 = vmul.f32 %v1140_v19, %v1362_v52 }
 0x142   :  { %1153 = vrcp.f32 %v500_v37  ;;  %v565_v39 = vmul.f32 %v1142_v33, %v1365_v55 }
 0x147   :  { %v1144_v34 = vpop.eup %1143 }
 0x148   :  { %v1146_v31 = vpop.eup %1145  ;;  %v547_v47 = vmul.f32 %v1144_v34, %v1404_v5 }
 0x149   :  { %v1148_v32 = vpop.eup %1147  ;;  %v563_v51 = vmul.f32 %v1146_v31, %v1408_v15 }
 0x14a   :  { %v1150_v43 = vpop.eup %1149  ;;  %v550_v20 = vmul.f32 %v1148_v32, %v1412_v61 }
 0x14b   :  { %v1152_v36 = vpop.eup %1151  ;;  %v566_v40 = vmul.f32 %v1150_v43, %v1416_v6 }
 0x14c   :  { %v1154_v45 = vpop.eup %1153  ;;  %v858_v48 = vpack.c.bf16 %v550_v20, %v549_v24  ;;  %v548_v49 = vmul.f32 %v1152_v36, %v1421_v11 }
 0x14d   :  { %v898_v56 = vpack.c.bf16 %v566_v40, %v565_v39  ;;  %v564_v1 = vmul.f32 %v1154_v45, %v1426_v25 }
 0x14e   :  { %906 = vst [vmem:[%s1493_s3 + $0x38] sm:$0xff] %v858_v48   ;;  %v853_v52 = vpack.c.bf16 %v548_v49, %v547_v47 }
 0x14f   :  { %914 = vst [vmem:[%s1493_s3 + $0x78] sm:$0xff] %v898_v56   ;;  %v893_v55 = vpack.c.bf16 %v564_v1, %v563_v51 }
 0x150   :  { %905 = vst [vmem:[%s1493_s3 + $0x30] sm:$0xff] %v853_v52  }
 0x151   :  { %913 = vst [vmem:[%s1493_s3 + $0x70] sm:$0xff] %v893_v55  }

// kernel: _lambda_.21
= control target key start
LH: loop header
LB: loop body
LE: loop exit
PB: predicated region body
PF: predicated region fallthrough
CT: control target
= control target key end

     0   :  { %s514_s1 = inlined_call_operand.vmem [shape: bf16[128,128], index: 1, kind: input, shape index: {}]   ;;  %s515_s0 = inlined_call_operand.vmem [shape: bf16[64,128], index: 0, kind: input, shape index: {}]   ;;  %s516_s2 = inlined_call_operand.vmem [shape: f32[1,128], index: 2, kind: input, shape index: {}]   ;;  %s517_s3 = inlined_call_operand.vmem [shape: bf16[64,128], index: 3, kind: output, shape index: {}]  }
   0x1   :  { %v379_v0 = vld [vmem:[%s514_s1] sm:$0xff]   ;;  %v380_v1 = vld [vmem:[%s514_s1 + $0x8] sm:$0xff]   ;;  %v381_v2 = vld [vmem:[%s514_s1 + $0x10] sm:$0xff]  }
   0x2   :  { %339 = vmatprep.subr.bf16.mxu0 %v379_v0  ;;  %363 = vmatprep.subr.bf16.mxu1 %v379_v0  ;;  %v382_v3 = vld [vmem:[%s514_s1 + $0x18] sm:$0xff]   ;;  %v387_v4 = vld [vmem:[%s515_s0] sm:$0xff]   ;;  %v388_v5 = vld [vmem:[%s515_s0 + $0x10] sm:$0xff]  }
   0x3   :  { %340 = vmatpush3.bf16.msra.mxu0 %v379_v0  ;;  %371 = vmatpush3.bf16.msra.mxu1 %v379_v0  ;;  %v383_v6 = vld [vmem:[%s514_s1 + $0x20] sm:$0xff]   ;;  %v384_v7 = vld [vmem:[%s514_s1 + $0x28] sm:$0xff]   ;;  %v385_v8 = vld [vmem:[%s514_s1 + $0x30] sm:$0xff]  }
   0x4   :  { %341 = vmatprep.subr.bf16.mxu0 %v380_v1  ;;  %364 = vmatprep.subr.bf16.mxu1 %v380_v1  ;;  %v386_v9 = vld [vmem:[%s514_s1 + $0x38] sm:$0xff]   ;;  %v389_v10 = vld [vmem:[%s515_s0 + $0x8] sm:$0xff]   ;;  %v275_v12 = vld [vmem:[%s516_s2] ss:$0 sm:$0xff] }
   0x5   :  { %355 = vmatprep.mubr.bf16.mxu0 %v387_v4  ;;  %359 = vmatprep.mubr.bf16.mxu1 %v388_v5  ;;  %v390_v11 = vld [vmem:[%s515_s0 + $0x18] sm:$0xff]  }
   0x7   :  { %342 = vmatpush3.bf16.msra.mxu0 %v380_v1  ;;  %372 = vmatpush3.bf16.msra.mxu1 %v380_v1 }
   0x8   :  { %343 = vmatprep.subr.bf16.mxu0 %v381_v2  ;;  %365 = vmatprep.subr.bf16.mxu1 %v381_v2 }
   0xb   :  { %344 = vmatpush3.bf16.msra.mxu0 %v381_v2  ;;  %373 = vmatpush3.bf16.msra.mxu1 %v381_v2 }
   0xc   :  { %345 = vmatprep.subr.bf16.mxu0 %v382_v3  ;;  %366 = vmatprep.subr.bf16.mxu1 %v382_v3 }
   0xf   :  { %346 = vmatpush3.bf16.msra.mxu0 %v382_v3  ;;  %374 = vmatpush3.bf16.msra.mxu1 %v382_v3 }
  0x10   :  { %347 = vmatprep.subr.bf16.mxu0 %v383_v6  ;;  %367 = vmatprep.subr.bf16.mxu1 %v383_v6 }
  0x13   :  { %348 = vmatpush3.bf16.msra.mxu0 %v383_v6  ;;  %375 = vmatpush3.bf16.msra.mxu1 %v383_v6 }
  0x14   :  { %349 = vmatprep.subr.bf16.mxu0 %v384_v7  ;;  %368 = vmatprep.subr.bf16.mxu1 %v384_v7 }
  0x17   :  { %350 = vmatpush3.bf16.msra.mxu0 %v384_v7  ;;  %376 = vmatpush3.bf16.msra.mxu1 %v384_v7 }
  0x18   :  { %351 = vmatprep.subr.bf16.mxu0 %v385_v8  ;;  %369 = vmatprep.subr.bf16.mxu1 %v385_v8 }
  0x1b   :  { %352 = vmatpush3.bf16.msra.mxu0 %v385_v8  ;;  %377 = vmatpush3.bf16.msra.mxu1 %v385_v8 }
  0x1c   :  { %353 = vmatprep.subr.bf16.mxu0 %v386_v9  ;;  %370 = vmatprep.subr.bf16.mxu1 %v386_v9 }
  0x1f   :  { %354 = vmatpush3.bf16.msra.mxu0 %v386_v9  ;;  %378 = vmatpush3.bf16.msra.mxu1 %v386_v9 }
  0x22   :  { %356 = vmatmul.mubr.bf16.vlgmr.msra.gmra.mrb[0].mxu0 %v389_v10  ;;  %360 = vmatmul.mubr.bf16.vlgmr.msra.gmra.mrb[0].mxu1 %v390_v11 }
  0xf5   :  { %v357_v13 = vpop.f32.mrb[0].mxu0  ;;  %v361_v14 = vpop.f32.mrb[0].mxu1 }
  0xf6   :  { %v482_v15 = vadd.f32 %v357_v13, %v275_v12  ;;  %v484_v16 = vadd.f32 %v361_v14, %v275_v12  ;;  %v152_v17 = vpop.f32.mrb[1].mxu0  ;;  %v168_v18 = vpop.f32.mrb[1].mxu1 }
  0xf7   :  { %v486_v19 = vadd.f32 %v275_v12, %v152_v17  ;;  %v488_v20 = vadd.f32 %v275_v12, %v168_v18  ;;  %v358_v21 = vpop.f32.mrb[2].mxu0  ;;  %v362_v22 = vpop.f32.mrb[2].mxu1 }
  0xf8   :  { %v185_v23 = vsub.f32 0.0, %v482_v15  ;;  %v189_v24 = vsub.f32 0.0, %v484_v16  ;;  %v164_v25 = vadd.f32 %v358_v21, %v275_v12  ;;  %v180_v26 = vadd.f32 %v362_v22, %v275_v12  ;;  %v155_v27 = vpop.f32.mrb[3].mxu0  ;;  %v171_v28 = vpop.f32.mrb[3].mxu1 }
  0xf9   :  { %v183_v29 = vsub.f32 0.0, %v486_v19  ;;  %v187_v30 = vsub.f32 0.0, %v488_v20  ;;  %v156_v31 = vadd.f32 %v275_v12, %v155_v27  ;;  %v494_v32 = vadd.f32 %v275_v12, %v171_v28 }
  0xfa   :  { %v195_v33 = vmul.f32 1.442695, %v185_v23  ;;  %v203_v34 = vmul.f32 1.442695, %v189_v24  ;;  %v186_v35 = vsub.f32 0.0, %v164_v25  ;;  %v190_v36 = vsub.f32 0.0, %v180_v26 }
  0xfb   :  { %v191_v37 = vmul.f32 1.442695, %v183_v29  ;;  %v199_v38 = vmul.f32 1.442695, %v187_v30  ;;  %v184_v39 = vsub.f32 0.0, %v156_v31  ;;  %v188_v40 = vsub.f32 0.0, %v494_v32 }
  0xfc   :  { %391 = vpow2.f32 %v195_v33  ;;  %v197_v41 = vmul.f32 1.442695, %v186_v35  ;;  %v205_v42 = vmul.f32 1.442695, %v190_v36 }
  0xfd   :  { %393 = vpow2.f32 %v203_v34  ;;  %v193_v43 = vmul.f32 1.442695, %v184_v39  ;;  %v201_v44 = vmul.f32 1.442695, %v188_v40 }
  0xfe   :  { %395 = vpow2.f32 %v191_v37 }
  0xff   :  { %397 = vpow2.f32 %v199_v38 }
 0x100   :  { %399 = vpow2.f32 %v197_v41 }
 0x101   :  { %401 = vpow2.f32 %v205_v42 }
 0x102   :  { %403 = vpow2.f32 %v193_v43 }
 0x103   :  { %405 = vpow2.f32 %v201_v44 }
 0x106   :  { %v392_v45 = vpop.eup %391 }
 0x107   :  { %v394_v46 = vpop.eup %393  ;;  %v209_v47 = vadd.f32 1.0, %v392_v45 }
 0x108   :  { %v396_v48 = vpop.eup %395  ;;  %v213_v49 = vadd.f32 1.0, %v394_v46 }
 0x109   :  { %v398_v50 = vpop.eup %397  ;;  %407 = vrcp.f32 %v209_v47  ;;  %v207_v51 = vadd.f32 1.0, %v396_v48 }
 0x10a   :  { %v400_v52 = vpop.eup %399  ;;  %409 = vrcp.f32 %v213_v49  ;;  %v211_v53 = vadd.f32 1.0, %v398_v50 }
 0x10b   :  { %v402_v54 = vpop.eup %401  ;;  %411 = vrcp.f32 %v207_v51  ;;  %v210_v55 = vadd.f32 1.0, %v400_v52 }
 0x10c   :  { %v404_v56 = vpop.eup %403  ;;  %413 = vrcp.f32 %v211_v53  ;;  %v214_v57 = vadd.f32 1.0, %v402_v54 }
 0x10d   :  { %v406_v58 = vpop.eup %405  ;;  %415 = vrcp.f32 %v210_v55  ;;  %v208_v59 = vadd.f32 1.0, %v404_v56 }
 0x10e   :  { %417 = vrcp.f32 %v214_v57  ;;  %v212_v60 = vadd.f32 1.0, %v406_v58 }
 0x10f   :  { %419 = vrcp.f32 %v208_v59 }
 0x110   :  { %421 = vrcp.f32 %v212_v60 }
 0x113   :  { %v408_v61 = vpop.eup %407 }
 0x114   :  { %v410_v62 = vpop.eup %409  ;;  %v225_v3 = vmul.f32 %v408_v61, %v482_v15 }
 0x115   :  { %v412_v63 = vpop.eup %411  ;;  %v229_v6 = vmul.f32 %v410_v62, %v484_v16 }
 0x116   :  { %v414_v0 = vpop.eup %413  ;;  %v223_v9 = vmul.f32 %v412_v63, %v486_v19 }
 0x117   :  { %v416_v1 = vpop.eup %415  ;;  %v227_v12 = vmul.f32 %v414_v0, %v488_v20 }
 0x118   :  { %v418_v2 = vpop.eup %417  ;;  %v226_v4 = vmul.f32 %v416_v1, %v164_v25 }
 0x119   :  { %v420_v5 = vpop.eup %419  ;;  %v230_v7 = vmul.f32 %v418_v2, %v180_v26 }
 0x11a   :  { %v422_v8 = vpop.eup %421  ;;  %v312_v10 = vpack.c.bf16 %v226_v4, %v225_v3  ;;  %v224_v11 = vmul.f32 %v420_v5, %v156_v31 }
 0x11b   :  { %v322_v13 = vpack.c.bf16 %v230_v7, %v229_v6  ;;  %v228_v14 = vmul.f32 %v422_v8, %v494_v32 }
 0x11c   :  { %324 = vst [vmem:[%s517_s3 + $0x8] sm:$0xff] %v312_v10   ;;  %v307_v15 = vpack.c.bf16 %v224_v11, %v223_v9 }
 0x11d   :  { %326 = vst [vmem:[%s517_s3 + $0x18] sm:$0xff] %v322_v13   ;;  %v317_v16 = vpack.c.bf16 %v228_v14, %v227_v12 }
 0x11e   :  { %308 = vst [vmem:[%s517_s3] sm:$0xff] %v307_v15  }
 0x11f   :  { %325 = vst [vmem:[%s517_s3 + $0x10] sm:$0xff] %v317_v16  }

// kernel: _lambda_.19
= control target key start
LH: loop header
LB: loop body
LE: loop exit
PB: predicated region body
PF: predicated region fallthrough
CT: control target
= control target key end

     0   :  { %vm181_vm0 = vcmask 130048   ;;  %s2568_s4 = inlined_call_operand.vmem [shape: bf16[16,128], index: 4, kind: input, shape index: {}]   ;;  %s2569_s3 = inlined_call_operand.vmem [shape: bf16[16,128], index: 3, kind: input, shape index: {}]   ;;  %s2570_s1 = inlined_call_operand.vmem [shape: bf16[256,16], index: 1, kind: input, shape index: {}]   ;;  %s2571_s0 = inlined_call_operand.vmem [shape: bf16[256,16], index: 0, kind: input, shape index: {}]   ;;  %s2572_s5 = inlined_call_operand.vmem [shape: bf16[16,128], index: 5, kind: input, shape index: {}]   ;;  %s2573_s2 = inlined_call_operand.vmem [shape: bf16[256,16], index: 2, kind: input, shape index: {}]   ;;  %s2574_s6 = inlined_call_operand.vmem [shape: f32[1,128], index: 6, kind: input, shape index: {}]   ;;  %s2575_s7 = inlined_call_operand.vmem [shape: bf16[256,128], index: 7, kind: output, shape index: {}]  }
   0x1   :  { %v1920_v0 = vld [vmem:[%s2568_s4] sm:$0xff]   ;;  %v1924_v4 = vld [vmem:[%s2570_s1 + $0x8] sm:$0xff]   ;;  %v1927_v7 = vld [vmem:[%s2570_s1 + $0x10] sm:$0xff]  }
   0x2   :  { %v1921_v1 = vld [vmem:[%s2569_s3] sm:$0xff]   ;;  %1752 = vmatprep.subr.bf16.mxu1 %v1920_v0  ;;  %v1925_v5 = vld [vmem:[%s2571_s0 + $0x8] sm:$0xff]   ;;  %v1928_v8 = vld [vmem:[%s2571_s0 + $0x10] sm:$0xff]  }
   0x3   :  { %v1922_v2 = vld [vmem:[%s2570_s1] sm:$0xff]   ;;  %1786 = vmatprep.subr.bf16.mxu0 %v1921_v1  ;;  %1753 = vmatpush3.bf16.msra.mxu1 %v1920_v0  ;;  %v1929_v9 = vld [vmem:[%s2570_s1 + $0x18] sm:$0xff]   ;;  %v1933_v13 = vld [vmem:[%s2570_s1 + $0x28] sm:$0xff]  }
   0x4   :  { %v1923_v3 = vld [vmem:[%s2571_s0] sm:$0xff]   ;;  %1787 = vmatpush3.bf16.msra.mxu0 %v1921_v1  ;;  %1754 = vmatprep.mubr.msk.bf16.mxu1 %vm181_vm0, %v1922_v2  ;;  %v1930_v10 = vld [vmem:[%s2571_s0 + $0x18] sm:$0xff]   ;;  %v1934_v14 = vld [vmem:[%s2571_s0 + $0x28] sm:$0xff]  }
   0x5   :  { %1788 = vmatprep.mubr.msk.bf16.mxu0 %vm181_vm0, %v1923_v3  ;;  %1854 = vmatprep.subr.bf16.mxu1 %v1921_v1  ;;  %v1926_v6 = vld [vmem:[%s2572_s5] sm:$0xff]   ;;  %v1935_v15 = vld [vmem:[%s2570_s1 + $0x30] sm:$0xff]   ;;  %v1937_v17 = vld [vmem:[%s2570_s1 + $0x38] sm:$0xff]  }
   0x6   :  { %1755 = vmatmul.mubr.msk.bf16.vlgmr.msra.gmra.mrb[0].mxu1 %vm181_vm0, %v1924_v4  ;;  %1820 = vmatprep.subr.bf16.mxu0 %v1926_v6  ;;  %v1931_v11 = vld [vmem:[%s2570_s1 + $0x20] sm:$0xff]   ;;  %v1936_v16 = vld [vmem:[%s2571_s0 + $0x30] sm:$0xff]   ;;  %v1938_v18 = vld [vmem:[%s2571_s0 + $0x38] sm:$0xff]  }
   0x7   :  { %1789 = vmatmul.mubr.msk.bf16.vlgmr.msra.gmra.mrb[0].mxu0 %vm181_vm0, %v1925_v5  ;;  %1855 = vmatpush3.bf16.msra.mxu1 %v1921_v1  ;;  %v1932_v12 = vld [vmem:[%s2571_s0 + $0x20] sm:$0xff]   ;;  %v1941_v21 = vld [vmem:[%s2570_s1 + $0x48] sm:$0xff]   ;;  %v1943_v23 = vld [vmem:[%s2570_s1 + $0x50] sm:$0xff]  }
   0x8   :  { %1821 = vmatpush3.bf16.msra.mxu0 %v1926_v6  ;;  %1758 = vmatprep.mubr.msk.bf16.mxu1 %vm181_vm0, %v1927_v7  ;;  %v1939_v19 = vld [vmem:[%s2570_s1 + $0x40] sm:$0xff]   ;;  %v1942_v22 = vld [vmem:[%s2573_s2 + $0x8] sm:$0xff]   ;;  %v1944_v24 = vld [vmem:[%s2573_s2 + $0x10] sm:$0xff]  }
   0x9   :  { %1792 = vmatprep.mubr.msk.bf16.mxu0 %vm181_vm0, %v1928_v8  ;;  %v1940_v20 = vld [vmem:[%s2573_s2] sm:$0xff]   ;;  %v1945_v25 = vld [vmem:[%s2570_s1 + $0x58] sm:$0xff]   ;;  %v1949_v29 = vld [vmem:[%s2570_s1 + $0x68] sm:$0xff]  }
   0xa   :  { %v1946_v26 = vld [vmem:[%s2573_s2 + $0x18] sm:$0xff]   ;;  %v1947_v27 = vld [vmem:[%s2570_s1 + $0x60] sm:$0xff]   ;;  %v1950_v30 = vld [vmem:[%s2573_s2 + $0x28] sm:$0xff]  }
   0xb   :  { %v1948_v28 = vld [vmem:[%s2573_s2 + $0x20] sm:$0xff]   ;;  %v1951_v31 = vld [vmem:[%s2570_s1 + $0x70] sm:$0xff]   ;;  %v1953_v33 = vld [vmem:[%s2570_s1 + $0x78] sm:$0xff]  }
   0xc   :  { %v1952_v32 = vld [vmem:[%s2573_s2 + $0x30] sm:$0xff]   ;;  %v1954_v34 = vld [vmem:[%s2573_s2 + $0x38] sm:$0xff]   ;;  %v1955_v35 = vld [vmem:[%s2571_s0 + $0x40] sm:$0xff]  }
   0xd   :  { %v1956_v36 = vld [vmem:[%s2573_s2 + $0x40] sm:$0xff]   ;;  %v1957_v37 = vld [vmem:[%s2571_s0 + $0x48] sm:$0xff]   ;;  %v1959_v39 = vld [vmem:[%s2571_s0 + $0x50] sm:$0xff]  }
   0xe   :  { %1759 = vmatmul.mubr.msk.bf16.gmra.mrb[4].mxu1 %vm181_vm0, %v1929_v9  ;;  %v1958_v38 = vld [vmem:[%s2573_s2 + $0x48] sm:$0xff]   ;;  %v1960_v40 = vld [vmem:[%s2573_s2 + $0x50] sm:$0xff]   ;;  %v1961_v41 = vld [vmem:[%s2571_s0 + $0x58] sm:$0xff]  }
   0xf   :  { %1793 = vmatmul.mubr.msk.bf16.gmra.mrb[4].mxu0 %vm181_vm0, %v1930_v10  ;;  %1762 = vmatprep.mubr.msk.bf16.mxu1 %vm181_vm0, %v1931_v11  ;;  %v1962_v42 = vld [vmem:[%s2573_s2 + $0x58] sm:$0xff]   ;;  %v1963_v43 = vld [vmem:[%s2571_s0 + $0x60] sm:$0xff]   ;;  %v1965_v45 = vld [vmem:[%s2571_s0 + $0x68] sm:$0xff]  }
  0x10   :  { %1796 = vmatprep.mubr.msk.bf16.mxu0 %vm181_vm0, %v1932_v12  ;;  %v1964_v44 = vld [vmem:[%s2573_s2 + $0x60] sm:$0xff]   ;;  %v1966_v46 = vld [vmem:[%s2573_s2 + $0x68] sm:$0xff]   ;;  %v1967_v47 = vld [vmem:[%s2571_s0 + $0x70] sm:$0xff]  }
  0x11   :  { %v1968_v48 = vld [vmem:[%s2573_s2 + $0x70] sm:$0xff]   ;;  %v1969_v49 = vld [vmem:[%s2571_s0 + $0x78] sm:$0xff]   ;;  %v2353_v4 = vld [vmem:[%s2574_s6] ss:$0 sm:$0xff] }
  0x12   :  { %v1970_v50 = vld [vmem:[%s2573_s2 + $0x78] sm:$0xff]  }
  0x16   :  { %1763 = vmatmul.mubr.msk.bf16.gmra.mrb[8].mxu1 %vm181_vm0, %v1933_v13 }
  0x17   :  { %1797 = vmatmul.mubr.msk.bf16.gmra.mrb[8].mxu0 %vm181_vm0, %v1934_v14  ;;  %1766 = vmatprep.mubr.msk.bf16.mxu1 %vm181_vm0, %v1935_v15 }
  0x18   :  { %1800 = vmatprep.mubr.msk.bf16.mxu0 %vm181_vm0, %v1936_v16 }
  0x1e   :  { %1767 = vmatmul.mubr.msk.bf16.gmra.mrb[12].mxu1 %vm181_vm0, %v1937_v17 }
  0x1f   :  { %1801 = vmatmul.mubr.msk.bf16.gmra.mrb[12].mxu0 %vm181_vm0, %v1938_v18  ;;  %1770 = vmatprep.mubr.msk.bf16.mxu1 %vm181_vm0, %v1939_v19 }
  0x20   :  { %1822 = vmatprep.mubr.msk.bf16.mxu0 %vm181_vm0, %v1940_v20 }
  0x26   :  { %1771 = vmatmul.mubr.msk.bf16.gmra.mrb[16].mxu1 %vm181_vm0, %v1941_v21 }
  0x27   :  { %1823 = vmatmul.mubr.msk.bf16.vlgmr.msra.gmra.mrb[0].mxu0 %vm181_vm0, %v1942_v22  ;;  %1774 = vmatprep.mubr.msk.bf16.mxu1 %vm181_vm0, %v1943_v23 }
  0x28   :  { %1826 = vmatprep.mubr.msk.bf16.mxu0 %vm181_vm0, %v1944_v24 }
  0x2e   :  { %1775 = vmatmul.mubr.msk.bf16.gmra.mrb[20].mxu1 %vm181_vm0, %v1945_v25 }
  0x2f   :  { %1827 = vmatmul.mubr.msk.bf16.gmra.mrb[4].mxu0 %vm181_vm0, %v1946_v26  ;;  %1778 = vmatprep.mubr.msk.bf16.mxu1 %vm181_vm0, %v1947_v27 }
  0x30   :  { %1830 = vmatprep.mubr.msk.bf16.mxu0 %vm181_vm0, %v1948_v28 }
  0x36   :  { %1779 = vmatmul.mubr.msk.bf16.gmra.mrb[24].mxu1 %vm181_vm0, %v1949_v29 }
  0x37   :  { %1831 = vmatmul.mubr.msk.bf16.gmra.mrb[8].mxu0 %vm181_vm0, %v1950_v30  ;;  %1782 = vmatprep.mubr.msk.bf16.mxu1 %vm181_vm0, %v1951_v31 }
  0x38   :  { %1834 = vmatprep.mubr.msk.bf16.mxu0 %vm181_vm0, %v1952_v32 }
  0x3e   :  { %1783 = vmatmul.mubr.msk.bf16.gmra.mrb[28].mxu1 %vm181_vm0, %v1953_v33 }
  0x3f   :  { %1835 = vmatmul.mubr.msk.bf16.gmra.mrb[12].mxu0 %vm181_vm0, %v1954_v34  ;;  %1804 = vmatprep.mubr.msk.bf16.mxu1 %vm181_vm0, %v1955_v35 }
  0x40   :  { %1838 = vmatprep.mubr.msk.bf16.mxu0 %vm181_vm0, %v1956_v36 }
  0x46   :  { %1805 = vmatmul.mubr.msk.bf16.vlgmr.msra.gmra.mrb[16].mxu1 %vm181_vm0, %v1957_v37 }
  0x47   :  { %1839 = vmatmul.mubr.msk.bf16.gmra.mrb[16].mxu0 %vm181_vm0, %v1958_v38  ;;  %1808 = vmatprep.mubr.msk.bf16.mxu1 %vm181_vm0, %v1959_v39 }
  0x48   :  { %1842 = vmatprep.mubr.msk.bf16.mxu0 %vm181_vm0, %v1960_v40 }
  0x4e   :  { %1809 = vmatmul.mubr.msk.bf16.gmra.mrb[20].mxu1 %vm181_vm0, %v1961_v41 }
  0x4f   :  { %1843 = vmatmul.mubr.msk.bf16.gmra.mrb[20].mxu0 %vm181_vm0, %v1962_v42  ;;  %1812 = vmatprep.mubr.msk.bf16.mxu1 %vm181_vm0, %v1963_v43 }
  0x50   :  { %1846 = vmatprep.mubr.msk.bf16.mxu0 %vm181_vm0, %v1964_v44 }
  0x56   :  { %1813 = vmatmul.mubr.msk.bf16.gmra.mrb[24].mxu1 %vm181_vm0, %v1965_v45 }
  0x57   :  { %1847 = vmatmul.mubr.msk.bf16.gmra.mrb[24].mxu0 %vm181_vm0, %v1966_v46  ;;  %1816 = vmatprep.mubr.msk.bf16.mxu1 %vm181_vm0, %v1967_v47 }
  0x58   :  { %1850 = vmatprep.mubr.msk.bf16.mxu0 %vm181_vm0, %v1968_v48 }
  0x5e   :  { %1817 = vmatmul.mubr.msk.bf16.gmra.mrb[28].mxu1 %vm181_vm0, %v1969_v49 }
  0x5f   :  { %1851 = vmatmul.mubr.msk.bf16.gmra.mrb[28].mxu0 %vm181_vm0, %v1970_v50 }
  0xd9   :  { %v1756_v51 = vpop.f32.mrb[0].mxu1 }
  0xda   :  { %v264_v52 = vpop.f32.mrb[1].mxu1 }
  0xdb   :  { %v1757_v53 = vpop.f32.mrb[2].mxu1 }
  0xdc   :  { %v267_v54 = vpop.f32.mrb[3].mxu1 }
  0xe1   :  { %v1760_v55 = vpop.f32.mrb[4].mxu1 }
  0xe2   :  { %v280_v56 = vpop.f32.mrb[5].mxu1 }
  0xe3   :  { %v1761_v57 = vpop.f32.mrb[6].mxu1 }
  0xe4   :  { %v283_v58 = vpop.f32.mrb[7].mxu1 }
  0xe9   :  { %v1764_v59 = vpop.f32.mrb[8].mxu1 }
  0xea   :  { %v296_v60 = vpop.f32.mrb[9].mxu1 }
  0xeb   :  { %v1765_v61 = vpop.f32.mrb[10].mxu1 }
  0xec   :  { %v2340_v62 = vpop.f32.mrb[11].mxu1 }
  0xf1   :  { %v2342_v63 = vpop.f32.mrb[12].mxu1 }
  0xf2   :  { %v2344_v0 = vpop.f32.mrb[13].mxu1 }
  0xf3   :  { %v2346_v1 = vpop.f32.mrb[14].mxu1 }
  0xf4   :  { %v2348_v2 = vpop.f32.mrb[15].mxu1 }
  0xfa   :  { %v1824_v3 = vpop.f32.mrb[0].mxu0 }
  0xfb   :  { %v1856_v5 = vadd.f32 %v1824_v3, %v1756_v51  ;;  %v888_v6 = vpop.f32.mrb[1].mxu0 }
  0xfc   :  { %v1857_v7 = vadd.f32 %v888_v6, %v264_v52  ;;  %v1825_v8 = vpop.f32.mrb[2].mxu0 }
  0xfd   :  { %v2356_v9 = vadd.f32 %v1856_v5, %v2353_v4  ;;  %v1858_v10 = vadd.f32 %v1825_v8, %v1757_v53  ;;  %v891_v11 = vpop.f32.mrb[3].mxu0 }
  0xfe   :  { %v2359_v12 = vadd.f32 %v1857_v7, %v2353_v4  ;;  %v1859_v13 = vadd.f32 %v891_v11, %v267_v54 }
  0xff   :  { %v1088_v14 = vsub.f32 0.0, %v2356_v9  ;;  %v2363_v15 = vadd.f32 %v1858_v10, %v2353_v4 }
 0x100   :  { %v1086_v16 = vsub.f32 0.0, %v2359_v12  ;;  %v2367_v17 = vadd.f32 %v1859_v13, %v2353_v4 }
 0x101   :  { %v1122_v18 = vmul.f32 1.442695, %v1088_v14  ;;  %v1089_v19 = vsub.f32 0.0, %v2363_v15 }
 0x102   :  { %v1118_v20 = vmul.f32 1.442695, %v1086_v16  ;;  %v1087_v21 = vsub.f32 0.0, %v2367_v17  ;;  %v1828_v22 = vpop.f32.mrb[4].mxu0 }
 0x103   :  { %1971 = vpow2.f32 %v1122_v18  ;;  %v1124_v23 = vmul.f32 1.442695, %v1089_v19  ;;  %v1860_v24 = vadd.f32 %v1828_v22, %v1760_v55  ;;  %v904_v25 = vpop.f32.mrb[5].mxu0 }
 0x104   :  { %1973 = vpow2.f32 %v1118_v20  ;;  %v1120_v26 = vmul.f32 1.442695, %v1087_v21  ;;  %v1861_v27 = vadd.f32 %v904_v25, %v280_v56  ;;  %v1829_v28 = vpop.f32.mrb[6].mxu0 }
 0x105   :  { %1975 = vpow2.f32 %v1124_v23  ;;  %v2372_v29 = vadd.f32 %v1860_v24, %v2353_v4  ;;  %v1862_v30 = vadd.f32 %v1829_v28, %v1761_v57  ;;  %v907_v31 = vpop.f32.mrb[7].mxu0 }
 0x106   :  { %1977 = vpow2.f32 %v1120_v26  ;;  %v2375_v32 = vadd.f32 %v1861_v27, %v2353_v4  ;;  %v1863_v33 = vadd.f32 %v907_v31, %v283_v58 }
 0x107   :  { %v1092_v34 = vsub.f32 0.0, %v2372_v29  ;;  %v2379_v35 = vadd.f32 %v1862_v30, %v2353_v4 }
 0x108   :  { %v1090_v36 = vsub.f32 0.0, %v2375_v32  ;;  %v2383_v37 = vadd.f32 %v1863_v33, %v2353_v4 }
 0x109   :  { %v1130_v38 = vmul.f32 1.442695, %v1092_v34  ;;  %v1093_v39 = vsub.f32 0.0, %v2379_v35 }
 0x10a   :  { %v1126_v40 = vmul.f32 1.442695, %v1090_v36  ;;  %v1091_v41 = vsub.f32 0.0, %v2383_v37  ;;  %v1832_v42 = vpop.f32.mrb[8].mxu0 }
 0x10b   :  { %1979 = vpow2.f32 %v1130_v38  ;;  %v1132_v43 = vmul.f32 1.442695, %v1093_v39  ;;  %v1864_v44 = vadd.f32 %v1832_v42, %v1764_v59  ;;  %v920_v45 = vpop.f32.mrb[9].mxu0 }
 0x10c   :  { %1981 = vpow2.f32 %v1126_v40  ;;  %v1128_v46 = vmul.f32 1.442695, %v1091_v41  ;;  %v1865_v47 = vadd.f32 %v920_v45, %v296_v60  ;;  %v1833_v48 = vpop.f32.mrb[10].mxu0 }
 0x10d   :  { %v1972_v49 = vpop.eup %1971  ;;  %1983 = vpow2.f32 %v1132_v43  ;;  %v2388_v50 = vadd.f32 %v1864_v44, %v2353_v4  ;;  %v1866_v51 = vadd.f32 %v1833_v48, %v1765_v61  ;;  %v923_v52 = vpop.f32.mrb[11].mxu0 }
 0x10e   :  { %v1974_v53 = vpop.eup %1973  ;;  %v1184_v54 = vadd.f32 1.0, %v1972_v49  ;;  %1985 = vpow2.f32 %v1128_v46  ;;  %v2391_v55 = vadd.f32 %v1865_v47, %v2353_v4  ;;  %v1867_v56 = vadd.f32 %v923_v52, %v2340_v62 }
 0x10f   :  { %v1976_v57 = vpop.eup %1975  ;;  %v1182_v58 = vadd.f32 1.0, %v1974_v53  ;;  %v1096_v59 = vsub.f32 0.0, %v2388_v50  ;;  %v2396_v60 = vadd.f32 %v1866_v51, %v2353_v4 }
 0x110   :  { %v1978_v3 = vpop.eup %1977  ;;  %1987 = vrcp.f32 %v1184_v54  ;;  %v1185_v5 = vadd.f32 1.0, %v1976_v57  ;;  %v1094_v61 = vsub.f32 0.0, %v2391_v55  ;;  %v2400_v6 = vadd.f32 %v1867_v56, %v2353_v4 }
 0x111   :  { %1989 = vrcp.f32 %v1182_v58  ;;  %v1183_v7 = vadd.f32 1.0, %v1978_v3  ;;  %v1138_v8 = vmul.f32 1.442695, %v1096_v59  ;;  %v1097_v62 = vsub.f32 0.0, %v2396_v60 }
 0x112   :  { %1991 = vrcp.f32 %v1185_v5  ;;  %v1134_v10 = vmul.f32 1.442695, %v1094_v61  ;;  %v1095_v11 = vsub.f32 0.0, %v2400_v6  ;;  %v1836_v13 = vpop.f32.mrb[12].mxu0 }
 0x113   :  { %1993 = vrcp.f32 %v1183_v7  ;;  %v1140_v14 = vmul.f32 1.442695, %v1097_v62  ;;  %v1868_v16 = vadd.f32 %v1836_v13, %v2342_v63  ;;  %v936_v18 = vpop.f32.mrb[13].mxu0 }
 0x114   :  { %1995 = vpow2.f32 %v1138_v8  ;;  %v1136_v19 = vmul.f32 1.442695, %v1095_v11  ;;  %v1869_v20 = vadd.f32 %v936_v18, %v2344_v0  ;;  %v1837_v21 = vpop.f32.mrb[14].mxu0 }
 0x115   :  { %v1980_v22 = vpop.eup %1979  ;;  %1997 = vpow2.f32 %v1134_v10  ;;  %v2407_v23 = vadd.f32 %v1868_v16, %v2353_v4  ;;  %v1870_v24 = vadd.f32 %v1837_v21, %v2346_v1  ;;  %v939_v25 = vpop.f32.mrb[15].mxu0 }
 0x116   :  { %v1982_v26 = vpop.eup %1981  ;;  %v1188_v27 = vadd.f32 1.0, %v1980_v22  ;;  %1999 = vpow2.f32 %v1140_v14  ;;  %v2411_v28 = vadd.f32 %v1869_v20, %v2353_v4  ;;  %v1871_v63 = vadd.f32 %v939_v25, %v2348_v2 }
 0x117   :  { %v1984_v30 = vpop.eup %1983  ;;  %v1186_v31 = vadd.f32 1.0, %v1982_v26  ;;  %2001 = vpow2.f32 %v1136_v19  ;;  %v1100_v0 = vsub.f32 0.0, %v2407_v23  ;;  %v2416_v33 = vadd.f32 %v1870_v24, %v2353_v4 }
 0x118   :  { %v1986_v34 = vpop.eup %1985  ;;  %2003 = vrcp.f32 %v1188_v27  ;;  %v1189_v1 = vadd.f32 1.0, %v1984_v30  ;;  %v1098_v36 = vsub.f32 0.0, %v2411_v28  ;;  %v2420_v38 = vadd.f32 %v1871_v63, %v2353_v4 }
 0x119   :  { %2005 = vrcp.f32 %v1186_v31  ;;  %v1187_v39 = vadd.f32 1.0, %v1986_v34  ;;  %v1146_v40 = vmul.f32 1.442695, %v1100_v0  ;;  %v1101_v2 = vsub.f32 0.0, %v2416_v33  ;;  %v1806_v41 = vpop.f32.mrb[16].mxu1 }
 0x11a   :  { %v1988_v42 = vpop.eup %1987  ;;  %2007 = vrcp.f32 %v1189_v1  ;;  %v1142_v43 = vmul.f32 1.442695, %v1098_v36  ;;  %v1099_v44 = vsub.f32 0.0, %v2420_v38  ;;  %v1840_v45 = vpop.f32.mrb[16].mxu0 }
 0x11b   :  { %v623_v46 = vpop.f32.mrb[17].mxu1  ;;  %v1990_v47 = vpop.eup %1989  ;;  %v1248_v48 = vmul.f32 %v1988_v42, %v2356_v9  ;;  %2009 = vrcp.f32 %v1187_v39  ;;  %v1148_v49 = vmul.f32 1.442695, %v1101_v2  ;;  %v1872_v51 = vadd.f32 %v1840_v45, %v1806_v41 }
 0x11c   :  { %v952_v52 = vpop.f32.mrb[17].mxu0  ;;  %v1807_v53 = vpop.f32.mrb[18].mxu1  ;;  %v1246_v56 = vmul.f32 %v1990_v47, %v2359_v12  ;;  %2011 = vpow2.f32 %v1146_v40  ;;  %v1144_v57 = vmul.f32 1.442695, %v1099_v44 }
 0x11d   :  { %v1992_v54 = vpop.eup %1991  ;;  %v1873_v58 = vadd.f32 %v952_v52, %v623_v46  ;;  %v1841_v59 = vpop.f32.mrb[18].mxu0  ;;  %2013 = vpow2.f32 %v1142_v43  ;;  %v2428_v7 = vadd.f32 %v1872_v51, %v2353_v4 }
 0x11e   :  { %v626_v3 = vpop.f32.mrb[19].mxu1  ;;  %v1994_v5 = vpop.eup %1993  ;;  %v1249_v61 = vmul.f32 %v1992_v54, %v2363_v15  ;;  %v1874_v9 = vadd.f32 %v1841_v59, %v1807_v53  ;;  %2015 = vpow2.f32 %v1148_v49 }
 0x11f   :  { %v955_v8 = vpop.f32.mrb[19].mxu0  ;;  %v1996_v62 = vpop.eup %1995  ;;  %v1247_v10 = vmul.f32 %v1994_v5, %v2367_v17  ;;  %v2432_v12 = vadd.f32 %v1873_v58, %v2353_v4  ;;  %2017 = vpow2.f32 %v1144_v57  ;;  %v1104_v15 = vsub.f32 0.0, %v2428_v7 }
 0x120   :  { %v1875_v11 = vadd.f32 %v955_v8, %v626_v3  ;;  %v1998_v13 = vpop.eup %1997  ;;  %v1614_v14 = vpack.c.bf16 %v1249_v61, %v1248_v48  ;;  %v1192_v16 = vadd.f32 1.0, %v1996_v62  ;;  %v2437_v22 = vadd.f32 %v1874_v9, %v2353_v4 }
 0x121   :  { %v2000_v18 = vpop.eup %1999  ;;  %v1609_v19 = vpack.c.bf16 %v1247_v10, %v1246_v56  ;;  %v1190_v20 = vadd.f32 1.0, %v1998_v13  ;;  %v1102_v21 = vsub.f32 0.0, %v2432_v12  ;;  %v1154_v25 = vmul.f32 1.442695, %v1104_v15  ;;  %v1810_v27 = vpop.f32.mrb[20].mxu1 }
 0x122   :  { %v2002_v17 = vpop.eup %2001  ;;  %1686 = vst [vmem:[%s2575_s7 + $0x8] sm:$0xff] %v1614_v14   ;;  %2019 = vrcp.f32 %v1192_v16  ;;  %v1193_v24 = vadd.f32 1.0, %v2000_v18  ;;  %v2443_v26 = vadd.f32 %v1875_v11, %v2353_v4  ;;  %v1105_v0 = vsub.f32 0.0, %v2437_v22  ;;  %v1844_v34 = vpop.f32.mrb[20].mxu0 }
 0x123   :  { %v2004_v63 = vpop.eup %2003  ;;  %1610 = vst [vmem:[%s2575_s7] sm:$0xff] %v1609_v19   ;;  %2021 = vrcp.f32 %v1190_v20  ;;  %v1191_v30 = vadd.f32 1.0, %v2002_v17  ;;  %v1150_v31 = vmul.f32 1.442695, %v1102_v21  ;;  %v639_v1 = vpop.f32.mrb[21].mxu1  ;;  %v1876_v2 = vadd.f32 %v1844_v34, %v1810_v27 }
 0x124   :  { %v2006_v36 = vpop.eup %2005  ;;  %v1252_v39 = vmul.f32 %v2004_v63, %v2372_v29  ;;  %2023 = vrcp.f32 %v1193_v24  ;;  %v1103_v40 = vsub.f32 0.0, %v2443_v26  ;;  %v968_v41 = vpop.f32.mrb[21].mxu0  ;;  %v1156_v45 = vmul.f32 1.442695, %v1105_v0 }
 0x125   :  { %v1811_v42 = vpop.f32.mrb[22].mxu1  ;;  %v2008_v43 = vpop.eup %2007  ;;  %v1250_v44 = vmul.f32 %v2006_v36, %v2375_v32  ;;  %2025 = vrcp.f32 %v1191_v30  ;;  %v1877_v46 = vadd.f32 %v968_v41, %v639_v1  ;;  %v2454_v29 = vadd.f32 %v1876_v2, %v2353_v4 }
 0x126   :  { %v1845_v47 = vpop.f32.mrb[22].mxu0  ;;  %v642_v48 = vpop.f32.mrb[23].mxu1  ;;  %v1253_v51 = vmul.f32 %v2008_v43, %v2379_v35  ;;  %2027 = vpow2.f32 %v1154_v25  ;;  %v1152_v52 = vmul.f32 1.442695, %v1103_v40 }
 0x127   :  { %v2010_v49 = vpop.eup %2009  ;;  %v971_v53 = vpop.f32.mrb[23].mxu0  ;;  %2029 = vpow2.f32 %v1150_v31  ;;  %v2458_v32 = vadd.f32 %v1877_v46, %v2353_v4  ;;  %v1878_v57 = vadd.f32 %v1845_v47, %v1811_v42  ;;  %v1108_v35 = vsub.f32 0.0, %v2454_v29 }
 0x128   :  { %v2012_v54 = vpop.eup %2011  ;;  %v1251_v56 = vmul.f32 %v2010_v49, %v2383_v37  ;;  %v1624_v59 = vpack.c.bf16 %v1253_v51, %v1252_v39  ;;  %2031 = vpow2.f32 %v1156_v45  ;;  %v1879_v15 = vadd.f32 %v971_v53, %v642_v48 }
 0x129   :  { %v2014_v58 = vpop.eup %2013  ;;  %v1196_v3 = vadd.f32 1.0, %v2012_v54  ;;  %2033 = vpow2.f32 %v1152_v52  ;;  %v1106_v8 = vsub.f32 0.0, %v2458_v32  ;;  %v1162_v10 = vmul.f32 1.442695, %v1108_v35  ;;  %v1814_v13 = vpop.f32.mrb[24].mxu1 }
 0x12a   :  { %v2016_v5 = vpop.eup %2015  ;;  %v1619_v61 = vpack.c.bf16 %v1251_v56, %v1250_v44  ;;  %v1194_v9 = vadd.f32 1.0, %v2014_v58  ;;  %1688 = vst [vmem:[%s2575_s7 + $0x18] sm:$0xff] %v1624_v59   ;;  %v2466_v11 = vadd.f32 %v1878_v57, %v2353_v4  ;;  %v1848_v18 = vpop.f32.mrb[24].mxu0  ;;  %v2474_v30 = vadd.f32 %v1879_v15, %v2353_v4 }
 0x12b   :  { %v2018_v62 = vpop.eup %2017  ;;  %2035 = vrcp.f32 %v1196_v3  ;;  %v1197_v37 = vadd.f32 1.0, %v2016_v5  ;;  %v1158_v16 = vmul.f32 1.442695, %v1106_v8  ;;  %v655_v19 = vpop.f32.mrb[25].mxu1  ;;  %v1880_v17 = vadd.f32 %v1848_v18, %v1814_v13 }
 0x12c   :  { %1687 = vst [vmem:[%s2575_s7 + $0x10] sm:$0xff] %v1619_v61   ;;  %2037 = vrcp.f32 %v1194_v9  ;;  %v1195_v14 = vadd.f32 1.0, %v2018_v62  ;;  %v2020_v20 = vpop.eup %2019  ;;  %v1109_v21 = vsub.f32 0.0, %v2466_v11  ;;  %v984_v24 = vpop.f32.mrb[25].mxu0 }
 0x12d   :  { %2039 = vrcp.f32 %v1197_v37  ;;  %v1815_v25 = vpop.f32.mrb[26].mxu1  ;;  %v2022_v27 = vpop.eup %2021  ;;  %v1256_v63 = vmul.f32 %v2020_v20, %v2388_v50  ;;  %v1881_v31 = vadd.f32 %v984_v24, %v655_v19  ;;  %v2478_v40 = vadd.f32 %v1880_v17, %v2353_v4 }
 0x12e   :  { %2041 = vrcp.f32 %v1195_v14  ;;  %v1849_v0 = vpop.f32.mrb[26].mxu0  ;;  %v658_v34 = vpop.f32.mrb[27].mxu1  ;;  %v1254_v36 = vmul.f32 %v2022_v27, %v2391_v55  ;;  %v1164_v39 = vmul.f32 1.442695, %v1109_v21  ;;  %v1107_v50 = vsub.f32 0.0, %v2474_v30 }
 0x12f   :  { %v2024_v1 = vpop.eup %2023  ;;  %2043 = vpow2.f32 %v1162_v10  ;;  %v987_v2 = vpop.f32.mrb[27].mxu0  ;;  %v2483_v43 = vadd.f32 %v1881_v31, %v2353_v4  ;;  %v1112_v55 = vsub.f32 0.0, %v2478_v40  ;;  %v1882_v46 = vadd.f32 %v1849_v0, %v1815_v25 }
 0x130   :  { %v2026_v41 = vpop.eup %2025  ;;  %v1257_v42 = vmul.f32 %v2024_v1, %v2396_v60  ;;  %2045 = vpow2.f32 %v1158_v16  ;;  %v1160_v51 = vmul.f32 1.442695, %v1107_v50  ;;  %v1883_v35 = vadd.f32 %v987_v2, %v658_v34 }
 0x131   :  { %v2028_v44 = vpop.eup %2027  ;;  %v1255_v45 = vmul.f32 %v2026_v41, %v2400_v6  ;;  %2047 = vpow2.f32 %v1164_v39  ;;  %v1110_v52 = vsub.f32 0.0, %v2483_v43  ;;  %v1170_v56 = vmul.f32 1.442695, %v1112_v55  ;;  %v1818_v58 = vpop.f32.mrb[28].mxu1 }
 0x132   :  { %v2030_v47 = vpop.eup %2029  ;;  %v1634_v48 = vpack.c.bf16 %v1257_v42, %v1256_v63  ;;  %v1200_v49 = vadd.f32 1.0, %v2028_v44  ;;  %v2489_v57 = vadd.f32 %v1882_v46, %v2353_v4  ;;  %v1852_v5 = vpop.f32.mrb[28].mxu0  ;;  %v2500_v15 = vadd.f32 %v1883_v35, %v2353_v4 }
 0x133   :  { %v2032_v60 = vpop.eup %2031  ;;  %v1629_v53 = vpack.c.bf16 %v1255_v45, %v1254_v36  ;;  %v1198_v54 = vadd.f32 1.0, %v2030_v47  ;;  %v1166_v3 = vmul.f32 1.442695, %v1110_v52  ;;  %v671_v61 = vpop.f32.mrb[29].mxu1  ;;  %v1884_v37 = vadd.f32 %v1852_v5, %v1818_v58 }
 0x134   :  { %v2034_v59 = vpop.eup %2033  ;;  %1690 = vst [vmem:[%s2575_s7 + $0x28] sm:$0xff] %v1634_v48   ;;  %2049 = vrcp.f32 %v1200_v49  ;;  %v1201_v6 = vadd.f32 1.0, %v2032_v60  ;;  %v1113_v62 = vsub.f32 0.0, %v2489_v57  ;;  %v1000_v10 = vpop.f32.mrb[29].mxu0 }
 0x135   :  { %v2036_v9 = vpop.eup %2035  ;;  %1689 = vst [vmem:[%s2575_s7 + $0x20] sm:$0xff] %v1629_v53   ;;  %2051 = vrcp.f32 %v1198_v54  ;;  %v1199_v8 = vadd.f32 1.0, %v2034_v59  ;;  %v1819_v13 = vpop.f32.mrb[30].mxu1  ;;  %v1885_v18 = vadd.f32 %v1000_v10, %v671_v61  ;;  %v2504_v25 = vadd.f32 %v1884_v37, %v2353_v4 }
 0x136   :  { %v2038_v14 = vpop.eup %2037  ;;  %v1260_v16 = vmul.f32 %v2036_v9, %v2407_v23  ;;  %2053 = vrcp.f32 %v1201_v6  ;;  %v1853_v19 = vpop.f32.mrb[30].mxu0  ;;  %v1172_v24 = vmul.f32 1.442695, %v1113_v62  ;;  %v1111_v23 = vsub.f32 0.0, %v2500_v15 }
 0x137   :  { %v674_v20 = vpop.f32.mrb[31].mxu1  ;;  %v2040_v21 = vpop.eup %2039  ;;  %v1258_v17 = vmul.f32 %v2038_v14, %v2411_v28  ;;  %2055 = vrcp.f32 %v1199_v8  ;;  %v2509_v0 = vadd.f32 %v1885_v18, %v2353_v4  ;;  %v1116_v28 = vsub.f32 0.0, %v2504_v25 }
 0x138   :  { %v1003_v27 = vpop.f32.mrb[31].mxu0  ;;  %v2042_v63 = vpop.eup %2041  ;;  %v1261_v31 = vmul.f32 %v2040_v21, %v2416_v33  ;;  %2057 = vpow2.f32 %v1160_v51  ;;  %v1886_v36 = vadd.f32 %v1853_v19, %v1819_v13  ;;  %v1168_v33 = vmul.f32 1.442695, %v1111_v23 }
 0x139   :  { %v2044_v34 = vpop.eup %2043  ;;  %v1259_v1 = vmul.f32 %v2042_v63, %v2420_v38  ;;  %2059 = vpow2.f32 %v1170_v56  ;;  %v1178_v44 = vmul.f32 1.442695, %v1116_v28  ;;  %v1114_v38 = vsub.f32 0.0, %v2509_v0 }
 0x13a   :  { %v2046_v39 = vpop.eup %2045  ;;  %v1644_v2 = vpack.c.bf16 %v1261_v31, %v1260_v16  ;;  %v1204_v41 = vadd.f32 1.0, %v2044_v34  ;;  %2061 = vpow2.f32 %v1166_v3  ;;  %v2518_v55 = vadd.f32 %v1886_v36, %v2353_v4 }
 0x13b   :  { %v2048_v42 = vpop.eup %2047  ;;  %v1639_v50 = vpack.c.bf16 %v1259_v1, %v1258_v17  ;;  %2063 = vpow2.f32 %v1172_v24  ;;  %v1202_v46 = vadd.f32 1.0, %v2046_v39  ;;  %v1887_v47 = vadd.f32 %v1003_v27, %v674_v20 }
 0x13c   :  { %1692 = vst [vmem:[%s2575_s7 + $0x38] sm:$0xff] %v1644_v2   ;;  %2065 = vrcp.f32 %v1204_v41  ;;  %v1205_v45 = vadd.f32 1.0, %v2048_v42  ;;  %v1117_v49 = vsub.f32 0.0, %v2518_v55  ;;  %v1174_v52 = vmul.f32 1.442695, %v1114_v38 }
 0x13d   :  { %1691 = vst [vmem:[%s2575_s7 + $0x30] sm:$0xff] %v1639_v50   ;;  %v2525_v60 = vadd.f32 %v1887_v47, %v2353_v4 }
 0x13e   :  { %v2050_v48 = vpop.eup %2049  ;;  %2067 = vrcp.f32 %v1205_v45  ;;  %v1180_v54 = vmul.f32 1.442695, %v1117_v49 }
 0x13f   :  { %v2052_v51 = vpop.eup %2051  ;;  %2069 = vpow2.f32 %v1168_v33  ;;  %v1264_v58 = vmul.f32 %v2050_v48, %v2428_v7  ;;  %v1115_v6 = vsub.f32 0.0, %v2525_v60 }
 0x140   :  { %v2054_v53 = vpop.eup %2053  ;;  %2071 = vpow2.f32 %v1178_v44  ;;  %v1262_v35 = vmul.f32 %v2052_v51, %v2432_v12 }
 0x141   :  { %v2056_v56 = vpop.eup %2055  ;;  %v1265_v59 = vmul.f32 %v2054_v53, %v2437_v22  ;;  %2073 = vrcp.f32 %v1202_v46  ;;  %v1176_v7 = vmul.f32 1.442695, %v1115_v6 }
 0x142   :  { %v2058_v3 = vpop.eup %2057  ;;  %v1263_v5 = vmul.f32 %v2056_v56, %v2443_v26  ;;  %2075 = vpow2.f32 %v1180_v54 }
 0x143   :  { %v2060_v61 = vpop.eup %2059  ;;  %v1654_v4 = vpack.c.bf16 %v1265_v59, %v1264_v58  ;;  %v1203_v9 = vadd.f32 1.0, %v2058_v3  ;;  %2077 = vpow2.f32 %v1174_v52 }
 0x144   :  { %v2062_v8 = vpop.eup %2061  ;;  %v1649_v62 = vpack.c.bf16 %v1263_v5, %v1262_v35  ;;  %v1208_v37 = vadd.f32 1.0, %v2060_v61 }
 0x145   :  { %v2064_v10 = vpop.eup %2063  ;;  %1694 = vst [vmem:[%s2575_s7 + $0x48] sm:$0xff] %v1654_v4   ;;  %2079 = vrcp.f32 %v1203_v9  ;;  %v1206_v12 = vadd.f32 1.0, %v2062_v8 }
 0x146   :  { %v2066_v22 = vpop.eup %2065  ;;  %1693 = vst [vmem:[%s2575_s7 + $0x40] sm:$0xff] %v1649_v62   ;;  %2081 = vrcp.f32 %v1208_v37  ;;  %v1209_v26 = vadd.f32 1.0, %v2064_v10 }
 0x147   :  { %v1268_v16 = vmul.f32 %v2066_v22, %v2454_v29 }
 0x148   :  { %v2068_v13 = vpop.eup %2067  ;;  %2083 = vrcp.f32 %v1209_v26 }
 0x149   :  { %v2070_v14 = vpop.eup %2069  ;;  %v1269_v18 = vmul.f32 %v2068_v13, %v2466_v11  ;;  %2085 = vpow2.f32 %v1176_v7 }
 0x14a   :  { %v2072_v19 = vpop.eup %2071  ;;  %2087 = vrcp.f32 %v1206_v12  ;;  %v1207_v20 = vadd.f32 1.0, %v2070_v14 }
 0x14b   :  { %v2074_v21 = vpop.eup %2073  ;;  %v1664_v17 = vpack.c.bf16 %v1269_v18, %v1268_v16  ;;  %v1212_v24 = vadd.f32 1.0, %v2072_v19 }
 0x14c   :  { %v2076_v27 = vpop.eup %2075  ;;  %2089 = vrcp.f32 %v1207_v20  ;;  %v1266_v11 = vmul.f32 %v2074_v21, %v2458_v32 }
 0x14d   :  { %v2078_v63 = vpop.eup %2077  ;;  %1696 = vst [vmem:[%s2575_s7 + $0x58] sm:$0xff] %v1664_v17   ;;  %2091 = vrcp.f32 %v1212_v24  ;;  %v1213_v31 = vadd.f32 1.0, %v2076_v27 }
 0x14e   :  { %v1210_v1 = vadd.f32 1.0, %v2078_v63 }
 0x14f   :  { %v2080_v23 = vpop.eup %2079  ;;  %2093 = vrcp.f32 %v1213_v31 }
 0x150   :  { %v2082_v29 = vpop.eup %2081  ;;  %v1267_v34 = vmul.f32 %v2080_v23, %v2474_v30  ;;  %2095 = vrcp.f32 %v1210_v1 }
 0x151   :  { %v1272_v2 = vmul.f32 %v2082_v29, %v2478_v40 }
 0x152   :  { %v2084_v28 = vpop.eup %2083  ;;  %v1659_v36 = vpack.c.bf16 %v1267_v34, %v1266_v11 }
 0x153   :  { %v2086_v39 = vpop.eup %2085  ;;  %v1273_v41 = vmul.f32 %v2084_v28, %v2489_v57 }
 0x154   :  { %v2088_v42 = vpop.eup %2087  ;;  %1695 = vst [vmem:[%s2575_s7 + $0x50] sm:$0xff] %v1659_v36   ;;  %v1211_v50 = vadd.f32 1.0, %v2086_v39 }
 0x155   :  { %v1674_v33 = vpack.c.bf16 %v1273_v41, %v1272_v2  ;;  %v1270_v30 = vmul.f32 %v2088_v42, %v2483_v43 }
 0x156   :  { %v2090_v44 = vpop.eup %2089  ;;  %2097 = vrcp.f32 %v1211_v50 }
 0x157   :  { %v2092_v32 = vpop.eup %2091  ;;  %1698 = vst [vmem:[%s2575_s7 + $0x68] sm:$0xff] %v1674_v33   ;;  %v1271_v40 = vmul.f32 %v2090_v44, %v2500_v15 }
 0x158   :  { %v1276_v38 = vmul.f32 %v2092_v32, %v2504_v25 }
 0x159   :  { %v2094_v57 = vpop.eup %2093  ;;  %v1669_v45 = vpack.c.bf16 %v1271_v40, %v1270_v30 }
 0x15a   :  { %v1277_v46 = vmul.f32 %v2094_v57, %v2518_v55  ;;  %v2096_v48 = vpop.eup %2095 }
 0x15b   :  { %1697 = vst [vmem:[%s2575_s7 + $0x60] sm:$0xff] %v1669_v45   ;;  %v1274_v49 = vmul.f32 %v2096_v48, %v2509_v0 }
 0x15c   :  { %v1684_v47 = vpack.c.bf16 %v1277_v46, %v1276_v38 }
 0x15e   :  { %1700 = vst [vmem:[%s2575_s7 + $0x78] sm:$0xff] %v1684_v47  }
 0x160   :  { %v2098_v43 = vpop.eup %2097 }
 0x161   :  { %v1275_v15 = vmul.f32 %v2098_v43, %v2525_v60 }
 0x163   :  { %v1679_v51 = vpack.c.bf16 %v1275_v15, %v1274_v49 }
 0x165   :  { %1699 = vst [vmem:[%s2575_s7 + $0x70] sm:$0xff] %v1679_v51  }

// kernel: _lambda_.22
= control target key start
LH: loop header
LB: loop body
LE: loop exit
PB: predicated region body
PF: predicated region fallthrough
CT: control target
= control target key end

     0   :  { %vm89_vm0 = vcmask 261120   ;;  %s1042_s5 = inlined_call_operand.vmem [shape: bf16[32,128], index: 5, kind: input, shape index: {}]   ;;  %s1043_s6 = inlined_call_operand.vmem [shape: bf16[32,128], index: 6, kind: input, shape index: {}]   ;;  %s1044_s1 = inlined_call_operand.vmem [shape: bf16[64,32], index: 1, kind: input, shape index: {}]   ;;  %s1045_s2 = inlined_call_operand.vmem [shape: bf16[64,32], index: 2, kind: input, shape index: {}]   ;;  %s1046_s4 = inlined_call_operand.vmem [shape: bf16[32,128], index: 4, kind: input, shape index: {}]   ;;  %s1047_s7 = inlined_call_operand.vmem [shape: bf16[32,128], index: 7, kind: input, shape index: {}]   ;;  %s1048_s0 = inlined_call_operand.vmem [shape: bf16[64,32], index: 0, kind: input, shape index: {}]   ;;  %s1049_s3 = inlined_call_operand.vmem [shape: bf16[64,32], index: 3, kind: input, shape index: {}]   ;;  %s1050_s8 = inlined_call_operand.vmem [shape: f32[1,128], index: 8, kind: input, shape index: {}]   ;;  %s1051_s9 = inlined_call_operand.vmem [shape: bf16[64,128], index: 9, kind: output, shape index: {}]  }
   0x1   :  { %v817_v0 = vld [vmem:[%s1042_s5] sm:$0xff]   ;;  %v819_v2 = vld [vmem:[%s1042_s5 + $0x8] sm:$0xff]   ;;  %v827_v10 = vld [vmem:[%s1044_s1 + $0x10] sm:$0xff]  }
   0x2   :  { %v818_v1 = vld [vmem:[%s1043_s6] sm:$0xff]   ;;  %745 = vmatprep.subr.bf16.mxu1 %v817_v0  ;;  %v820_v3 = vld [vmem:[%s1043_s6 + $0x8] sm:$0xff]   ;;  %v828_v11 = vld [vmem:[%s1045_s2 + $0x10] sm:$0xff]  }
   0x3   :  { %769 = vmatprep.subr.bf16.mxu0 %v818_v1  ;;  %746 = vmatpush3.bf16.msra.mxu1 %v817_v0  ;;  %v821_v4 = vld [vmem:[%s1044_s1] sm:$0xff]   ;;  %v823_v6 = vld [vmem:[%s1044_s1 + $0x8] sm:$0xff]   ;;  %v829_v12 = vld [vmem:[%s1044_s1 + $0x18] sm:$0xff]  }
   0x4   :  { %770 = vmatpush3.bf16.msra.mxu0 %v818_v1  ;;  %747 = vmatprep.subr.bf16.mxu1 %v819_v2  ;;  %v822_v5 = vld [vmem:[%s1045_s2] sm:$0xff]   ;;  %v825_v8 = vld [vmem:[%s1045_s2 + $0x8] sm:$0xff]   ;;  %v831_v14 = vld [vmem:[%s1045_s2 + $0x18] sm:$0xff]  }
   0x5   :  { %771 = vmatprep.subr.bf16.mxu0 %v820_v3  ;;  %749 = vmatprep.mubr.msk.bf16.mxu1 %vm89_vm0, %v821_v4  ;;  %v824_v7 = vld [vmem:[%s1046_s4] sm:$0xff]   ;;  %v830_v13 = vld [vmem:[%s1046_s4 + $0x8] sm:$0xff]   ;;  %v837_v20 = vld [vmem:[%s1048_s0 + $0x10] sm:$0xff]  }
   0x6   :  { %773 = vmatprep.mubr.msk.bf16.mxu0 %vm89_vm0, %v822_v5  ;;  %v826_v9 = vld [vmem:[%s1047_s7] sm:$0xff]   ;;  %v832_v15 = vld [vmem:[%s1047_s7 + $0x8] sm:$0xff]   ;;  %v838_v21 = vld [vmem:[%s1049_s3 + $0x10] sm:$0xff]  }
   0x7   :  { %748 = vmatpush3.bf16.msra.mxu1 %v819_v2  ;;  %v833_v16 = vld [vmem:[%s1048_s0] sm:$0xff]   ;;  %v835_v18 = vld [vmem:[%s1048_s0 + $0x8] sm:$0xff]   ;;  %v839_v22 = vld [vmem:[%s1048_s0 + $0x18] sm:$0xff]  }
   0x8   :  { %772 = vmatpush3.bf16.msra.mxu0 %v820_v3  ;;  %757 = vmatprep.subr.bf16.mxu1 %v824_v7  ;;  %v834_v17 = vld [vmem:[%s1049_s3] sm:$0xff]   ;;  %v836_v19 = vld [vmem:[%s1049_s3 + $0x8] sm:$0xff]   ;;  %v840_v23 = vld [vmem:[%s1049_s3 + $0x18] sm:$0xff]  }
   0x9   :  { %781 = vmatprep.subr.bf16.mxu0 %v826_v9  ;;  %v681_v26 = vld [vmem:[%s1050_s8] ss:$0 sm:$0xff] }
   0xa   :  { %750 = vmatmul.mubr.msk.bf16.vlgmr.msra.gmra.mrb[0].mxu1 %vm89_vm0, %v823_v6 }
   0xb   :  { %774 = vmatmul.mubr.msk.bf16.vlgmr.msra.gmra.mrb[0].mxu0 %vm89_vm0, %v825_v8  ;;  %758 = vmatpush3.bf16.msra.mxu1 %v824_v7 }
   0xc   :  { %782 = vmatpush3.bf16.msra.mxu0 %v826_v9  ;;  %753 = vmatprep.mubr.msk.bf16.mxu1 %vm89_vm0, %v827_v10 }
   0xd   :  { %777 = vmatprep.mubr.msk.bf16.mxu0 %vm89_vm0, %v828_v11  ;;  %759 = vmatprep.subr.bf16.mxu1 %v830_v13 }
   0xe   :  { %783 = vmatprep.subr.bf16.mxu0 %v832_v15 }
   0xf   :  { %760 = vmatpush3.bf16.msra.mxu1 %v830_v13 }
  0x10   :  { %784 = vmatpush3.bf16.msra.mxu0 %v832_v15 }
  0x12   :  { %754 = vmatmul.mubr.msk.bf16.gmra.mrb[4].mxu1 %vm89_vm0, %v829_v12 }
  0x13   :  { %778 = vmatmul.mubr.msk.bf16.gmra.mrb[4].mxu0 %vm89_vm0, %v831_v14  ;;  %761 = vmatprep.mubr.msk.bf16.mxu1 %vm89_vm0, %v833_v16 }
  0x14   :  { %785 = vmatprep.mubr.msk.bf16.mxu0 %vm89_vm0, %v834_v17 }
  0x1a   :  { %762 = vmatmul.mubr.msk.bf16.vlgmr.msra.gmra.mrb[0].mxu1 %vm89_vm0, %v835_v18 }
  0x1b   :  { %786 = vmatmul.mubr.msk.bf16.vlgmr.msra.gmra.mrb[0].mxu0 %vm89_vm0, %v836_v19  ;;  %765 = vmatprep.mubr.msk.bf16.mxu1 %vm89_vm0, %v837_v20 }
  0x1c   :  { %789 = vmatprep.mubr.msk.bf16.mxu0 %vm89_vm0, %v838_v21 }
  0x22   :  { %766 = vmatmul.mubr.msk.bf16.gmra.mrb[4].mxu1 %vm89_vm0, %v839_v22 }
  0x23   :  { %790 = vmatmul.mubr.msk.bf16.gmra.mrb[4].mxu0 %vm89_vm0, %v840_v23 }
  0xed   :  { %v763_v24 = vpop.f32.mrb[0].mxu1 }
  0xee   :  { %v787_v25 = vpop.f32.mrb[0].mxu0  ;;  %v245_v27 = vpop.f32.mrb[1].mxu1 }
  0xef   :  { %v793_v28 = vadd.f32 %v787_v25, %v763_v24  ;;  %v495_v29 = vpop.f32.mrb[1].mxu0  ;;  %v764_v30 = vpop.f32.mrb[2].mxu1 }
  0xf0   :  { %v794_v31 = vadd.f32 %v495_v29, %v245_v27  ;;  %v788_v32 = vpop.f32.mrb[2].mxu0  ;;  %v248_v33 = vpop.f32.mrb[3].mxu1 }
  0xf1   :  { %v1014_v34 = vadd.f32 %v793_v28, %v681_v26  ;;  %v795_v35 = vadd.f32 %v788_v32, %v764_v30  ;;  %v498_v36 = vpop.f32.mrb[3].mxu0 }
  0xf2   :  { %v1016_v37 = vadd.f32 %v794_v31, %v681_v26  ;;  %v796_v38 = vadd.f32 %v498_v36, %v248_v33 }
  0xf3   :  { %v551_v39 = vsub.f32 0.0, %v1014_v34  ;;  %v1019_v40 = vadd.f32 %v795_v35, %v681_v26 }
  0xf4   :  { %v549_v41 = vsub.f32 0.0, %v1016_v37  ;;  %v1022_v42 = vadd.f32 %v796_v38, %v681_v26 }
  0xf5   :  { %v561_v43 = vmul.f32 1.442695, %v551_v39  ;;  %v552_v44 = vsub.f32 0.0, %v1019_v40  ;;  %v767_v45 = vpop.f32.mrb[4].mxu1 }
  0xf6   :  { %v557_v46 = vmul.f32 1.442695, %v549_v41  ;;  %v550_v47 = vsub.f32 0.0, %v1022_v42  ;;  %v791_v48 = vpop.f32.mrb[4].mxu0  ;;  %v261_v49 = vpop.f32.mrb[5].mxu1 }
  0xf7   :  { %841 = vpow2.f32 %v561_v43  ;;  %v563_v50 = vmul.f32 1.442695, %v552_v44  ;;  %v797_v51 = vadd.f32 %v791_v48, %v767_v45  ;;  %v511_v52 = vpop.f32.mrb[5].mxu0  ;;  %v768_v53 = vpop.f32.mrb[6].mxu1 }
  0xf8   :  { %843 = vpow2.f32 %v557_v46  ;;  %v559_v54 = vmul.f32 1.442695, %v550_v47  ;;  %v798_v55 = vadd.f32 %v511_v52, %v261_v49  ;;  %v792_v56 = vpop.f32.mrb[6].mxu0  ;;  %v264_v57 = vpop.f32.mrb[7].mxu1 }
  0xf9   :  { %845 = vpow2.f32 %v563_v50  ;;  %v547_v58 = vadd.f32 %v797_v51, %v681_v26  ;;  %v799_v59 = vadd.f32 %v792_v56, %v768_v53  ;;  %v514_v60 = vpop.f32.mrb[7].mxu0 }
  0xfa   :  { %847 = vpow2.f32 %v559_v54  ;;  %v545_v61 = vadd.f32 %v798_v55, %v681_v26  ;;  %v800_v62 = vadd.f32 %v514_v60, %v264_v57 }
  0xfb   :  { %v555_v63 = vsub.f32 0.0, %v547_v58  ;;  %v548_v0 = vadd.f32 %v799_v59, %v681_v26 }
  0xfc   :  { %v553_v1 = vsub.f32 0.0, %v545_v61  ;;  %v546_v2 = vadd.f32 %v800_v62, %v681_v26 }
  0xfd   :  { %v569_v3 = vmul.f32 1.442695, %v555_v63  ;;  %v556_v4 = vsub.f32 0.0, %v548_v0 }
  0xfe   :  { %v565_v5 = vmul.f32 1.442695, %v553_v1  ;;  %v554_v6 = vsub.f32 0.0, %v546_v2 }
  0xff   :  { %849 = vpow2.f32 %v569_v3  ;;  %v571_v7 = vmul.f32 1.442695, %v556_v4 }
 0x100   :  { %851 = vpow2.f32 %v565_v5  ;;  %v567_v8 = vmul.f32 1.442695, %v554_v6 }
 0x101   :  { %v842_v9 = vpop.eup %841  ;;  %853 = vpow2.f32 %v571_v7 }
 0x102   :  { %v844_v10 = vpop.eup %843  ;;  %v575_v11 = vadd.f32 1.0, %v842_v9  ;;  %855 = vpow2.f32 %v567_v8 }
 0x103   :  { %v846_v12 = vpop.eup %845  ;;  %v573_v13 = vadd.f32 1.0, %v844_v10 }
 0x104   :  { %v848_v14 = vpop.eup %847  ;;  %857 = vrcp.f32 %v575_v11  ;;  %v576_v15 = vadd.f32 1.0, %v846_v12 }
 0x105   :  { %859 = vrcp.f32 %v573_v13  ;;  %v574_v16 = vadd.f32 1.0, %v848_v14 }
 0x106   :  { %861 = vrcp.f32 %v576_v15 }
 0x107   :  { %863 = vrcp.f32 %v574_v16 }
 0x109   :  { %v850_v17 = vpop.eup %849 }
 0x10a   :  { %v852_v18 = vpop.eup %851  ;;  %v579_v19 = vadd.f32 1.0, %v850_v17 }
 0x10b   :  { %v854_v20 = vpop.eup %853  ;;  %v577_v21 = vadd.f32 1.0, %v852_v18 }
 0x10c   :  { %v856_v22 = vpop.eup %855  ;;  %865 = vrcp.f32 %v579_v19  ;;  %v580_v23 = vadd.f32 1.0, %v854_v20 }
 0x10d   :  { %867 = vrcp.f32 %v577_v21  ;;  %v578_v24 = vadd.f32 1.0, %v856_v22 }
 0x10e   :  { %v858_v25 = vpop.eup %857  ;;  %869 = vrcp.f32 %v580_v23 }
 0x10f   :  { %v860_v26 = vpop.eup %859  ;;  %871 = vrcp.f32 %v578_v24  ;;  %v591_v29 = vmul.f32 %v858_v25, %v1014_v34 }
 0x110   :  { %v862_v27 = vpop.eup %861  ;;  %v589_v31 = vmul.f32 %v860_v26, %v1016_v37 }
 0x111   :  { %v864_v28 = vpop.eup %863  ;;  %v592_v30 = vmul.f32 %v862_v27, %v1019_v40 }
 0x112   :  { %v590_v32 = vmul.f32 %v864_v28, %v1022_v42 }
 0x113   :  { %v706_v33 = vpack.c.bf16 %v592_v30, %v591_v29 }
 0x114   :  { %v701_v35 = vpack.c.bf16 %v590_v32, %v589_v31 }
 0x115   :  { %718 = vst [vmem:[%s1051_s9 + $0x8] sm:$0xff] %v706_v33  }
 0x116   :  { %v866_v36 = vpop.eup %865  ;;  %702 = vst [vmem:[%s1051_s9] sm:$0xff] %v701_v35  }
 0x117   :  { %v868_v38 = vpop.eup %867  ;;  %v595_v41 = vmul.f32 %v866_v36, %v547_v58 }
 0x118   :  { %v870_v39 = vpop.eup %869  ;;  %v593_v43 = vmul.f32 %v868_v38, %v545_v61 }
 0x119   :  { %v872_v34 = vpop.eup %871  ;;  %v596_v40 = vmul.f32 %v870_v39, %v548_v0 }
 0x11a   :  { %v594_v37 = vmul.f32 %v872_v34, %v546_v2 }
 0x11b   :  { %v716_v44 = vpack.c.bf16 %v596_v40, %v595_v41 }
 0x11c   :  { %v711_v42 = vpack.c.bf16 %v594_v37, %v593_v43 }
 0x11d   :  { %720 = vst [vmem:[%s1051_s9 + $0x18] sm:$0xff] %v716_v44  }
 0x11e   :  { %719 = vst [vmem:[%s1051_s9 + $0x10] sm:$0xff] %v711_v42  }

// kernel: _lambda_.17
= control target key start
LH: loop header
LB: loop body
LE: loop exit
PB: predicated region body
PF: predicated region fallthrough
CT: control target
= control target key end

     0   :  { %s6515_s10 = inlined_call_operand.vmem [shape: bf16[128,128], index: 10, kind: input, shape index: {}]   ;;  %s6516_s13 = inlined_call_operand.vmem [shape: bf16[128,128], index: 13, kind: input, shape index: {}]   ;;  %s6517_s1 = inlined_call_operand.vmem [shape: bf16[256,128], index: 1, kind: input, shape index: {}]   ;;  %s6518_s4 = inlined_call_operand.vmem [shape: bf16[256,128], index: 4, kind: input, shape index: {}]   ;;  %s6519_s9 = inlined_call_operand.vmem [shape: bf16[128,128], index: 9, kind: input, shape index: {}]   ;;  %s6520_s14 = inlined_call_operand.vmem [shape: bf16[128,128], index: 14, kind: input, shape index: {}]   ;;  %s6521_s5 = inlined_call_operand.vmem [shape: bf16[256,128], index: 5, kind: input, shape index: {}]   ;;  %s6522_s15 = inlined_call_operand.vmem [shape: bf16[128,128], index: 15, kind: input, shape index: {}]   ;;  %s6523_s0 = inlined_call_operand.vmem [shape: bf16[256,128], index: 0, kind: input, shape index: {}]   ;;  %s6524_s11 = inlined_call_operand.vmem [shape: bf16[128,128], index: 11, kind: input, shape index: {}]   ;;  %s6525_s6 = inlined_call_operand.vmem [shape: bf16[256,128], index: 6, kind: input, shape index: {}]   ;;  %s6526_s16 = inlined_call_operand.vmem [shape: bf16[128,128], index: 16, kind: input, shape index: {}]   ;;  %s6527_s2 = inlined_call_operand.vmem [shape: bf16[256,128], index: 2, kind: input, shape index: {}]   ;;  %s6528_s12 = inlined_call_operand.vmem [shape: bf16[128,128], index: 12, kind: input, shape index: {}]   ;;  %s6529_s7 = inlined_call_operand.vmem [shape: bf16[256,128], index: 7, kind: input, shape index: {}]   ;;  %s6530_s17 = inlined_call_operand.vmem [shape: bf16[128,128], index: 17, kind: input, shape index: {}]   ;;  %s6531_s3 = inlined_call_operand.vmem [shape: bf16[256,128], index: 3, kind: input, shape index: {}]   ;;  %s6532_s8 = inlined_call_operand.vmem [shape: bf16[256,128], index: 8, kind: input, shape index: {}]   ;;  %s6533_s18 = inlined_call_operand.vmem [shape: f32[1,128], index: 18, kind: input, shape index: {}]   ;;  %s6534_s19 = inlined_call_operand.vmem [shape: bf16[256,128], index: 19, kind: output, shape index: {}]  }
   0x1   :  { %6540 = sst [smem:[#allocation2_spill]] %s6515_s10  ;;  %v5174_v19 = vld [vmem:[%s6519_s9] sm:$0xff]   ;;  %v5177_v22 = vld [vmem:[%s6520_s14 + $0x8] sm:$0xff]   ;;  %v5188_v27 = vld [vmem:[%s6519_s9 + $0x10] sm:$0xff]  }
   0x2   :  { %6541 = sst [smem:[#allocation3_spill]] %s6516_s13  ;;  %s6545_s20 = sld [smem:[#allocation2_spill]]  ;;  %v5176_v20 = vld [vmem:[%s6520_s14] sm:$0xff]   ;;  %v5181_v25 = vld [vmem:[%s6519_s9 + $0x8] sm:$0xff]   ;;  %v5183_v28 = vld [vmem:[%s6520_s14 + $0x10] sm:$0xff]  }
   0x3   :  { %6542 = sst [smem:[#allocation4_spill]] %s6517_s1  ;;  %v5184_v32 = vld [vmem:[%s6520_s14 + $0x18] sm:$0xff]   ;;  %v5190_v36 = vld [vmem:[%s6520_s14 + $0x20] sm:$0xff]   ;;  %v5191_v40 = vld [vmem:[%s6520_s14 + $0x28] sm:$0xff]  }
   0x4   :  { %6543 = sst [smem:[#allocation5_spill]] %s6518_s4  ;;  %s6547_s28 = sld [smem:[#allocation4_spill]]  ;;  %v5195_v33 = vld [vmem:[%s6519_s9 + $0x18] sm:$0xff]   ;;  %v5202_v38 = vld [vmem:[%s6519_s9 + $0x20] sm:$0xff]   ;;  %v5197_v42 = vld [vmem:[%s6520_s14 + $0x30] sm:$0xff]  }
   0x5   :  { %6544 = sst [smem:[#allocation6_spill]] %s6529_s7  ;;  %s6546_s7 = sld [smem:[#allocation3_spill]]  ;;  %v5208_v43 = vld [vmem:[%s6519_s9 + $0x28] sm:$0xff]   ;;  %v5200_v46 = vld [vmem:[%s6521_s5] sm:$0xff]   ;;  %v5198_v47 = vld [vmem:[%s6520_s14 + $0x38] sm:$0xff]  }
   0x6   :  { %s6548_s30 = sld [smem:[#allocation5_spill]]  ;;  %v5214_v48 = vld [vmem:[%s6519_s9 + $0x30] sm:$0xff]   ;;  %v5203_v50 = vld [vmem:[%s6521_s5 + $0x8] sm:$0xff]   ;;  %v5204_v51 = vld [vmem:[%s6522_s15] sm:$0xff]  }
   0x7   :  { %v5206_v53 = vld [vmem:[%s6521_s5 + $0x10] sm:$0xff]   ;;  %v5210_v54 = vld [vmem:[%s6522_s15 + $0x8] sm:$0xff]   ;;  %v5220_v55 = vld [vmem:[%s6519_s9 + $0x38] sm:$0xff]  }
   0x8   :  { %v5155_v0 = vld [vmem:[%s6545_s20] sm:$0xff]   ;;  %v5157_v2 = vld [vmem:[%s6545_s20 + $0x8] sm:$0xff]   ;;  %v5159_v4 = vld [vmem:[%s6545_s20 + $0x10] sm:$0xff]  }
   0x9   :  { %4451 = vmatprep.subr.bf16.mxu1 %v5155_v0  ;;  %v5161_v6 = vld [vmem:[%s6545_s20 + $0x18] sm:$0xff]   ;;  %v5163_v8 = vld [vmem:[%s6545_s20 + $0x20] sm:$0xff]   ;;  %v5165_v10 = vld [vmem:[%s6545_s20 + $0x28] sm:$0xff]  }
   0xa   :  { %4452 = vmatpush3.bf16.msra.mxu1 %v5155_v0  ;;  %v5171_v12 = vld [vmem:[%s6547_s28] sm:$0xff]   ;;  %v5167_v14 = vld [vmem:[%s6545_s20 + $0x30] sm:$0xff]   ;;  %v5169_v16 = vld [vmem:[%s6545_s20 + $0x38] sm:$0xff]  }
   0xb   :  { %v5156_v1 = vld [vmem:[%s6546_s7] sm:$0xff]   ;;  %v5158_v3 = vld [vmem:[%s6546_s7 + $0x8] sm:$0xff]   ;;  %4453 = vmatprep.subr.bf16.mxu1 %v5157_v2  ;;  %v5160_v5 = vld [vmem:[%s6546_s7 + $0x10] sm:$0xff]   ;;  %4467 = vmatprep.mubr.bf16.mxu1 %v5171_v12 }
   0xc   :  { %4643 = vmatprep.subr.bf16.mxu0 %v5156_v1  ;;  %v5162_v7 = vld [vmem:[%s6546_s7 + $0x18] sm:$0xff]   ;;  %v5164_v9 = vld [vmem:[%s6546_s7 + $0x20] sm:$0xff]   ;;  %v5166_v11 = vld [vmem:[%s6546_s7 + $0x28] sm:$0xff]  }
   0xd   :  { %4644 = vmatpush3.bf16.msra.mxu0 %v5156_v1  ;;  %v5172_v13 = vld [vmem:[%s6548_s30] sm:$0xff]   ;;  %v5168_v15 = vld [vmem:[%s6546_s7 + $0x30] sm:$0xff]   ;;  %v5170_v17 = vld [vmem:[%s6546_s7 + $0x38] sm:$0xff]  }
   0xe   :  { %4645 = vmatprep.subr.bf16.mxu0 %v5158_v3  ;;  %4454 = vmatpush3.bf16.msra.mxu1 %v5157_v2  ;;  %v5173_v18 = vld [vmem:[%s6547_s28 + $0x8] sm:$0xff]   ;;  %v5178_v23 = vld [vmem:[%s6547_s28 + $0x10] sm:$0xff]   ;;  %v5180_v26 = vld [vmem:[%s6547_s28 + $0x18] sm:$0xff]  }
   0xf   :  { %4455 = vmatprep.subr.bf16.mxu1 %v5159_v4  ;;  %4659 = vmatprep.mubr.bf16.mxu0 %v5172_v13  ;;  %v5175_v21 = vld [vmem:[%s6548_s30 + $0x8] sm:$0xff]   ;;  %v5179_v24 = vld [vmem:[%s6548_s30 + $0x10] sm:$0xff]   ;;  %v5182_v29 = vld [vmem:[%s6548_s30 + $0x18] sm:$0xff]  }
  0x10   :  { %v5185_v30 = vld [vmem:[%s6547_s28 + $0x20] sm:$0xff]   ;;  %v5187_v34 = vld [vmem:[%s6547_s28 + $0x28] sm:$0xff]   ;;  %v5192_v37 = vld [vmem:[%s6547_s28 + $0x30] sm:$0xff]  }
  0x11   :  { %4646 = vmatpush3.bf16.msra.mxu0 %v5158_v3  ;;  %v5186_v31 = vld [vmem:[%s6548_s30 + $0x20] sm:$0xff]   ;;  %v5189_v35 = vld [vmem:[%s6548_s30 + $0x28] sm:$0xff]   ;;  %v5193_v39 = vld [vmem:[%s6548_s30 + $0x30] sm:$0xff]  }
  0x12   :  { %4647 = vmatprep.subr.bf16.mxu0 %v5160_v5  ;;  %4456 = vmatpush3.bf16.msra.mxu1 %v5159_v4  ;;  %v5194_v41 = vld [vmem:[%s6547_s28 + $0x38] sm:$0xff]   ;;  %v5199_v45 = vld [vmem:[%s6547_s28 + $0x40] sm:$0xff]   ;;  %v5201_v49 = vld [vmem:[%s6547_s28 + $0x48] sm:$0xff]  }
  0x13   :  { %4457 = vmatprep.subr.bf16.mxu1 %v5161_v6  ;;  %v5196_v44 = vld [vmem:[%s6548_s30 + $0x38] sm:$0xff]   ;;  %v5205_v52 = vld [vmem:[%s6547_s28 + $0x50] sm:$0xff]   ;;  %v5211_v59 = vld [vmem:[%s6547_s28 + $0x60] sm:$0xff]  }
  0x14   :  { %v5207_v56 = vld [vmem:[%s6547_s28 + $0x58] sm:$0xff]   ;;  %v5216_v58 = vld [vmem:[%s6522_s15 + $0x10] sm:$0xff]   ;;  %v5226_v60 = vld [vmem:[%s6524_s11] sm:$0xff]  }
  0x15   :  { %4648 = vmatpush3.bf16.msra.mxu0 %v5160_v5  ;;  %v5209_v57 = vld [vmem:[%s6521_s5 + $0x18] sm:$0xff]   ;;  %v5212_v61 = vld [vmem:[%s6521_s5 + $0x20] sm:$0xff]   ;;  %v5213_v63 = vld [vmem:[%s6547_s28 + $0x68] sm:$0xff]  }
  0x16   :  { %4649 = vmatprep.subr.bf16.mxu0 %v5162_v7  ;;  %4458 = vmatpush3.bf16.msra.mxu1 %v5161_v6  ;;  %v5222_v62 = vld [vmem:[%s6522_s15 + $0x18] sm:$0xff]   ;;  %v5228_v0 = vld [vmem:[%s6522_s15 + $0x20] sm:$0xff]   ;;  %v5215_v1 = vld [vmem:[%s6521_s5 + $0x28] sm:$0xff]  }
  0x17   :  { %4459 = vmatprep.subr.bf16.mxu1 %v5163_v8  ;;  %v5217_v2 = vld [vmem:[%s6547_s28 + $0x70] sm:$0xff]   ;;  %v5234_v4 = vld [vmem:[%s6522_s15 + $0x28] sm:$0xff]   ;;  %v5219_v5 = vld [vmem:[%s6547_s28 + $0x78] sm:$0xff]  }
  0x18   :  { %v5218_v3 = vld [vmem:[%s6521_s5 + $0x30] sm:$0xff]   ;;  %v5227_v12 = vld [vmem:[%s6521_s5 + $0x48] sm:$0xff]  }
  0x19   :  { %4650 = vmatpush3.bf16.msra.mxu0 %v5162_v7  ;;  %v5240_v6 = vld [vmem:[%s6522_s15 + $0x30] sm:$0xff]   ;;  %v5221_v7 = vld [vmem:[%s6521_s5 + $0x38] sm:$0xff]  }
  0x1a   :  { %4651 = vmatprep.subr.bf16.mxu0 %v5164_v9  ;;  %4460 = vmatpush3.bf16.msra.mxu1 %v5163_v8  ;;  %v5223_v8 = vld [vmem:[%s6523_s0] sm:$0xff]   ;;  %v5229_v13 = vld [vmem:[%s6523_s0 + $0x10] sm:$0xff]  }
  0x1b   :  { %4461 = vmatprep.subr.bf16.mxu1 %v5165_v10 }
  0x1d   :  { %4652 = vmatpush3.bf16.msra.mxu0 %v5164_v9  ;;  %v5224_v9 = vld [vmem:[%s6521_s5 + $0x40] sm:$0xff]  }
  0x1e   :  { %4653 = vmatprep.subr.bf16.mxu0 %v5166_v11  ;;  %4462 = vmatpush3.bf16.msra.mxu1 %v5165_v10  ;;  %v5246_v10 = vld [vmem:[%s6522_s15 + $0x38] sm:$0xff]   ;;  %s6549_s15 = sld [smem:[#allocation6_spill]] }
  0x1f   :  { %4463 = vmatprep.subr.bf16.mxu1 %v5167_v14 }
  0x21   :  { %4654 = vmatpush3.bf16.msra.mxu0 %v5166_v11  ;;  %v5225_v11 = vld [vmem:[%s6523_s0 + $0x8] sm:$0xff]  }
  0x22   :  { %4655 = vmatprep.subr.bf16.mxu0 %v5168_v15  ;;  %4464 = vmatpush3.bf16.msra.mxu1 %v5167_v14  ;;  %v5230_v14 = vld [vmem:[%s6521_s5 + $0x50] sm:$0xff]  }
  0x23   :  { %4465 = vmatprep.subr.bf16.mxu1 %v5169_v16 }
  0x25   :  { %4656 = vmatpush3.bf16.msra.mxu0 %v5168_v15  ;;  %v5232_v15 = vld [vmem:[%s6524_s11 + $0x8] sm:$0xff]  }
  0x26   :  { %4657 = vmatprep.subr.bf16.mxu0 %v5170_v17  ;;  %4466 = vmatpush3.bf16.msra.mxu1 %v5169_v16  ;;  %v5252_v16 = vld [vmem:[%s6526_s16] sm:$0xff]  }
  0x27   :  { %4499 = vmatprep.subr.bf16.mxu1 %v5174_v19 }
  0x29   :  { %4658 = vmatpush3.bf16.msra.mxu0 %v5170_v17  ;;  %4468 = vmatmul.mubr.bf16.vlgmr.msra.gmra.mrb[0].mxu1 %v5173_v18  ;;  %v5238_v17 = vld [vmem:[%s6524_s11 + $0x10] sm:$0xff]   ;;  %v5231_v18 = vld [vmem:[%s6523_s0 + $0x18] sm:$0xff]  }
  0x2a   :  { %4691 = vmatprep.subr.bf16.mxu0 %v5176_v20  ;;  %4500 = vmatpush3.bf16.msra.mxu1 %v5174_v19  ;;  %v5233_v19 = vld [vmem:[%s6521_s5 + $0x58] sm:$0xff]  }
  0x2b   :  { %4471 = vmatprep.mubr.bf16.mxu1 %v5178_v23  ;;  %4501 = vmatprep.subr.bf16.mxu1 %v5181_v25  ;;  %v5237_v23 = vld [vmem:[%s6523_s0 + $0x28] sm:$0xff]  }
  0x2c   :  { %4660 = vmatmul.mubr.bf16.vlgmr.msra.gmra.mrb[0].mxu0 %v5175_v21  ;;  %v5236_v21 = vld [vmem:[%s6521_s5 + $0x60] sm:$0xff]  }
  0x2d   :  { %4692 = vmatpush3.bf16.msra.mxu0 %v5176_v20  ;;  %4663 = vmatprep.mubr.bf16.mxu0 %v5179_v24  ;;  %v5235_v20 = vld [vmem:[%s6523_s0 + $0x20] sm:$0xff]  }
  0x2e   :  { %4693 = vmatprep.subr.bf16.mxu0 %v5177_v22  ;;  %4502 = vmatpush3.bf16.msra.mxu1 %v5181_v25  ;;  %v5250_v24 = vld [vmem:[%s6524_s11 + $0x20] sm:$0xff]   ;;  %v5239_v25 = vld [vmem:[%s6521_s5 + $0x68] sm:$0xff]  }
  0x2f   :  { %4503 = vmatprep.subr.bf16.mxu1 %v5188_v27 }
  0x31   :  { %4694 = vmatpush3.bf16.msra.mxu0 %v5177_v22  ;;  %4472 = vmatmul.mubr.bf16.gmra.mrb[4].mxu1 %v5180_v26  ;;  %v5244_v22 = vld [vmem:[%s6524_s11 + $0x18] sm:$0xff]   ;;  %v5241_v26 = vld [vmem:[%s6523_s0 + $0x30] sm:$0xff]  }
  0x32   :  { %4695 = vmatprep.subr.bf16.mxu0 %v5183_v28  ;;  %4475 = vmatprep.mubr.bf16.mxu1 %v5185_v30  ;;  %v5262_v30 = vld [vmem:[%s6524_s11 + $0x30] sm:$0xff]  }
  0x33   :  { %4504 = vmatpush3.bf16.msra.mxu1 %v5188_v27  ;;  %v5242_v27 = vld [vmem:[%s6521_s5 + $0x70] sm:$0xff]  }
  0x34   :  { %4664 = vmatmul.mubr.bf16.gmra.mrb[4].mxu0 %v5182_v29  ;;  %4505 = vmatprep.subr.bf16.mxu1 %v5195_v33  ;;  %v5243_v29 = vld [vmem:[%s6523_s0 + $0x38] sm:$0xff]  }
  0x35   :  { %4696 = vmatpush3.bf16.msra.mxu0 %v5183_v28  ;;  %4667 = vmatprep.mubr.bf16.mxu0 %v5186_v31  ;;  %v5256_v28 = vld [vmem:[%s6524_s11 + $0x28] sm:$0xff]   ;;  %v5245_v31 = vld [vmem:[%s6521_s5 + $0x78] sm:$0xff]  }
  0x36   :  { %4697 = vmatprep.subr.bf16.mxu0 %v5184_v32 }
  0x37   :  { %4506 = vmatpush3.bf16.msra.mxu1 %v5195_v33  ;;  %v5248_v33 = vld [vmem:[%s6525_s6] sm:$0xff]  }
  0x38   :  { %4507 = vmatprep.subr.bf16.mxu1 %v5202_v38 }
  0x39   :  { %4698 = vmatpush3.bf16.msra.mxu0 %v5184_v32  ;;  %4476 = vmatmul.mubr.bf16.gmra.mrb[8].mxu1 %v5187_v34  ;;  %v5247_v32 = vld [vmem:[%s6523_s0 + $0x40] sm:$0xff]   ;;  %v5268_v34 = vld [vmem:[%s6524_s11 + $0x38] sm:$0xff]  }
  0x3a   :  { %4699 = vmatprep.subr.bf16.mxu0 %v5190_v36  ;;  %4479 = vmatprep.mubr.bf16.mxu1 %v5192_v37  ;;  %v5251_v37 = vld [vmem:[%s6525_s6 + $0x8] sm:$0xff]  }
  0x3b   :  { %4508 = vmatpush3.bf16.msra.mxu1 %v5202_v38  ;;  %v5253_v38 = vld [vmem:[%s6523_s0 + $0x50] sm:$0xff]  }
  0x3c   :  { %4668 = vmatmul.mubr.bf16.gmra.mrb[8].mxu0 %v5189_v35  ;;  %4509 = vmatprep.subr.bf16.mxu1 %v5208_v43  ;;  %v5249_v35 = vld [vmem:[%s6523_s0 + $0x48] sm:$0xff]  }
  0x3d   :  { %4700 = vmatpush3.bf16.msra.mxu0 %v5190_v36  ;;  %4671 = vmatprep.mubr.bf16.mxu0 %v5193_v39  ;;  %v5910_v36 = vld [vmem:[%s6528_s12] sm:$0xff]   ;;  %v5254_v39 = vld [vmem:[%s6525_s6 + $0x10] sm:$0xff]  }
  0x3e   :  { %4701 = vmatprep.subr.bf16.mxu0 %v5191_v40 }
  0x3f   :  { %4510 = vmatpush3.bf16.msra.mxu1 %v5208_v43  ;;  %v5257_v43 = vld [vmem:[%s6525_s6 + $0x18] sm:$0xff]  }
  0x40   :  { %4511 = vmatprep.subr.bf16.mxu1 %v5214_v48 }
  0x41   :  { %4702 = vmatpush3.bf16.msra.mxu0 %v5191_v40  ;;  %4480 = vmatmul.mubr.bf16.gmra.mrb[12].mxu1 %v5194_v41  ;;  %v5258_v40 = vld [vmem:[%s6526_s16 + $0x8] sm:$0xff]   ;;  %v5255_v41 = vld [vmem:[%s6523_s0 + $0x58] sm:$0xff]  }
  0x42   :  { %4703 = vmatprep.subr.bf16.mxu0 %v5197_v42  ;;  %4483 = vmatprep.mubr.bf16.mxu1 %v5199_v45  ;;  %v5260_v45 = vld [vmem:[%s6525_s6 + $0x20] sm:$0xff]  }
  0x43   :  { %4512 = vmatpush3.bf16.msra.mxu1 %v5214_v48  ;;  %v5276_v48 = vld [vmem:[%s6526_s16 + $0x20] sm:$0xff]  }
  0x44   :  { %4672 = vmatmul.mubr.bf16.gmra.mrb[12].mxu0 %v5196_v44  ;;  %4513 = vmatprep.subr.bf16.mxu1 %v5220_v55  ;;  %v5259_v44 = vld [vmem:[%s6523_s0 + $0x60] sm:$0xff]  }
  0x45   :  { %4704 = vmatpush3.bf16.msra.mxu0 %v5197_v42  ;;  %4707 = vmatprep.mubr.bf16.mxu0 %v5200_v46  ;;  %v5264_v42 = vld [vmem:[%s6526_s16 + $0x10] sm:$0xff]   ;;  %v5270_v46 = vld [vmem:[%s6526_s16 + $0x18] sm:$0xff]  }
  0x46   :  { %4705 = vmatprep.subr.bf16.mxu0 %v5198_v47 }
  0x47   :  { %4514 = vmatpush3.bf16.msra.mxu1 %v5220_v55  ;;  %v5269_v55 = vld [vmem:[%s6525_s6 + $0x38] sm:$0xff]  }
  0x48   :  { %4547 = vmatprep.subr.bf16.mxu1 %v5226_v60 }
  0x49   :  { %4706 = vmatpush3.bf16.msra.mxu0 %v5198_v47  ;;  %4484 = vmatmul.mubr.bf16.gmra.mrb[16].mxu1 %v5201_v49  ;;  %v5261_v47 = vld [vmem:[%s6523_s0 + $0x68] sm:$0xff]  }
  0x4a   :  { %4739 = vmatprep.subr.bf16.mxu0 %v5204_v51  ;;  %4487 = vmatprep.mubr.bf16.mxu1 %v5205_v52  ;;  %v5263_v49 = vld [vmem:[%s6525_s6 + $0x28] sm:$0xff]  }
  0x4b   :  { %v5282_v52 = vld [vmem:[%s6526_s16 + $0x28] sm:$0xff]  }
  0x4c   :  { %4708 = vmatmul.mubr.bf16.vlgmr.msra.gmra.mrb[0].mxu0 %v5203_v50  ;;  %v5265_v50 = vld [vmem:[%s6523_s0 + $0x70] sm:$0xff]  }
  0x4d   :  { %4740 = vmatpush3.bf16.msra.mxu0 %v5204_v51  ;;  %4711 = vmatprep.mubr.bf16.mxu0 %v5206_v53  ;;  %v5266_v51 = vld [vmem:[%s6525_s6 + $0x30] sm:$0xff]   ;;  %v5267_v53 = vld [vmem:[%s6523_s0 + $0x78] sm:$0xff]  }
  0x4e   :  { %4741 = vmatprep.subr.bf16.mxu0 %v5210_v54 }
  0x51   :  { %4742 = vmatpush3.bf16.msra.mxu0 %v5210_v54  ;;  %4488 = vmatmul.mubr.bf16.gmra.mrb[20].mxu1 %v5207_v56  ;;  %v5288_v54 = vld [vmem:[%s6526_s16 + $0x30] sm:$0xff]   ;;  %v5271_v56 = vld [vmem:[%s6527_s2] sm:$0xff]  }
  0x52   :  { %4743 = vmatprep.subr.bf16.mxu0 %v5216_v58  ;;  %4491 = vmatprep.mubr.bf16.mxu1 %v5211_v59  ;;  %v5273_v59 = vld [vmem:[%s6527_s2 + $0x8] sm:$0xff]  }
  0x54   :  { %4712 = vmatmul.mubr.bf16.gmra.mrb[4].mxu0 %v5209_v57  ;;  %v5272_v57 = vld [vmem:[%s6525_s6 + $0x40] sm:$0xff]  }
  0x55   :  { %4715 = vmatprep.mubr.bf16.mxu0 %v5212_v61  ;;  %4744 = vmatpush3.bf16.msra.mxu0 %v5216_v58  ;;  %v5294_v58 = vld [vmem:[%s6526_s16 + $0x38] sm:$0xff]   ;;  %v5275_v61 = vld [vmem:[%s6525_s6 + $0x48] sm:$0xff]  }
  0x56   :  { %4745 = vmatprep.subr.bf16.mxu0 %v5222_v62 }
  0x59   :  { %4746 = vmatpush3.bf16.msra.mxu0 %v5222_v62  ;;  %4492 = vmatmul.mubr.bf16.gmra.mrb[24].mxu1 %v5213_v63  ;;  %v5277_v62 = vld [vmem:[%s6527_s2 + $0x10] sm:$0xff]  }
  0x5a   :  { %4747 = vmatprep.subr.bf16.mxu0 %v5228_v0  ;;  %4495 = vmatprep.mubr.bf16.mxu1 %v5217_v2  ;;  %v5278_v63 = vld [vmem:[%s6525_s6 + $0x50] sm:$0xff]   ;;  %v5279_v2 = vld [vmem:[%s6527_s2 + $0x18] sm:$0xff]  }
  0x5c   :  { %4716 = vmatmul.mubr.bf16.gmra.mrb[8].mxu0 %v5215_v1  ;;  %v5286_v1 = vld [vmem:[%s6528_s12 + $0x10] sm:$0xff]  }
  0x5d   :  { %4719 = vmatprep.mubr.bf16.mxu0 %v5218_v3  ;;  %4748 = vmatpush3.bf16.msra.mxu0 %v5228_v0  ;;  %v5280_v0 = vld [vmem:[%s6528_s12 + $0x8] sm:$0xff]   ;;  %v5281_v3 = vld [vmem:[%s6525_s6 + $0x58] sm:$0xff]  }
  0x5e   :  { %4749 = vmatprep.subr.bf16.mxu0 %v5234_v4 }
  0x61   :  { %4750 = vmatpush3.bf16.msra.mxu0 %v5234_v4  ;;  %4496 = vmatmul.mubr.bf16.gmra.mrb[28].mxu1 %v5219_v5  ;;  %v5283_v4 = vld [vmem:[%s6527_s2 + $0x20] sm:$0xff]  }
  0x62   :  { %4751 = vmatprep.subr.bf16.mxu0 %v5240_v6  ;;  %4515 = vmatprep.mubr.bf16.mxu1 %v5223_v8  ;;  %v5284_v5 = vld [vmem:[%s6525_s6 + $0x60] sm:$0xff]  }
  0x63   :  { %v5298_v8 = vld [vmem:[%s6528_s12 + $0x20] sm:$0xff]  }
  0x64   :  { %4720 = vmatmul.mubr.bf16.gmra.mrb[12].mxu0 %v5221_v7  ;;  %v5285_v7 = vld [vmem:[%s6527_s2 + $0x28] sm:$0xff]  }
  0x65   :  { %4723 = vmatprep.mubr.bf16.mxu0 %v5224_v9  ;;  %4752 = vmatpush3.bf16.msra.mxu0 %v5240_v6  ;;  %v5292_v6 = vld [vmem:[%s6528_s12 + $0x18] sm:$0xff]   ;;  %v5287_v9 = vld [vmem:[%s6525_s6 + $0x68] sm:$0xff]  }
  0x66   :  { %4753 = vmatprep.subr.bf16.mxu0 %v5246_v10 }
  0x69   :  { %4754 = vmatpush3.bf16.msra.mxu0 %v5246_v10  ;;  %4516 = vmatmul.mubr.bf16.vlgmr.msra.gmra.mrb[0].mxu1 %v5225_v11  ;;  %v5289_v10 = vld [vmem:[%s6527_s2 + $0x30] sm:$0xff]  }
  0x6a   :  { %4548 = vmatpush3.bf16.msra.mxu1 %v5226_v60  ;;  %4519 = vmatprep.mubr.bf16.mxu1 %v5229_v13  ;;  %v5985_v60 = vld [vmem:[%s6530_s17] sm:$0xff]   ;;  %v5290_v11 = vld [vmem:[%s6525_s6 + $0x70] sm:$0xff]   ;;  %v5291_v13 = vld [vmem:[%s6527_s2 + $0x38] sm:$0xff]  }
  0x6b   :  { %4549 = vmatprep.subr.bf16.mxu1 %v5232_v15  ;;  %4787 = vmatprep.subr.bf16.mxu0 %v5252_v16 }
  0x6c   :  { %4724 = vmatmul.mubr.bf16.gmra.mrb[16].mxu0 %v5227_v12  ;;  %v5304_v12 = vld [vmem:[%s6528_s12 + $0x28] sm:$0xff]  }
  0x6d   :  { %4727 = vmatprep.mubr.bf16.mxu0 %v5230_v14  ;;  %v5310_v14 = vld [vmem:[%s6528_s12 + $0x30] sm:$0xff]  }
  0x6e   :  { %4550 = vmatpush3.bf16.msra.mxu1 %v5232_v15  ;;  %v5293_v15 = vld [vmem:[%s6525_s6 + $0x78] sm:$0xff]  }
  0x6f   :  { %4551 = vmatprep.subr.bf16.mxu1 %v5238_v17 }
  0x71   :  { %4520 = vmatmul.mubr.bf16.gmra.mrb[4].mxu1 %v5231_v18  ;;  %v5316_v18 = vld [vmem:[%s6528_s12 + $0x38] sm:$0xff]  }
  0x72   :  { %4523 = vmatprep.mubr.bf16.mxu1 %v5235_v20  ;;  %4552 = vmatpush3.bf16.msra.mxu1 %v5238_v17  ;;  %v5296_v17 = vld [vmem:[%s6549_s15] sm:$0xff]   ;;  %v5299_v20 = vld [vmem:[%s6549_s15 + $0x8] sm:$0xff]  }
  0x73   :  { %4553 = vmatprep.subr.bf16.mxu1 %v5244_v22 }
  0x74   :  { %4728 = vmatmul.mubr.bf16.gmra.mrb[20].mxu0 %v5233_v19  ;;  %v5297_v19 = vld [vmem:[%s6527_s2 + $0x48] sm:$0xff]  }
  0x75   :  { %4731 = vmatprep.mubr.bf16.mxu0 %v5236_v21  ;;  %v5301_v21 = vld [vmem:[%s6527_s2 + $0x50] sm:$0xff]  }
  0x76   :  { %4554 = vmatpush3.bf16.msra.mxu1 %v5244_v22  ;;  %v5302_v22 = vld [vmem:[%s6549_s15 + $0x10] sm:$0xff]  }
  0x77   :  { %4555 = vmatprep.subr.bf16.mxu1 %v5250_v24 }
  0x79   :  { %4524 = vmatmul.mubr.bf16.gmra.mrb[8].mxu1 %v5237_v23  ;;  %v5306_v23 = vld [vmem:[%s6530_s17 + $0x8] sm:$0xff]  }
  0x7a   :  { %4527 = vmatprep.mubr.bf16.mxu1 %v5241_v26  ;;  %4556 = vmatpush3.bf16.msra.mxu1 %v5250_v24  ;;  %v5499_v24 = vld [vmem:[%s6546_s7] sm:$0xff]   ;;  %v5312_v26 = vld [vmem:[%s6530_s17 + $0x10] sm:$0xff]  }
  0x7b   :  { %4557 = vmatprep.subr.bf16.mxu1 %v5256_v28 }
  0x7c   :  { %4732 = vmatmul.mubr.bf16.gmra.mrb[24].mxu0 %v5239_v25  ;;  %v5303_v25 = vld [vmem:[%s6527_s2 + $0x58] sm:$0xff]  }
  0x7d   :  { %4735 = vmatprep.mubr.bf16.mxu0 %v5242_v27  ;;  %v5305_v27 = vld [vmem:[%s6549_s15 + $0x18] sm:$0xff]  }
  0x7e   :  { %4558 = vmatpush3.bf16.msra.mxu1 %v5256_v28  ;;  %v5307_v28 = vld [vmem:[%s6527_s2 + $0x60] sm:$0xff]  }
  0x7f   :  { %4559 = vmatprep.subr.bf16.mxu1 %v5262_v30 }
  0x81   :  { %4528 = vmatmul.mubr.bf16.gmra.mrb[12].mxu1 %v5243_v29  ;;  %v5308_v29 = vld [vmem:[%s6549_s15 + $0x20] sm:$0xff]  }
  0x82   :  { %4531 = vmatprep.mubr.bf16.mxu1 %v5247_v32  ;;  %4560 = vmatpush3.bf16.msra.mxu1 %v5262_v30  ;;  %v5318_v30 = vld [vmem:[%s6530_s17 + $0x18] sm:$0xff]   ;;  %v5323_v32 = vld [vmem:[%s6530_s17 + $0x20] sm:$0xff]  }
  0x83   :  { %4561 = vmatprep.subr.bf16.mxu1 %v5268_v34 }
  0x84   :  { %4736 = vmatmul.mubr.bf16.gmra.mrb[28].mxu0 %v5245_v31  ;;  %v5309_v31 = vld [vmem:[%s6527_s2 + $0x68] sm:$0xff]  }
  0x85   :  { %4755 = vmatprep.mubr.bf16.mxu0 %v5248_v33  ;;  %v5311_v33 = vld [vmem:[%s6549_s15 + $0x28] sm:$0xff]  }
  0x86   :  { %4562 = vmatpush3.bf16.msra.mxu1 %v5268_v34  ;;  %v5313_v34 = vld [vmem:[%s6527_s2 + $0x70] sm:$0xff]  }
  0x87   :  { %4595 = vmatprep.subr.bf16.mxu1 %v5910_v36 }
  0x89   :  { %4532 = vmatmul.mubr.bf16.gmra.mrb[16].mxu1 %v5249_v35  ;;  %v5314_v35 = vld [vmem:[%s6549_s15 + $0x30] sm:$0xff]  }
  0x8a   :  { %4535 = vmatprep.mubr.bf16.mxu1 %v5253_v38  ;;  %v5333_v38 = vld [vmem:[%s6530_s17 + $0x30] sm:$0xff]  }
  0x8c   :  { %4756 = vmatmul.mubr.bf16.vlgmr.msra.gmra.mrb[0].mxu0 %v5251_v37  ;;  %v5315_v37 = vld [vmem:[%s6527_s2 + $0x78] sm:$0xff]  }
  0x8d   :  { %4788 = vmatpush3.bf16.msra.mxu0 %v5252_v16  ;;  %4759 = vmatprep.mubr.bf16.mxu0 %v5254_v39  ;;  %v5295_v16 = vld [vmem:[%s6527_s2 + $0x40] sm:$0xff]   ;;  %v5317_v39 = vld [vmem:[%s6549_s15 + $0x38] sm:$0xff]  }
  0x8e   :  { %4789 = vmatprep.subr.bf16.mxu0 %v5258_v40 }
  0x91   :  { %4790 = vmatpush3.bf16.msra.mxu0 %v5258_v40  ;;  %4536 = vmatmul.mubr.bf16.gmra.mrb[20].mxu1 %v5255_v41  ;;  %v5319_v40 = vld [vmem:[%s6531_s3] sm:$0xff]  }
  0x92   :  { %4791 = vmatprep.subr.bf16.mxu0 %v5264_v42  ;;  %4539 = vmatprep.mubr.bf16.mxu1 %v5259_v44  ;;  %v5320_v41 = vld [vmem:[%s6549_s15 + $0x40] sm:$0xff]   ;;  %v5322_v44 = vld [vmem:[%s6549_s15 + $0x48] sm:$0xff]  }
  0x94   :  { %4760 = vmatmul.mubr.bf16.gmra.mrb[4].mxu0 %v5257_v43  ;;  %v5321_v43 = vld [vmem:[%s6531_s3 + $0x8] sm:$0xff]  }
  0x95   :  { %4763 = vmatprep.mubr.bf16.mxu0 %v5260_v45  ;;  %4792 = vmatpush3.bf16.msra.mxu0 %v5264_v42  ;;  %v5338_v42 = vld [vmem:[%s6530_s17 + $0x38] sm:$0xff]   ;;  %v5324_v45 = vld [vmem:[%s6531_s3 + $0x10] sm:$0xff]  }
  0x96   :  { %4793 = vmatprep.subr.bf16.mxu0 %v5270_v46 }
  0x99   :  { %4794 = vmatpush3.bf16.msra.mxu0 %v5270_v46  ;;  %4540 = vmatmul.mubr.bf16.gmra.mrb[24].mxu1 %v5261_v47  ;;  %v5325_v46 = vld [vmem:[%s6549_s15 + $0x50] sm:$0xff]   ;;  %v5500_v47 = vld [vmem:[%s6546_s7 + $0x8] sm:$0xff]  }
  0x9a   :  { %4795 = vmatprep.subr.bf16.mxu0 %v5276_v48  ;;  %4543 = vmatprep.mubr.bf16.mxu1 %v5265_v50  ;;  %v5329_v50 = vld [vmem:[%s6531_s3 + $0x20] sm:$0xff]  }
  0x9c   :  { %4764 = vmatmul.mubr.bf16.gmra.mrb[8].mxu0 %v5263_v49  ;;  %v5327_v49 = vld [vmem:[%s6549_s15 + $0x58] sm:$0xff]  }
  0x9d   :  { %4767 = vmatprep.mubr.bf16.mxu0 %v5266_v51  ;;  %4796 = vmatpush3.bf16.msra.mxu0 %v5276_v48  ;;  %v5326_v48 = vld [vmem:[%s6531_s3 + $0x18] sm:$0xff]   ;;  %v5330_v51 = vld [vmem:[%s6549_s15 + $0x60] sm:$0xff]  }
  0x9e   :  { %4797 = vmatprep.subr.bf16.mxu0 %v5282_v52 }
  0xa1   :  { %4798 = vmatpush3.bf16.msra.mxu0 %v5282_v52  ;;  %4544 = vmatmul.mubr.bf16.gmra.mrb[28].mxu1 %v5267_v53  ;;  %v5501_v52 = vld [vmem:[%s6546_s7 + $0x10] sm:$0xff]   ;;  %v5502_v53 = vld [vmem:[%s6546_s7 + $0x18] sm:$0xff]  }
  0xa2   :  { %4799 = vmatprep.subr.bf16.mxu0 %v5288_v54  ;;  %4563 = vmatprep.mubr.bf16.mxu1 %v5271_v56  ;;  %v5334_v56 = vld [vmem:[%s6531_s3 + $0x30] sm:$0xff]  }
  0xa4   :  { %4768 = vmatmul.mubr.bf16.gmra.mrb[12].mxu0 %v5269_v55  ;;  %v5332_v55 = vld [vmem:[%s6549_s15 + $0x68] sm:$0xff]  }
  0xa5   :  { %4771 = vmatprep.mubr.bf16.mxu0 %v5272_v57  ;;  %4800 = vmatpush3.bf16.msra.mxu0 %v5288_v54  ;;  %v5331_v54 = vld [vmem:[%s6531_s3 + $0x28] sm:$0xff]   ;;  %v5335_v57 = vld [vmem:[%s6549_s15 + $0x70] sm:$0xff]  }
  0xa6   :  { %4801 = vmatprep.subr.bf16.mxu0 %v5294_v58 }
  0xa9   :  { %4802 = vmatpush3.bf16.msra.mxu0 %v5294_v58  ;;  %4564 = vmatmul.mubr.bf16.vlgmr.msra.gmra.mrb[0].mxu1 %v5273_v59  ;;  %v5503_v58 = vld [vmem:[%s6546_s7 + $0x20] sm:$0xff]   ;;  %v5504_v59 = vld [vmem:[%s6546_s7 + $0x28] sm:$0xff]  }
  0xaa   :  { %4835 = vmatprep.subr.bf16.mxu0 %v5985_v60  ;;  %4596 = vmatpush3.bf16.msra.mxu1 %v5910_v36  ;;  %v5328_v36 = vld [vmem:[%s6530_s17 + $0x28] sm:$0xff]  }
  0xab   :  { %4567 = vmatprep.mubr.bf16.mxu1 %v5277_v62  ;;  %4597 = vmatprep.subr.bf16.mxu1 %v5280_v0  ;;  %v5339_v62 = vld [vmem:[%s6531_s3 + $0x40] sm:$0xff]  }
  0xac   :  { %4772 = vmatmul.mubr.bf16.gmra.mrb[16].mxu0 %v5275_v61  ;;  %v5337_v61 = vld [vmem:[%s6549_s15 + $0x78] sm:$0xff]  }
  0xad   :  { %4775 = vmatprep.mubr.bf16.mxu0 %v5278_v63  ;;  %v5340_v63 = vld [vmem:[%s6532_s8] sm:$0xff]  }
  0xae   :  { %4598 = vmatpush3.bf16.msra.mxu1 %v5280_v0  ;;  %v5505_v0 = vld [vmem:[%s6546_s7 + $0x30] sm:$0xff]  }
  0xaf   :  { %4599 = vmatprep.subr.bf16.mxu1 %v5286_v1 }
  0xb1   :  { %4568 = vmatmul.mubr.bf16.gmra.mrb[4].mxu1 %v5279_v2  ;;  %v5341_v2 = vld [vmem:[%s6531_s3 + $0x48] sm:$0xff]  }
  0xb2   :  { %4571 = vmatprep.mubr.bf16.mxu1 %v5283_v4  ;;  %4600 = vmatpush3.bf16.msra.mxu1 %v5286_v1  ;;  %v5506_v1 = vld [vmem:[%s6546_s7 + $0x38] sm:$0xff]   ;;  %v5343_v4 = vld [vmem:[%s6531_s3 + $0x50] sm:$0xff]  }
  0xb3   :  { %4601 = vmatprep.subr.bf16.mxu1 %v5292_v6 }
  0xb4   :  { %4776 = vmatmul.mubr.bf16.gmra.mrb[20].mxu0 %v5281_v3  ;;  %v5342_v3 = vld [vmem:[%s6532_s8 + $0x8] sm:$0xff]  }
  0xb5   :  { %4779 = vmatprep.mubr.bf16.mxu0 %v5284_v5  ;;  %v5344_v5 = vld [vmem:[%s6532_s8 + $0x10] sm:$0xff]  }
  0xb6   :  { %4602 = vmatpush3.bf16.msra.mxu1 %v5292_v6  ;;  %v5345_v6 = vld [vmem:[%s6531_s3 + $0x58] sm:$0xff]  }
  0xb7   :  { %4603 = vmatprep.subr.bf16.mxu1 %v5298_v8 }
  0xb9   :  { %4572 = vmatmul.mubr.bf16.gmra.mrb[8].mxu1 %v5285_v7  ;;  %v5346_v7 = vld [vmem:[%s6532_s8 + $0x18] sm:$0xff]  }
  0xba   :  { %4575 = vmatprep.mubr.bf16.mxu1 %v5289_v10  ;;  %4604 = vmatpush3.bf16.msra.mxu1 %v5298_v8  ;;  %v5347_v8 = vld [vmem:[%s6531_s3 + $0x60] sm:$0xff]   ;;  %v5349_v10 = vld [vmem:[%s6531_s3 + $0x68] sm:$0xff]  }
  0xbb   :  { %4605 = vmatprep.subr.bf16.mxu1 %v5304_v12 }
  0xbc   :  { %4780 = vmatmul.mubr.bf16.gmra.mrb[24].mxu0 %v5287_v9  ;;  %v5348_v9 = vld [vmem:[%s6532_s8 + $0x20] sm:$0xff]  }
  0xbd   :  { %4783 = vmatprep.mubr.bf16.mxu0 %v5290_v11  ;;  %v5350_v11 = vld [vmem:[%s6532_s8 + $0x28] sm:$0xff]  }
  0xbe   :  { %4606 = vmatpush3.bf16.msra.mxu1 %v5304_v12  ;;  %v5351_v12 = vld [vmem:[%s6531_s3 + $0x70] sm:$0xff]  }
  0xbf   :  { %4607 = vmatprep.subr.bf16.mxu1 %v5310_v14 }
  0xc1   :  { %4576 = vmatmul.mubr.bf16.gmra.mrb[12].mxu1 %v5291_v13  ;;  %v5352_v13 = vld [vmem:[%s6532_s8 + $0x30] sm:$0xff]  }
  0xc2   :  { %4579 = vmatprep.mubr.bf16.mxu1 %v5295_v16  ;;  %4608 = vmatpush3.bf16.msra.mxu1 %v5310_v14  ;;  %v5353_v14 = vld [vmem:[%s6531_s3 + $0x78] sm:$0xff]   ;;  %v5355_v16 = vld [vmem:[%s6548_s30 + $0x40] sm:$0xff]  }
  0xc3   :  { %4609 = vmatprep.subr.bf16.mxu1 %v5316_v18 }
  0xc4   :  { %4784 = vmatmul.mubr.bf16.gmra.mrb[28].mxu0 %v5293_v15  ;;  %v5354_v15 = vld [vmem:[%s6532_s8 + $0x38] sm:$0xff]  }
  0xc5   :  { %4803 = vmatprep.mubr.bf16.mxu0 %v5296_v17  ;;  %v5356_v17 = vld [vmem:[%s6532_s8 + $0x40] sm:$0xff]  }
  0xc6   :  { %4610 = vmatpush3.bf16.msra.mxu1 %v5316_v18  ;;  %v5357_v18 = vld [vmem:[%s6548_s30 + $0x48] sm:$0xff]  }
  0xc7   :  { %4883 = vmatprep.subr.bf16.mxu1 %v5499_v24 }
  0xc9   :  { %4580 = vmatmul.mubr.bf16.gmra.mrb[16].mxu1 %v5297_v19  ;;  %v5358_v19 = vld [vmem:[%s6532_s8 + $0x48] sm:$0xff]  }
  0xca   :  { %4583 = vmatprep.mubr.bf16.mxu1 %v5301_v21  ;;  %v5360_v21 = vld [vmem:[%s6532_s8 + $0x50] sm:$0xff]  }
  0xcc   :  { %4804 = vmatmul.mubr.bf16.vlgmr.msra.gmra.mrb[0].mxu0 %v5299_v20  ;;  %v5359_v20 = vld [vmem:[%s6548_s30 + $0x50] sm:$0xff]  }
  0xcd   :  { %4836 = vmatpush3.bf16.msra.mxu0 %v5985_v60  ;;  %4807 = vmatprep.mubr.bf16.mxu0 %v5302_v22  ;;  %v5336_v60 = vld [vmem:[%s6531_s3 + $0x38] sm:$0xff]  }
  0xce   :  { %4837 = vmatprep.subr.bf16.mxu0 %v5306_v23  ;;  %v5361_v22 = vld [vmem:[%s6548_s30 + $0x58] sm:$0xff]  }
  0xd1   :  { %4838 = vmatpush3.bf16.msra.mxu0 %v5306_v23  ;;  %4584 = vmatmul.mubr.bf16.gmra.mrb[20].mxu1 %v5303_v25  ;;  %v5362_v23 = vld [vmem:[%s6532_s8 + $0x58] sm:$0xff]   ;;  %v5364_v25 = vld [vmem:[%s6532_s8 + $0x60] sm:$0xff]  }
  0xd2   :  { %4839 = vmatprep.subr.bf16.mxu0 %v5312_v26  ;;  %4587 = vmatprep.mubr.bf16.mxu1 %v5307_v28  ;;  %v5367_v28 = vld [vmem:[%s6548_s30 + $0x70] sm:$0xff]  }
  0xd4   :  { %4808 = vmatmul.mubr.bf16.gmra.mrb[4].mxu0 %v5305_v27  ;;  %v5366_v27 = vld [vmem:[%s6532_s8 + $0x68] sm:$0xff]  }
  0xd5   :  { %4811 = vmatprep.mubr.bf16.mxu0 %v5308_v29  ;;  %4840 = vmatpush3.bf16.msra.mxu0 %v5312_v26  ;;  %v5365_v26 = vld [vmem:[%s6548_s30 + $0x68] sm:$0xff]   ;;  %v5368_v29 = vld [vmem:[%s6532_s8 + $0x70] sm:$0xff]  }
  0xd6   :  { %4841 = vmatprep.subr.bf16.mxu0 %v5318_v30 }
  0xd9   :  { %4842 = vmatpush3.bf16.msra.mxu0 %v5318_v30  ;;  %4588 = vmatmul.mubr.bf16.gmra.mrb[24].mxu1 %v5309_v31  ;;  %v5369_v30 = vld [vmem:[%s6548_s30 + $0x78] sm:$0xff]  }
  0xda   :  { %4843 = vmatprep.subr.bf16.mxu0 %v5323_v32  ;;  %4591 = vmatprep.mubr.bf16.mxu1 %v5313_v34  ;;  %v5370_v31 = vld [vmem:[%s6532_s8 + $0x78] sm:$0xff]  }
  0xdc   :  { %4812 = vmatmul.mubr.bf16.gmra.mrb[8].mxu0 %v5311_v33 }
  0xdd   :  { %4815 = vmatprep.mubr.bf16.mxu0 %v5314_v35  ;;  %4844 = vmatpush3.bf16.msra.mxu0 %v5323_v32 }
  0xde   :  { %4845 = vmatprep.subr.bf16.mxu0 %v5328_v36 }
  0xe1   :  { %4846 = vmatpush3.bf16.msra.mxu0 %v5328_v36  ;;  %4592 = vmatmul.mubr.bf16.gmra.mrb[28].mxu1 %v5315_v37 }
  0xe2   :  { %4847 = vmatprep.subr.bf16.mxu0 %v5333_v38  ;;  %4611 = vmatprep.mubr.bf16.mxu1 %v5319_v40 }
  0xe4   :  { %4816 = vmatmul.mubr.bf16.gmra.mrb[12].mxu0 %v5317_v39 }
  0xe5   :  { %4819 = vmatprep.mubr.bf16.mxu0 %v5320_v41  ;;  %4848 = vmatpush3.bf16.msra.mxu0 %v5333_v38 }
  0xe6   :  { %4849 = vmatprep.subr.bf16.mxu0 %v5338_v42 }
  0xe9   :  { %4850 = vmatpush3.bf16.msra.mxu0 %v5338_v42  ;;  %4612 = vmatmul.mubr.bf16.vlgmr.msra.gmra.mrb[0].mxu1 %v5321_v43 }
  0xea   :  { %4891 = vmatpush3.bf16.msra.mxu1 %v5499_v24  ;;  %4615 = vmatprep.mubr.bf16.mxu1 %v5324_v45  ;;  %v5363_v24 = vld [vmem:[%s6548_s30 + $0x60] sm:$0xff]  }
  0xeb   :  { %4884 = vmatprep.subr.bf16.mxu1 %v5500_v47 }
  0xec   :  { %4820 = vmatmul.mubr.bf16.gmra.mrb[16].mxu0 %v5322_v44 }
  0xed   :  { %4823 = vmatprep.mubr.bf16.mxu0 %v5325_v46 }
  0xee   :  { %4892 = vmatpush3.bf16.msra.mxu1 %v5500_v47 }
  0xef   :  { %4885 = vmatprep.subr.bf16.mxu1 %v5501_v52 }
  0xf1   :  { %4616 = vmatmul.mubr.bf16.gmra.mrb[4].mxu1 %v5326_v48 }
  0xf2   :  { %4619 = vmatprep.mubr.bf16.mxu1 %v5329_v50  ;;  %4893 = vmatpush3.bf16.msra.mxu1 %v5501_v52 }
  0xf3   :  { %4886 = vmatprep.subr.bf16.mxu1 %v5502_v53 }
  0xf4   :  { %4824 = vmatmul.mubr.bf16.gmra.mrb[20].mxu0 %v5327_v49  ;;  %v6300_v49 = vld [vmem:[%s6533_s18] ss:$0 sm:$0xff] }
  0xf5   :  { %4827 = vmatprep.mubr.bf16.mxu0 %v5330_v51 }
  0xf6   :  { %4894 = vmatpush3.bf16.msra.mxu1 %v5502_v53 }
  0xf7   :  { %4887 = vmatprep.subr.bf16.mxu1 %v5503_v58 }
  0xf9   :  { %4620 = vmatmul.mubr.bf16.gmra.mrb[8].mxu1 %v5331_v54 }
  0xfa   :  { %4623 = vmatprep.mubr.bf16.mxu1 %v5334_v56  ;;  %4895 = vmatpush3.bf16.msra.mxu1 %v5503_v58 }
  0xfb   :  { %4888 = vmatprep.subr.bf16.mxu1 %v5504_v59 }
  0xfc   :  { %4828 = vmatmul.mubr.bf16.gmra.mrb[24].mxu0 %v5332_v55 }
  0xfd   :  { %4831 = vmatprep.mubr.bf16.mxu0 %v5335_v57 }
  0xfe   :  { %4896 = vmatpush3.bf16.msra.mxu1 %v5504_v59 }
  0xff   :  { %4889 = vmatprep.subr.bf16.mxu1 %v5505_v0 }
 0x101   :  { %4624 = vmatmul.mubr.bf16.gmra.mrb[12].mxu1 %v5336_v60 }
 0x102   :  { %4627 = vmatprep.mubr.bf16.mxu1 %v5339_v62  ;;  %4897 = vmatpush3.bf16.msra.mxu1 %v5505_v0 }
 0x103   :  { %4890 = vmatprep.subr.bf16.mxu1 %v5506_v1 }
 0x104   :  { %4832 = vmatmul.mubr.bf16.gmra.mrb[28].mxu0 %v5337_v61 }
 0x105   :  { %4851 = vmatprep.mubr.bf16.mxu0 %v5340_v63 }
 0x106   :  { %4898 = vmatpush3.bf16.msra.mxu1 %v5506_v1 }
 0x109   :  { %4628 = vmatmul.mubr.bf16.gmra.mrb[16].mxu1 %v5341_v2 }
 0x10a   :  { %4631 = vmatprep.mubr.bf16.mxu1 %v5343_v4 }
 0x10c   :  { %4852 = vmatmul.mubr.bf16.vlgmr.msra.gmra.mrb[0].mxu0 %v5342_v3 }
 0x10d   :  { %4855 = vmatprep.mubr.bf16.mxu0 %v5344_v5 }
 0x111   :  { %4632 = vmatmul.mubr.bf16.gmra.mrb[20].mxu1 %v5345_v6 }
 0x112   :  { %4635 = vmatprep.mubr.bf16.mxu1 %v5347_v8 }
 0x114   :  { %4856 = vmatmul.mubr.bf16.gmra.mrb[4].mxu0 %v5346_v7 }
 0x115   :  { %4859 = vmatprep.mubr.bf16.mxu0 %v5348_v9 }
 0x119   :  { %4636 = vmatmul.mubr.bf16.gmra.mrb[24].mxu1 %v5349_v10 }
 0x11a   :  { %4639 = vmatprep.mubr.bf16.mxu1 %v5351_v12 }
 0x11c   :  { %4860 = vmatmul.mubr.bf16.gmra.mrb[8].mxu0 %v5350_v11 }
 0x11d   :  { %4863 = vmatprep.mubr.bf16.mxu0 %v5352_v13 }
 0x121   :  { %4640 = vmatmul.mubr.bf16.gmra.mrb[28].mxu1 %v5353_v14 }
 0x122   :  { %4675 = vmatprep.mubr.bf16.mxu1 %v5355_v16 }
 0x124   :  { %4864 = vmatmul.mubr.bf16.gmra.mrb[12].mxu0 %v5354_v15 }
 0x125   :  { %4867 = vmatprep.mubr.bf16.mxu0 %v5356_v17 }
 0x129   :  { %4676 = vmatmul.mubr.bf16.vlgmr.msra.gmra.mrb[16].mxu1 %v5357_v18 }
 0x12a   :  { %4679 = vmatprep.mubr.bf16.mxu1 %v5359_v20 }
 0x12c   :  { %4868 = vmatmul.mubr.bf16.gmra.mrb[16].mxu0 %v5358_v19 }
 0x12d   :  { %4871 = vmatprep.mubr.bf16.mxu0 %v5360_v21 }
 0x131   :  { %4680 = vmatmul.mubr.bf16.gmra.mrb[20].mxu1 %v5361_v22 }
 0x132   :  { %4683 = vmatprep.mubr.bf16.mxu1 %v5363_v24 }
 0x134   :  { %4872 = vmatmul.mubr.bf16.gmra.mrb[20].mxu0 %v5362_v23 }
 0x135   :  { %4875 = vmatprep.mubr.bf16.mxu0 %v5364_v25 }
 0x139   :  { %4684 = vmatmul.mubr.bf16.gmra.mrb[24].mxu1 %v5365_v26 }
 0x13a   :  { %4687 = vmatprep.mubr.bf16.mxu1 %v5367_v28 }
 0x13c   :  { %4876 = vmatmul.mubr.bf16.gmra.mrb[24].mxu0 %v5366_v27 }
 0x13d   :  { %4879 = vmatprep.mubr.bf16.mxu0 %v5368_v29 }
 0x141   :  { %4688 = vmatmul.mubr.bf16.gmra.mrb[28].mxu1 %v5369_v30 }
 0x144   :  { %4880 = vmatmul.mubr.bf16.gmra.mrb[28].mxu0 %v5370_v31 }
 0x1bc   :  { %v4613_v32 = vpop.f32.mrb[0].mxu1 }
 0x1bd   :  { %v1380_v33 = vpop.f32.mrb[1].mxu1 }
 0x1be   :  { %v4614_v34 = vpop.f32.mrb[2].mxu1 }
 0x1bf   :  { %v1383_v35 = vpop.f32.mrb[3].mxu1 }
 0x1c4   :  { %v4617_v36 = vpop.f32.mrb[4].mxu1 }
 0x1c5   :  { %v1396_v37 = vpop.f32.mrb[5].mxu1 }
 0x1c6   :  { %v4618_v38 = vpop.f32.mrb[6].mxu1 }
 0x1c7   :  { %v1399_v39 = vpop.f32.mrb[7].mxu1 }
 0x1cc   :  { %v4621_v40 = vpop.f32.mrb[8].mxu1 }
 0x1cd   :  { %v1412_v41 = vpop.f32.mrb[9].mxu1 }
 0x1ce   :  { %v4622_v42 = vpop.f32.mrb[10].mxu1 }
 0x1cf   :  { %v6287_v43 = vpop.f32.mrb[11].mxu1 }
 0x1d4   :  { %v6289_v44 = vpop.f32.mrb[12].mxu1 }
 0x1d5   :  { %v6291_v45 = vpop.f32.mrb[13].mxu1 }
 0x1d6   :  { %v6293_v46 = vpop.f32.mrb[14].mxu1 }
 0x1d7   :  { %v6295_v47 = vpop.f32.mrb[15].mxu1 }
 0x1df   :  { %v4853_v48 = vpop.f32.mrb[0].mxu0 }
 0x1e0   :  { %v4899_v50 = vadd.f32 %v4853_v48, %v4613_v32  ;;  %v3305_v51 = vpop.f32.mrb[1].mxu0 }
 0x1e1   :  { %v4900_v52 = vadd.f32 %v3305_v51, %v1380_v33  ;;  %v4854_v53 = vpop.f32.mrb[2].mxu0 }
 0x1e2   :  { %v6303_v54 = vadd.f32 %v4899_v50, %v6300_v49  ;;  %v4901_v55 = vadd.f32 %v4854_v53, %v4614_v34  ;;  %v3308_v56 = vpop.f32.mrb[3].mxu0 }
 0x1e3   :  { %v6306_v57 = vadd.f32 %v4900_v52, %v6300_v49  ;;  %v4902_v58 = vadd.f32 %v3308_v56, %v1383_v35 }
 0x1e4   :  { %v3505_v59 = vsub.f32 0.0, %v6303_v54  ;;  %v6310_v60 = vadd.f32 %v4901_v55, %v6300_v49 }
 0x1e5   :  { %v3503_v61 = vsub.f32 0.0, %v6306_v57  ;;  %v6314_v62 = vadd.f32 %v4902_v58, %v6300_v49 }
 0x1e6   :  { %v3539_v63 = vmul.f32 1.442695, %v3505_v59  ;;  %v3506_v0 = vsub.f32 0.0, %v6310_v60 }
 0x1e7   :  { %v3535_v1 = vmul.f32 1.442695, %v3503_v61  ;;  %v3504_v2 = vsub.f32 0.0, %v6314_v62  ;;  %v4857_v3 = vpop.f32.mrb[4].mxu0 }
 0x1e8   :  { %5371 = vpow2.f32 %v3539_v63  ;;  %v3541_v4 = vmul.f32 1.442695, %v3506_v0  ;;  %v4903_v5 = vadd.f32 %v4857_v3, %v4617_v36  ;;  %v3321_v6 = vpop.f32.mrb[5].mxu0 }
 0x1e9   :  { %5373 = vpow2.f32 %v3535_v1  ;;  %v3537_v7 = vmul.f32 1.442695, %v3504_v2  ;;  %v4904_v8 = vadd.f32 %v3321_v6, %v1396_v37  ;;  %v4858_v9 = vpop.f32.mrb[6].mxu0 }
 0x1ea   :  { %5375 = vpow2.f32 %v3541_v4  ;;  %v6319_v10 = vadd.f32 %v4903_v5, %v6300_v49  ;;  %v4905_v11 = vadd.f32 %v4858_v9, %v4618_v38  ;;  %v3324_v12 = vpop.f32.mrb[7].mxu0 }
 0x1eb   :  { %5377 = vpow2.f32 %v3537_v7  ;;  %v6322_v13 = vadd.f32 %v4904_v8, %v6300_v49  ;;  %v4906_v14 = vadd.f32 %v3324_v12, %v1399_v39 }
 0x1ec   :  { %v3509_v15 = vsub.f32 0.0, %v6319_v10  ;;  %v6326_v16 = vadd.f32 %v4905_v11, %v6300_v49 }
 0x1ed   :  { %v3507_v17 = vsub.f32 0.0, %v6322_v13  ;;  %v6330_v18 = vadd.f32 %v4906_v14, %v6300_v49 }
 0x1ee   :  { %v3547_v19 = vmul.f32 1.442695, %v3509_v15  ;;  %v3510_v20 = vsub.f32 0.0, %v6326_v16 }
 0x1ef   :  { %v3543_v21 = vmul.f32 1.442695, %v3507_v17  ;;  %v3508_v22 = vsub.f32 0.0, %v6330_v18  ;;  %v4861_v23 = vpop.f32.mrb[8].mxu0 }
 0x1f0   :  { %5379 = vpow2.f32 %v3547_v19  ;;  %v3549_v24 = vmul.f32 1.442695, %v3510_v20  ;;  %v4907_v25 = vadd.f32 %v4861_v23, %v4621_v40  ;;  %v3337_v26 = vpop.f32.mrb[9].mxu0 }
 0x1f1   :  { %5381 = vpow2.f32 %v3543_v21  ;;  %v3545_v27 = vmul.f32 1.442695, %v3508_v22  ;;  %v4908_v28 = vadd.f32 %v3337_v26, %v1412_v41  ;;  %v4862_v29 = vpop.f32.mrb[10].mxu0 }
 0x1f2   :  { %v5372_v30 = vpop.eup %5371  ;;  %5383 = vpow2.f32 %v3549_v24  ;;  %v6335_v31 = vadd.f32 %v4907_v25, %v6300_v49  ;;  %v4909_v32 = vadd.f32 %v4862_v29, %v4622_v42  ;;  %v3340_v33 = vpop.f32.mrb[11].mxu0 }
 0x1f3   :  { %v5374_v34 = vpop.eup %5373  ;;  %v3601_v35 = vadd.f32 1.0, %v5372_v30  ;;  %5385 = vpow2.f32 %v3545_v27  ;;  %v6338_v36 = vadd.f32 %v4908_v28, %v6300_v49  ;;  %v4910_v37 = vadd.f32 %v3340_v33, %v6287_v43 }
 0x1f4   :  { %v5376_v38 = vpop.eup %5375  ;;  %v3599_v39 = vadd.f32 1.0, %v5374_v34  ;;  %v3513_v40 = vsub.f32 0.0, %v6335_v31  ;;  %v6343_v41 = vadd.f32 %v4909_v32, %v6300_v49 }
 0x1f5   :  { %v5378_v48 = vpop.eup %5377  ;;  %5387 = vrcp.f32 %v3601_v35  ;;  %v3602_v50 = vadd.f32 1.0, %v5376_v38  ;;  %v3511_v42 = vsub.f32 0.0, %v6338_v36  ;;  %v6347_v51 = vadd.f32 %v4910_v37, %v6300_v49 }
 0x1f6   :  { %5389 = vrcp.f32 %v3599_v39  ;;  %v3600_v52 = vadd.f32 1.0, %v5378_v48  ;;  %v3555_v53 = vmul.f32 1.442695, %v3513_v40  ;;  %v3514_v43 = vsub.f32 0.0, %v6343_v41 }
 0x1f7   :  { %5391 = vrcp.f32 %v3602_v50  ;;  %v3551_v55 = vmul.f32 1.442695, %v3511_v42  ;;  %v3512_v56 = vsub.f32 0.0, %v6347_v51  ;;  %v4865_v58 = vpop.f32.mrb[12].mxu0 }
 0x1f8   :  { %5393 = vrcp.f32 %v3600_v52  ;;  %v3557_v59 = vmul.f32 1.442695, %v3514_v43  ;;  %v4911_v61 = vadd.f32 %v4865_v58, %v6289_v44  ;;  %v3353_v63 = vpop.f32.mrb[13].mxu0 }
 0x1f9   :  { %5395 = vpow2.f32 %v3555_v53  ;;  %v3553_v0 = vmul.f32 1.442695, %v3512_v56  ;;  %v4912_v1 = vadd.f32 %v3353_v63, %v6291_v45  ;;  %v4866_v2 = vpop.f32.mrb[14].mxu0 }
 0x1fa   :  { %v5380_v3 = vpop.eup %5379  ;;  %5397 = vpow2.f32 %v3551_v55  ;;  %v6354_v4 = vadd.f32 %v4911_v61, %v6300_v49  ;;  %v4913_v5 = vadd.f32 %v4866_v2, %v6293_v46  ;;  %v3356_v6 = vpop.f32.mrb[15].mxu0 }
 0x1fb   :  { %v5382_v7 = vpop.eup %5381  ;;  %v3605_v8 = vadd.f32 1.0, %v5380_v3  ;;  %5399 = vpow2.f32 %v3557_v59  ;;  %v6358_v9 = vadd.f32 %v4912_v1, %v6300_v49  ;;  %v4914_v44 = vadd.f32 %v3356_v6, %v6295_v47 }
 0x1fc   :  { %v5384_v11 = vpop.eup %5383  ;;  %v3603_v12 = vadd.f32 1.0, %v5382_v7  ;;  %5401 = vpow2.f32 %v3553_v0  ;;  %v3517_v45 = vsub.f32 0.0, %v6354_v4  ;;  %v6363_v14 = vadd.f32 %v4913_v5, %v6300_v49  ;;  %v4677_v22 = vpop.f32.mrb[16].mxu1 }
 0x1fd   :  { %v5386_v15 = vpop.eup %5385  ;;  %5403 = vrcp.f32 %v3605_v8  ;;  %v3606_v46 = vadd.f32 1.0, %v5384_v11  ;;  %v3515_v17 = vsub.f32 0.0, %v6358_v9  ;;  %v6367_v19 = vadd.f32 %v4914_v44, %v6300_v49  ;;  %v1829_v27 = vpop.f32.mrb[17].mxu1 }
 0x1fe   :  { %5405 = vrcp.f32 %v3603_v12  ;;  %v3604_v20 = vadd.f32 1.0, %v5386_v15  ;;  %v3563_v21 = vmul.f32 1.442695, %v3517_v45  ;;  %v3518_v47 = vsub.f32 0.0, %v6363_v14  ;;  %v4678_v34 = vpop.f32.mrb[18].mxu1 }
 0x1ff   :  { %v5388_v23 = vpop.eup %5387  ;;  %5407 = vrcp.f32 %v3606_v46  ;;  %v3559_v24 = vmul.f32 1.442695, %v3515_v17  ;;  %v3516_v25 = vsub.f32 0.0, %v6367_v19  ;;  %v4869_v26 = vpop.f32.mrb[16].mxu0 }
 0x200   :  { %v5390_v28 = vpop.eup %5389  ;;  %v3665_v29 = vmul.f32 %v5388_v23, %v6303_v54  ;;  %5409 = vrcp.f32 %v3604_v20  ;;  %v3565_v30 = vmul.f32 1.442695, %v3518_v47  ;;  %v4915_v32 = vadd.f32 %v4869_v26, %v4677_v22  ;;  %v3369_v33 = vpop.f32.mrb[17].mxu0 }
 0x201   :  { %v5392_v35 = vpop.eup %5391  ;;  %v3663_v37 = vmul.f32 %v5390_v28, %v6306_v57  ;;  %5411 = vpow2.f32 %v3563_v21  ;;  %v3561_v38 = vmul.f32 1.442695, %v3516_v25  ;;  %v4916_v39 = vadd.f32 %v3369_v33, %v1829_v27  ;;  %v4870_v40 = vpop.f32.mrb[18].mxu0 }
 0x202   :  { %v1832_v48 = vpop.f32.mrb[19].mxu1  ;;  %v5394_v50 = vpop.eup %5393  ;;  %v3666_v42 = vmul.f32 %v5392_v35, %v6310_v60  ;;  %5413 = vpow2.f32 %v3559_v24  ;;  %v6375_v52 = vadd.f32 %v4915_v32, %v6300_v49  ;;  %v4917_v54 = vadd.f32 %v4870_v40, %v4678_v34 }
 0x203   :  { %v3372_v53 = vpop.f32.mrb[19].mxu0  ;;  %v5396_v43 = vpop.eup %5395  ;;  %v3664_v55 = vmul.f32 %v5394_v50, %v6314_v62  ;;  %5415 = vpow2.f32 %v3565_v30  ;;  %v6379_v57 = vadd.f32 %v4916_v39, %v6300_v49 }
 0x204   :  { %v4918_v56 = vadd.f32 %v3372_v53, %v1832_v48  ;;  %v5398_v58 = vpop.eup %5397  ;;  %v4148_v59 = vpack.c.bf16 %v3666_v42, %v3665_v29  ;;  %v3609_v61 = vadd.f32 1.0, %v5396_v43  ;;  %5417 = vpow2.f32 %v3561_v38  ;;  %v4681_v8 = vpop.f32.mrb[20].mxu1 }
 0x205   :  { %v3521_v60 = vsub.f32 0.0, %v6375_v52  ;;  %v5400_v63 = vpop.eup %5399  ;;  %v4143_v0 = vpack.c.bf16 %v3664_v55, %v3663_v37  ;;  %v3607_v1 = vadd.f32 1.0, %v5398_v58  ;;  %v3519_v2 = vsub.f32 0.0, %v6379_v57  ;;  %v1845_v46 = vpop.f32.mrb[21].mxu1 }
 0x206   :  { %v6384_v3 = vadd.f32 %v4917_v54, %v6300_v49  ;;  %v5402_v62 = vpop.eup %5401  ;;  %4220 = vst [vmem:[%s6534_s19 + $0x8] sm:$0xff] %v4148_v59   ;;  %5419 = vrcp.f32 %v3609_v61  ;;  %v3610_v5 = vadd.f32 1.0, %v5400_v63  ;;  %v6390_v7 = vadd.f32 %v4918_v56, %v6300_v49  ;;  %v4682_v23 = vpop.f32.mrb[22].mxu1 }
 0x207   :  { %v3571_v6 = vmul.f32 1.442695, %v3521_v60  ;;  %v5404_v44 = vpop.eup %5403  ;;  %4144 = vst [vmem:[%s6534_s19] sm:$0xff] %v4143_v0   ;;  %5421 = vrcp.f32 %v3607_v1  ;;  %v3608_v11 = vadd.f32 1.0, %v5402_v62  ;;  %v3567_v12 = vmul.f32 1.442695, %v3519_v2  ;;  %v4873_v15 = vpop.f32.mrb[20].mxu0 }
 0x208   :  { %v3522_v45 = vsub.f32 0.0, %v6384_v3  ;;  %v5406_v17 = vpop.eup %5405  ;;  %v3669_v20 = vmul.f32 %v5404_v44, %v6319_v10  ;;  %5423 = vrcp.f32 %v3610_v5  ;;  %v3520_v21 = vsub.f32 0.0, %v6390_v7  ;;  %v3385_v22 = vpop.f32.mrb[21].mxu0 }
 0x209   :  { %v4919_v47 = vadd.f32 %v4873_v15, %v4681_v8  ;;  %v5408_v24 = vpop.eup %5407  ;;  %v3667_v25 = vmul.f32 %v5406_v17, %v6322_v13  ;;  %5425 = vrcp.f32 %v3608_v11  ;;  %v4920_v27 = vadd.f32 %v3385_v22, %v1845_v46  ;;  %v4874_v28 = vpop.f32.mrb[22].mxu0 }
 0x20a   :  { %v3573_v26 = vmul.f32 1.442695, %v3522_v45  ;;  %v1848_v29 = vpop.f32.mrb[23].mxu1  ;;  %v5410_v30 = vpop.eup %5409  ;;  %v3670_v32 = vmul.f32 %v5408_v24, %v6326_v16  ;;  %5427 = vpow2.f32 %v3571_v6  ;;  %v3569_v33 = vmul.f32 1.442695, %v3520_v21 }
 0x20b   :  { %v6401_v10 = vadd.f32 %v4919_v47, %v6300_v49  ;;  %v3388_v34 = vpop.f32.mrb[23].mxu0  ;;  %v5412_v35 = vpop.eup %5411  ;;  %v3668_v37 = vmul.f32 %v5410_v30, %v6330_v18  ;;  %5429 = vpow2.f32 %v3567_v12  ;;  %v6405_v13 = vadd.f32 %v4920_v27, %v6300_v49 }
 0x20c   :  { %v4921_v38 = vadd.f32 %v4874_v28, %v4682_v23  ;;  %v5414_v39 = vpop.eup %5413  ;;  %v4158_v40 = vpack.c.bf16 %v3670_v32, %v3669_v20  ;;  %v3613_v48 = vadd.f32 1.0, %v5412_v35  ;;  %5431 = vpow2.f32 %v3573_v26  ;;  %v4685_v58 = vpop.f32.mrb[24].mxu1 }
 0x20d   :  { %v3525_v16 = vsub.f32 0.0, %v6401_v10  ;;  %v5416_v50 = vpop.eup %5415  ;;  %v4153_v42 = vpack.c.bf16 %v3668_v37, %v3667_v25  ;;  %v3611_v54 = vadd.f32 1.0, %v5414_v39  ;;  %5433 = vpow2.f32 %v3569_v33  ;;  %v1861_v0 = vpop.f32.mrb[25].mxu1 }
 0x20e   :  { %v3523_v53 = vsub.f32 0.0, %v6405_v13  ;;  %v5418_v43 = vpop.eup %5417  ;;  %4222 = vst [vmem:[%s6534_s19 + $0x18] sm:$0xff] %v4158_v40   ;;  %5435 = vrcp.f32 %v3613_v48  ;;  %v3614_v18 = vadd.f32 1.0, %v5416_v50  ;;  %v6413_v56 = vadd.f32 %v4921_v38, %v6300_v49  ;;  %v4686_v6 = vpop.f32.mrb[26].mxu1 }
 0x20f   :  { %v3579_v55 = vmul.f32 1.442695, %v3525_v16  ;;  %4221 = vst [vmem:[%s6534_s19 + $0x10] sm:$0xff] %v4153_v42   ;;  %5437 = vrcp.f32 %v3611_v54  ;;  %v3612_v59 = vadd.f32 1.0, %v5418_v43  ;;  %v4922_v60 = vadd.f32 %v3388_v34, %v1848_v29  ;;  %v4877_v63 = vpop.f32.mrb[24].mxu0  ;;  %v1864_v15 = vpop.f32.mrb[27].mxu1 }
 0x210   :  { %v3575_v61 = vmul.f32 1.442695, %v3523_v53  ;;  %v5420_v1 = vpop.eup %5419  ;;  %5439 = vrcp.f32 %v3614_v18  ;;  %v3526_v2 = vsub.f32 0.0, %v6413_v56  ;;  %v4923_v62 = vadd.f32 %v4877_v63, %v4685_v58  ;;  %v3401_v5 = vpop.f32.mrb[25].mxu0 }
 0x211   :  { %v5422_v8 = vpop.eup %5421  ;;  %v3673_v44 = vmul.f32 %v5420_v1, %v6335_v31  ;;  %5441 = vrcp.f32 %v3612_v59  ;;  %v6421_v11 = vadd.f32 %v4922_v60, %v6300_v49  ;;  %v4924_v12 = vadd.f32 %v3401_v5, %v1861_v0  ;;  %v4878_v45 = vpop.f32.mrb[26].mxu0 }
 0x212   :  { %v5424_v46 = vpop.eup %5423  ;;  %v3671_v17 = vmul.f32 %v5422_v8, %v6338_v36  ;;  %5443 = vpow2.f32 %v3579_v55  ;;  %v3581_v20 = vmul.f32 1.442695, %v3526_v2  ;;  %v6425_v21 = vadd.f32 %v4923_v62, %v6300_v49  ;;  %v3404_v47 = vpop.f32.mrb[27].mxu0 }
 0x213   :  { %v5426_v22 = vpop.eup %5425  ;;  %v3674_v23 = vmul.f32 %v5424_v46, %v6343_v41  ;;  %5445 = vpow2.f32 %v3575_v61  ;;  %v3524_v31 = vsub.f32 0.0, %v6421_v11  ;;  %v6430_v24 = vadd.f32 %v4924_v12, %v6300_v49 }
 0x214   :  { %v5428_v25 = vpop.eup %5427  ;;  %v3672_v26 = vmul.f32 %v5426_v22, %v6347_v51  ;;  %5447 = vpow2.f32 %v3581_v20  ;;  %v3529_v36 = vsub.f32 0.0, %v6425_v21  ;;  %v4925_v27 = vadd.f32 %v4878_v45, %v4686_v6  ;;  %v4689_v39 = vpop.f32.mrb[28].mxu1 }
 0x215   :  { %v5430_v28 = vpop.eup %5429  ;;  %v4168_v29 = vpack.c.bf16 %v3674_v23, %v3673_v44  ;;  %v3617_v30 = vadd.f32 1.0, %v5428_v25  ;;  %v3577_v32 = vmul.f32 1.442695, %v3524_v31  ;;  %v3527_v33 = vsub.f32 0.0, %v6430_v24  ;;  %v1877_v42 = vpop.f32.mrb[29].mxu1 }
 0x216   :  { %v5432_v41 = vpop.eup %5431  ;;  %v4163_v34 = vpack.c.bf16 %v3672_v26, %v3671_v17  ;;  %v3615_v35 = vadd.f32 1.0, %v5430_v28  ;;  %v3587_v37 = vmul.f32 1.442695, %v3529_v36  ;;  %v6436_v38 = vadd.f32 %v4925_v27, %v6300_v49  ;;  %v4690_v58 = vpop.f32.mrb[30].mxu1 }
 0x217   :  { %v5434_v40 = vpop.eup %5433  ;;  %4224 = vst [vmem:[%s6534_s19 + $0x28] sm:$0xff] %v4168_v29   ;;  %5449 = vrcp.f32 %v3617_v30  ;;  %v3618_v51 = vadd.f32 1.0, %v5432_v41  ;;  %v3583_v48 = vmul.f32 1.442695, %v3527_v33  ;;  %v4926_v16 = vadd.f32 %v3404_v47, %v1864_v15  ;;  %v4881_v50 = vpop.f32.mrb[28].mxu0 }
 0x218   :  { %v5436_v54 = vpop.eup %5435  ;;  %4223 = vst [vmem:[%s6534_s19 + $0x20] sm:$0xff] %v4163_v34   ;;  %5451 = vrcp.f32 %v3615_v35  ;;  %v3616_v53 = vadd.f32 1.0, %v5434_v40  ;;  %v3530_v43 = vsub.f32 0.0, %v6436_v38  ;;  %v4927_v18 = vadd.f32 %v4881_v50, %v4689_v39  ;;  %v3417_v55 = vpop.f32.mrb[29].mxu0 }
 0x219   :  { %v5438_v59 = vpop.eup %5437  ;;  %v3677_v61 = vmul.f32 %v5436_v54, %v6354_v4  ;;  %5453 = vrcp.f32 %v3618_v51  ;;  %v6447_v60 = vadd.f32 %v4926_v16, %v6300_v49  ;;  %v4928_v63 = vadd.f32 %v3417_v55, %v1877_v42  ;;  %v4882_v0 = vpop.f32.mrb[30].mxu0 }
 0x21a   :  { %v1880_v1 = vpop.f32.mrb[31].mxu1  ;;  %v5440_v2 = vpop.eup %5439  ;;  %v3675_v62 = vmul.f32 %v5438_v59, %v6358_v9  ;;  %5455 = vrcp.f32 %v3616_v53  ;;  %v3589_v5 = vmul.f32 1.442695, %v3530_v43  ;;  %v6451_v6 = vadd.f32 %v4927_v18, %v6300_v49 }
 0x21b   :  { %v3420_v8 = vpop.f32.mrb[31].mxu0  ;;  %v5442_v44 = vpop.eup %5441  ;;  %v3678_v12 = vmul.f32 %v5440_v2, %v6363_v14  ;;  %5457 = vpow2.f32 %v3577_v32  ;;  %v3528_v4 = vsub.f32 0.0, %v6447_v60  ;;  %v6456_v45 = vadd.f32 %v4928_v63, %v6300_v49 }
 0x21c   :  { %v5444_v15 = vpop.eup %5443  ;;  %v3676_v46 = vmul.f32 %v5442_v44, %v6367_v19  ;;  %5459 = vpow2.f32 %v3587_v37  ;;  %v3533_v9 = vsub.f32 0.0, %v6451_v6  ;;  %v4929_v17 = vadd.f32 %v4882_v0, %v4690_v58 }
 0x21d   :  { %v5446_v20 = vpop.eup %5445  ;;  %v4178_v47 = vpack.c.bf16 %v3678_v12, %v3677_v61  ;;  %v3621_v22 = vadd.f32 1.0, %v5444_v15  ;;  %5461 = vpow2.f32 %v3583_v48  ;;  %v3585_v14 = vmul.f32 1.442695, %v3528_v4 }
 0x21e   :  { %v5448_v23 = vpop.eup %5447  ;;  %v4173_v31 = vpack.c.bf16 %v3676_v46, %v3675_v62  ;;  %5463 = vpow2.f32 %v3589_v5  ;;  %v3595_v25 = vmul.f32 1.442695, %v3533_v9  ;;  %v3531_v19 = vsub.f32 0.0, %v6456_v45 }
 0x21f   :  { %4226 = vst [vmem:[%s6534_s19 + $0x38] sm:$0xff] %v4178_v47   ;;  %5465 = vrcp.f32 %v3621_v22  ;;  %v3622_v26 = vadd.f32 1.0, %v5448_v23  ;;  %v6465_v36 = vadd.f32 %v4929_v17, %v6300_v49  ;;  %v3619_v27 = vadd.f32 1.0, %v5446_v20 }
 0x220   :  { %4225 = vst [vmem:[%s6534_s19 + $0x30] sm:$0xff] %v4173_v31   ;;  %v4930_v28 = vadd.f32 %v3420_v8, %v1880_v1  ;;  %v3591_v33 = vmul.f32 1.442695, %v3531_v19 }
 0x221   :  { %v5450_v29 = vpop.eup %5449  ;;  %5467 = vrcp.f32 %v3622_v26  ;;  %v3534_v30 = vsub.f32 0.0, %v6465_v36 }
 0x222   :  { %v5452_v32 = vpop.eup %5451  ;;  %5469 = vpow2.f32 %v3585_v14  ;;  %v6472_v41 = vadd.f32 %v4930_v28, %v6300_v49  ;;  %v3681_v39 = vmul.f32 %v5450_v29, %v6375_v52 }
 0x223   :  { %v5454_v34 = vpop.eup %5453  ;;  %5471 = vpow2.f32 %v3595_v25  ;;  %v3597_v35 = vmul.f32 1.442695, %v3534_v30  ;;  %v3679_v16 = vmul.f32 %v5452_v32, %v6379_v57 }
 0x224   :  { %v5456_v37 = vpop.eup %5455  ;;  %v3682_v40 = vmul.f32 %v5454_v34, %v6384_v3  ;;  %5473 = vrcp.f32 %v3619_v27  ;;  %v3532_v51 = vsub.f32 0.0, %v6472_v41 }
 0x225   :  { %v5458_v48 = vpop.eup %5457  ;;  %v3680_v50 = vmul.f32 %v5456_v37, %v6390_v7  ;;  %5475 = vpow2.f32 %v3597_v35 }
 0x226   :  { %v5460_v42 = vpop.eup %5459  ;;  %v4188_v49 = vpack.c.bf16 %v3682_v40, %v3681_v39  ;;  %v3620_v54 = vadd.f32 1.0, %v5458_v48  ;;  %5477 = vpow2.f32 %v3591_v33  ;;  %v3593_v52 = vmul.f32 1.442695, %v3532_v51 }
 0x227   :  { %v5462_v53 = vpop.eup %5461  ;;  %v4183_v43 = vpack.c.bf16 %v3680_v50, %v3679_v16  ;;  %v3625_v18 = vadd.f32 1.0, %v5460_v42 }
 0x228   :  { %v5464_v55 = vpop.eup %5463  ;;  %4228 = vst [vmem:[%s6534_s19 + $0x48] sm:$0xff] %v4188_v49   ;;  %5479 = vrcp.f32 %v3620_v54  ;;  %v3623_v57 = vadd.f32 1.0, %v5462_v53 }
 0x229   :  { %v5466_v3 = vpop.eup %5465  ;;  %4227 = vst [vmem:[%s6534_s19 + $0x40] sm:$0xff] %v4183_v43   ;;  %5481 = vrcp.f32 %v3625_v18  ;;  %v3626_v7 = vadd.f32 1.0, %v5464_v55 }
 0x22a   :  { %v3685_v61 = vmul.f32 %v5466_v3, %v6401_v10 }
 0x22b   :  { %v5468_v58 = vpop.eup %5467  ;;  %5483 = vrcp.f32 %v3626_v7 }
 0x22c   :  { %v5470_v59 = vpop.eup %5469  ;;  %v3686_v63 = vmul.f32 %v5468_v58, %v6413_v56  ;;  %5485 = vpow2.f32 %v3593_v52 }
 0x22d   :  { %v5472_v0 = vpop.eup %5471  ;;  %5487 = vrcp.f32 %v3623_v57  ;;  %v3624_v1 = vadd.f32 1.0, %v5470_v59 }
 0x22e   :  { %v5474_v2 = vpop.eup %5473  ;;  %v4198_v62 = vpack.c.bf16 %v3686_v63, %v3685_v61  ;;  %v3629_v5 = vadd.f32 1.0, %v5472_v0 }
 0x22f   :  { %v5476_v8 = vpop.eup %5475  ;;  %5489 = vrcp.f32 %v3624_v1  ;;  %v3683_v56 = vmul.f32 %v5474_v2, %v6405_v13 }
 0x230   :  { %v5478_v44 = vpop.eup %5477  ;;  %4230 = vst [vmem:[%s6534_s19 + $0x58] sm:$0xff] %v4198_v62   ;;  %5491 = vrcp.f32 %v3629_v5  ;;  %v3630_v12 = vadd.f32 1.0, %v5476_v8 }
 0x231   :  { %v3627_v46 = vadd.f32 1.0, %v5478_v44 }
 0x232   :  { %v5480_v4 = vpop.eup %5479  ;;  %5493 = vrcp.f32 %v3630_v12 }
 0x233   :  { %v5482_v10 = vpop.eup %5481  ;;  %v3684_v15 = vmul.f32 %v5480_v4, %v6421_v11  ;;  %5495 = vrcp.f32 %v3627_v46 }
 0x234   :  { %v3689_v47 = vmul.f32 %v5482_v10, %v6425_v21 }
 0x235   :  { %v5484_v9 = vpop.eup %5483  ;;  %v4193_v17 = vpack.c.bf16 %v3684_v15, %v3683_v56 }
 0x236   :  { %v5486_v20 = vpop.eup %5485  ;;  %v3690_v22 = vmul.f32 %v5484_v9, %v6436_v38 }
 0x237   :  { %v5488_v23 = vpop.eup %5487  ;;  %4229 = vst [vmem:[%s6534_s19 + $0x50] sm:$0xff] %v4193_v17   ;;  %v3628_v31 = vadd.f32 1.0, %v5486_v20 }
 0x238   :  { %v4208_v14 = vpack.c.bf16 %v3690_v22, %v3689_v47  ;;  %v3687_v11 = vmul.f32 %v5488_v23, %v6430_v24 }
 0x239   :  { %v5490_v25 = vpop.eup %5489  ;;  %5497 = vrcp.f32 %v3628_v31 }
 0x23a   :  { %v5492_v13 = vpop.eup %5491  ;;  %4232 = vst [vmem:[%s6534_s19 + $0x68] sm:$0xff] %v4208_v14   ;;  %v3688_v21 = vmul.f32 %v5490_v25, %v6447_v60 }
 0x23b   :  { %v3693_v19 = vmul.f32 %v5492_v13, %v6451_v6 }
 0x23c   :  { %v5494_v38 = vpop.eup %5493  ;;  %v4203_v26 = vpack.c.bf16 %v3688_v21, %v3687_v11 }
 0x23d   :  { %v3694_v27 = vmul.f32 %v5494_v38, %v6465_v36  ;;  %v5496_v29 = vpop.eup %5495 }
 0x23e   :  { %4231 = vst [vmem:[%s6534_s19 + $0x60] sm:$0xff] %v4203_v26   ;;  %v3691_v30 = vmul.f32 %v5496_v29, %v6456_v45 }
 0x23f   :  { %v4218_v28 = vpack.c.bf16 %v3694_v27, %v3693_v19 }
 0x241   :  { %4234 = vst [vmem:[%s6534_s19 + $0x78] sm:$0xff] %v4218_v28  }
 0x243   :  { %v5498_v24 = vpop.eup %5497 }
 0x244   :  { %v3692_v60 = vmul.f32 %v5498_v24, %v6472_v41 }
 0x246   :  { %v4213_v32 = vpack.c.bf16 %v3692_v60, %v3691_v30 }
 0x248   :  { %4233 = vst [vmem:[%s6534_s19 + $0x70] sm:$0xff] %v4213_v32  }

// kernel: _lambda_.20
= control target key start
LH: loop header
LB: loop body
LE: loop exit
PB: predicated region body
PF: predicated region fallthrough
CT: control target
= control target key end

     0   :  { %s2830_s10 = inlined_call_operand.vmem [shape: bf16[128,128], index: 10, kind: input, shape index: {}]   ;;  %s2831_s13 = inlined_call_operand.vmem [shape: bf16[128,128], index: 13, kind: input, shape index: {}]   ;;  %s2832_s1 = inlined_call_operand.vmem [shape: bf16[64,128], index: 1, kind: input, shape index: {}]   ;;  %s2833_s4 = inlined_call_operand.vmem [shape: bf16[64,128], index: 4, kind: input, shape index: {}]   ;;  %s2834_s9 = inlined_call_operand.vmem [shape: bf16[128,128], index: 9, kind: input, shape index: {}]   ;;  %s2835_s14 = inlined_call_operand.vmem [shape: bf16[128,128], index: 14, kind: input, shape index: {}]   ;;  %s2836_s0 = inlined_call_operand.vmem [shape: bf16[64,128], index: 0, kind: input, shape index: {}]   ;;  %s2837_s5 = inlined_call_operand.vmem [shape: bf16[64,128], index: 5, kind: input, shape index: {}]   ;;  %s2838_s11 = inlined_call_operand.vmem [shape: bf16[128,128], index: 11, kind: input, shape index: {}]   ;;  %s2839_s15 = inlined_call_operand.vmem [shape: bf16[128,128], index: 15, kind: input, shape index: {}]   ;;  %s2840_s2 = inlined_call_operand.vmem [shape: bf16[64,128], index: 2, kind: input, shape index: {}]   ;;  %s2841_s12 = inlined_call_operand.vmem [shape: bf16[128,128], index: 12, kind: input, shape index: {}]   ;;  %s2842_s6 = inlined_call_operand.vmem [shape: bf16[64,128], index: 6, kind: input, shape index: {}]   ;;  %s2843_s16 = inlined_call_operand.vmem [shape: bf16[128,128], index: 16, kind: input, shape index: {}]   ;;  %s2844_s3 = inlined_call_operand.vmem [shape: bf16[64,128], index: 3, kind: input, shape index: {}]   ;;  %s2845_s7 = inlined_call_operand.vmem [shape: bf16[64,128], index: 7, kind: input, shape index: {}]   ;;  %s2846_s17 = inlined_call_operand.vmem [shape: bf16[128,128], index: 17, kind: input, shape index: {}]   ;;  %s2847_s8 = inlined_call_operand.vmem [shape: bf16[64,128], index: 8, kind: input, shape index: {}]   ;;  %s2848_s18 = inlined_call_operand.vmem [shape: f32[1,128], index: 18, kind: input, shape index: {}]   ;;  %s2849_s19 = inlined_call_operand.vmem [shape: bf16[64,128], index: 19, kind: output, shape index: {}]  }
   0x1   :  { %2855 = sst [smem:[#allocation2_spill]] %s2830_s10  ;;  %v2244_v18 = vld [vmem:[%s2834_s9] sm:$0xff]   ;;  %v2249_v22 = vld [vmem:[%s2834_s9 + $0x8] sm:$0xff]   ;;  %v2251_v26 = vld [vmem:[%s2834_s9 + $0x10] sm:$0xff]  }
   0x2   :  { %2856 = sst [smem:[#allocation3_spill]] %s2831_s13  ;;  %s2860_s20 = sld [smem:[#allocation2_spill]]  ;;  %v2246_v19 = vld [vmem:[%s2835_s14] sm:$0xff]   ;;  %v2250_v23 = vld [vmem:[%s2835_s14 + $0x8] sm:$0xff]   ;;  %v2252_v27 = vld [vmem:[%s2835_s14 + $0x10] sm:$0xff]  }
   0x3   :  { %2857 = sst [smem:[#allocation4_spill]] %s2832_s1  ;;  %v2253_v28 = vld [vmem:[%s2834_s9 + $0x18] sm:$0xff]   ;;  %v2267_v32 = vld [vmem:[%s2836_s0] sm:$0xff]   ;;  %v2257_v36 = vld [vmem:[%s2834_s9 + $0x28] sm:$0xff]  }
   0x4   :  { %2858 = sst [smem:[#allocation5_spill]] %s2833_s4  ;;  %s2862_s26 = sld [smem:[#allocation4_spill]]  ;;  %v2254_v31 = vld [vmem:[%s2835_s14 + $0x18] sm:$0xff]   ;;  %v2269_v33 = vld [vmem:[%s2837_s5] sm:$0xff]   ;;  %v2258_v37 = vld [vmem:[%s2835_s14 + $0x28] sm:$0xff]  }
   0x5   :  { %2859 = sst [smem:[#allocation6_spill]] %s2844_s3  ;;  %s2861_s3 = sld [smem:[#allocation3_spill]]  ;;  %v2255_v34 = vld [vmem:[%s2834_s9 + $0x20] sm:$0xff]   ;;  %v2260_v38 = vld [vmem:[%s2834_s9 + $0x30] sm:$0xff]   ;;  %v2265_v40 = vld [vmem:[%s2834_s9 + $0x38] sm:$0xff]  }
   0x6   :  { %s2863_s30 = sld [smem:[#allocation5_spill]]  ;;  %v2256_v35 = vld [vmem:[%s2835_s14 + $0x20] sm:$0xff]   ;;  %v2262_v39 = vld [vmem:[%s2835_s14 + $0x30] sm:$0xff]   ;;  %v2266_v41 = vld [vmem:[%s2835_s14 + $0x38] sm:$0xff]  }
   0x7   :  { %v2268_v42 = vld [vmem:[%s2838_s11] sm:$0xff]   ;;  %v2271_v44 = vld [vmem:[%s2836_s0 + $0x8] sm:$0xff]   ;;  %v2283_v48 = vld [vmem:[%s2836_s0 + $0x10] sm:$0xff]  }
   0x8   :  { %v2227_v0 = vld [vmem:[%s2860_s20] sm:$0xff]   ;;  %v2229_v2 = vld [vmem:[%s2860_s20 + $0x8] sm:$0xff]   ;;  %v2231_v4 = vld [vmem:[%s2860_s20 + $0x10] sm:$0xff]  }
   0x9   :  { %1931 = vmatprep.subr.bf16.mxu1 %v2227_v0  ;;  %v2233_v6 = vld [vmem:[%s2860_s20 + $0x18] sm:$0xff]   ;;  %v2235_v8 = vld [vmem:[%s2860_s20 + $0x20] sm:$0xff]   ;;  %v2237_v10 = vld [vmem:[%s2860_s20 + $0x28] sm:$0xff]  }
   0xa   :  { %1932 = vmatpush3.bf16.msra.mxu1 %v2227_v0  ;;  %v2243_v11 = vld [vmem:[%s2862_s26] sm:$0xff]   ;;  %v2239_v14 = vld [vmem:[%s2860_s20 + $0x30] sm:$0xff]   ;;  %v2241_v16 = vld [vmem:[%s2860_s20 + $0x38] sm:$0xff]  }
   0xb   :  { %v2228_v1 = vld [vmem:[%s2861_s3] sm:$0xff]   ;;  %v2230_v3 = vld [vmem:[%s2861_s3 + $0x8] sm:$0xff]   ;;  %1933 = vmatprep.subr.bf16.mxu1 %v2229_v2  ;;  %v2232_v5 = vld [vmem:[%s2861_s3 + $0x10] sm:$0xff]   ;;  %1947 = vmatprep.mubr.bf16.mxu1 %v2243_v11 }
   0xc   :  { %2027 = vmatprep.subr.bf16.mxu0 %v2228_v1  ;;  %v2234_v7 = vld [vmem:[%s2861_s3 + $0x18] sm:$0xff]   ;;  %v2236_v9 = vld [vmem:[%s2861_s3 + $0x20] sm:$0xff]   ;;  %v2238_v12 = vld [vmem:[%s2861_s3 + $0x28] sm:$0xff]  }
   0xd   :  { %2028 = vmatpush3.bf16.msra.mxu0 %v2228_v1  ;;  %v2245_v13 = vld [vmem:[%s2863_s30] sm:$0xff]   ;;  %v2240_v15 = vld [vmem:[%s2861_s3 + $0x30] sm:$0xff]   ;;  %v2242_v17 = vld [vmem:[%s2861_s3 + $0x38] sm:$0xff]  }
   0xe   :  { %2029 = vmatprep.subr.bf16.mxu0 %v2230_v3  ;;  %1934 = vmatpush3.bf16.msra.mxu1 %v2229_v2  ;;  %v2247_v20 = vld [vmem:[%s2862_s26 + $0x8] sm:$0xff]   ;;  %v2259_v24 = vld [vmem:[%s2862_s26 + $0x10] sm:$0xff]   ;;  %v2263_v29 = vld [vmem:[%s2862_s26 + $0x18] sm:$0xff]  }
   0xf   :  { %1935 = vmatprep.subr.bf16.mxu1 %v2231_v4  ;;  %2043 = vmatprep.mubr.bf16.mxu0 %v2245_v13  ;;  %v2248_v21 = vld [vmem:[%s2863_s30 + $0x8] sm:$0xff]   ;;  %v2261_v25 = vld [vmem:[%s2863_s30 + $0x10] sm:$0xff]   ;;  %v2264_v30 = vld [vmem:[%s2863_s30 + $0x18] sm:$0xff]  }
  0x10   :  { %v2270_v43 = vld [vmem:[%s2839_s15] sm:$0xff]   ;;  %v2272_v45 = vld [vmem:[%s2837_s5 + $0x8] sm:$0xff]   ;;  %v2285_v49 = vld [vmem:[%s2837_s5 + $0x10] sm:$0xff]  }
  0x11   :  { %2030 = vmatpush3.bf16.msra.mxu0 %v2230_v3  ;;  %v2273_v46 = vld [vmem:[%s2838_s11 + $0x8] sm:$0xff]   ;;  %v2275_v50 = vld [vmem:[%s2838_s11 + $0x10] sm:$0xff]   ;;  %v2277_v52 = vld [vmem:[%s2838_s11 + $0x18] sm:$0xff]  }
  0x12   :  { %2031 = vmatprep.subr.bf16.mxu0 %v2232_v5  ;;  %1936 = vmatpush3.bf16.msra.mxu1 %v2231_v4  ;;  %v2274_v47 = vld [vmem:[%s2839_s15 + $0x8] sm:$0xff]   ;;  %v2276_v51 = vld [vmem:[%s2839_s15 + $0x10] sm:$0xff]   ;;  %v2287_v53 = vld [vmem:[%s2836_s0 + $0x18] sm:$0xff]  }
  0x13   :  { %1937 = vmatprep.subr.bf16.mxu1 %v2233_v6  ;;  %v2288_v54 = vld [vmem:[%s2837_s5 + $0x18] sm:$0xff]   ;;  %v2291_v56 = vld [vmem:[%s2840_s2] sm:$0xff]   ;;  %v2281_v60 = vld [vmem:[%s2838_s11 + $0x28] sm:$0xff]  }
  0x14   :  { %v2278_v55 = vld [vmem:[%s2839_s15 + $0x18] sm:$0xff]   ;;  %v2293_v57 = vld [vmem:[%s2842_s6] sm:$0xff]   ;;  %v2282_v61 = vld [vmem:[%s2839_s15 + $0x28] sm:$0xff]  }
  0x15   :  { %2032 = vmatpush3.bf16.msra.mxu0 %v2232_v5  ;;  %v2279_v58 = vld [vmem:[%s2838_s11 + $0x20] sm:$0xff]   ;;  %v2284_v62 = vld [vmem:[%s2838_s11 + $0x30] sm:$0xff]   ;;  %v2289_v0 = vld [vmem:[%s2838_s11 + $0x38] sm:$0xff]  }
  0x16   :  { %2033 = vmatprep.subr.bf16.mxu0 %v2234_v7  ;;  %1938 = vmatpush3.bf16.msra.mxu1 %v2233_v6  ;;  %v2280_v59 = vld [vmem:[%s2839_s15 + $0x20] sm:$0xff]   ;;  %v2286_v63 = vld [vmem:[%s2839_s15 + $0x30] sm:$0xff]   ;;  %v2290_v1 = vld [vmem:[%s2839_s15 + $0x38] sm:$0xff]   ;;  %s2864_s15 = sld [smem:[#allocation6_spill]] }
  0x17   :  { %1939 = vmatprep.subr.bf16.mxu1 %v2235_v8  ;;  %v2292_v2 = vld [vmem:[%s2841_s12] sm:$0xff]   ;;  %v2295_v4 = vld [vmem:[%s2840_s2 + $0x8] sm:$0xff]   ;;  %v2300_v11 = vld [vmem:[%s2843_s16 + $0x10] sm:$0xff]  }
  0x18   :  { %v2294_v3 = vld [vmem:[%s2843_s16] sm:$0xff]   ;;  %v2296_v5 = vld [vmem:[%s2842_s6 + $0x8] sm:$0xff]   ;;  %v2309_v13 = vld [vmem:[%s2840_s2 + $0x18] sm:$0xff]  }
  0x19   :  { %2034 = vmatpush3.bf16.msra.mxu0 %v2234_v7  ;;  %v2297_v6 = vld [vmem:[%s2841_s12 + $0x8] sm:$0xff]  }
  0x1a   :  { %2035 = vmatprep.subr.bf16.mxu0 %v2236_v9  ;;  %1940 = vmatpush3.bf16.msra.mxu1 %v2235_v8  ;;  %v2298_v7 = vld [vmem:[%s2843_s16 + $0x8] sm:$0xff]   ;;  %v2307_v8 = vld [vmem:[%s2840_s2 + $0x10] sm:$0xff]  }
  0x1b   :  { %1941 = vmatprep.subr.bf16.mxu1 %v2237_v10 }
  0x1d   :  { %2036 = vmatpush3.bf16.msra.mxu0 %v2236_v9  ;;  %v2308_v9 = vld [vmem:[%s2842_s6 + $0x10] sm:$0xff]  }
  0x1e   :  { %2037 = vmatprep.subr.bf16.mxu0 %v2238_v12  ;;  %1942 = vmatpush3.bf16.msra.mxu1 %v2237_v10  ;;  %v2299_v10 = vld [vmem:[%s2841_s12 + $0x10] sm:$0xff]  }
  0x1f   :  { %1943 = vmatprep.subr.bf16.mxu1 %v2239_v14 }
  0x21   :  { %2038 = vmatpush3.bf16.msra.mxu0 %v2238_v12  ;;  %v2301_v12 = vld [vmem:[%s2841_s12 + $0x18] sm:$0xff]  }
  0x22   :  { %2039 = vmatprep.subr.bf16.mxu0 %v2240_v15  ;;  %1944 = vmatpush3.bf16.msra.mxu1 %v2239_v14  ;;  %v2311_v14 = vld [vmem:[%s2842_s6 + $0x18] sm:$0xff]  }
  0x23   :  { %1945 = vmatprep.subr.bf16.mxu1 %v2241_v16 }
  0x25   :  { %2040 = vmatpush3.bf16.msra.mxu0 %v2240_v15  ;;  %v2302_v15 = vld [vmem:[%s2843_s16 + $0x18] sm:$0xff]  }
  0x26   :  { %2041 = vmatprep.subr.bf16.mxu0 %v2242_v17  ;;  %1946 = vmatpush3.bf16.msra.mxu1 %v2241_v16  ;;  %v2315_v16 = vld [vmem:[%s2864_s15] sm:$0xff]  }
  0x27   :  { %1955 = vmatprep.subr.bf16.mxu1 %v2244_v18 }
  0x29   :  { %2042 = vmatpush3.bf16.msra.mxu0 %v2242_v17  ;;  %1948 = vmatmul.mubr.bf16.vlgmr.msra.gmra.mrb[0].mxu1 %v2247_v20  ;;  %v2316_v17 = vld [vmem:[%s2845_s7] sm:$0xff]   ;;  %v2305_v20 = vld [vmem:[%s2841_s12 + $0x28] sm:$0xff]  }
  0x2a   :  { %2051 = vmatprep.subr.bf16.mxu0 %v2246_v19  ;;  %1956 = vmatpush3.bf16.msra.mxu1 %v2244_v18  ;;  %v2303_v18 = vld [vmem:[%s2841_s12 + $0x20] sm:$0xff]  }
  0x2b   :  { %1957 = vmatprep.subr.bf16.mxu1 %v2249_v22  ;;  %1951 = vmatprep.mubr.bf16.mxu1 %v2259_v24  ;;  %v2313_v24 = vld [vmem:[%s2841_s12 + $0x38] sm:$0xff]  }
  0x2c   :  { %2044 = vmatmul.mubr.bf16.vlgmr.msra.gmra.mrb[0].mxu0 %v2248_v21  ;;  %v2306_v21 = vld [vmem:[%s2843_s16 + $0x28] sm:$0xff]  }
  0x2d   :  { %2052 = vmatpush3.bf16.msra.mxu0 %v2246_v19  ;;  %2047 = vmatprep.mubr.bf16.mxu0 %v2261_v25  ;;  %v2304_v19 = vld [vmem:[%s2843_s16 + $0x20] sm:$0xff]   ;;  %v2314_v25 = vld [vmem:[%s2843_s16 + $0x38] sm:$0xff]  }
  0x2e   :  { %2053 = vmatprep.subr.bf16.mxu0 %v2250_v23  ;;  %1958 = vmatpush3.bf16.msra.mxu1 %v2249_v22  ;;  %v2310_v22 = vld [vmem:[%s2841_s12 + $0x30] sm:$0xff]  }
  0x2f   :  { %1959 = vmatprep.subr.bf16.mxu1 %v2251_v26 }
  0x31   :  { %2054 = vmatpush3.bf16.msra.mxu0 %v2250_v23  ;;  %1952 = vmatmul.mubr.bf16.gmra.mrb[4].mxu1 %v2263_v29  ;;  %v2312_v23 = vld [vmem:[%s2843_s16 + $0x30] sm:$0xff]   ;;  %v2320_v29 = vld [vmem:[%s2846_s17 + $0x8] sm:$0xff]  }
  0x32   :  { %2055 = vmatprep.subr.bf16.mxu0 %v2252_v27  ;;  %1960 = vmatpush3.bf16.msra.mxu1 %v2251_v26  ;;  %v2319_v26 = vld [vmem:[%s2846_s17] sm:$0xff]  }
  0x33   :  { %1961 = vmatprep.subr.bf16.mxu1 %v2253_v28  ;;  %1971 = vmatprep.mubr.bf16.mxu1 %v2267_v32  ;;  %v2325_v32 = vld [vmem:[%s2846_s17 + $0x10] sm:$0xff]  }
  0x34   :  { %2048 = vmatmul.mubr.bf16.gmra.mrb[4].mxu0 %v2264_v30  ;;  %v2321_v30 = vld [vmem:[%s2864_s15 + $0x10] sm:$0xff]  }
  0x35   :  { %2056 = vmatpush3.bf16.msra.mxu0 %v2252_v27  ;;  %2067 = vmatprep.mubr.bf16.mxu0 %v2269_v33  ;;  %v2317_v27 = vld [vmem:[%s2864_s15 + $0x8] sm:$0xff]   ;;  %v2323_v33 = vld [vmem:[%s2864_s15 + $0x18] sm:$0xff]  }
  0x36   :  { %2057 = vmatprep.subr.bf16.mxu0 %v2254_v31  ;;  %1962 = vmatpush3.bf16.msra.mxu1 %v2253_v28  ;;  %v2318_v28 = vld [vmem:[%s2845_s7 + $0x8] sm:$0xff]  }
  0x37   :  { %1963 = vmatprep.subr.bf16.mxu1 %v2255_v34 }
  0x39   :  { %2058 = vmatpush3.bf16.msra.mxu0 %v2254_v31  ;;  %v2322_v31 = vld [vmem:[%s2845_s7 + $0x10] sm:$0xff]  }
  0x3a   :  { %2059 = vmatprep.subr.bf16.mxu0 %v2256_v35  ;;  %1964 = vmatpush3.bf16.msra.mxu1 %v2255_v34  ;;  %v2324_v34 = vld [vmem:[%s2845_s7 + $0x18] sm:$0xff]  }
  0x3b   :  { %1965 = vmatprep.subr.bf16.mxu1 %v2257_v36 }
  0x3d   :  { %2060 = vmatpush3.bf16.msra.mxu0 %v2256_v35  ;;  %v2326_v35 = vld [vmem:[%s2846_s17 + $0x18] sm:$0xff]  }
  0x3e   :  { %2061 = vmatprep.subr.bf16.mxu0 %v2258_v37  ;;  %1966 = vmatpush3.bf16.msra.mxu1 %v2257_v36  ;;  %v2331_v36 = vld [vmem:[%s2847_s8] sm:$0xff]  }
  0x3f   :  { %1967 = vmatprep.subr.bf16.mxu1 %v2260_v38 }
  0x41   :  { %2062 = vmatpush3.bf16.msra.mxu0 %v2258_v37  ;;  %v2332_v37 = vld [vmem:[%s2847_s8 + $0x10] sm:$0xff]  }
  0x42   :  { %2063 = vmatprep.subr.bf16.mxu0 %v2262_v39  ;;  %1968 = vmatpush3.bf16.msra.mxu1 %v2260_v38  ;;  %v2327_v38 = vld [vmem:[%s2846_s17 + $0x20] sm:$0xff]  }
  0x43   :  { %1969 = vmatprep.subr.bf16.mxu1 %v2265_v40 }
  0x45   :  { %2064 = vmatpush3.bf16.msra.mxu0 %v2262_v39  ;;  %v2328_v39 = vld [vmem:[%s2846_s17 + $0x28] sm:$0xff]  }
  0x46   :  { %2065 = vmatprep.subr.bf16.mxu0 %v2266_v41  ;;  %1970 = vmatpush3.bf16.msra.mxu1 %v2265_v40  ;;  %v2329_v40 = vld [vmem:[%s2846_s17 + $0x30] sm:$0xff]  }
  0x47   :  { %1979 = vmatprep.subr.bf16.mxu1 %v2268_v42 }
  0x49   :  { %2066 = vmatpush3.bf16.msra.mxu0 %v2266_v41  ;;  %1972 = vmatmul.mubr.bf16.vlgmr.msra.gmra.mrb[0].mxu1 %v2271_v44  ;;  %v2330_v41 = vld [vmem:[%s2846_s17 + $0x38] sm:$0xff]  }
  0x4a   :  { %2075 = vmatprep.subr.bf16.mxu0 %v2270_v43  ;;  %1980 = vmatpush3.bf16.msra.mxu1 %v2268_v42  ;;  %v2334_v42 = vld [vmem:[%s2847_s8 + $0x18] sm:$0xff]  }
  0x4b   :  { %1981 = vmatprep.subr.bf16.mxu1 %v2273_v46  ;;  %1975 = vmatprep.mubr.bf16.mxu1 %v2283_v48 }
  0x4c   :  { %2068 = vmatmul.mubr.bf16.vlgmr.msra.gmra.mrb[0].mxu0 %v2272_v45 }
  0x4d   :  { %2076 = vmatpush3.bf16.msra.mxu0 %v2270_v43  ;;  %2071 = vmatprep.mubr.bf16.mxu0 %v2285_v49  ;;  %v2333_v43 = vld [vmem:[%s2847_s8 + $0x8] sm:$0xff]  }
  0x4e   :  { %2077 = vmatprep.subr.bf16.mxu0 %v2274_v47  ;;  %1982 = vmatpush3.bf16.msra.mxu1 %v2273_v46 }
  0x4f   :  { %1983 = vmatprep.subr.bf16.mxu1 %v2275_v50 }
  0x51   :  { %2078 = vmatpush3.bf16.msra.mxu0 %v2274_v47  ;;  %1976 = vmatmul.mubr.bf16.gmra.mrb[4].mxu1 %v2287_v53 }
  0x52   :  { %2079 = vmatprep.subr.bf16.mxu0 %v2276_v51  ;;  %1984 = vmatpush3.bf16.msra.mxu1 %v2275_v50 }
  0x53   :  { %1985 = vmatprep.subr.bf16.mxu1 %v2277_v52  ;;  %1995 = vmatprep.mubr.bf16.mxu1 %v2291_v56 }
  0x54   :  { %2072 = vmatmul.mubr.bf16.gmra.mrb[4].mxu0 %v2288_v54 }
  0x55   :  { %2080 = vmatpush3.bf16.msra.mxu0 %v2276_v51  ;;  %2091 = vmatprep.mubr.bf16.mxu0 %v2293_v57 }
  0x56   :  { %2081 = vmatprep.subr.bf16.mxu0 %v2278_v55  ;;  %1986 = vmatpush3.bf16.msra.mxu1 %v2277_v52 }
  0x57   :  { %1987 = vmatprep.subr.bf16.mxu1 %v2279_v58 }
  0x59   :  { %2082 = vmatpush3.bf16.msra.mxu0 %v2278_v55 }
  0x5a   :  { %2083 = vmatprep.subr.bf16.mxu0 %v2280_v59  ;;  %1988 = vmatpush3.bf16.msra.mxu1 %v2279_v58 }
  0x5b   :  { %1989 = vmatprep.subr.bf16.mxu1 %v2281_v60 }
  0x5d   :  { %2084 = vmatpush3.bf16.msra.mxu0 %v2280_v59 }
  0x5e   :  { %2085 = vmatprep.subr.bf16.mxu0 %v2282_v61  ;;  %1990 = vmatpush3.bf16.msra.mxu1 %v2281_v60  ;;  %v1783_v60 = vld [vmem:[%s2848_s18] ss:$0 sm:$0xff] }
  0x5f   :  { %1991 = vmatprep.subr.bf16.mxu1 %v2284_v62 }
  0x61   :  { %2086 = vmatpush3.bf16.msra.mxu0 %v2282_v61 }
  0x62   :  { %2087 = vmatprep.subr.bf16.mxu0 %v2286_v63  ;;  %1992 = vmatpush3.bf16.msra.mxu1 %v2284_v62 }
  0x63   :  { %1993 = vmatprep.subr.bf16.mxu1 %v2289_v0 }
  0x65   :  { %2088 = vmatpush3.bf16.msra.mxu0 %v2286_v63 }
  0x66   :  { %2089 = vmatprep.subr.bf16.mxu0 %v2290_v1  ;;  %1994 = vmatpush3.bf16.msra.mxu1 %v2289_v0 }
  0x67   :  { %2003 = vmatprep.subr.bf16.mxu1 %v2292_v2 }
  0x69   :  { %2090 = vmatpush3.bf16.msra.mxu0 %v2290_v1  ;;  %1996 = vmatmul.mubr.bf16.vlgmr.msra.gmra.mrb[0].mxu1 %v2295_v4 }
  0x6a   :  { %2099 = vmatprep.subr.bf16.mxu0 %v2294_v3  ;;  %2004 = vmatpush3.bf16.msra.mxu1 %v2292_v2 }
  0x6b   :  { %2005 = vmatprep.subr.bf16.mxu1 %v2297_v6  ;;  %1999 = vmatprep.mubr.bf16.mxu1 %v2307_v8 }
  0x6c   :  { %2092 = vmatmul.mubr.bf16.vlgmr.msra.gmra.mrb[0].mxu0 %v2296_v5 }
  0x6d   :  { %2100 = vmatpush3.bf16.msra.mxu0 %v2294_v3  ;;  %2095 = vmatprep.mubr.bf16.mxu0 %v2308_v9 }
  0x6e   :  { %2101 = vmatprep.subr.bf16.mxu0 %v2298_v7  ;;  %2006 = vmatpush3.bf16.msra.mxu1 %v2297_v6 }
  0x6f   :  { %2007 = vmatprep.subr.bf16.mxu1 %v2299_v10 }
  0x71   :  { %2102 = vmatpush3.bf16.msra.mxu0 %v2298_v7  ;;  %2000 = vmatmul.mubr.bf16.gmra.mrb[4].mxu1 %v2309_v13 }
  0x72   :  { %2103 = vmatprep.subr.bf16.mxu0 %v2300_v11  ;;  %2008 = vmatpush3.bf16.msra.mxu1 %v2299_v10 }
  0x73   :  { %2009 = vmatprep.subr.bf16.mxu1 %v2301_v12  ;;  %2019 = vmatprep.mubr.bf16.mxu1 %v2315_v16 }
  0x74   :  { %2096 = vmatmul.mubr.bf16.gmra.mrb[4].mxu0 %v2311_v14 }
  0x75   :  { %2104 = vmatpush3.bf16.msra.mxu0 %v2300_v11  ;;  %2115 = vmatprep.mubr.bf16.mxu0 %v2316_v17 }
  0x76   :  { %2105 = vmatprep.subr.bf16.mxu0 %v2302_v15  ;;  %2010 = vmatpush3.bf16.msra.mxu1 %v2301_v12 }
  0x77   :  { %2011 = vmatprep.subr.bf16.mxu1 %v2303_v18 }
  0x79   :  { %2106 = vmatpush3.bf16.msra.mxu0 %v2302_v15 }
  0x7a   :  { %2107 = vmatprep.subr.bf16.mxu0 %v2304_v19  ;;  %2012 = vmatpush3.bf16.msra.mxu1 %v2303_v18 }
  0x7b   :  { %2013 = vmatprep.subr.bf16.mxu1 %v2305_v20 }
  0x7d   :  { %2108 = vmatpush3.bf16.msra.mxu0 %v2304_v19 }
  0x7e   :  { %2109 = vmatprep.subr.bf16.mxu0 %v2306_v21  ;;  %2014 = vmatpush3.bf16.msra.mxu1 %v2305_v20 }
  0x7f   :  { %2015 = vmatprep.subr.bf16.mxu1 %v2310_v22 }
  0x81   :  { %2110 = vmatpush3.bf16.msra.mxu0 %v2306_v21 }
  0x82   :  { %2111 = vmatprep.subr.bf16.mxu0 %v2312_v23  ;;  %2016 = vmatpush3.bf16.msra.mxu1 %v2310_v22 }
  0x83   :  { %2017 = vmatprep.subr.bf16.mxu1 %v2313_v24 }
  0x85   :  { %2112 = vmatpush3.bf16.msra.mxu0 %v2312_v23 }
  0x86   :  { %2113 = vmatprep.subr.bf16.mxu0 %v2314_v25  ;;  %2018 = vmatpush3.bf16.msra.mxu1 %v2313_v24 }
  0x87   :  { %2147 = vmatprep.subr.bf16.mxu1 %v2319_v26 }
  0x89   :  { %2114 = vmatpush3.bf16.msra.mxu0 %v2314_v25  ;;  %2020 = vmatmul.mubr.bf16.vlgmr.msra.gmra.mrb[0].mxu1 %v2317_v27 }
  0x8a   :  { %2123 = vmatprep.subr.bf16.mxu0 %v2319_v26  ;;  %2155 = vmatpush3.bf16.msra.mxu1 %v2319_v26 }
  0x8b   :  { %2148 = vmatprep.subr.bf16.mxu1 %v2320_v29  ;;  %2023 = vmatprep.mubr.bf16.mxu1 %v2321_v30 }
  0x8c   :  { %2116 = vmatmul.mubr.bf16.vlgmr.msra.gmra.mrb[0].mxu0 %v2318_v28 }
  0x8d   :  { %2124 = vmatpush3.bf16.msra.mxu0 %v2319_v26  ;;  %2119 = vmatprep.mubr.bf16.mxu0 %v2322_v31 }
  0x8e   :  { %2125 = vmatprep.subr.bf16.mxu0 %v2320_v29  ;;  %2156 = vmatpush3.bf16.msra.mxu1 %v2320_v29 }
  0x8f   :  { %2149 = vmatprep.subr.bf16.mxu1 %v2325_v32 }
  0x91   :  { %2126 = vmatpush3.bf16.msra.mxu0 %v2320_v29  ;;  %2024 = vmatmul.mubr.bf16.gmra.mrb[4].mxu1 %v2323_v33 }
  0x92   :  { %2127 = vmatprep.subr.bf16.mxu0 %v2325_v32  ;;  %2157 = vmatpush3.bf16.msra.mxu1 %v2325_v32 }
  0x93   :  { %2150 = vmatprep.subr.bf16.mxu1 %v2326_v35  ;;  %2143 = vmatprep.mubr.bf16.mxu1 %v2332_v37 }
  0x94   :  { %2120 = vmatmul.mubr.bf16.gmra.mrb[4].mxu0 %v2324_v34 }
  0x95   :  { %2128 = vmatpush3.bf16.msra.mxu0 %v2325_v32  ;;  %2139 = vmatprep.mubr.bf16.mxu0 %v2331_v36 }
  0x96   :  { %2129 = vmatprep.subr.bf16.mxu0 %v2326_v35  ;;  %2158 = vmatpush3.bf16.msra.mxu1 %v2326_v35 }
  0x97   :  { %2151 = vmatprep.subr.bf16.mxu1 %v2327_v38 }
  0x99   :  { %2130 = vmatpush3.bf16.msra.mxu0 %v2326_v35 }
  0x9a   :  { %2131 = vmatprep.subr.bf16.mxu0 %v2327_v38  ;;  %2159 = vmatpush3.bf16.msra.mxu1 %v2327_v38 }
  0x9b   :  { %2152 = vmatprep.subr.bf16.mxu1 %v2328_v39 }
  0x9d   :  { %2132 = vmatpush3.bf16.msra.mxu0 %v2327_v38 }
  0x9e   :  { %2133 = vmatprep.subr.bf16.mxu0 %v2328_v39  ;;  %2160 = vmatpush3.bf16.msra.mxu1 %v2328_v39 }
  0x9f   :  { %2153 = vmatprep.subr.bf16.mxu1 %v2329_v40 }
  0xa1   :  { %2134 = vmatpush3.bf16.msra.mxu0 %v2328_v39 }
  0xa2   :  { %2135 = vmatprep.subr.bf16.mxu0 %v2329_v40  ;;  %2161 = vmatpush3.bf16.msra.mxu1 %v2329_v40 }
  0xa3   :  { %2154 = vmatprep.subr.bf16.mxu1 %v2330_v41 }
  0xa5   :  { %2136 = vmatpush3.bf16.msra.mxu0 %v2329_v40 }
  0xa6   :  { %2137 = vmatprep.subr.bf16.mxu0 %v2330_v41  ;;  %2162 = vmatpush3.bf16.msra.mxu1 %v2330_v41 }
  0xa9   :  { %2138 = vmatpush3.bf16.msra.mxu0 %v2330_v41  ;;  %2144 = vmatmul.mubr.bf16.vlgmr.msra.gmra.mrb[8].mxu1 %v2334_v42 }
  0xac   :  { %2140 = vmatmul.mubr.bf16.vlgmr.msra.gmra.mrb[0].mxu0 %v2333_v43 }
 0x15c   :  { %v2021_v44 = vpop.f32.mrb[0].mxu1 }
 0x15d   :  { %v684_v45 = vpop.f32.mrb[1].mxu1 }
 0x15e   :  { %v2022_v46 = vpop.f32.mrb[2].mxu1 }
 0x15f   :  { %v687_v47 = vpop.f32.mrb[3].mxu1 }
 0x164   :  { %v2025_v48 = vpop.f32.mrb[4].mxu1 }
 0x165   :  { %v700_v50 = vpop.f32.mrb[5].mxu1 }
 0x166   :  { %v2026_v53 = vpop.f32.mrb[6].mxu1 }
 0x167   :  { %v2121_v49 = vpop.f32.mrb[4].mxu0  ;;  %v703_v56 = vpop.f32.mrb[7].mxu1 }
 0x168   :  { %v2167_v51 = vadd.f32 %v2121_v49, %v2025_v48  ;;  %v1376_v52 = vpop.f32.mrb[5].mxu0 }
 0x169   :  { %v2169_v54 = vadd.f32 %v1376_v52, %v700_v50  ;;  %v2122_v55 = vpop.f32.mrb[6].mxu0 }
 0x16a   :  { %v2171_v57 = vadd.f32 %v2122_v55, %v2026_v53  ;;  %v1379_v58 = vpop.f32.mrb[7].mxu0 }
 0x16b   :  { %v2173_v59 = vadd.f32 %v1379_v58, %v703_v56 }
 0x17c   :  { %v2145_v61 = vpop.f32.mrb[8].mxu1 }
 0x17d   :  { %v2168_v63 = vadd.f32 %v2167_v51, %v2145_v61  ;;  %v1545_v0 = vpop.f32.mrb[9].mxu1 }
 0x17e   :  { %v2170_v3 = vadd.f32 %v2169_v54, %v1545_v0  ;;  %v2146_v4 = vpop.f32.mrb[10].mxu1 }
 0x17f   :  { %v2141_v62 = vpop.f32.mrb[0].mxu0  ;;  %v2794_v5 = vadd.f32 %v2168_v63, %v1783_v60  ;;  %v2172_v8 = vadd.f32 %v2171_v57, %v2146_v4  ;;  %v1548_v9 = vpop.f32.mrb[11].mxu1 }
 0x180   :  { %v2163_v1 = vadd.f32 %v2141_v62, %v2021_v44  ;;  %v1529_v2 = vpop.f32.mrb[1].mxu0  ;;  %v2798_v11 = vadd.f32 %v2170_v3, %v1783_v60  ;;  %v2174_v14 = vadd.f32 %v2173_v59, %v1548_v9 }
 0x181   :  { %v2164_v6 = vadd.f32 %v1529_v2, %v684_v45  ;;  %v2142_v7 = vpop.f32.mrb[2].mxu0  ;;  %v1589_v15 = vsub.f32 0.0, %v2794_v5  ;;  %v2803_v17 = vadd.f32 %v2172_v8, %v1783_v60 }
 0x182   :  { %v2796_v10 = vadd.f32 %v2163_v1, %v1783_v60  ;;  %v2165_v12 = vadd.f32 %v2142_v7, %v2022_v46  ;;  %v1532_v13 = vpop.f32.mrb[3].mxu0  ;;  %v1587_v20 = vsub.f32 0.0, %v2798_v11  ;;  %v2807_v22 = vadd.f32 %v2174_v14, %v1783_v60 }
 0x183   :  { %v2801_v16 = vadd.f32 %v2164_v6, %v1783_v60  ;;  %v2166_v18 = vadd.f32 %v1532_v13, %v687_v47  ;;  %v1603_v23 = vmul.f32 1.442695, %v1589_v15  ;;  %v1590_v25 = vsub.f32 0.0, %v2803_v17 }
 0x184   :  { %v1585_v19 = vsub.f32 0.0, %v2796_v10  ;;  %v1578_v21 = vadd.f32 %v2165_v12, %v1783_v60  ;;  %v1599_v28 = vmul.f32 1.442695, %v1587_v20  ;;  %v1588_v30 = vsub.f32 0.0, %v2807_v22 }
 0x185   :  { %v1583_v24 = vsub.f32 0.0, %v2801_v16  ;;  %v1576_v26 = vadd.f32 %v2166_v18, %v1783_v60  ;;  %2335 = vpow2.f32 %v1603_v23  ;;  %v1605_v34 = vmul.f32 1.442695, %v1590_v25 }
 0x186   :  { %v1595_v27 = vmul.f32 1.442695, %v1585_v19  ;;  %v1586_v29 = vsub.f32 0.0, %v1578_v21  ;;  %v1601_v36 = vmul.f32 1.442695, %v1588_v30 }
 0x187   :  { %v1591_v31 = vmul.f32 1.442695, %v1583_v24  ;;  %v1584_v32 = vsub.f32 0.0, %v1576_v26 }
 0x188   :  { %2337 = vpow2.f32 %v1595_v27  ;;  %v1597_v33 = vmul.f32 1.442695, %v1586_v29 }
 0x189   :  { %2339 = vpow2.f32 %v1591_v31  ;;  %v1593_v35 = vmul.f32 1.442695, %v1584_v32 }
 0x18a   :  { %2341 = vpow2.f32 %v1599_v28 }
 0x18b   :  { %2343 = vpow2.f32 %v1597_v33 }
 0x18c   :  { %2345 = vpow2.f32 %v1605_v34 }
 0x18d   :  { %2347 = vpow2.f32 %v1593_v35 }
 0x18e   :  { %2349 = vpow2.f32 %v1601_v36 }
 0x18f   :  { %v2336_v37 = vpop.eup %2335 }
 0x190   :  { %v1613_v39 = vadd.f32 1.0, %v2336_v37 }
 0x192   :  { %v2338_v38 = vpop.eup %2337  ;;  %2351 = vrcp.f32 %v1613_v39 }
 0x193   :  { %v2340_v40 = vpop.eup %2339  ;;  %v1609_v41 = vadd.f32 1.0, %v2338_v38 }
 0x194   :  { %v2342_v42 = vpop.eup %2341  ;;  %v1607_v43 = vadd.f32 1.0, %v2340_v40 }
 0x195   :  { %v2344_v44 = vpop.eup %2343  ;;  %2353 = vrcp.f32 %v1609_v41  ;;  %v1611_v45 = vadd.f32 1.0, %v2342_v42 }
 0x196   :  { %v2346_v46 = vpop.eup %2345  ;;  %2355 = vrcp.f32 %v1607_v43  ;;  %v1610_v47 = vadd.f32 1.0, %v2344_v44 }
 0x197   :  { %v2348_v48 = vpop.eup %2347  ;;  %2357 = vrcp.f32 %v1611_v45  ;;  %v1614_v49 = vadd.f32 1.0, %v2346_v46 }
 0x198   :  { %v2350_v50 = vpop.eup %2349  ;;  %2359 = vrcp.f32 %v1610_v47  ;;  %v1608_v51 = vadd.f32 1.0, %v2348_v48 }
 0x199   :  { %2361 = vrcp.f32 %v1614_v49  ;;  %v1612_v52 = vadd.f32 1.0, %v2350_v50 }
 0x19a   :  { %2363 = vrcp.f32 %v1608_v51 }
 0x19b   :  { %2365 = vrcp.f32 %v1612_v52 }
 0x19c   :  { %v2352_v53 = vpop.eup %2351 }
 0x19d   :  { %v1629_v62 = vmul.f32 %v2352_v53, %v2794_v5 }
 0x19f   :  { %v2354_v54 = vpop.eup %2353 }
 0x1a0   :  { %v2356_v55 = vpop.eup %2355  ;;  %v1625_v59 = vmul.f32 %v2354_v54, %v2796_v10 }
 0x1a1   :  { %v2358_v56 = vpop.eup %2357  ;;  %v1623_v1 = vmul.f32 %v2356_v55, %v2801_v16 }
 0x1a2   :  { %v2360_v57 = vpop.eup %2359  ;;  %v1627_v4 = vmul.f32 %v2358_v56, %v2798_v11 }
 0x1a3   :  { %v2362_v58 = vpop.eup %2361  ;;  %v1626_v60 = vmul.f32 %v2360_v57, %v1578_v21 }
 0x1a4   :  { %v2364_v61 = vpop.eup %2363  ;;  %v1630_v63 = vmul.f32 %v2362_v58, %v2803_v17 }
 0x1a5   :  { %v2366_v0 = vpop.eup %2365  ;;  %v1808_v2 = vpack.c.bf16 %v1626_v60, %v1625_v59  ;;  %v1624_v3 = vmul.f32 %v2364_v61, %v1576_v26 }
 0x1a6   :  { %v1818_v6 = vpack.c.bf16 %v1630_v63, %v1629_v62  ;;  %v1628_v7 = vmul.f32 %v2366_v0, %v2807_v22 }
 0x1a7   :  { %1820 = vst [vmem:[%s2849_s19 + $0x8] sm:$0xff] %v1808_v2   ;;  %v1803_v8 = vpack.c.bf16 %v1624_v3, %v1623_v1 }
 0x1a8   :  { %1822 = vst [vmem:[%s2849_s19 + $0x18] sm:$0xff] %v1818_v6   ;;  %v1813_v5 = vpack.c.bf16 %v1628_v7, %v1627_v4 }
 0x1a9   :  { %1804 = vst [vmem:[%s2849_s19] sm:$0xff] %v1803_v8  }
 0x1aa   :  { %1821 = vst [vmem:[%s2849_s19 + $0x10] sm:$0xff] %v1813_v5  }

// kernel: _lambda_.24
= control target key start
LH: loop header
LB: loop body
LE: loop exit
PB: predicated region body
PF: predicated region fallthrough
CT: control target
= control target key end

     0   :  { %v228_v0 = vmov 0.0   ;;  %vm229_vm0 = vmmov 0   ;;  %s283_s1 = inlined_call_operand.vmem [shape: bf16[128,128], index: 1, kind: input, shape index: {}]   ;;  %s284_s0 = inlined_call_operand.vmem [shape: bf16[16,128], index: 0, kind: input, shape index: {}]   ;;  %s285_s2 = inlined_call_operand.vmem [shape: f32[1,128], index: 2, kind: input, shape index: {}]   ;;  %s286_s3 = inlined_call_operand.vmem [shape: bf16[16,128], index: 3, kind: output, shape index: {}]  }
   0x1   :  { %189 = vmatprep.subr.bf16.mxu0 %v228_v0  ;;  %v211_v1 = vld [vmem:[%s283_s1] sm:$0xff]   ;;  %205 = vmatprep.mubr.msk.bf16.mxu0 %vm229_vm0, %v228_v0  ;;  %v212_v2 = vld [vmem:[%s283_s1 + $0x8] sm:$0xff]   ;;  %v213_v3 = vld [vmem:[%s283_s1 + $0x10] sm:$0xff]  }
   0x2   :  { %190 = vmatpush3.bf16.msra.mxu0 %v211_v1  ;;  %v214_v4 = vld [vmem:[%s283_s1 + $0x18] sm:$0xff]   ;;  %v215_v5 = vld [vmem:[%s283_s1 + $0x20] sm:$0xff]   ;;  %v216_v6 = vld [vmem:[%s283_s1 + $0x28] sm:$0xff]  }
   0x3   :  { %191 = vmatprep.subr.bf16.mxu0 %v228_v0  ;;  %v217_v7 = vld [vmem:[%s283_s1 + $0x30] sm:$0xff]   ;;  %v218_v8 = vld [vmem:[%s283_s1 + $0x38] sm:$0xff]   ;;  %v219_v9 = vld [vmem:[%s284_s0] sm:$0xff]  }
   0x4   :  { %v161_v10 = vld [vmem:[%s285_s2] ss:$0 sm:$0xff] }
   0x6   :  { %192 = vmatpush3.bf16.msra.mxu0 %v212_v2 }
   0x7   :  { %193 = vmatprep.subr.bf16.mxu0 %v228_v0 }
   0xa   :  { %194 = vmatpush3.bf16.msra.mxu0 %v213_v3 }
   0xb   :  { %195 = vmatprep.subr.bf16.mxu0 %v228_v0 }
   0xe   :  { %196 = vmatpush3.bf16.msra.mxu0 %v214_v4 }
   0xf   :  { %197 = vmatprep.subr.bf16.mxu0 %v228_v0 }
  0x12   :  { %198 = vmatpush3.bf16.msra.mxu0 %v215_v5 }
  0x13   :  { %199 = vmatprep.subr.bf16.mxu0 %v228_v0 }
  0x16   :  { %200 = vmatpush3.bf16.msra.mxu0 %v216_v6 }
  0x17   :  { %201 = vmatprep.subr.bf16.mxu0 %v228_v0 }
  0x1a   :  { %202 = vmatpush3.bf16.msra.mxu0 %v217_v7 }
  0x1b   :  { %203 = vmatprep.subr.bf16.mxu0 %v228_v0 }
  0x1e   :  { %204 = vmatpush3.bf16.msra.mxu0 %v218_v8 }
  0x21   :  { %206 = vmatmul.mubr.bf16.vlgmr.msra.gmra.mrb[0].mxu0 %v219_v9 }
  0xf4   :  { %v128_v11 = vpop.f32.mrb[0].mxu0 }
  0xf5   :  { %v129_v12 = vadd.f32 %v161_v10, %v128_v11  ;;  %v207_v13 = vpop.f32.mrb[1].mxu0 }
  0xf6   :  { %v131_v14 = vpop.f32.mrb[2].mxu0 }
  0xf7   :  { %v135_v15 = vsub.f32 0.0, %v129_v12  ;;  %v132_v16 = vadd.f32 %v161_v10, %v131_v14  ;;  %v208_v17 = vpop.f32.mrb[3].mxu0 }
  0xf9   :  { %v137_v18 = vmul.f32 1.442695, %v135_v15  ;;  %v136_v19 = vsub.f32 0.0, %v132_v16 }
  0xfb   :  { %220 = vpow2.f32 %v137_v18  ;;  %v139_v20 = vmul.f32 1.442695, %v136_v19 }
  0xfd   :  { %222 = vpow2.f32 %v139_v20 }
 0x105   :  { %v221_v21 = vpop.eup %220 }
 0x106   :  { %v141_v22 = vadd.f32 1.0, %v221_v21 }
 0x107   :  { %v223_v23 = vpop.eup %222 }
 0x108   :  { %224 = vrcp.f32 %v141_v22  ;;  %v142_v24 = vadd.f32 1.0, %v223_v23 }
 0x10a   :  { %226 = vrcp.f32 %v142_v24 }
 0x112   :  { %v225_v25 = vpop.eup %224 }
 0x113   :  { %v145_v27 = vmul.f32 %v225_v25, %v129_v12 }
 0x114   :  { %v227_v26 = vpop.eup %226 }
 0x115   :  { %v146_v28 = vmul.f32 %v227_v26, %v132_v16 }
 0x117   :  { %v178_v29 = vpack.c.bf16 %v146_v28, %v145_v27 }
 0x119   :  { %179 = vst [vmem:[%s286_s3] sm:$0xff] %v178_v29  }

// kernel: _lambda_.25
= control target key start
LH: loop header
LB: loop body
LE: loop exit
PB: predicated region body
PF: predicated region fallthrough
CT: control target
= control target key end

     0   :  { %v537_v0 = vmov 0.0   ;;  %vm538_vm0 = vmmov 0   ;;  %vm82_vm1 = vcmask 523264   ;;  %s663_s5 = inlined_call_operand.vmem [shape: bf16[64,128], index: 5, kind: input, shape index: {}]   ;;  %s664_s4 = inlined_call_operand.vmem [shape: bf16[64,128], index: 4, kind: input, shape index: {}]   ;;  %s665_s1 = inlined_call_operand.vmem [shape: bf16[16,64], index: 1, kind: input, shape index: {}]   ;;  %s666_s0 = inlined_call_operand.vmem [shape: bf16[16,64], index: 0, kind: input, shape index: {}]   ;;  %s667_s6 = inlined_call_operand.vmem [shape: bf16[64,128], index: 6, kind: input, shape index: {}]   ;;  %s668_s7 = inlined_call_operand.vmem [shape: bf16[64,128], index: 7, kind: input, shape index: {}]   ;;  %s669_s2 = inlined_call_operand.vmem [shape: bf16[16,64], index: 2, kind: input, shape index: {}]   ;;  %s670_s3 = inlined_call_operand.vmem [shape: bf16[16,64], index: 3, kind: input, shape index: {}]   ;;  %s671_s8 = inlined_call_operand.vmem [shape: f32[1,128], index: 8, kind: input, shape index: {}]   ;;  %s672_s9 = inlined_call_operand.vmem [shape: bf16[16,128], index: 9, kind: output, shape index: {}]  }
   0x1   :  { %459 = vmatprep.subr.bf16.mxu0 %v537_v0  ;;  %471 = vmatprep.subr.bf16.mxu1 %v537_v0  ;;  %v509_v1 = vld [vmem:[%s663_s5] sm:$0xff]   ;;  %v511_v3 = vld [vmem:[%s663_s5 + $0x8] sm:$0xff]   ;;  %v513_v5 = vld [vmem:[%s663_s5 + $0x10] sm:$0xff]  }
   0x2   :  { %v510_v2 = vld [vmem:[%s664_s4] sm:$0xff]   ;;  %467 = vmatprep.mubr.msk.bf16.mxu0 %vm538_vm0, %v537_v0  ;;  %479 = vmatprep.mubr.msk.bf16.mxu1 %vm538_vm0, %v537_v0  ;;  %v512_v4 = vld [vmem:[%s664_s4 + $0x8] sm:$0xff]   ;;  %v514_v6 = vld [vmem:[%s664_s4 + $0x10] sm:$0xff]  }
   0x3   :  { %460 = vmatpush3.bf16.msra.mxu0 %v509_v1  ;;  %472 = vmatpush3.bf16.msra.mxu1 %v510_v2  ;;  %v515_v7 = vld [vmem:[%s663_s5 + $0x18] sm:$0xff]   ;;  %v517_v9 = vld [vmem:[%s665_s1] sm:$0xff]   ;;  %v521_v13 = vld [vmem:[%s667_s6 + $0x8] sm:$0xff]  }
   0x4   :  { %461 = vmatprep.subr.bf16.mxu0 %v537_v0  ;;  %473 = vmatprep.subr.bf16.mxu1 %v537_v0  ;;  %v516_v8 = vld [vmem:[%s664_s4 + $0x18] sm:$0xff]   ;;  %v518_v10 = vld [vmem:[%s666_s0] sm:$0xff]   ;;  %v522_v14 = vld [vmem:[%s668_s7 + $0x8] sm:$0xff]  }
   0x5   :  { %v519_v11 = vld [vmem:[%s667_s6] sm:$0xff]   ;;  %v523_v15 = vld [vmem:[%s667_s6 + $0x10] sm:$0xff]   ;;  %v525_v17 = vld [vmem:[%s667_s6 + $0x18] sm:$0xff]  }
   0x6   :  { %v520_v12 = vld [vmem:[%s668_s7] sm:$0xff]   ;;  %v524_v16 = vld [vmem:[%s668_s7 + $0x10] sm:$0xff]   ;;  %v526_v18 = vld [vmem:[%s668_s7 + $0x18] sm:$0xff]  }
   0x7   :  { %462 = vmatpush3.bf16.msra.mxu0 %v511_v3  ;;  %474 = vmatpush3.bf16.msra.mxu1 %v512_v4  ;;  %v527_v19 = vld [vmem:[%s669_s2] sm:$0xff]  }
   0x8   :  { %463 = vmatprep.subr.bf16.mxu0 %v537_v0  ;;  %475 = vmatprep.subr.bf16.mxu1 %v537_v0  ;;  %v528_v20 = vld [vmem:[%s670_s3] sm:$0xff]  }
   0x9   :  { %v429_v35 = vld [vmem:[%s671_s8] ss:$0 sm:$0xff] }
   0xb   :  { %464 = vmatpush3.bf16.msra.mxu0 %v513_v5  ;;  %476 = vmatpush3.bf16.msra.mxu1 %v514_v6 }
   0xc   :  { %465 = vmatprep.subr.bf16.mxu0 %v537_v0  ;;  %477 = vmatprep.subr.bf16.mxu1 %v537_v0 }
   0xf   :  { %466 = vmatpush3.bf16.msra.mxu0 %v515_v7  ;;  %478 = vmatpush3.bf16.msra.mxu1 %v516_v8 }
  0x10   :  { %483 = vmatprep.subr.bf16.mxu0 %v537_v0  ;;  %495 = vmatprep.subr.bf16.mxu1 %v537_v0 }
  0x12   :  { %468 = vmatmul.mubr.msk.bf16.vlgmr.msra.gmra.mrb[0].mxu0 %vm82_vm1, %v517_v9  ;;  %480 = vmatmul.mubr.msk.bf16.vlgmr.msra.gmra.mrb[0].mxu1 %vm82_vm1, %v518_v10 }
  0x13   :  { %484 = vmatpush3.bf16.msra.mxu0 %v519_v11  ;;  %496 = vmatpush3.bf16.msra.mxu1 %v520_v12 }
  0x14   :  { %485 = vmatprep.subr.bf16.mxu0 %v537_v0  ;;  %497 = vmatprep.subr.bf16.mxu1 %v537_v0 }
  0x15   :  { %491 = vmatprep.mubr.msk.bf16.mxu0 %vm538_vm0, %v537_v0  ;;  %503 = vmatprep.mubr.msk.bf16.mxu1 %vm538_vm0, %v537_v0 }
  0x17   :  { %486 = vmatpush3.bf16.msra.mxu0 %v521_v13  ;;  %498 = vmatpush3.bf16.msra.mxu1 %v522_v14 }
  0x18   :  { %487 = vmatprep.subr.bf16.mxu0 %v537_v0  ;;  %499 = vmatprep.subr.bf16.mxu1 %v537_v0 }
  0x1b   :  { %488 = vmatpush3.bf16.msra.mxu0 %v523_v15  ;;  %500 = vmatpush3.bf16.msra.mxu1 %v524_v16 }
  0x1c   :  { %489 = vmatprep.subr.bf16.mxu0 %v537_v0  ;;  %501 = vmatprep.subr.bf16.mxu1 %v537_v0 }
  0x1f   :  { %490 = vmatpush3.bf16.msra.mxu0 %v525_v17  ;;  %502 = vmatpush3.bf16.msra.mxu1 %v526_v18 }
  0x22   :  { %492 = vmatmul.mubr.msk.bf16.vlgmr.msra.gmra.mrb[4].mxu0 %vm82_vm1, %v527_v19  ;;  %504 = vmatmul.mubr.msk.bf16.vlgmr.msra.gmra.mrb[4].mxu1 %vm82_vm1, %v528_v20 }
  0xe5   :  { %v120_v21 = vpop.f32.mrb[0].mxu0  ;;  %v193_v22 = vpop.f32.mrb[0].mxu1 }
  0xe6   :  { %v469_v23 = vpop.f32.mrb[1].mxu0  ;;  %v194_v24 = vadd.f32 %v193_v22, %v120_v21  ;;  %v481_v25 = vpop.f32.mrb[1].mxu1 }
  0xe7   :  { %v123_v26 = vpop.f32.mrb[2].mxu0  ;;  %v196_v27 = vpop.f32.mrb[2].mxu1 }
  0xe8   :  { %v470_v28 = vpop.f32.mrb[3].mxu0  ;;  %v197_v29 = vadd.f32 %v196_v27, %v123_v26  ;;  %v482_v30 = vpop.f32.mrb[3].mxu1 }
  0xf5   :  { %v276_v31 = vpop.f32.mrb[4].mxu0  ;;  %v361_v33 = vpop.f32.mrb[4].mxu1 }
  0xf6   :  { %v283_v32 = vadd.f32 %v276_v31, %v194_v24  ;;  %v493_v34 = vpop.f32.mrb[5].mxu0  ;;  %v505_v36 = vpop.f32.mrb[5].mxu1 }
  0xf7   :  { %v279_v37 = vpop.f32.mrb[6].mxu0  ;;  %v364_v40 = vpop.f32.mrb[6].mxu1 }
  0xf8   :  { %v368_v38 = vadd.f32 %v361_v33, %v283_v32  ;;  %v284_v39 = vadd.f32 %v279_v37, %v197_v29  ;;  %v494_v41 = vpop.f32.mrb[7].mxu0  ;;  %v506_v42 = vpop.f32.mrb[7].mxu1 }
  0xfa   :  { %v377_v43 = vadd.f32 %v429_v35, %v368_v38  ;;  %v369_v44 = vadd.f32 %v364_v40, %v284_v39 }
  0xfc   :  { %v379_v45 = vsub.f32 0.0, %v377_v43  ;;  %v378_v46 = vadd.f32 %v429_v35, %v369_v44 }
  0xfe   :  { %v381_v47 = vmul.f32 1.442695, %v379_v45  ;;  %v380_v48 = vsub.f32 0.0, %v378_v46 }
 0x100   :  { %529 = vpow2.f32 %v381_v47  ;;  %v383_v49 = vmul.f32 1.442695, %v380_v48 }
 0x102   :  { %531 = vpow2.f32 %v383_v49 }
 0x10a   :  { %v530_v50 = vpop.eup %529 }
 0x10b   :  { %v385_v51 = vadd.f32 1.0, %v530_v50 }
 0x10c   :  { %v532_v52 = vpop.eup %531 }
 0x10d   :  { %533 = vrcp.f32 %v385_v51  ;;  %v386_v53 = vadd.f32 1.0, %v532_v52 }
 0x10f   :  { %535 = vrcp.f32 %v386_v53 }
 0x117   :  { %v534_v54 = vpop.eup %533 }
 0x118   :  { %v389_v56 = vmul.f32 %v534_v54, %v377_v43 }
 0x119   :  { %v536_v55 = vpop.eup %535 }
 0x11a   :  { %v390_v57 = vmul.f32 %v536_v55, %v378_v46 }
 0x11c   :  { %v437_v58 = vpack.c.bf16 %v390_v57, %v389_v56 }
 0x11e   :  { %438 = vst [vmem:[%s672_s9] sm:$0xff] %v437_v58  }

// kernel: _lambda_.23
= control target key start
LH: loop header
LB: loop body
LE: loop exit
PB: predicated region body
PF: predicated region fallthrough
CT: control target
= control target key end

     0   :  { %v1572_v0 = vmov 0.0   ;;  %vm1573_vm0 = vmmov 0   ;;  %s2013_s10 = inlined_call_operand.vmem [shape: bf16[128,128], index: 10, kind: input, shape index: {}]   ;;  %s2014_s9 = inlined_call_operand.vmem [shape: bf16[128,128], index: 9, kind: input, shape index: {}]   ;;  %s2015_s1 = inlined_call_operand.vmem [shape: bf16[16,128], index: 1, kind: input, shape index: {}]   ;;  %s2016_s0 = inlined_call_operand.vmem [shape: bf16[16,128], index: 0, kind: input, shape index: {}]   ;;  %s2017_s11 = inlined_call_operand.vmem [shape: bf16[128,128], index: 11, kind: input, shape index: {}]   ;;  %s2018_s12 = inlined_call_operand.vmem [shape: bf16[128,128], index: 12, kind: input, shape index: {}]   ;;  %s2019_s2 = inlined_call_operand.vmem [shape: bf16[16,128], index: 2, kind: input, shape index: {}]   ;;  %s2020_s13 = inlined_call_operand.vmem [shape: bf16[128,128], index: 13, kind: input, shape index: {}]   ;;  %s2021_s3 = inlined_call_operand.vmem [shape: bf16[16,128], index: 3, kind: input, shape index: {}]   ;;  %s2022_s14 = inlined_call_operand.vmem [shape: bf16[128,128], index: 14, kind: input, shape index: {}]   ;;  %s2023_s4 = inlined_call_operand.vmem [shape: bf16[16,128], index: 4, kind: input, shape index: {}]   ;;  %s2024_s15 = inlined_call_operand.vmem [shape: bf16[128,128], index: 15, kind: input, shape index: {}]   ;;  %s2025_s5 = inlined_call_operand.vmem [shape: bf16[16,128], index: 5, kind: input, shape index: {}]   ;;  %s2026_s16 = inlined_call_operand.vmem [shape: bf16[128,128], index: 16, kind: input, shape index: {}]   ;;  %s2027_s6 = inlined_call_operand.vmem [shape: bf16[16,128], index: 6, kind: input, shape index: {}]   ;;  %s2028_s17 = inlined_call_operand.vmem [shape: bf16[128,128], index: 17, kind: input, shape index: {}]   ;;  %s2029_s7 = inlined_call_operand.vmem [shape: bf16[16,128], index: 7, kind: input, shape index: {}]   ;;  %s2030_s8 = inlined_call_operand.vmem [shape: bf16[16,128], index: 8, kind: input, shape index: {}]   ;;  %s2031_s18 = inlined_call_operand.vmem [shape: f32[1,128], index: 18, kind: input, shape index: {}]   ;;  %s2032_s19 = inlined_call_operand.vmem [shape: bf16[16,128], index: 19, kind: output, shape index: {}]  }
   0x1   :  { %2035 = sst [smem:[#allocation2_spill]] %s2013_s10  ;;  %1301 = vmatprep.subr.bf16.mxu0 %v1572_v0  ;;  %1321 = vmatprep.subr.bf16.mxu1 %v1572_v0  ;;  %v1501_v19 = vld [vmem:[%s2017_s11] sm:$0xff]   ;;  %v1503_v21 = vld [vmem:[%s2017_s11 + $0x8] sm:$0xff]   ;;  %v1505_v23 = vld [vmem:[%s2017_s11 + $0x10] sm:$0xff]  }
   0x2   :  { %2036 = sst [smem:[#allocation3_spill]] %s2014_s9  ;;  %s2039_s20 = sld [smem:[#allocation2_spill]]  ;;  %1317 = vmatprep.mubr.msk.bf16.mxu0 %vm1573_vm0, %v1572_v0  ;;  %1337 = vmatprep.mubr.msk.bf16.mxu1 %vm1573_vm0, %v1572_v0  ;;  %v1502_v20 = vld [vmem:[%s2018_s12] sm:$0xff]   ;;  %v1504_v22 = vld [vmem:[%s2018_s12 + $0x8] sm:$0xff]   ;;  %v1506_v24 = vld [vmem:[%s2018_s12 + $0x10] sm:$0xff]  }
   0x3   :  { %2037 = sst [smem:[#allocation4_spill]] %s2015_s1  ;;  %s2040_s22 = sld [smem:[#allocation3_spill]]  ;;  %v1507_v25 = vld [vmem:[%s2017_s11 + $0x18] sm:$0xff]   ;;  %v1509_v27 = vld [vmem:[%s2017_s11 + $0x20] sm:$0xff]   ;;  %v1511_v29 = vld [vmem:[%s2017_s11 + $0x28] sm:$0xff]  }
   0x4   :  { %2038 = sst [smem:[#allocation5_spill]] %s2016_s0  ;;  %s2041_s0 = sld [smem:[#allocation4_spill]]  ;;  %v1508_v26 = vld [vmem:[%s2018_s12 + $0x18] sm:$0xff]   ;;  %v1510_v28 = vld [vmem:[%s2018_s12 + $0x20] sm:$0xff]   ;;  %v1512_v30 = vld [vmem:[%s2018_s12 + $0x28] sm:$0xff]  }
   0x5   :  { %s2042_s28 = sld [smem:[#allocation5_spill]]  ;;  %v1513_v31 = vld [vmem:[%s2017_s11 + $0x30] sm:$0xff]   ;;  %v1515_v33 = vld [vmem:[%s2017_s11 + $0x38] sm:$0xff]   ;;  %v1517_v35 = vld [vmem:[%s2019_s2] sm:$0xff]  }
   0x6   :  { %v1514_v32 = vld [vmem:[%s2018_s12 + $0x30] sm:$0xff]   ;;  %v1516_v34 = vld [vmem:[%s2018_s12 + $0x38] sm:$0xff]   ;;  %v1518_v36 = vld [vmem:[%s2020_s13] sm:$0xff]  }
   0x7   :  { %v1519_v37 = vld [vmem:[%s2021_s3] sm:$0xff]   ;;  %v1521_v39 = vld [vmem:[%s2020_s13 + $0x8] sm:$0xff]   ;;  %v1523_v41 = vld [vmem:[%s2020_s13 + $0x10] sm:$0xff]  }
   0x8   :  { %v1483_v1 = vld [vmem:[%s2039_s20] sm:$0xff]   ;;  %v1485_v3 = vld [vmem:[%s2039_s20 + $0x8] sm:$0xff]   ;;  %v1487_v5 = vld [vmem:[%s2039_s20 + $0x10] sm:$0xff]  }
   0x9   :  { %v1484_v2 = vld [vmem:[%s2040_s22] sm:$0xff]   ;;  %1302 = vmatpush3.bf16.msra.mxu0 %v1483_v1  ;;  %v1486_v4 = vld [vmem:[%s2040_s22 + $0x8] sm:$0xff]   ;;  %v1488_v6 = vld [vmem:[%s2040_s22 + $0x10] sm:$0xff]  }
   0xa   :  { %1322 = vmatpush3.bf16.msra.mxu1 %v1484_v2  ;;  %1303 = vmatprep.subr.bf16.mxu0 %v1572_v0  ;;  %v1489_v7 = vld [vmem:[%s2039_s20 + $0x18] sm:$0xff]   ;;  %v1491_v9 = vld [vmem:[%s2039_s20 + $0x20] sm:$0xff]   ;;  %v1493_v11 = vld [vmem:[%s2039_s20 + $0x28] sm:$0xff]  }
   0xb   :  { %1323 = vmatprep.subr.bf16.mxu1 %v1572_v0  ;;  %v1490_v8 = vld [vmem:[%s2040_s22 + $0x18] sm:$0xff]   ;;  %v1492_v10 = vld [vmem:[%s2040_s22 + $0x20] sm:$0xff]   ;;  %v1494_v12 = vld [vmem:[%s2040_s22 + $0x28] sm:$0xff]  }
   0xc   :  { %v1495_v13 = vld [vmem:[%s2039_s20 + $0x30] sm:$0xff]   ;;  %v1497_v15 = vld [vmem:[%s2039_s20 + $0x38] sm:$0xff]   ;;  %v1499_v17 = vld [vmem:[%s2041_s0] sm:$0xff]  }
   0xd   :  { %1304 = vmatpush3.bf16.msra.mxu0 %v1485_v3  ;;  %v1496_v14 = vld [vmem:[%s2040_s22 + $0x30] sm:$0xff]   ;;  %v1498_v16 = vld [vmem:[%s2040_s22 + $0x38] sm:$0xff]   ;;  %v1500_v18 = vld [vmem:[%s2042_s28] sm:$0xff]  }
   0xe   :  { %1324 = vmatpush3.bf16.msra.mxu1 %v1486_v4  ;;  %1305 = vmatprep.subr.bf16.mxu0 %v1572_v0  ;;  %v1520_v38 = vld [vmem:[%s2022_s14] sm:$0xff]   ;;  %v1522_v40 = vld [vmem:[%s2022_s14 + $0x8] sm:$0xff]   ;;  %v1524_v42 = vld [vmem:[%s2022_s14 + $0x10] sm:$0xff]  }
   0xf   :  { %1325 = vmatprep.subr.bf16.mxu1 %v1572_v0  ;;  %v1525_v43 = vld [vmem:[%s2020_s13 + $0x18] sm:$0xff]   ;;  %v1527_v45 = vld [vmem:[%s2020_s13 + $0x20] sm:$0xff]   ;;  %v1529_v47 = vld [vmem:[%s2020_s13 + $0x28] sm:$0xff]  }
  0x10   :  { %v1526_v44 = vld [vmem:[%s2022_s14 + $0x18] sm:$0xff]   ;;  %v1528_v46 = vld [vmem:[%s2022_s14 + $0x20] sm:$0xff]   ;;  %v1530_v48 = vld [vmem:[%s2022_s14 + $0x28] sm:$0xff]  }
  0x11   :  { %1306 = vmatpush3.bf16.msra.mxu0 %v1487_v5  ;;  %v1531_v49 = vld [vmem:[%s2020_s13 + $0x30] sm:$0xff]   ;;  %v1533_v51 = vld [vmem:[%s2020_s13 + $0x38] sm:$0xff]   ;;  %v1535_v53 = vld [vmem:[%s2023_s4] sm:$0xff]  }
  0x12   :  { %1326 = vmatpush3.bf16.msra.mxu1 %v1488_v6  ;;  %1307 = vmatprep.subr.bf16.mxu0 %v1572_v0  ;;  %v1532_v50 = vld [vmem:[%s2022_s14 + $0x30] sm:$0xff]   ;;  %v1534_v52 = vld [vmem:[%s2022_s14 + $0x38] sm:$0xff]   ;;  %v1536_v54 = vld [vmem:[%s2024_s15] sm:$0xff]  }
  0x13   :  { %1327 = vmatprep.subr.bf16.mxu1 %v1572_v0  ;;  %v1537_v55 = vld [vmem:[%s2025_s5] sm:$0xff]   ;;  %v1539_v57 = vld [vmem:[%s2024_s15 + $0x8] sm:$0xff]   ;;  %v1541_v59 = vld [vmem:[%s2024_s15 + $0x10] sm:$0xff]  }
  0x14   :  { %v1538_v56 = vld [vmem:[%s2026_s16] sm:$0xff]   ;;  %v1540_v58 = vld [vmem:[%s2026_s16 + $0x8] sm:$0xff]   ;;  %v1542_v60 = vld [vmem:[%s2026_s16 + $0x10] sm:$0xff]  }
  0x15   :  { %1308 = vmatpush3.bf16.msra.mxu0 %v1489_v7  ;;  %v1543_v61 = vld [vmem:[%s2024_s15 + $0x18] sm:$0xff]   ;;  %v1545_v63 = vld [vmem:[%s2024_s15 + $0x20] sm:$0xff]   ;;  %v1547_v2 = vld [vmem:[%s2024_s15 + $0x28] sm:$0xff]  }
  0x16   :  { %1328 = vmatpush3.bf16.msra.mxu1 %v1490_v8  ;;  %1309 = vmatprep.subr.bf16.mxu0 %v1572_v0  ;;  %v1544_v62 = vld [vmem:[%s2026_s16 + $0x18] sm:$0xff]   ;;  %v1546_v1 = vld [vmem:[%s2026_s16 + $0x20] sm:$0xff]   ;;  %v1548_v3 = vld [vmem:[%s2026_s16 + $0x28] sm:$0xff]  }
  0x17   :  { %1329 = vmatprep.subr.bf16.mxu1 %v1572_v0  ;;  %v1549_v4 = vld [vmem:[%s2024_s15 + $0x30] sm:$0xff]   ;;  %v1551_v6 = vld [vmem:[%s2024_s15 + $0x38] sm:$0xff]   ;;  %v1553_v8 = vld [vmem:[%s2027_s6] sm:$0xff]  }
  0x18   :  { %v1550_v5 = vld [vmem:[%s2026_s16 + $0x30] sm:$0xff]   ;;  %v1552_v7 = vld [vmem:[%s2026_s16 + $0x38] sm:$0xff]  }
  0x19   :  { %1310 = vmatpush3.bf16.msra.mxu0 %v1491_v9  ;;  %v1554_v9 = vld [vmem:[%s2028_s17] sm:$0xff]  }
  0x1a   :  { %1330 = vmatpush3.bf16.msra.mxu1 %v1492_v10  ;;  %1311 = vmatprep.subr.bf16.mxu0 %v1572_v0  ;;  %v1555_v10 = vld [vmem:[%s2029_s7] sm:$0xff]  }
  0x1b   :  { %1331 = vmatprep.subr.bf16.mxu1 %v1572_v0 }
  0x1d   :  { %1312 = vmatpush3.bf16.msra.mxu0 %v1493_v11  ;;  %v1556_v11 = vld [vmem:[%s2028_s17 + $0x8] sm:$0xff]  }
  0x1e   :  { %1332 = vmatpush3.bf16.msra.mxu1 %v1494_v12  ;;  %1313 = vmatprep.subr.bf16.mxu0 %v1572_v0  ;;  %v1557_v12 = vld [vmem:[%s2028_s17 + $0x10] sm:$0xff]  }
  0x1f   :  { %1333 = vmatprep.subr.bf16.mxu1 %v1572_v0 }
  0x21   :  { %1314 = vmatpush3.bf16.msra.mxu0 %v1495_v13  ;;  %v1558_v13 = vld [vmem:[%s2028_s17 + $0x18] sm:$0xff]  }
  0x22   :  { %1334 = vmatpush3.bf16.msra.mxu1 %v1496_v14  ;;  %1315 = vmatprep.subr.bf16.mxu0 %v1572_v0  ;;  %v1559_v14 = vld [vmem:[%s2028_s17 + $0x20] sm:$0xff]  }
  0x23   :  { %1335 = vmatprep.subr.bf16.mxu1 %v1572_v0 }
  0x25   :  { %1316 = vmatpush3.bf16.msra.mxu0 %v1497_v15  ;;  %v1560_v15 = vld [vmem:[%s2028_s17 + $0x28] sm:$0xff]  }
  0x26   :  { %1336 = vmatpush3.bf16.msra.mxu1 %v1498_v16  ;;  %1341 = vmatprep.subr.bf16.mxu0 %v1572_v0  ;;  %v1561_v16 = vld [vmem:[%s2028_s17 + $0x30] sm:$0xff]  }
  0x27   :  { %1361 = vmatprep.subr.bf16.mxu1 %v1572_v0 }
  0x28   :  { %1318 = vmatmul.mubr.bf16.vlgmr.msra.gmra.mrb[0].mxu0 %v1499_v17  ;;  %v1562_v17 = vld [vmem:[%s2028_s17 + $0x38] sm:$0xff]  }
  0x29   :  { %1338 = vmatmul.mubr.bf16.vlgmr.msra.gmra.mrb[0].mxu1 %v1500_v18  ;;  %1342 = vmatpush3.bf16.msra.mxu0 %v1501_v19  ;;  %v1563_v18 = vld [vmem:[%s2030_s8] sm:$0xff]  }
  0x2a   :  { %1362 = vmatpush3.bf16.msra.mxu1 %v1502_v20  ;;  %1343 = vmatprep.subr.bf16.mxu0 %v1572_v0 }
  0x2b   :  { %1363 = vmatprep.subr.bf16.mxu1 %v1572_v0  ;;  %1357 = vmatprep.mubr.msk.bf16.mxu0 %vm1573_vm0, %v1572_v0 }
  0x2c   :  { %1377 = vmatprep.mubr.msk.bf16.mxu1 %vm1573_vm0, %v1572_v0 }
  0x2d   :  { %1344 = vmatpush3.bf16.msra.mxu0 %v1503_v21 }
  0x2e   :  { %1364 = vmatpush3.bf16.msra.mxu1 %v1504_v22  ;;  %1345 = vmatprep.subr.bf16.mxu0 %v1572_v0 }
  0x2f   :  { %1365 = vmatprep.subr.bf16.mxu1 %v1572_v0 }
  0x31   :  { %1346 = vmatpush3.bf16.msra.mxu0 %v1505_v23 }
  0x32   :  { %1366 = vmatpush3.bf16.msra.mxu1 %v1506_v24  ;;  %1347 = vmatprep.subr.bf16.mxu0 %v1572_v0 }
  0x33   :  { %1367 = vmatprep.subr.bf16.mxu1 %v1572_v0 }
  0x35   :  { %1348 = vmatpush3.bf16.msra.mxu0 %v1507_v25 }
  0x36   :  { %1368 = vmatpush3.bf16.msra.mxu1 %v1508_v26  ;;  %1349 = vmatprep.subr.bf16.mxu0 %v1572_v0 }
  0x37   :  { %1369 = vmatprep.subr.bf16.mxu1 %v1572_v0 }
  0x39   :  { %1350 = vmatpush3.bf16.msra.mxu0 %v1509_v27 }
  0x3a   :  { %1370 = vmatpush3.bf16.msra.mxu1 %v1510_v28  ;;  %1351 = vmatprep.subr.bf16.mxu0 %v1572_v0 }
  0x3b   :  { %1371 = vmatprep.subr.bf16.mxu1 %v1572_v0 }
  0x3d   :  { %1352 = vmatpush3.bf16.msra.mxu0 %v1511_v29 }
  0x3e   :  { %1372 = vmatpush3.bf16.msra.mxu1 %v1512_v30  ;;  %1353 = vmatprep.subr.bf16.mxu0 %v1572_v0 }
  0x3f   :  { %1373 = vmatprep.subr.bf16.mxu1 %v1572_v0 }
  0x41   :  { %1354 = vmatpush3.bf16.msra.mxu0 %v1513_v31 }
  0x42   :  { %1374 = vmatpush3.bf16.msra.mxu1 %v1514_v32  ;;  %1355 = vmatprep.subr.bf16.mxu0 %v1572_v0 }
  0x43   :  { %1375 = vmatprep.subr.bf16.mxu1 %v1572_v0 }
  0x45   :  { %1356 = vmatpush3.bf16.msra.mxu0 %v1515_v33 }
  0x46   :  { %1376 = vmatpush3.bf16.msra.mxu1 %v1516_v34  ;;  %1381 = vmatprep.subr.bf16.mxu0 %v1572_v0 }
  0x47   :  { %1401 = vmatprep.subr.bf16.mxu1 %v1572_v0 }
  0x48   :  { %1358 = vmatmul.mubr.bf16.vlgmr.msra.gmra.mrb[4].mxu0 %v1517_v35 }
  0x49   :  { %1382 = vmatpush3.bf16.msra.mxu0 %v1518_v36  ;;  %1378 = vmatmul.mubr.bf16.vlgmr.msra.gmra.mrb[4].mxu1 %v1519_v37 }
  0x4a   :  { %1402 = vmatpush3.bf16.msra.mxu1 %v1520_v38  ;;  %1383 = vmatprep.subr.bf16.mxu0 %v1572_v0 }
  0x4b   :  { %1403 = vmatprep.subr.bf16.mxu1 %v1572_v0  ;;  %1397 = vmatprep.mubr.msk.bf16.mxu0 %vm1573_vm0, %v1572_v0 }
  0x4c   :  { %1417 = vmatprep.mubr.msk.bf16.mxu1 %vm1573_vm0, %v1572_v0 }
  0x4d   :  { %1384 = vmatpush3.bf16.msra.mxu0 %v1521_v39 }
  0x4e   :  { %1404 = vmatpush3.bf16.msra.mxu1 %v1522_v40  ;;  %1385 = vmatprep.subr.bf16.mxu0 %v1572_v0 }
  0x4f   :  { %1405 = vmatprep.subr.bf16.mxu1 %v1572_v0 }
  0x51   :  { %1386 = vmatpush3.bf16.msra.mxu0 %v1523_v41 }
  0x52   :  { %1406 = vmatpush3.bf16.msra.mxu1 %v1524_v42  ;;  %1387 = vmatprep.subr.bf16.mxu0 %v1572_v0 }
  0x53   :  { %1407 = vmatprep.subr.bf16.mxu1 %v1572_v0 }
  0x55   :  { %1388 = vmatpush3.bf16.msra.mxu0 %v1525_v43 }
  0x56   :  { %1408 = vmatpush3.bf16.msra.mxu1 %v1526_v44  ;;  %1389 = vmatprep.subr.bf16.mxu0 %v1572_v0 }
  0x57   :  { %1409 = vmatprep.subr.bf16.mxu1 %v1572_v0 }
  0x59   :  { %1390 = vmatpush3.bf16.msra.mxu0 %v1527_v45 }
  0x5a   :  { %1410 = vmatpush3.bf16.msra.mxu1 %v1528_v46  ;;  %1391 = vmatprep.subr.bf16.mxu0 %v1572_v0 }
  0x5b   :  { %1411 = vmatprep.subr.bf16.mxu1 %v1572_v0 }
  0x5d   :  { %1392 = vmatpush3.bf16.msra.mxu0 %v1529_v47 }
  0x5e   :  { %1412 = vmatpush3.bf16.msra.mxu1 %v1530_v48  ;;  %1393 = vmatprep.subr.bf16.mxu0 %v1572_v0 }
  0x5f   :  { %1413 = vmatprep.subr.bf16.mxu1 %v1572_v0 }
  0x61   :  { %1394 = vmatpush3.bf16.msra.mxu0 %v1531_v49 }
  0x62   :  { %1414 = vmatpush3.bf16.msra.mxu1 %v1532_v50  ;;  %1395 = vmatprep.subr.bf16.mxu0 %v1572_v0 }
  0x63   :  { %1415 = vmatprep.subr.bf16.mxu1 %v1572_v0 }
  0x65   :  { %1396 = vmatpush3.bf16.msra.mxu0 %v1533_v51 }
  0x66   :  { %1416 = vmatpush3.bf16.msra.mxu1 %v1534_v52  ;;  %1421 = vmatprep.subr.bf16.mxu0 %v1572_v0 }
  0x67   :  { %1441 = vmatprep.subr.bf16.mxu1 %v1572_v0 }
  0x68   :  { %1398 = vmatmul.mubr.bf16.vlgmr.msra.gmra.mrb[8].mxu0 %v1535_v53 }
  0x69   :  { %1422 = vmatpush3.bf16.msra.mxu0 %v1536_v54  ;;  %1418 = vmatmul.mubr.bf16.vlgmr.msra.gmra.mrb[8].mxu1 %v1537_v55 }
  0x6a   :  { %1442 = vmatpush3.bf16.msra.mxu1 %v1538_v56  ;;  %1423 = vmatprep.subr.bf16.mxu0 %v1572_v0 }
  0x6b   :  { %1443 = vmatprep.subr.bf16.mxu1 %v1572_v0  ;;  %1437 = vmatprep.mubr.msk.bf16.mxu0 %vm1573_vm0, %v1572_v0 }
  0x6c   :  { %1457 = vmatprep.mubr.msk.bf16.mxu1 %vm1573_vm0, %v1572_v0 }
  0x6d   :  { %1424 = vmatpush3.bf16.msra.mxu0 %v1539_v57 }
  0x6e   :  { %1444 = vmatpush3.bf16.msra.mxu1 %v1540_v58  ;;  %1425 = vmatprep.subr.bf16.mxu0 %v1572_v0 }
  0x6f   :  { %1445 = vmatprep.subr.bf16.mxu1 %v1572_v0 }
  0x71   :  { %1426 = vmatpush3.bf16.msra.mxu0 %v1541_v59 }
  0x72   :  { %1446 = vmatpush3.bf16.msra.mxu1 %v1542_v60  ;;  %1427 = vmatprep.subr.bf16.mxu0 %v1572_v0 }
  0x73   :  { %1447 = vmatprep.subr.bf16.mxu1 %v1572_v0 }
  0x75   :  { %1428 = vmatpush3.bf16.msra.mxu0 %v1543_v61 }
  0x76   :  { %1448 = vmatpush3.bf16.msra.mxu1 %v1544_v62  ;;  %1429 = vmatprep.subr.bf16.mxu0 %v1572_v0 }
  0x77   :  { %1449 = vmatprep.subr.bf16.mxu1 %v1572_v0 }
  0x79   :  { %1430 = vmatpush3.bf16.msra.mxu0 %v1545_v63 }
  0x7a   :  { %1450 = vmatpush3.bf16.msra.mxu1 %v1546_v1  ;;  %1431 = vmatprep.subr.bf16.mxu0 %v1572_v0 }
  0x7b   :  { %1451 = vmatprep.subr.bf16.mxu1 %v1572_v0 }
  0x7d   :  { %1432 = vmatpush3.bf16.msra.mxu0 %v1547_v2  ;;  %v1210_v2 = vld [vmem:[%s2031_s18] ss:$0 sm:$0xff] }
  0x7e   :  { %1452 = vmatpush3.bf16.msra.mxu1 %v1548_v3  ;;  %1433 = vmatprep.subr.bf16.mxu0 %v1572_v0 }
  0x7f   :  { %1453 = vmatprep.subr.bf16.mxu1 %v1572_v0 }
  0x81   :  { %1434 = vmatpush3.bf16.msra.mxu0 %v1549_v4 }
  0x82   :  { %1454 = vmatpush3.bf16.msra.mxu1 %v1550_v5  ;;  %1435 = vmatprep.subr.bf16.mxu0 %v1572_v0 }
  0x83   :  { %1455 = vmatprep.subr.bf16.mxu1 %v1572_v0 }
  0x85   :  { %1436 = vmatpush3.bf16.msra.mxu0 %v1551_v6 }
  0x86   :  { %1456 = vmatpush3.bf16.msra.mxu1 %v1552_v7  ;;  %1461 = vmatprep.subr.bf16.mxu0 %v1572_v0 }
  0x88   :  { %1438 = vmatmul.mubr.bf16.vlgmr.msra.gmra.mrb[12].mxu0 %v1553_v8 }
  0x89   :  { %1462 = vmatpush3.bf16.msra.mxu0 %v1554_v9  ;;  %1458 = vmatmul.mubr.bf16.vlgmr.msra.gmra.mrb[12].mxu1 %v1555_v10 }
  0x8a   :  { %1463 = vmatprep.subr.bf16.mxu0 %v1572_v0  ;;  %1477 = vmatprep.mubr.msk.bf16.mxu0 %vm1573_vm0, %v1572_v0 }
  0x8d   :  { %1464 = vmatpush3.bf16.msra.mxu0 %v1556_v11 }
  0x8e   :  { %1465 = vmatprep.subr.bf16.mxu0 %v1572_v0 }
  0x91   :  { %1466 = vmatpush3.bf16.msra.mxu0 %v1557_v12 }
  0x92   :  { %1467 = vmatprep.subr.bf16.mxu0 %v1572_v0 }
  0x95   :  { %1468 = vmatpush3.bf16.msra.mxu0 %v1558_v13 }
  0x96   :  { %1469 = vmatprep.subr.bf16.mxu0 %v1572_v0 }
  0x99   :  { %1470 = vmatpush3.bf16.msra.mxu0 %v1559_v14 }
  0x9a   :  { %1471 = vmatprep.subr.bf16.mxu0 %v1572_v0 }
  0x9d   :  { %1472 = vmatpush3.bf16.msra.mxu0 %v1560_v15 }
  0x9e   :  { %1473 = vmatprep.subr.bf16.mxu0 %v1572_v0 }
  0xa1   :  { %1474 = vmatpush3.bf16.msra.mxu0 %v1561_v16 }
  0xa2   :  { %1475 = vmatprep.subr.bf16.mxu0 %v1572_v0 }
  0xa5   :  { %1476 = vmatpush3.bf16.msra.mxu0 %v1562_v17 }
  0xa8   :  { %1478 = vmatmul.mubr.bf16.vlgmr.msra.gmra.mrb[16].mxu0 %v1563_v18 }
  0xfb   :  { %v187_v19 = vpop.f32.mrb[0].mxu0 }
  0xfc   :  { %v282_v20 = vpop.f32.mrb[0].mxu1  ;;  %v1319_v21 = vpop.f32.mrb[1].mxu0 }
  0xfd   :  { %v283_v22 = vadd.f32 %v282_v20, %v187_v19  ;;  %v1339_v23 = vpop.f32.mrb[1].mxu1  ;;  %v190_v24 = vpop.f32.mrb[2].mxu0 }
  0xfe   :  { %v285_v25 = vpop.f32.mrb[2].mxu1  ;;  %v1320_v26 = vpop.f32.mrb[3].mxu0 }
  0xff   :  { %v286_v27 = vadd.f32 %v285_v25, %v190_v24  ;;  %v1340_v28 = vpop.f32.mrb[3].mxu1 }
 0x11b   :  { %v395_v29 = vpop.f32.mrb[4].mxu0 }
 0x11c   :  { %v402_v30 = vadd.f32 %v395_v29, %v283_v22  ;;  %v1359_v31 = vpop.f32.mrb[5].mxu0  ;;  %v510_v0 = vpop.f32.mrb[4].mxu1 }
 0x11d   :  { %v398_v32 = vpop.f32.mrb[6].mxu0  ;;  %v1379_v33 = vpop.f32.mrb[5].mxu1 }
 0x11e   :  { %v403_v34 = vadd.f32 %v398_v32, %v286_v27  ;;  %v517_v35 = vadd.f32 %v510_v0, %v402_v30  ;;  %v1360_v36 = vpop.f32.mrb[7].mxu0  ;;  %v513_v37 = vpop.f32.mrb[6].mxu1 }
 0x11f   :  { %v1380_v38 = vpop.f32.mrb[7].mxu1 }
 0x120   :  { %v518_v39 = vadd.f32 %v513_v37, %v403_v34 }
 0x13b   :  { %v625_v40 = vpop.f32.mrb[8].mxu0 }
 0x13c   :  { %v632_v41 = vadd.f32 %v625_v40, %v517_v35  ;;  %v1399_v42 = vpop.f32.mrb[9].mxu0  ;;  %v740_v43 = vpop.f32.mrb[8].mxu1 }
 0x13d   :  { %v628_v44 = vpop.f32.mrb[10].mxu0  ;;  %v1419_v45 = vpop.f32.mrb[9].mxu1 }
 0x13e   :  { %v633_v46 = vadd.f32 %v628_v44, %v518_v39  ;;  %v747_v47 = vadd.f32 %v740_v43, %v632_v41  ;;  %v1400_v48 = vpop.f32.mrb[11].mxu0  ;;  %v743_v49 = vpop.f32.mrb[10].mxu1 }
 0x13f   :  { %v1420_v50 = vpop.f32.mrb[11].mxu1 }
 0x140   :  { %v748_v51 = vadd.f32 %v743_v49, %v633_v46 }
 0x15b   :  { %v855_v52 = vpop.f32.mrb[12].mxu0 }
 0x15c   :  { %v862_v53 = vadd.f32 %v855_v52, %v747_v47  ;;  %v1439_v54 = vpop.f32.mrb[13].mxu0  ;;  %v970_v55 = vpop.f32.mrb[12].mxu1 }
 0x15d   :  { %v858_v56 = vpop.f32.mrb[14].mxu0  ;;  %v1459_v57 = vpop.f32.mrb[13].mxu1 }
 0x15e   :  { %v863_v58 = vadd.f32 %v858_v56, %v748_v51  ;;  %v977_v59 = vadd.f32 %v970_v55, %v862_v53  ;;  %v1440_v60 = vpop.f32.mrb[15].mxu0  ;;  %v973_v61 = vpop.f32.mrb[14].mxu1 }
 0x15f   :  { %v1460_v62 = vpop.f32.mrb[15].mxu1 }
 0x160   :  { %v978_v63 = vadd.f32 %v973_v61, %v863_v58 }
 0x17b   :  { %v1085_v1 = vpop.f32.mrb[16].mxu0 }
 0x17c   :  { %v1092_v3 = vadd.f32 %v1085_v1, %v977_v59  ;;  %v1479_v4 = vpop.f32.mrb[17].mxu0 }
 0x17d   :  { %v1088_v5 = vpop.f32.mrb[18].mxu0 }
 0x17e   :  { %v1101_v6 = vadd.f32 %v1210_v2, %v1092_v3  ;;  %v1093_v7 = vadd.f32 %v1088_v5, %v978_v63  ;;  %v1480_v8 = vpop.f32.mrb[19].mxu0 }
 0x180   :  { %v1103_v9 = vsub.f32 0.0, %v1101_v6  ;;  %v1102_v10 = vadd.f32 %v1210_v2, %v1093_v7 }
 0x182   :  { %v1105_v11 = vmul.f32 1.442695, %v1103_v9  ;;  %v1104_v12 = vsub.f32 0.0, %v1102_v10 }
 0x184   :  { %1564 = vpow2.f32 %v1105_v11  ;;  %v1107_v13 = vmul.f32 1.442695, %v1104_v12 }
 0x186   :  { %1566 = vpow2.f32 %v1107_v13 }
 0x18e   :  { %v1565_v14 = vpop.eup %1564 }
 0x18f   :  { %v1109_v15 = vadd.f32 1.0, %v1565_v14 }
 0x190   :  { %v1567_v16 = vpop.eup %1566 }
 0x191   :  { %1568 = vrcp.f32 %v1109_v15  ;;  %v1110_v17 = vadd.f32 1.0, %v1567_v16 }
 0x193   :  { %1570 = vrcp.f32 %v1110_v17 }
 0x19b   :  { %v1569_v18 = vpop.eup %1568 }
 0x19c   :  { %v1113_v20 = vmul.f32 %v1569_v18, %v1101_v6 }
 0x19d   :  { %v1571_v19 = vpop.eup %1570 }
 0x19e   :  { %v1114_v21 = vmul.f32 %v1571_v19, %v1102_v10 }
 0x1a0   :  { %v1218_v22 = vpack.c.bf16 %v1114_v21, %v1113_v20 }
 0x1a2   :  { %1219 = vst [vmem:[%s2032_s19] sm:$0xff] %v1218_v22  }

// kernel: _lambda_.27
= control target key start
LH: loop header
LB: loop body
LE: loop exit
PB: predicated region body
PF: predicated region fallthrough
CT: control target
= control target key end

     0   :  { %v49_v34 = vlaneseq  ;;  %s517_s1 = inlined_call_operand.vmem [shape: bf16[256,256], index: 1, kind: input, shape index: {}]   ;;  %s518_s0 = inlined_call_operand.vmem [shape: bf16[4,256], index: 0, kind: input, shape index: {}]   ;;  %s519_s2 = inlined_call_operand.vmem [shape: f32[1,256], index: 2, kind: input, shape index: {}]   ;;  %s520_s3 = inlined_call_operand.vmem [shape: bf16[4,256], index: 3, kind: output, shape index: {}]  }
   0x1   :  { %v336_v0 = vld [vmem:[%s517_s1 + $0x4] ss:$8 sps:$4 sm:$0xff]   ;;  %v338_v1 = vld [vmem:[%s517_s1] ss:$8 sps:$4 sm:$0xff]   ;;  %v339_v2 = vld [vmem:[%s517_s1 + $0x14] ss:$8 sps:$4 sm:$0xff]  }
   0x2   :  { %230 = vmatprep.subr.bf16.mxu0 %v336_v0  ;;  %v341_v3 = vld [vmem:[%s517_s1 + $0x10] ss:$8 sps:$4 sm:$0xff]   ;;  %v342_v4 = vld [vmem:[%s517_s1 + $0x24] ss:$8 sps:$4 sm:$0xff]   ;;  %v344_v5 = vld [vmem:[%s517_s1 + $0x20] ss:$8 sps:$4 sm:$0xff]  }
   0x3   :  { %231 = vmatpush1.bf16.msra.mxu0 %v338_v1  ;;  %v345_v6 = vld [vmem:[%s517_s1 + $0x34] ss:$8 sps:$4 sm:$0xff]   ;;  %v347_v7 = vld [vmem:[%s517_s1 + $0x30] ss:$8 sps:$4 sm:$0xff]   ;;  %v348_v8 = vld [vmem:[%s517_s1 + $0x44] ss:$8 sps:$4 sm:$0xff]  }
   0x4   :  { %232 = vmatprep.subr.bf16.mxu0 %v339_v2  ;;  %v350_v9 = vld [vmem:[%s517_s1 + $0x40] ss:$8 sps:$4 sm:$0xff]   ;;  %v351_v10 = vld [vmem:[%s517_s1 + $0x54] ss:$8 sps:$4 sm:$0xff]   ;;  %v353_v11 = vld [vmem:[%s517_s1 + $0x50] ss:$8 sps:$4 sm:$0xff]  }
   0x5   :  { %v354_v12 = vld [vmem:[%s517_s1 + $0x64] ss:$8 sps:$4 sm:$0xff]   ;;  %v301_v13 = vld.sshfl [vmem:[%s518_s0] sm:$0x33 pattern:$0x76325410] }
   0x6   :  { %v67_v14 = vcombine.high %v301_v13, %v301_v13  ;;  %v356_v15 = vld [vmem:[%s517_s1 + $0x60] ss:$8 sps:$4 sm:$0xff]   ;;  %v357_v16 = vld [vmem:[%s517_s1 + $0x74] ss:$8 sps:$4 sm:$0xff]   ;;  %v359_v17 = vld [vmem:[%s517_s1 + $0x70] ss:$8 sps:$4 sm:$0xff]  }
   0x7   :  { %233 = vmatpush1.bf16.msra.mxu0 %v341_v3  ;;  %v360_v18 = vld [vmem:[%s517_s1 + $0x84] ss:$8 sps:$4 sm:$0xff]   ;;  %v362_v19 = vld [vmem:[%s517_s1 + $0x80] ss:$8 sps:$4 sm:$0xff]   ;;  %v363_v20 = vld [vmem:[%s517_s1 + $0x94] ss:$8 sps:$4 sm:$0xff]  }
   0x8   :  { %234 = vmatprep.subr.bf16.mxu0 %v342_v4  ;;  %262 = vmatprep.mubr.bf16.mxu0 %v67_v14  ;;  %v365_v21 = vld [vmem:[%s517_s1 + $0x90] ss:$8 sps:$4 sm:$0xff]   ;;  %v366_v22 = vld [vmem:[%s517_s1 + $0xa4] ss:$8 sps:$4 sm:$0xff]   ;;  %v368_v23 = vld [vmem:[%s517_s1 + $0xa0] ss:$8 sps:$4 sm:$0xff]  }
   0x9   :  { %v369_v24 = vld [vmem:[%s517_s1 + $0xb4] ss:$8 sps:$4 sm:$0xff]   ;;  %v371_v25 = vld [vmem:[%s517_s1 + $0xb0] ss:$8 sps:$4 sm:$0xff]   ;;  %v372_v26 = vld [vmem:[%s517_s1 + $0xc4] ss:$8 sps:$4 sm:$0xff]  }
   0xa   :  { %v374_v27 = vld [vmem:[%s517_s1 + $0xc0] ss:$8 sps:$4 sm:$0xff]   ;;  %v375_v28 = vld [vmem:[%s517_s1 + $0xd4] ss:$8 sps:$4 sm:$0xff]   ;;  %v377_v29 = vld [vmem:[%s517_s1 + $0xd0] ss:$8 sps:$4 sm:$0xff]  }
   0xb   :  { %235 = vmatpush1.bf16.msra.mxu0 %v344_v5  ;;  %v378_v30 = vld [vmem:[%s517_s1 + $0xe4] ss:$8 sps:$4 sm:$0xff]   ;;  %v380_v31 = vld [vmem:[%s517_s1 + $0xe0] ss:$8 sps:$4 sm:$0xff]   ;;  %v381_v32 = vld [vmem:[%s517_s1 + $0xf4] ss:$8 sps:$4 sm:$0xff]  }
   0xc   :  { %236 = vmatprep.subr.bf16.mxu0 %v345_v6  ;;  %v383_v33 = vld [vmem:[%s517_s1 + $0xf0] ss:$8 sps:$4 sm:$0xff]   ;;  %v50_v35 = vshrl.u32 %v49_v34, 7  ;;  %v47_v37 = vld [vmem:[%s519_s2] sm:$0x3] }
   0xe   :  { %v51_v36 = vsub.s32 0, %v50_v35  ;;  %v55_v38 = vsub.s32 1, %v50_v35 }
   0xf   :  { %237 = vmatpush1.bf16.msra.mxu0 %v347_v7 }
  0x10   :  { %238 = vmatprep.subr.bf16.mxu0 %v348_v8  ;;  %v52_v39 = vrot.slane %v47_v37, %v51_v36  ;;  %v56_v40 = vrot.slane %v47_v37, %v55_v38 }
  0x13   :  { %239 = vmatpush1.bf16.msra.mxu0 %v350_v9 }
  0x14   :  { %240 = vmatprep.subr.bf16.mxu0 %v351_v10 }
  0x17   :  { %241 = vmatpush1.bf16.msra.mxu0 %v353_v11 }
  0x18   :  { %242 = vmatprep.subr.bf16.mxu0 %v354_v12 }
  0x1b   :  { %243 = vmatpush1.bf16.msra.mxu0 %v356_v15 }
  0x1c   :  { %244 = vmatprep.subr.bf16.mxu0 %v357_v16 }
  0x1f   :  { %245 = vmatpush1.bf16.msra.mxu0 %v359_v17 }
  0x20   :  { %246 = vmatprep.subr.bf16.mxu0 %v360_v18 }
  0x23   :  { %247 = vmatpush1.bf16.msra.mxu0 %v362_v19 }
  0x24   :  { %248 = vmatprep.subr.bf16.mxu0 %v363_v20 }
  0x27   :  { %249 = vmatpush1.bf16.msra.mxu0 %v365_v21 }
  0x28   :  { %250 = vmatprep.subr.bf16.mxu0 %v366_v22 }
  0x2b   :  { %251 = vmatpush1.bf16.msra.mxu0 %v368_v23 }
  0x2c   :  { %252 = vmatprep.subr.bf16.mxu0 %v369_v24 }
  0x2f   :  { %253 = vmatpush1.bf16.msra.mxu0 %v371_v25 }
  0x30   :  { %254 = vmatprep.subr.bf16.mxu0 %v372_v26 }
  0x33   :  { %255 = vmatpush1.bf16.msra.mxu0 %v374_v27 }
  0x34   :  { %256 = vmatprep.subr.bf16.mxu0 %v375_v28 }
  0x37   :  { %257 = vmatpush1.bf16.msra.mxu0 %v377_v29 }
  0x38   :  { %258 = vmatprep.subr.bf16.mxu0 %v378_v30 }
  0x3b   :  { %259 = vmatpush1.bf16.msra.mxu0 %v380_v31 }
  0x3c   :  { %260 = vmatprep.subr.bf16.mxu0 %v381_v32 }
  0x3f   :  { %261 = vmatpush1.bf16.msra.mxu0 %v383_v33 }
  0x42   :  { %263 = vmatmul.mubr.bf16.vlgmr.msra.gmra.mrb[0].mxu0 %v301_v13 }
 0x115   :  { %v264_v41 = vpop.f32.mrb[0].mxu0 }
 0x116   :  { %v265_v42 = vadd.f32 %v264_v41, %v52_v39  ;;  %v266_v43 = vpop.f32.mrb[1].mxu0 }
 0x117   :  { %v267_v44 = vadd.f32 %v266_v43, %v56_v40  ;;  %v268_v45 = vpop.f32.mrb[2].mxu0 }
 0x118   :  { %v271_v46 = vsub.f32 0.0, %v265_v42  ;;  %v269_v47 = vpop.f32.mrb[3].mxu0 }
 0x119   :  { %v272_v48 = vsub.f32 0.0, %v267_v44 }
 0x11a   :  { %v273_v49 = vmul.f32 1.442695, %v271_v46 }
 0x11b   :  { %v275_v50 = vmul.f32 1.442695, %v272_v48 }
 0x11c   :  { %384 = vpow2.f32 %v273_v49 }
 0x11d   :  { %386 = vpow2.f32 %v275_v50 }
 0x126   :  { %v385_v51 = vpop.eup %384 }
 0x127   :  { %v387_v52 = vpop.eup %386  ;;  %v277_v53 = vadd.f32 1.0, %v385_v51 }
 0x128   :  { %v278_v54 = vadd.f32 1.0, %v387_v52 }
 0x129   :  { %388 = vrcp.f32 %v277_v53 }
 0x12a   :  { %390 = vrcp.f32 %v278_v54 }
 0x133   :  { %v389_v55 = vpop.eup %388 }
 0x134   :  { %v391_v56 = vpop.eup %390  ;;  %v281_v57 = vmul.f32 %v389_v55, %v265_v42 }
 0x135   :  { %v282_v58 = vmul.f32 %v391_v56, %v267_v44 }
 0x137   :  { %v334_v59 = vpack.c.bf16 %v282_v58, %v281_v57 }
 0x139   :  { %335 = vst.sshfl [vmem:[%s520_s3] sm:$0x33 pattern:$0x76325410] %v334_v59 }

// kernel: _lambda_.26
= control target key start
LH: loop header
LB: loop body
LE: loop exit
PB: predicated region body
PF: predicated region fallthrough
CT: control target
= control target key end

     0   :  { %v1734_v1 = vmov 0   ;;  %s2309_s10 = inlined_call_operand.vmem [shape: bf16[128,256], index: 10, kind: input, shape index: {}]   ;;  %s2310_s9 = inlined_call_operand.vmem [shape: bf16[128,256], index: 9, kind: input, shape index: {}]   ;;  %s2311_s11 = inlined_call_operand.vmem [shape: bf16[128,256], index: 11, kind: input, shape index: {}]   ;;  %s2312_s12 = inlined_call_operand.vmem [shape: bf16[128,256], index: 12, kind: input, shape index: {}]   ;;  %s2313_s1 = inlined_call_operand.vmem [shape: bf16[4,128], index: 1, kind: input, shape index: {}]   ;;  %s2314_s0 = inlined_call_operand.vmem [shape: bf16[4,128], index: 0, kind: input, shape index: {}]   ;;  %s2315_s13 = inlined_call_operand.vmem [shape: bf16[128,256], index: 13, kind: input, shape index: {}]   ;;  %s2316_s14 = inlined_call_operand.vmem [shape: bf16[128,256], index: 14, kind: input, shape index: {}]   ;;  %s2317_s2 = inlined_call_operand.vmem [shape: bf16[4,128], index: 2, kind: input, shape index: {}]   ;;  %s2318_s3 = inlined_call_operand.vmem [shape: bf16[4,128], index: 3, kind: input, shape index: {}]   ;;  %s2319_s15 = inlined_call_operand.vmem [shape: bf16[128,256], index: 15, kind: input, shape index: {}]   ;;  %s2320_s16 = inlined_call_operand.vmem [shape: bf16[128,256], index: 16, kind: input, shape index: {}]   ;;  %s2321_s17 = inlined_call_operand.vmem [shape: bf16[128,256], index: 17, kind: input, shape index: {}]   ;;  %s2322_s4 = inlined_call_operand.vmem [shape: bf16[4,128], index: 4, kind: input, shape index: {}]   ;;  %s2323_s5 = inlined_call_operand.vmem [shape: bf16[4,128], index: 5, kind: input, shape index: {}]   ;;  %s2324_s6 = inlined_call_operand.vmem [shape: bf16[4,128], index: 6, kind: input, shape index: {}]   ;;  %s2325_s7 = inlined_call_operand.vmem [shape: bf16[4,128], index: 7, kind: input, shape index: {}]   ;;  %s2326_s8 = inlined_call_operand.vmem [shape: bf16[4,128], index: 8, kind: input, shape index: {}]   ;;  %s2327_s18 = inlined_call_operand.vmem [shape: f32[1,256], index: 18, kind: input, shape index: {}]   ;;  %s2328_s19 = inlined_call_operand.vmem [shape: bf16[4,256], index: 19, kind: output, shape index: {}]  }
   0x1   :  { %2333 = sst [smem:[#allocation2_spill]] %s2309_s10  ;;  %209 = vmatprep.mubr.bf16.mxu0 %v1734_v1  ;;  %330 = vmatprep.mubr.bf16.mxu1 %v1734_v1  ;;  %v80_v35 = vld [vmem:[%s2313_s1] sm:$0x3] }
   0x2   :  { %2334 = sst [smem:[#allocation3_spill]] %s2310_s9  ;;  %s2337_s20 = sld [smem:[#allocation2_spill]]  ;;  %v63_v36 = vld [vmem:[%s2314_s0] sm:$0x3] }
   0x3   :  { %2335 = sst [smem:[#allocation4_spill]] %s2311_s11  ;;  %s2338_s22 = sld [smem:[#allocation3_spill]] }
   0x4   :  { %2336 = sst [smem:[#allocation5_spill]] %s2312_s12  ;;  %s2339_s30 = sld [smem:[#allocation4_spill]] }
   0x5   :  { %s2340_s11 = sld [smem:[#allocation5_spill]] }
   0x8   :  { %v1510_v0 = vld [vmem:[%s2337_s20 + $0x4] ss:$8 sps:$4 sm:$0xff]   ;;  %v1514_v3 = vld [vmem:[%s2337_s20] ss:$8 sps:$4 sm:$0xff]   ;;  %v1516_v5 = vld [vmem:[%s2337_s20 + $0x14] ss:$8 sps:$4 sm:$0xff]  }
   0x9   :  { %v1512_v2 = vld [vmem:[%s2338_s22 + $0x4] ss:$8 sps:$4 sm:$0xff]   ;;  %177 = vmatprep.subr.bf16.mxu0 %v1510_v0  ;;  %v1515_v4 = vld [vmem:[%s2338_s22] ss:$8 sps:$4 sm:$0xff]   ;;  %v1518_v6 = vld [vmem:[%s2338_s22 + $0x14] ss:$8 sps:$4 sm:$0xff]  }
   0xa   :  { %298 = vmatprep.subr.bf16.mxu1 %v1512_v2  ;;  %178 = vmatpush1.bf16.msra.mxu0 %v1514_v3  ;;  %v1520_v7 = vld [vmem:[%s2337_s20 + $0x10] ss:$8 sps:$4 sm:$0xff]   ;;  %v1522_v9 = vld [vmem:[%s2337_s20 + $0x24] ss:$8 sps:$4 sm:$0xff]   ;;  %v1526_v11 = vld [vmem:[%s2337_s20 + $0x20] ss:$8 sps:$4 sm:$0xff]  }
   0xb   :  { %299 = vmatpush1.bf16.msra.mxu1 %v1515_v4  ;;  %179 = vmatprep.subr.bf16.mxu0 %v1516_v5  ;;  %v1521_v8 = vld [vmem:[%s2338_s22 + $0x10] ss:$8 sps:$4 sm:$0xff]   ;;  %v1524_v10 = vld [vmem:[%s2338_s22 + $0x24] ss:$8 sps:$4 sm:$0xff]   ;;  %v1527_v12 = vld [vmem:[%s2338_s22 + $0x20] ss:$8 sps:$4 sm:$0xff]  }
   0xc   :  { %300 = vmatprep.subr.bf16.mxu1 %v1518_v6  ;;  %v1528_v13 = vld [vmem:[%s2337_s20 + $0x34] ss:$8 sps:$4 sm:$0xff]   ;;  %v1532_v15 = vld [vmem:[%s2337_s20 + $0x30] ss:$8 sps:$4 sm:$0xff]   ;;  %v1534_v17 = vld [vmem:[%s2337_s20 + $0x44] ss:$8 sps:$4 sm:$0xff]  }
   0xd   :  { %v1530_v14 = vld [vmem:[%s2338_s22 + $0x34] ss:$8 sps:$4 sm:$0xff]   ;;  %v1533_v16 = vld [vmem:[%s2338_s22 + $0x30] ss:$8 sps:$4 sm:$0xff]   ;;  %v1536_v18 = vld [vmem:[%s2338_s22 + $0x44] ss:$8 sps:$4 sm:$0xff]  }
   0xe   :  { %180 = vmatpush1.bf16.msra.mxu0 %v1520_v7  ;;  %v1538_v19 = vld [vmem:[%s2337_s20 + $0x40] ss:$8 sps:$4 sm:$0xff]   ;;  %v1540_v21 = vld [vmem:[%s2337_s20 + $0x54] ss:$8 sps:$4 sm:$0xff]   ;;  %v1544_v23 = vld [vmem:[%s2337_s20 + $0x50] ss:$8 sps:$4 sm:$0xff]  }
   0xf   :  { %301 = vmatpush1.bf16.msra.mxu1 %v1521_v8  ;;  %181 = vmatprep.subr.bf16.mxu0 %v1522_v9  ;;  %v1539_v20 = vld [vmem:[%s2338_s22 + $0x40] ss:$8 sps:$4 sm:$0xff]   ;;  %v1542_v22 = vld [vmem:[%s2338_s22 + $0x54] ss:$8 sps:$4 sm:$0xff]   ;;  %v1545_v24 = vld [vmem:[%s2338_s22 + $0x50] ss:$8 sps:$4 sm:$0xff]  }
  0x10   :  { %302 = vmatprep.subr.bf16.mxu1 %v1524_v10  ;;  %v1546_v25 = vld [vmem:[%s2337_s20 + $0x64] ss:$8 sps:$4 sm:$0xff]   ;;  %v1550_v27 = vld [vmem:[%s2337_s20 + $0x60] ss:$8 sps:$4 sm:$0xff]   ;;  %v1552_v29 = vld [vmem:[%s2337_s20 + $0x74] ss:$8 sps:$4 sm:$0xff]  }
  0x11   :  { %v1548_v26 = vld [vmem:[%s2338_s22 + $0x64] ss:$8 sps:$4 sm:$0xff]   ;;  %v1551_v28 = vld [vmem:[%s2338_s22 + $0x60] ss:$8 sps:$4 sm:$0xff]   ;;  %v1554_v30 = vld [vmem:[%s2338_s22 + $0x74] ss:$8 sps:$4 sm:$0xff]  }
  0x12   :  { %182 = vmatpush1.bf16.msra.mxu0 %v1526_v11  ;;  %v1556_v31 = vld [vmem:[%s2337_s20 + $0x70] ss:$8 sps:$4 sm:$0xff]   ;;  %v1560_v33 = vld [vmem:[%s2339_s30 + $0x4] ss:$8 sps:$4 sm:$0xff]   ;;  %v1558_v37 = vld [vmem:[%s2339_s30] ss:$8 sps:$4 sm:$0xff]  }
  0x13   :  { %303 = vmatpush1.bf16.msra.mxu1 %v1527_v12  ;;  %183 = vmatprep.subr.bf16.mxu0 %v1528_v13  ;;  %v1557_v32 = vld [vmem:[%s2338_s22 + $0x70] ss:$8 sps:$4 sm:$0xff]   ;;  %v1563_v34 = vld [vmem:[%s2340_s11 + $0x4] ss:$8 sps:$4 sm:$0xff]   ;;  %v1561_v38 = vld [vmem:[%s2340_s11] ss:$8 sps:$4 sm:$0xff]  }
  0x14   :  { %304 = vmatprep.subr.bf16.mxu1 %v1530_v14  ;;  %v1566_v39 = vld [vmem:[%s2339_s30 + $0x14] ss:$8 sps:$4 sm:$0xff]   ;;  %v1564_v41 = vld [vmem:[%s2339_s30 + $0x10] ss:$8 sps:$4 sm:$0xff]   ;;  %v1572_v43 = vld [vmem:[%s2339_s30 + $0x24] ss:$8 sps:$4 sm:$0xff]  }
  0x15   :  { %v1569_v40 = vld [vmem:[%s2340_s11 + $0x14] ss:$8 sps:$4 sm:$0xff]   ;;  %v1567_v42 = vld [vmem:[%s2340_s11 + $0x10] ss:$8 sps:$4 sm:$0xff]   ;;  %v1575_v44 = vld [vmem:[%s2340_s11 + $0x24] ss:$8 sps:$4 sm:$0xff]  }
  0x16   :  { %184 = vmatpush1.bf16.msra.mxu0 %v1532_v15  ;;  %v1570_v45 = vld [vmem:[%s2339_s30 + $0x20] ss:$8 sps:$4 sm:$0xff]   ;;  %v1578_v47 = vld [vmem:[%s2339_s30 + $0x34] ss:$8 sps:$4 sm:$0xff]   ;;  %v1576_v49 = vld [vmem:[%s2339_s30 + $0x30] ss:$8 sps:$4 sm:$0xff]  }
  0x17   :  { %305 = vmatpush1.bf16.msra.mxu1 %v1533_v16  ;;  %185 = vmatprep.subr.bf16.mxu0 %v1534_v17  ;;  %v1573_v46 = vld [vmem:[%s2340_s11 + $0x20] ss:$8 sps:$4 sm:$0xff]   ;;  %v1581_v48 = vld [vmem:[%s2340_s11 + $0x34] ss:$8 sps:$4 sm:$0xff]   ;;  %v1579_v50 = vld [vmem:[%s2340_s11 + $0x30] ss:$8 sps:$4 sm:$0xff]  }
  0x18   :  { %306 = vmatprep.subr.bf16.mxu1 %v1536_v18  ;;  %v1584_v51 = vld [vmem:[%s2339_s30 + $0x44] ss:$8 sps:$4 sm:$0xff]   ;;  %v1582_v53 = vld [vmem:[%s2339_s30 + $0x40] ss:$8 sps:$4 sm:$0xff]   ;;  %v1590_v55 = vld [vmem:[%s2339_s30 + $0x54] ss:$8 sps:$4 sm:$0xff]  }
  0x19   :  { %v1587_v52 = vld [vmem:[%s2340_s11 + $0x44] ss:$8 sps:$4 sm:$0xff]   ;;  %v1585_v54 = vld [vmem:[%s2340_s11 + $0x40] ss:$8 sps:$4 sm:$0xff]   ;;  %v1593_v56 = vld [vmem:[%s2340_s11 + $0x54] ss:$8 sps:$4 sm:$0xff]  }
  0x1a   :  { %186 = vmatpush1.bf16.msra.mxu0 %v1538_v19  ;;  %v1588_v57 = vld [vmem:[%s2339_s30 + $0x50] ss:$8 sps:$4 sm:$0xff]   ;;  %v1596_v59 = vld [vmem:[%s2339_s30 + $0x64] ss:$8 sps:$4 sm:$0xff]   ;;  %v1594_v61 = vld [vmem:[%s2339_s30 + $0x60] ss:$8 sps:$4 sm:$0xff]  }
  0x1b   :  { %307 = vmatpush1.bf16.msra.mxu1 %v1539_v20  ;;  %187 = vmatprep.subr.bf16.mxu0 %v1540_v21  ;;  %v1591_v58 = vld [vmem:[%s2340_s11 + $0x50] ss:$8 sps:$4 sm:$0xff]   ;;  %v1599_v60 = vld [vmem:[%s2340_s11 + $0x64] ss:$8 sps:$4 sm:$0xff]   ;;  %v1597_v62 = vld [vmem:[%s2340_s11 + $0x60] ss:$8 sps:$4 sm:$0xff]  }
  0x1c   :  { %308 = vmatprep.subr.bf16.mxu1 %v1542_v22  ;;  %v1602_v63 = vld [vmem:[%s2339_s30 + $0x74] ss:$8 sps:$4 sm:$0xff]   ;;  %v1600_v2 = vld [vmem:[%s2339_s30 + $0x70] ss:$8 sps:$4 sm:$0xff]   ;;  %v1608_v4 = vld [vmem:[%s2315_s13 + $0x4] ss:$8 sps:$4 sm:$0xff]  }
  0x1d   :  { %v1605_v0 = vld [vmem:[%s2340_s11 + $0x74] ss:$8 sps:$4 sm:$0xff]   ;;  %v1603_v3 = vld [vmem:[%s2340_s11 + $0x70] ss:$8 sps:$4 sm:$0xff]   ;;  %v1611_v5 = vld [vmem:[%s2316_s14 + $0x4] ss:$8 sps:$4 sm:$0xff]  }
  0x1e   :  { %188 = vmatpush1.bf16.msra.mxu0 %v1544_v23  ;;  %v339_v6 = vld [vmem:[%s2317_s2] sm:$0x3]  ;;  %v1614_v10 = vld [vmem:[%s2315_s13 + $0x14] ss:$8 sps:$4 sm:$0xff]   ;;  %v1612_v12 = vld [vmem:[%s2315_s13 + $0x10] ss:$8 sps:$4 sm:$0xff]  }
  0x1f   :  { %309 = vmatpush1.bf16.msra.mxu1 %v1545_v24  ;;  %189 = vmatprep.subr.bf16.mxu0 %v1546_v25  ;;  %v1606_v7 = vld [vmem:[%s2315_s13] ss:$8 sps:$4 sm:$0xff]   ;;  %v1617_v11 = vld [vmem:[%s2316_s14 + $0x14] ss:$8 sps:$4 sm:$0xff]   ;;  %v1615_v13 = vld [vmem:[%s2316_s14 + $0x10] ss:$8 sps:$4 sm:$0xff]  }
  0x20   :  { %310 = vmatprep.subr.bf16.mxu1 %v1548_v26  ;;  %v479_v8 = vld [vmem:[%s2318_s3] sm:$0x3]  ;;  %v1620_v14 = vld [vmem:[%s2315_s13 + $0x24] ss:$8 sps:$4 sm:$0xff]   ;;  %v1626_v18 = vld [vmem:[%s2315_s13 + $0x34] ss:$8 sps:$4 sm:$0xff]  }
  0x21   :  { %v1609_v9 = vld [vmem:[%s2316_s14] ss:$8 sps:$4 sm:$0xff]   ;;  %v1623_v15 = vld [vmem:[%s2316_s14 + $0x24] ss:$8 sps:$4 sm:$0xff]   ;;  %v1629_v19 = vld [vmem:[%s2316_s14 + $0x34] ss:$8 sps:$4 sm:$0xff]  }
  0x22   :  { %190 = vmatpush1.bf16.msra.mxu0 %v1550_v27  ;;  %v1618_v16 = vld [vmem:[%s2315_s13 + $0x20] ss:$8 sps:$4 sm:$0xff]   ;;  %v1624_v20 = vld [vmem:[%s2315_s13 + $0x30] ss:$8 sps:$4 sm:$0xff]   ;;  %v1632_v22 = vld [vmem:[%s2315_s13 + $0x44] ss:$8 sps:$4 sm:$0xff]  }
  0x23   :  { %311 = vmatpush1.bf16.msra.mxu1 %v1551_v28  ;;  %191 = vmatprep.subr.bf16.mxu0 %v1552_v29  ;;  %v1621_v17 = vld [vmem:[%s2316_s14 + $0x20] ss:$8 sps:$4 sm:$0xff]   ;;  %v1627_v21 = vld [vmem:[%s2316_s14 + $0x30] ss:$8 sps:$4 sm:$0xff]   ;;  %v1635_v23 = vld [vmem:[%s2316_s14 + $0x44] ss:$8 sps:$4 sm:$0xff]  }
  0x24   :  { %312 = vmatprep.subr.bf16.mxu1 %v1554_v30  ;;  %v1630_v24 = vld [vmem:[%s2315_s13 + $0x40] ss:$8 sps:$4 sm:$0xff]   ;;  %v1638_v26 = vld [vmem:[%s2315_s13 + $0x54] ss:$8 sps:$4 sm:$0xff]   ;;  %v1636_v28 = vld [vmem:[%s2315_s13 + $0x50] ss:$8 sps:$4 sm:$0xff]  }
  0x25   :  { %v1633_v25 = vld [vmem:[%s2316_s14 + $0x40] ss:$8 sps:$4 sm:$0xff]   ;;  %v1641_v27 = vld [vmem:[%s2316_s14 + $0x54] ss:$8 sps:$4 sm:$0xff]   ;;  %v1639_v29 = vld [vmem:[%s2316_s14 + $0x50] ss:$8 sps:$4 sm:$0xff]  }
  0x26   :  { %192 = vmatpush1.bf16.msra.mxu0 %v1556_v31  ;;  %v1644_v30 = vld [vmem:[%s2315_s13 + $0x64] ss:$8 sps:$4 sm:$0xff]  }
  0x27   :  { %313 = vmatpush1.bf16.msra.mxu1 %v1557_v32  ;;  %436 = vmatprep.subr.bf16.mxu0 %v1560_v33  ;;  %v1647_v31 = vld [vmem:[%s2316_s14 + $0x64] ss:$8 sps:$4 sm:$0xff]   ;;  %v1642_v32 = vld [vmem:[%s2315_s13 + $0x60] ss:$8 sps:$4 sm:$0xff]  }
  0x28   :  { %576 = vmatprep.subr.bf16.mxu1 %v1563_v34  ;;  %v1645_v33 = vld [vmem:[%s2316_s14 + $0x60] ss:$8 sps:$4 sm:$0xff]   ;;  %v1650_v34 = vld [vmem:[%s2315_s13 + $0x74] ss:$8 sps:$4 sm:$0xff]  }
  0x29   :  { %210 = vmatmul.mubr.bf16.vlgmr.msra.gmra.mrb[0].mxu0 %v80_v35  ;;  %v1653_v35 = vld [vmem:[%s2316_s14 + $0x74] ss:$8 sps:$4 sm:$0xff]  }
  0x2a   :  { %331 = vmatmul.mubr.bf16.vlgmr.msra.gmra.mrb[0].mxu1 %v63_v36  ;;  %437 = vmatpush1.bf16.msra.mxu0 %v1558_v37  ;;  %v1648_v36 = vld [vmem:[%s2315_s13 + $0x70] ss:$8 sps:$4 sm:$0xff]  }
  0x2b   :  { %577 = vmatpush1.bf16.msra.mxu1 %v1561_v38  ;;  %438 = vmatprep.subr.bf16.mxu0 %v1566_v39  ;;  %v1651_v37 = vld [vmem:[%s2316_s14 + $0x70] ss:$8 sps:$4 sm:$0xff]   ;;  %v1656_v38 = vld [vmem:[%s2319_s15 + $0x4] ss:$8 sps:$4 sm:$0xff]  }
  0x2c   :  { %578 = vmatprep.subr.bf16.mxu1 %v1569_v40  ;;  %468 = vmatprep.mubr.bf16.mxu0 %v1734_v1  ;;  %v1659_v39 = vld [vmem:[%s2320_s16 + $0x4] ss:$8 sps:$4 sm:$0xff]   ;;  %v619_v40 = vld [vmem:[%s2322_s4] sm:$0x3] }
  0x2d   :  { %608 = vmatprep.mubr.bf16.mxu1 %v1734_v1 }
  0x2e   :  { %439 = vmatpush1.bf16.msra.mxu0 %v1564_v41  ;;  %v1654_v41 = vld [vmem:[%s2319_s15] ss:$8 sps:$4 sm:$0xff]  }
  0x2f   :  { %579 = vmatpush1.bf16.msra.mxu1 %v1567_v42  ;;  %440 = vmatprep.subr.bf16.mxu0 %v1572_v43  ;;  %v759_v42 = vld [vmem:[%s2323_s5] sm:$0x3] }
  0x30   :  { %580 = vmatprep.subr.bf16.mxu1 %v1575_v44  ;;  %v1657_v43 = vld [vmem:[%s2320_s16] ss:$8 sps:$4 sm:$0xff]   ;;  %v1662_v44 = vld [vmem:[%s2319_s15 + $0x14] ss:$8 sps:$4 sm:$0xff]  }
  0x32   :  { %441 = vmatpush1.bf16.msra.mxu0 %v1570_v45  ;;  %v1665_v45 = vld [vmem:[%s2320_s16 + $0x14] ss:$8 sps:$4 sm:$0xff]  }
  0x33   :  { %581 = vmatpush1.bf16.msra.mxu1 %v1573_v46  ;;  %442 = vmatprep.subr.bf16.mxu0 %v1578_v47  ;;  %v1660_v46 = vld [vmem:[%s2319_s15 + $0x10] ss:$8 sps:$4 sm:$0xff]  }
  0x34   :  { %582 = vmatprep.subr.bf16.mxu1 %v1581_v48  ;;  %v1663_v47 = vld [vmem:[%s2320_s16 + $0x10] ss:$8 sps:$4 sm:$0xff]   ;;  %v1668_v48 = vld [vmem:[%s2319_s15 + $0x24] ss:$8 sps:$4 sm:$0xff]  }
  0x36   :  { %443 = vmatpush1.bf16.msra.mxu0 %v1576_v49  ;;  %v1671_v49 = vld [vmem:[%s2320_s16 + $0x24] ss:$8 sps:$4 sm:$0xff]  }
  0x37   :  { %583 = vmatpush1.bf16.msra.mxu1 %v1579_v50  ;;  %444 = vmatprep.subr.bf16.mxu0 %v1584_v51  ;;  %v1666_v50 = vld [vmem:[%s2319_s15 + $0x20] ss:$8 sps:$4 sm:$0xff]  }
  0x38   :  { %584 = vmatprep.subr.bf16.mxu1 %v1587_v52  ;;  %v1669_v51 = vld [vmem:[%s2320_s16 + $0x20] ss:$8 sps:$4 sm:$0xff]   ;;  %v1674_v52 = vld [vmem:[%s2319_s15 + $0x34] ss:$8 sps:$4 sm:$0xff]  }
  0x3a   :  { %445 = vmatpush1.bf16.msra.mxu0 %v1582_v53  ;;  %v1677_v53 = vld [vmem:[%s2320_s16 + $0x34] ss:$8 sps:$4 sm:$0xff]  }
  0x3b   :  { %585 = vmatpush1.bf16.msra.mxu1 %v1585_v54  ;;  %446 = vmatprep.subr.bf16.mxu0 %v1590_v55  ;;  %v1672_v54 = vld [vmem:[%s2319_s15 + $0x30] ss:$8 sps:$4 sm:$0xff]  }
  0x3c   :  { %586 = vmatprep.subr.bf16.mxu1 %v1593_v56  ;;  %v1675_v55 = vld [vmem:[%s2320_s16 + $0x30] ss:$8 sps:$4 sm:$0xff]   ;;  %v1680_v56 = vld [vmem:[%s2319_s15 + $0x44] ss:$8 sps:$4 sm:$0xff]  }
  0x3e   :  { %447 = vmatpush1.bf16.msra.mxu0 %v1588_v57  ;;  %v1683_v57 = vld [vmem:[%s2320_s16 + $0x44] ss:$8 sps:$4 sm:$0xff]  }
  0x3f   :  { %587 = vmatpush1.bf16.msra.mxu1 %v1591_v58  ;;  %448 = vmatprep.subr.bf16.mxu0 %v1596_v59  ;;  %v1678_v58 = vld [vmem:[%s2319_s15 + $0x40] ss:$8 sps:$4 sm:$0xff]  }
  0x40   :  { %588 = vmatprep.subr.bf16.mxu1 %v1599_v60  ;;  %v1681_v59 = vld [vmem:[%s2320_s16 + $0x40] ss:$8 sps:$4 sm:$0xff]   ;;  %v1686_v60 = vld [vmem:[%s2319_s15 + $0x54] ss:$8 sps:$4 sm:$0xff]  }
  0x42   :  { %449 = vmatpush1.bf16.msra.mxu0 %v1594_v61  ;;  %v1689_v61 = vld [vmem:[%s2320_s16 + $0x54] ss:$8 sps:$4 sm:$0xff]  }
  0x43   :  { %589 = vmatpush1.bf16.msra.mxu1 %v1597_v62  ;;  %450 = vmatprep.subr.bf16.mxu0 %v1602_v63  ;;  %v1684_v62 = vld [vmem:[%s2319_s15 + $0x50] ss:$8 sps:$4 sm:$0xff]  }
  0x44   :  { %590 = vmatprep.subr.bf16.mxu1 %v1605_v0  ;;  %v1687_v63 = vld [vmem:[%s2320_s16 + $0x50] ss:$8 sps:$4 sm:$0xff]   ;;  %v1692_v0 = vld [vmem:[%s2319_s15 + $0x64] ss:$8 sps:$4 sm:$0xff]  }
  0x46   :  { %451 = vmatpush1.bf16.msra.mxu0 %v1600_v2  ;;  %v1695_v2 = vld [vmem:[%s2320_s16 + $0x64] ss:$8 sps:$4 sm:$0xff]  }
  0x47   :  { %591 = vmatpush1.bf16.msra.mxu1 %v1603_v3  ;;  %716 = vmatprep.subr.bf16.mxu0 %v1608_v4  ;;  %v1690_v3 = vld [vmem:[%s2319_s15 + $0x60] ss:$8 sps:$4 sm:$0xff]  }
  0x48   :  { %856 = vmatprep.subr.bf16.mxu1 %v1611_v5  ;;  %v1693_v4 = vld [vmem:[%s2320_s16 + $0x60] ss:$8 sps:$4 sm:$0xff]   ;;  %v1698_v5 = vld [vmem:[%s2319_s15 + $0x74] ss:$8 sps:$4 sm:$0xff]  }
  0x49   :  { %469 = vmatmul.mubr.bf16.vlgmr.msra.gmra.mrb[4].mxu0 %v339_v6  ;;  %v1701_v6 = vld [vmem:[%s2320_s16 + $0x74] ss:$8 sps:$4 sm:$0xff]  }
  0x4a   :  { %609 = vmatmul.mubr.bf16.vlgmr.msra.gmra.mrb[4].mxu1 %v479_v8  ;;  %717 = vmatpush1.bf16.msra.mxu0 %v1606_v7  ;;  %v1696_v7 = vld [vmem:[%s2319_s15 + $0x70] ss:$8 sps:$4 sm:$0xff]  }
  0x4b   :  { %857 = vmatpush1.bf16.msra.mxu1 %v1609_v9  ;;  %718 = vmatprep.subr.bf16.mxu0 %v1614_v10  ;;  %v1699_v8 = vld [vmem:[%s2320_s16 + $0x70] ss:$8 sps:$4 sm:$0xff]   ;;  %v1704_v9 = vld [vmem:[%s2321_s17 + $0x4] ss:$8 sps:$4 sm:$0xff]   ;;  %v899_v10 = vld [vmem:[%s2324_s6] sm:$0x3] }
  0x4c   :  { %858 = vmatprep.subr.bf16.mxu1 %v1617_v11  ;;  %748 = vmatprep.mubr.bf16.mxu0 %v1734_v1  ;;  %v1702_v11 = vld [vmem:[%s2321_s17] ss:$8 sps:$4 sm:$0xff]  }
  0x4d   :  { %888 = vmatprep.mubr.bf16.mxu1 %v1734_v1 }
  0x4e   :  { %719 = vmatpush1.bf16.msra.mxu0 %v1612_v12  ;;  %v1039_v12 = vld [vmem:[%s2325_s7] sm:$0x3] }
  0x4f   :  { %859 = vmatpush1.bf16.msra.mxu1 %v1615_v13  ;;  %720 = vmatprep.subr.bf16.mxu0 %v1620_v14  ;;  %v1707_v13 = vld [vmem:[%s2321_s17 + $0x14] ss:$8 sps:$4 sm:$0xff]   ;;  %v1705_v14 = vld [vmem:[%s2321_s17 + $0x10] ss:$8 sps:$4 sm:$0xff]  }
  0x50   :  { %860 = vmatprep.subr.bf16.mxu1 %v1623_v15  ;;  %v1710_v15 = vld [vmem:[%s2321_s17 + $0x24] ss:$8 sps:$4 sm:$0xff]  }
  0x52   :  { %721 = vmatpush1.bf16.msra.mxu0 %v1618_v16  ;;  %v1708_v16 = vld [vmem:[%s2321_s17 + $0x20] ss:$8 sps:$4 sm:$0xff]  }
  0x53   :  { %861 = vmatpush1.bf16.msra.mxu1 %v1621_v17  ;;  %722 = vmatprep.subr.bf16.mxu0 %v1626_v18  ;;  %v1713_v17 = vld [vmem:[%s2321_s17 + $0x34] ss:$8 sps:$4 sm:$0xff]   ;;  %v1716_v18 = vld [vmem:[%s2321_s17 + $0x44] ss:$8 sps:$4 sm:$0xff]  }
  0x54   :  { %862 = vmatprep.subr.bf16.mxu1 %v1629_v19  ;;  %v1714_v19 = vld [vmem:[%s2321_s17 + $0x40] ss:$8 sps:$4 sm:$0xff]  }
  0x56   :  { %723 = vmatpush1.bf16.msra.mxu0 %v1624_v20  ;;  %v1719_v20 = vld [vmem:[%s2321_s17 + $0x54] ss:$8 sps:$4 sm:$0xff]  }
  0x57   :  { %863 = vmatpush1.bf16.msra.mxu1 %v1627_v21  ;;  %724 = vmatprep.subr.bf16.mxu0 %v1632_v22  ;;  %v1717_v21 = vld [vmem:[%s2321_s17 + $0x50] ss:$8 sps:$4 sm:$0xff]   ;;  %v1722_v22 = vld [vmem:[%s2321_s17 + $0x64] ss:$8 sps:$4 sm:$0xff]  }
  0x58   :  { %864 = vmatprep.subr.bf16.mxu1 %v1635_v23  ;;  %v1720_v23 = vld [vmem:[%s2321_s17 + $0x60] ss:$8 sps:$4 sm:$0xff]  }
  0x5a   :  { %725 = vmatpush1.bf16.msra.mxu0 %v1630_v24  ;;  %v1725_v24 = vld [vmem:[%s2321_s17 + $0x74] ss:$8 sps:$4 sm:$0xff]  }
  0x5b   :  { %865 = vmatpush1.bf16.msra.mxu1 %v1633_v25  ;;  %726 = vmatprep.subr.bf16.mxu0 %v1638_v26  ;;  %v1723_v25 = vld [vmem:[%s2321_s17 + $0x70] ss:$8 sps:$4 sm:$0xff]   ;;  %v1179_v26 = vld [vmem:[%s2326_s8] sm:$0x3] }
  0x5c   :  { %866 = vmatprep.subr.bf16.mxu1 %v1641_v27 }
  0x5e   :  { %727 = vmatpush1.bf16.msra.mxu0 %v1636_v28 }
  0x5f   :  { %867 = vmatpush1.bf16.msra.mxu1 %v1639_v29  ;;  %728 = vmatprep.subr.bf16.mxu0 %v1644_v30 }
  0x60   :  { %868 = vmatprep.subr.bf16.mxu1 %v1647_v31 }
  0x62   :  { %729 = vmatpush1.bf16.msra.mxu0 %v1642_v32 }
  0x63   :  { %869 = vmatpush1.bf16.msra.mxu1 %v1645_v33  ;;  %730 = vmatprep.subr.bf16.mxu0 %v1650_v34 }
  0x64   :  { %870 = vmatprep.subr.bf16.mxu1 %v1653_v35 }
  0x66   :  { %731 = vmatpush1.bf16.msra.mxu0 %v1648_v36 }
  0x67   :  { %871 = vmatpush1.bf16.msra.mxu1 %v1651_v37  ;;  %996 = vmatprep.subr.bf16.mxu0 %v1656_v38 }
  0x68   :  { %1136 = vmatprep.subr.bf16.mxu1 %v1659_v39 }
  0x69   :  { %749 = vmatmul.mubr.bf16.vlgmr.msra.gmra.mrb[8].mxu0 %v619_v40 }
  0x6a   :  { %889 = vmatmul.mubr.bf16.vlgmr.msra.gmra.mrb[8].mxu1 %v759_v42  ;;  %997 = vmatpush1.bf16.msra.mxu0 %v1654_v41 }
  0x6b   :  { %1137 = vmatpush1.bf16.msra.mxu1 %v1657_v43  ;;  %998 = vmatprep.subr.bf16.mxu0 %v1662_v44 }
  0x6c   :  { %1138 = vmatprep.subr.bf16.mxu1 %v1665_v45  ;;  %1028 = vmatprep.mubr.bf16.mxu0 %v1734_v1 }
  0x6d   :  { %1168 = vmatprep.mubr.bf16.mxu1 %v1734_v1 }
  0x6e   :  { %999 = vmatpush1.bf16.msra.mxu0 %v1660_v46 }
  0x6f   :  { %1139 = vmatpush1.bf16.msra.mxu1 %v1663_v47  ;;  %1000 = vmatprep.subr.bf16.mxu0 %v1668_v48 }
  0x70   :  { %1140 = vmatprep.subr.bf16.mxu1 %v1671_v49 }
  0x72   :  { %1001 = vmatpush1.bf16.msra.mxu0 %v1666_v50 }
  0x73   :  { %1141 = vmatpush1.bf16.msra.mxu1 %v1669_v51  ;;  %1002 = vmatprep.subr.bf16.mxu0 %v1674_v52 }
  0x74   :  { %1142 = vmatprep.subr.bf16.mxu1 %v1677_v53 }
  0x76   :  { %1003 = vmatpush1.bf16.msra.mxu0 %v1672_v54 }
  0x77   :  { %1143 = vmatpush1.bf16.msra.mxu1 %v1675_v55  ;;  %1004 = vmatprep.subr.bf16.mxu0 %v1680_v56 }
  0x78   :  { %1144 = vmatprep.subr.bf16.mxu1 %v1683_v57 }
  0x7a   :  { %1005 = vmatpush1.bf16.msra.mxu0 %v1678_v58 }
  0x7b   :  { %1145 = vmatpush1.bf16.msra.mxu1 %v1681_v59  ;;  %1006 = vmatprep.subr.bf16.mxu0 %v1686_v60 }
  0x7c   :  { %1146 = vmatprep.subr.bf16.mxu1 %v1689_v61 }
  0x7e   :  { %1007 = vmatpush1.bf16.msra.mxu0 %v1684_v62 }
  0x7f   :  { %1147 = vmatpush1.bf16.msra.mxu1 %v1687_v63  ;;  %1008 = vmatprep.subr.bf16.mxu0 %v1692_v0 }
  0x80   :  { %1148 = vmatprep.subr.bf16.mxu1 %v1695_v2 }
  0x82   :  { %1009 = vmatpush1.bf16.msra.mxu0 %v1690_v3 }
  0x83   :  { %1149 = vmatpush1.bf16.msra.mxu1 %v1693_v4  ;;  %1010 = vmatprep.subr.bf16.mxu0 %v1698_v5 }
  0x84   :  { %1150 = vmatprep.subr.bf16.mxu1 %v1701_v6 }
  0x86   :  { %1011 = vmatpush1.bf16.msra.mxu0 %v1696_v7 }
  0x87   :  { %1151 = vmatpush1.bf16.msra.mxu1 %v1699_v8  ;;  %1276 = vmatprep.subr.bf16.mxu0 %v1704_v9 }
  0x89   :  { %1029 = vmatmul.mubr.bf16.vlgmr.msra.gmra.mrb[12].mxu0 %v899_v10  ;;  %v1321_v10 = vlaneseq }
  0x8a   :  { %1169 = vmatmul.mubr.bf16.vlgmr.msra.gmra.mrb[12].mxu1 %v1039_v12  ;;  %1277 = vmatpush1.bf16.msra.mxu0 %v1702_v11 }
  0x8b   :  { %1308 = vmatprep.mubr.bf16.mxu0 %v1734_v1  ;;  %1278 = vmatprep.subr.bf16.mxu0 %v1707_v13  ;;  %v1711_v1 = vld [vmem:[%s2321_s17 + $0x30] ss:$8 sps:$4 sm:$0xff]   ;;  %v1322_v11 = vshrl.u32 %v1321_v10, 7  ;;  %v1319_v13 = vld [vmem:[%s2327_s18] sm:$0x3] }
  0x8d   :  { %v1323_v12 = vsub.s32 0, %v1322_v11 }
  0x8e   :  { %1279 = vmatpush1.bf16.msra.mxu0 %v1705_v14  ;;  %v1327_v14 = vsub.s32 1, %v1322_v11 }
  0x8f   :  { %1280 = vmatprep.subr.bf16.mxu0 %v1710_v15  ;;  %v1324_v15 = vrot.slane %v1319_v13, %v1323_v12 }
  0x92   :  { %1281 = vmatpush1.bf16.msra.mxu0 %v1708_v16 }
  0x93   :  { %1282 = vmatprep.subr.bf16.mxu0 %v1713_v17  ;;  %v1328_v17 = vrot.slane %v1319_v13, %v1327_v14 }
  0x96   :  { %1283 = vmatpush1.bf16.msra.mxu0 %v1711_v1 }
  0x97   :  { %1284 = vmatprep.subr.bf16.mxu0 %v1716_v18 }
  0x9a   :  { %1285 = vmatpush1.bf16.msra.mxu0 %v1714_v19 }
  0x9b   :  { %1286 = vmatprep.subr.bf16.mxu0 %v1719_v20 }
  0x9e   :  { %1287 = vmatpush1.bf16.msra.mxu0 %v1717_v21 }
  0x9f   :  { %1288 = vmatprep.subr.bf16.mxu0 %v1722_v22 }
  0xa2   :  { %1289 = vmatpush1.bf16.msra.mxu0 %v1720_v23 }
  0xa3   :  { %1290 = vmatprep.subr.bf16.mxu0 %v1725_v24 }
  0xa6   :  { %1291 = vmatpush1.bf16.msra.mxu0 %v1723_v25 }
  0xa9   :  { %1309 = vmatmul.mubr.bf16.vlgmr.msra.gmra.mrb[16].mxu0 %v1179_v26 }
  0xfc   :  { %v211_v27 = vpop.f32.mrb[0].mxu0 }
  0xfd   :  { %v332_v28 = vpop.f32.mrb[0].mxu1  ;;  %v213_v30 = vpop.f32.mrb[1].mxu0 }
  0xfe   :  { %v333_v29 = vadd.f32 %v332_v28, %v211_v27  ;;  %v334_v31 = vpop.f32.mrb[1].mxu1  ;;  %v215_v33 = vpop.f32.mrb[2].mxu0 }
  0xff   :  { %v335_v32 = vadd.f32 %v334_v31, %v213_v30  ;;  %v336_v34 = vpop.f32.mrb[2].mxu1  ;;  %v216_v35 = vpop.f32.mrb[3].mxu0 }
 0x100   :  { %v337_v36 = vpop.f32.mrb[3].mxu1 }
 0x11c   :  { %v470_v37 = vpop.f32.mrb[4].mxu0 }
 0x11d   :  { %v610_v38 = vpop.f32.mrb[4].mxu1  ;;  %v477_v39 = vadd.f32 %v470_v37, %v333_v29  ;;  %v472_v40 = vpop.f32.mrb[5].mxu0 }
 0x11e   :  { %v612_v41 = vpop.f32.mrb[5].mxu1  ;;  %v478_v42 = vadd.f32 %v472_v40, %v335_v32  ;;  %v474_v43 = vpop.f32.mrb[6].mxu0 }
 0x11f   :  { %v614_v44 = vpop.f32.mrb[6].mxu1  ;;  %v617_v45 = vadd.f32 %v610_v38, %v477_v39  ;;  %v475_v46 = vpop.f32.mrb[7].mxu0 }
 0x120   :  { %v615_v47 = vpop.f32.mrb[7].mxu1  ;;  %v618_v48 = vadd.f32 %v612_v41, %v478_v42 }
 0x13c   :  { %v750_v49 = vpop.f32.mrb[8].mxu0 }
 0x13d   :  { %v890_v50 = vpop.f32.mrb[8].mxu1  ;;  %v757_v51 = vadd.f32 %v750_v49, %v617_v45  ;;  %v752_v52 = vpop.f32.mrb[9].mxu0 }
 0x13e   :  { %v892_v53 = vpop.f32.mrb[9].mxu1  ;;  %v758_v54 = vadd.f32 %v752_v52, %v618_v48  ;;  %v754_v55 = vpop.f32.mrb[10].mxu0 }
 0x13f   :  { %v894_v56 = vpop.f32.mrb[10].mxu1  ;;  %v897_v57 = vadd.f32 %v890_v50, %v757_v51  ;;  %v755_v58 = vpop.f32.mrb[11].mxu0 }
 0x140   :  { %v895_v59 = vpop.f32.mrb[11].mxu1  ;;  %v898_v60 = vadd.f32 %v892_v53, %v758_v54 }
 0x15c   :  { %v1030_v61 = vpop.f32.mrb[12].mxu0 }
 0x15d   :  { %v1170_v62 = vpop.f32.mrb[12].mxu1  ;;  %v1037_v63 = vadd.f32 %v1030_v61, %v897_v57  ;;  %v1032_v0 = vpop.f32.mrb[13].mxu0 }
 0x15e   :  { %v1172_v2 = vpop.f32.mrb[13].mxu1  ;;  %v1038_v3 = vadd.f32 %v1032_v0, %v898_v60  ;;  %v1034_v4 = vpop.f32.mrb[14].mxu0 }
 0x15f   :  { %v1174_v5 = vpop.f32.mrb[14].mxu1  ;;  %v1177_v6 = vadd.f32 %v1170_v62, %v1037_v63  ;;  %v1035_v7 = vpop.f32.mrb[15].mxu0 }
 0x160   :  { %v1175_v8 = vpop.f32.mrb[15].mxu1  ;;  %v1178_v9 = vadd.f32 %v1172_v2, %v1038_v3 }
 0x17c   :  { %v1310_v16 = vpop.f32.mrb[16].mxu0 }
 0x17d   :  { %v1317_v1 = vadd.f32 %v1310_v16, %v1177_v6  ;;  %v1312_v18 = vpop.f32.mrb[17].mxu0 }
 0x17e   :  { %v1318_v19 = vadd.f32 %v1312_v18, %v1178_v9  ;;  %v1314_v20 = vpop.f32.mrb[18].mxu0 }
 0x17f   :  { %v1331_v21 = vadd.f32 %v1324_v15, %v1317_v1  ;;  %v1315_v22 = vpop.f32.mrb[19].mxu0 }
 0x180   :  { %v1332_v23 = vadd.f32 %v1328_v17, %v1318_v19 }
 0x181   :  { %v1333_v24 = vsub.f32 0.0, %v1331_v21 }
 0x182   :  { %v1334_v25 = vsub.f32 0.0, %v1332_v23 }
 0x183   :  { %v1335_v26 = vmul.f32 1.442695, %v1333_v24 }
 0x184   :  { %v1337_v27 = vmul.f32 1.442695, %v1334_v25 }
 0x185   :  { %1726 = vpow2.f32 %v1335_v26 }
 0x186   :  { %1728 = vpow2.f32 %v1337_v27 }
 0x18f   :  { %v1727_v28 = vpop.eup %1726 }
 0x190   :  { %v1729_v29 = vpop.eup %1728  ;;  %v1339_v30 = vadd.f32 1.0, %v1727_v28 }
 0x191   :  { %v1340_v31 = vadd.f32 1.0, %v1729_v29 }
 0x192   :  { %1730 = vrcp.f32 %v1339_v30 }
 0x193   :  { %1732 = vrcp.f32 %v1340_v31 }
 0x19c   :  { %v1731_v32 = vpop.eup %1730 }
 0x19d   :  { %v1733_v33 = vpop.eup %1732  ;;  %v1343_v34 = vmul.f32 %v1731_v32, %v1331_v21 }
 0x19e   :  { %v1344_v35 = vmul.f32 %v1733_v33, %v1332_v23 }
 0x1a0   :  { %v1507_v36 = vpack.c.bf16 %v1344_v35, %v1343_v34 }
 0x1a2   :  { %1508 = vst.sshfl [vmem:[%s2328_s19] sm:$0x33 pattern:$0x76325410] %v1507_v36 }

// kernel: _lambda_.29
= control target key start
LH: loop header
LB: loop body
LE: loop exit
PB: predicated region body
PF: predicated region fallthrough
CT: control target
= control target key end

     0   :  { %s351_s1 = inlined_call_operand.vmem [shape: bf16[256,128], index: 1, kind: input, shape index: {}]   ;;  %s352_s0 = inlined_call_operand.vmem [shape: bf16[4,256], index: 0, kind: input, shape index: {}]   ;;  %s353_s2 = inlined_call_operand.vmem [shape: f32[1,128], index: 2, kind: input, shape index: {}]   ;;  %s354_s3 = inlined_call_operand.vmem [shape: bf16[4,128], index: 3, kind: output, shape index: {}]  }
   0x1   :  { %v254_v0 = vld [vmem:[%s351_s1 + $0x40] sm:$0xff]   ;;  %v256_v2 = vld [vmem:[%s351_s1 + $0x48] sm:$0xff]   ;;  %v258_v4 = vld [vmem:[%s351_s1 + $0x50] sm:$0xff]  }
   0x2   :  { %v255_v1 = vld [vmem:[%s351_s1] sm:$0xff]   ;;  %232 = vmatprep.subr.bf16.mxu0 %v254_v0  ;;  %v257_v3 = vld [vmem:[%s351_s1 + $0x8] sm:$0xff]   ;;  %v259_v5 = vld [vmem:[%s351_s1 + $0x10] sm:$0xff]  }
   0x3   :  { %233 = vmatpush3.bf16.msra.mxu0 %v255_v1  ;;  %v260_v6 = vld [vmem:[%s351_s1 + $0x58] sm:$0xff]   ;;  %v262_v8 = vld [vmem:[%s351_s1 + $0x60] sm:$0xff]   ;;  %v264_v10 = vld [vmem:[%s351_s1 + $0x68] sm:$0xff]  }
   0x4   :  { %234 = vmatprep.subr.bf16.mxu0 %v256_v2  ;;  %v261_v7 = vld [vmem:[%s351_s1 + $0x18] sm:$0xff]   ;;  %v263_v9 = vld [vmem:[%s351_s1 + $0x20] sm:$0xff]   ;;  %v265_v13 = vld [vmem:[%s351_s1 + $0x28] sm:$0xff]  }
   0x5   :  { %v215_v11 = vld.sshfl [vmem:[%s352_s0] sm:$0x33 pattern:$0x76325410]  ;;  %v266_v14 = vld [vmem:[%s351_s1 + $0x70] sm:$0xff]   ;;  %v268_v16 = vld [vmem:[%s351_s1 + $0x78] sm:$0xff]  }
   0x6   :  { %v63_v12 = vcombine.high %v215_v11, %v215_v11  ;;  %v267_v15 = vld [vmem:[%s351_s1 + $0x30] sm:$0xff]   ;;  %v269_v17 = vld [vmem:[%s351_s1 + $0x38] sm:$0xff]   ;;  %v214_v19 = vld [vmem:[%s353_s2] ss:$0 sm:$0xff] }
   0x7   :  { %235 = vmatpush3.bf16.msra.mxu0 %v257_v3 }
   0x8   :  { %236 = vmatprep.subr.bf16.mxu0 %v258_v4  ;;  %194 = vmatprep.mubr.bf16.mxu0 %v63_v12 }
   0xb   :  { %237 = vmatpush3.bf16.msra.mxu0 %v259_v5 }
   0xc   :  { %238 = vmatprep.subr.bf16.mxu0 %v260_v6 }
   0xf   :  { %239 = vmatpush3.bf16.msra.mxu0 %v261_v7 }
  0x10   :  { %240 = vmatprep.subr.bf16.mxu0 %v262_v8 }
  0x13   :  { %241 = vmatpush3.bf16.msra.mxu0 %v263_v9 }
  0x14   :  { %242 = vmatprep.subr.bf16.mxu0 %v264_v10 }
  0x17   :  { %243 = vmatpush3.bf16.msra.mxu0 %v265_v13 }
  0x18   :  { %244 = vmatprep.subr.bf16.mxu0 %v266_v14 }
  0x1b   :  { %245 = vmatpush3.bf16.msra.mxu0 %v267_v15 }
  0x1c   :  { %246 = vmatprep.subr.bf16.mxu0 %v268_v16 }
  0x1f   :  { %247 = vmatpush3.bf16.msra.mxu0 %v269_v17 }
  0x22   :  { %195 = vmatmul.mubr.bf16.vlgmr.msra.gmra.mrb[0].mxu0 %v215_v11 }
  0xf5   :  { %v248_v18 = vpop.f32.mrb[0].mxu0 }
  0xf6   :  { %v249_v20 = vpop.f32.mrb[1].mxu0 }
  0xf7   :  { %v250_v21 = vadd.f32 %v249_v20, %v248_v18  ;;  %v251_v22 = vpop.f32.mrb[2].mxu0 }
  0xf8   :  { %v252_v23 = vpop.f32.mrb[3].mxu0 }
  0xf9   :  { %v197_v24 = vadd.f32 %v250_v21, %v214_v19 }
  0xfb   :  { %v202_v25 = vsub.f32 0.0, %v197_v24 }
  0xfd   :  { %v203_v26 = vmul.f32 1.442695, %v202_v25 }
  0xff   :  { %270 = vpow2.f32 %v203_v26 }
 0x109   :  { %v271_v27 = vpop.eup %270 }
 0x10a   :  { %v205_v28 = vadd.f32 1.0, %v271_v27 }
 0x10c   :  { %272 = vrcp.f32 %v205_v28 }
 0x116   :  { %v273_v29 = vpop.eup %272 }
 0x117   :  { %v207_v30 = vmul.f32 %v273_v29, %v197_v24 }
 0x119   :  { %v208_v31 = vpack.c.bf16 %v207_v30, %v207_v30 }
 0x11b   :  { %209 = vst [vmem:[%s354_s3] sm:$0x3] %v208_v31 }

// kernel: _lambda_.28
= control target key start
LH: loop header
LB: loop body
LE: loop exit
PB: predicated region body
PF: predicated region fallthrough
CT: control target
= control target key end

     0   :  { %v618_v1 = vmov 0   ;;  %v445_v62 = vlaneseq  ;;  %s821_s4 = inlined_call_operand.vmem [shape: bf16[128,256], index: 4, kind: input, shape index: {}]   ;;  %s822_s3 = inlined_call_operand.vmem [shape: bf16[128,256], index: 3, kind: input, shape index: {}]   ;;  %s823_s5 = inlined_call_operand.vmem [shape: bf16[128,256], index: 5, kind: input, shape index: {}]   ;;  %s824_s1 = inlined_call_operand.vmem [shape: bf16[4,128], index: 1, kind: input, shape index: {}]   ;;  %s825_s0 = inlined_call_operand.vmem [shape: bf16[4,128], index: 0, kind: input, shape index: {}]   ;;  %s826_s2 = inlined_call_operand.vmem [shape: bf16[4,128], index: 2, kind: input, shape index: {}]   ;;  %s827_s6 = inlined_call_operand.vmem [shape: f32[1,256], index: 6, kind: input, shape index: {}]   ;;  %s828_s7 = inlined_call_operand.vmem [shape: bf16[4,256], index: 7, kind: output, shape index: {}]  }
   0x1   :  { %v538_v0 = vld [vmem:[%s821_s4 + $0x4] ss:$8 sps:$4 sm:$0xff]   ;;  %173 = vmatprep.mubr.bf16.mxu0 %v618_v1  ;;  %294 = vmatprep.mubr.bf16.mxu1 %v618_v1  ;;  %v542_v3 = vld [vmem:[%s821_s4] ss:$8 sps:$4 sm:$0xff]   ;;  %v544_v5 = vld [vmem:[%s821_s4 + $0x14] ss:$8 sps:$4 sm:$0xff]  }
   0x2   :  { %v540_v2 = vld [vmem:[%s822_s3 + $0x4] ss:$8 sps:$4 sm:$0xff]   ;;  %141 = vmatprep.subr.bf16.mxu0 %v538_v0  ;;  %v543_v4 = vld [vmem:[%s822_s3] ss:$8 sps:$4 sm:$0xff]   ;;  %v546_v6 = vld [vmem:[%s822_s3 + $0x14] ss:$8 sps:$4 sm:$0xff]  }
   0x3   :  { %262 = vmatprep.subr.bf16.mxu1 %v540_v2  ;;  %142 = vmatpush1.bf16.msra.mxu0 %v542_v3  ;;  %v548_v7 = vld [vmem:[%s821_s4 + $0x10] ss:$8 sps:$4 sm:$0xff]   ;;  %v550_v9 = vld [vmem:[%s821_s4 + $0x24] ss:$8 sps:$4 sm:$0xff]   ;;  %v554_v11 = vld [vmem:[%s821_s4 + $0x20] ss:$8 sps:$4 sm:$0xff]  }
   0x4   :  { %263 = vmatpush1.bf16.msra.mxu1 %v543_v4  ;;  %143 = vmatprep.subr.bf16.mxu0 %v544_v5  ;;  %v549_v8 = vld [vmem:[%s822_s3 + $0x10] ss:$8 sps:$4 sm:$0xff]   ;;  %v552_v10 = vld [vmem:[%s822_s3 + $0x24] ss:$8 sps:$4 sm:$0xff]   ;;  %v555_v12 = vld [vmem:[%s822_s3 + $0x20] ss:$8 sps:$4 sm:$0xff]  }
   0x5   :  { %264 = vmatprep.subr.bf16.mxu1 %v546_v6  ;;  %v556_v13 = vld [vmem:[%s821_s4 + $0x34] ss:$8 sps:$4 sm:$0xff]   ;;  %v560_v15 = vld [vmem:[%s821_s4 + $0x30] ss:$8 sps:$4 sm:$0xff]   ;;  %v562_v17 = vld [vmem:[%s821_s4 + $0x44] ss:$8 sps:$4 sm:$0xff]  }
   0x6   :  { %v558_v14 = vld [vmem:[%s822_s3 + $0x34] ss:$8 sps:$4 sm:$0xff]   ;;  %v561_v16 = vld [vmem:[%s822_s3 + $0x30] ss:$8 sps:$4 sm:$0xff]   ;;  %v564_v18 = vld [vmem:[%s822_s3 + $0x44] ss:$8 sps:$4 sm:$0xff]  }
   0x7   :  { %144 = vmatpush1.bf16.msra.mxu0 %v548_v7  ;;  %v566_v19 = vld [vmem:[%s821_s4 + $0x40] ss:$8 sps:$4 sm:$0xff]   ;;  %v568_v21 = vld [vmem:[%s821_s4 + $0x54] ss:$8 sps:$4 sm:$0xff]   ;;  %v572_v23 = vld [vmem:[%s821_s4 + $0x50] ss:$8 sps:$4 sm:$0xff]  }
   0x8   :  { %265 = vmatpush1.bf16.msra.mxu1 %v549_v8  ;;  %145 = vmatprep.subr.bf16.mxu0 %v550_v9  ;;  %v567_v20 = vld [vmem:[%s822_s3 + $0x40] ss:$8 sps:$4 sm:$0xff]   ;;  %v570_v22 = vld [vmem:[%s822_s3 + $0x54] ss:$8 sps:$4 sm:$0xff]   ;;  %v573_v24 = vld [vmem:[%s822_s3 + $0x50] ss:$8 sps:$4 sm:$0xff]  }
   0x9   :  { %266 = vmatprep.subr.bf16.mxu1 %v552_v10  ;;  %v574_v25 = vld [vmem:[%s821_s4 + $0x64] ss:$8 sps:$4 sm:$0xff]   ;;  %v578_v27 = vld [vmem:[%s821_s4 + $0x60] ss:$8 sps:$4 sm:$0xff]   ;;  %v580_v29 = vld [vmem:[%s821_s4 + $0x74] ss:$8 sps:$4 sm:$0xff]  }
   0xa   :  { %v576_v26 = vld [vmem:[%s822_s3 + $0x64] ss:$8 sps:$4 sm:$0xff]   ;;  %v579_v28 = vld [vmem:[%s822_s3 + $0x60] ss:$8 sps:$4 sm:$0xff]   ;;  %v582_v30 = vld [vmem:[%s822_s3 + $0x74] ss:$8 sps:$4 sm:$0xff]  }
   0xb   :  { %146 = vmatpush1.bf16.msra.mxu0 %v554_v11  ;;  %v584_v31 = vld [vmem:[%s821_s4 + $0x70] ss:$8 sps:$4 sm:$0xff]   ;;  %v588_v33 = vld [vmem:[%s823_s5 + $0x4] ss:$8 sps:$4 sm:$0xff]   ;;  %v44_v34 = vld [vmem:[%s824_s1] sm:$0x3] }
   0xc   :  { %267 = vmatpush1.bf16.msra.mxu1 %v555_v12  ;;  %147 = vmatprep.subr.bf16.mxu0 %v556_v13  ;;  %v585_v32 = vld [vmem:[%s822_s3 + $0x70] ss:$8 sps:$4 sm:$0xff]   ;;  %v27_v35 = vld [vmem:[%s825_s0] sm:$0x3]  ;;  %v591_v37 = vld [vmem:[%s823_s5 + $0x14] ss:$8 sps:$4 sm:$0xff]  }
   0xd   :  { %268 = vmatprep.subr.bf16.mxu1 %v558_v14  ;;  %v586_v36 = vld [vmem:[%s823_s5] ss:$8 sps:$4 sm:$0xff]   ;;  %v589_v38 = vld [vmem:[%s823_s5 + $0x10] ss:$8 sps:$4 sm:$0xff]   ;;  %v594_v39 = vld [vmem:[%s823_s5 + $0x24] ss:$8 sps:$4 sm:$0xff]  }
   0xe   :  { %v592_v40 = vld [vmem:[%s823_s5 + $0x20] ss:$8 sps:$4 sm:$0xff]   ;;  %v597_v41 = vld [vmem:[%s823_s5 + $0x34] ss:$8 sps:$4 sm:$0xff]   ;;  %v595_v42 = vld [vmem:[%s823_s5 + $0x30] ss:$8 sps:$4 sm:$0xff]  }
   0xf   :  { %148 = vmatpush1.bf16.msra.mxu0 %v560_v15  ;;  %v600_v43 = vld [vmem:[%s823_s5 + $0x44] ss:$8 sps:$4 sm:$0xff]   ;;  %v598_v44 = vld [vmem:[%s823_s5 + $0x40] ss:$8 sps:$4 sm:$0xff]   ;;  %v603_v45 = vld [vmem:[%s823_s5 + $0x54] ss:$8 sps:$4 sm:$0xff]  }
  0x10   :  { %269 = vmatpush1.bf16.msra.mxu1 %v561_v16  ;;  %149 = vmatprep.subr.bf16.mxu0 %v562_v17  ;;  %v601_v46 = vld [vmem:[%s823_s5 + $0x50] ss:$8 sps:$4 sm:$0xff]   ;;  %v606_v47 = vld [vmem:[%s823_s5 + $0x64] ss:$8 sps:$4 sm:$0xff]   ;;  %v604_v48 = vld [vmem:[%s823_s5 + $0x60] ss:$8 sps:$4 sm:$0xff]  }
  0x11   :  { %270 = vmatprep.subr.bf16.mxu1 %v564_v18  ;;  %v609_v49 = vld [vmem:[%s823_s5 + $0x74] ss:$8 sps:$4 sm:$0xff]   ;;  %v607_v50 = vld [vmem:[%s823_s5 + $0x70] ss:$8 sps:$4 sm:$0xff]   ;;  %v303_v51 = vld [vmem:[%s826_s2] sm:$0x3] }
  0x12   :  { %v446_v63 = vshrl.u32 %v445_v62, 7 }
  0x13   :  { %150 = vmatpush1.bf16.msra.mxu0 %v566_v19 }
  0x14   :  { %271 = vmatpush1.bf16.msra.mxu1 %v567_v20  ;;  %151 = vmatprep.subr.bf16.mxu0 %v568_v21  ;;  %v447_v0 = vsub.s32 0, %v446_v63  ;;  %v451_v2 = vsub.s32 1, %v446_v63 }
  0x15   :  { %272 = vmatprep.subr.bf16.mxu1 %v570_v22 }
  0x17   :  { %152 = vmatpush1.bf16.msra.mxu0 %v572_v23 }
  0x18   :  { %273 = vmatpush1.bf16.msra.mxu1 %v573_v24  ;;  %153 = vmatprep.subr.bf16.mxu0 %v574_v25 }
  0x19   :  { %274 = vmatprep.subr.bf16.mxu1 %v576_v26 }
  0x1b   :  { %154 = vmatpush1.bf16.msra.mxu0 %v578_v27 }
  0x1c   :  { %275 = vmatpush1.bf16.msra.mxu1 %v579_v28  ;;  %155 = vmatprep.subr.bf16.mxu0 %v580_v29 }
  0x1d   :  { %276 = vmatprep.subr.bf16.mxu1 %v582_v30 }
  0x1f   :  { %156 = vmatpush1.bf16.msra.mxu0 %v584_v31 }
  0x20   :  { %277 = vmatpush1.bf16.msra.mxu1 %v585_v32  ;;  %400 = vmatprep.subr.bf16.mxu0 %v588_v33 }
  0x22   :  { %174 = vmatmul.mubr.bf16.vlgmr.msra.gmra.mrb[0].mxu0 %v44_v34 }
  0x23   :  { %295 = vmatmul.mubr.bf16.vlgmr.msra.gmra.mrb[0].mxu1 %v27_v35  ;;  %401 = vmatpush1.bf16.msra.mxu0 %v586_v36 }
  0x24   :  { %432 = vmatprep.mubr.bf16.mxu0 %v618_v1  ;;  %402 = vmatprep.subr.bf16.mxu0 %v591_v37  ;;  %v443_v1 = vld [vmem:[%s827_s6] sm:$0x3] }
  0x25   :  { %v448_v3 = vrot.slane %v443_v1, %v447_v0  ;;  %v452_v5 = vrot.slane %v443_v1, %v451_v2 }
  0x27   :  { %403 = vmatpush1.bf16.msra.mxu0 %v589_v38 }
  0x28   :  { %404 = vmatprep.subr.bf16.mxu0 %v594_v39 }
  0x2b   :  { %405 = vmatpush1.bf16.msra.mxu0 %v592_v40 }
  0x2c   :  { %406 = vmatprep.subr.bf16.mxu0 %v597_v41 }
  0x2f   :  { %407 = vmatpush1.bf16.msra.mxu0 %v595_v42 }
  0x30   :  { %408 = vmatprep.subr.bf16.mxu0 %v600_v43 }
  0x33   :  { %409 = vmatpush1.bf16.msra.mxu0 %v598_v44 }
  0x34   :  { %410 = vmatprep.subr.bf16.mxu0 %v603_v45 }
  0x37   :  { %411 = vmatpush1.bf16.msra.mxu0 %v601_v46 }
  0x38   :  { %412 = vmatprep.subr.bf16.mxu0 %v606_v47 }
  0x3b   :  { %413 = vmatpush1.bf16.msra.mxu0 %v604_v48 }
  0x3c   :  { %414 = vmatprep.subr.bf16.mxu0 %v609_v49 }
  0x3f   :  { %415 = vmatpush1.bf16.msra.mxu0 %v607_v50 }
  0x42   :  { %433 = vmatmul.mubr.bf16.vlgmr.msra.gmra.mrb[4].mxu0 %v303_v51 }
  0xf5   :  { %v175_v52 = vpop.f32.mrb[0].mxu0 }
  0xf6   :  { %v296_v53 = vpop.f32.mrb[0].mxu1  ;;  %v177_v55 = vpop.f32.mrb[1].mxu0 }
  0xf7   :  { %v297_v54 = vadd.f32 %v296_v53, %v175_v52  ;;  %v298_v56 = vpop.f32.mrb[1].mxu1  ;;  %v179_v58 = vpop.f32.mrb[2].mxu0 }
  0xf8   :  { %v299_v57 = vadd.f32 %v298_v56, %v177_v55  ;;  %v300_v59 = vpop.f32.mrb[2].mxu1  ;;  %v180_v60 = vpop.f32.mrb[3].mxu0 }
  0xf9   :  { %v301_v61 = vpop.f32.mrb[3].mxu1 }
 0x115   :  { %v434_v4 = vpop.f32.mrb[4].mxu0 }
 0x116   :  { %v441_v6 = vadd.f32 %v434_v4, %v297_v54  ;;  %v436_v7 = vpop.f32.mrb[5].mxu0 }
 0x117   :  { %v442_v8 = vadd.f32 %v436_v7, %v299_v57  ;;  %v438_v9 = vpop.f32.mrb[6].mxu0 }
 0x118   :  { %v455_v10 = vadd.f32 %v448_v3, %v441_v6  ;;  %v439_v11 = vpop.f32.mrb[7].mxu0 }
 0x119   :  { %v456_v12 = vadd.f32 %v452_v5, %v442_v8 }
 0x11a   :  { %v457_v13 = vsub.f32 0.0, %v455_v10 }
 0x11b   :  { %v458_v14 = vsub.f32 0.0, %v456_v12 }
 0x11c   :  { %v459_v15 = vmul.f32 1.442695, %v457_v13 }
 0x11d   :  { %v461_v16 = vmul.f32 1.442695, %v458_v14 }
 0x11e   :  { %610 = vpow2.f32 %v459_v15 }
 0x11f   :  { %612 = vpow2.f32 %v461_v16 }
 0x128   :  { %v611_v17 = vpop.eup %610 }
 0x129   :  { %v613_v18 = vpop.eup %612  ;;  %v463_v19 = vadd.f32 1.0, %v611_v17 }
 0x12a   :  { %v464_v20 = vadd.f32 1.0, %v613_v18 }
 0x12b   :  { %614 = vrcp.f32 %v463_v19 }
 0x12c   :  { %616 = vrcp.f32 %v464_v20 }
 0x135   :  { %v615_v21 = vpop.eup %614 }
 0x136   :  { %v617_v22 = vpop.eup %616  ;;  %v467_v23 = vmul.f32 %v615_v21, %v455_v10 }
 0x137   :  { %v468_v24 = vmul.f32 %v617_v22, %v456_v12 }
 0x139   :  { %v535_v25 = vpack.c.bf16 %v468_v24, %v467_v23 }
 0x13b   :  { %536 = vst.sshfl [vmem:[%s828_s7] sm:$0x33 pattern:$0x76325410] %v535_v25 }

// kernel: _lambda_.30
= control target key start
LH: loop header
LB: loop body
LE: loop exit
PB: predicated region body
PF: predicated region fallthrough
CT: control target
= control target key end

     0   :  { %v188_v0 = vmov -3e+38   ;;  %s257_s0 = inlined_call_operand.vmem [shape: bf16[1,2,2,128], index: 0, kind: input, shape index: {}]   ;;  %s258_s1 = inlined_call_operand.vmem [shape: bf16[1,2,2,128], index: 1, kind: output, shape index: {0}]   ;;  %s259_s2 = inlined_call_operand.vmem [shape: bf16[1,2,2,128], index: 2, kind: output, shape index: {1}]   ;;  %s260_s3 = inlined_call_operand.vmem [shape: bf16[1,2,2,128], index: 3, kind: output, shape index: {2}]  }
   0x1   :  { %15 = vst [vmem:[#allocation2] sm:$0x3] %v188_v0  ;;  %16 = vst [vmem:[#allocation2 + $0x2] sm:$0x3] %v188_v0  ;;  %v11_v1 = vld [vmem:[%s257_s0] sm:$0x1] }
   0x2   :  { %17 = vst [vmem:[#allocation2 + $0x4] sm:$0x3] %v188_v0  ;;  %18 = vst [vmem:[#allocation2 + $0x6] sm:$0x3] %v188_v0  ;;  %v12_v2 = vld [vmem:[%s257_s0 + $0x1] sm:$0x1]  ;;  %v13_v3 = vunpack.c.l.bf16 %v11_v1 }
   0x3   :  { %19 = vst [vmem:[#allocation2 + $0x8] sm:$0x3] %v188_v0  ;;  %20 = vst [vmem:[#allocation2 + $0xa] sm:$0x3] %v188_v0  ;;  %v14_v4 = vunpack.c.l.bf16 %v12_v2 }
   0x4   :  { %45 = vst [vmem:[#allocation3] sm:$0x3f] %v188_v0  ;;  %46 = vst [vmem:[#allocation3 + $0x8] sm:$0x3f] %v188_v0 }
   0x5   :  { %22 = vst [vmem:[#allocation2 + $0x4] sm:$0x3] %v13_v3  ;;  %23 = vst [vmem:[#allocation2 + $0x6] sm:$0x3] %v14_v4 }
   0x8   :  { %v24_v5 = vld [vmem:[#allocation2] sm:$0x3]  ;;  %v27_v6 = vld [vmem:[#allocation2 + $0x2] sm:$0x3] }
   0x9   :  { %v29_v8 = vmax.f32 %v24_v5, %v27_v6  ;;  %71 = vst [vmem:[#allocation2] sm:$0x3] %v188_v0  ;;  %v25_v9 = vld [vmem:[#allocation2 + $0x2] sm:$0x3] }
   0xa   :  { %v41_v7 = vld [vmem:[#allocation2 + $0x8] sm:$0x3]  ;;  %v42_v11 = vld [vmem:[#allocation2 + $0xa] sm:$0x3]  ;;  %72 = vst [vmem:[#allocation2 + $0x2] sm:$0x3] %v188_v0 }
   0xb   :  { %v37_v10 = vld [vmem:[#allocation2 + $0x8] sm:$0x3]  ;;  %76 = vst [vmem:[#allocation2 + $0xa] sm:$0x3] %v188_v0  ;;  %v49_v29 = vld [vmem:[#allocation3] sm:$0x3] }
   0xc   :  { %75 = vst [vmem:[#allocation2 + $0x8] sm:$0x3] %v188_v0  ;;  %v31_v12 = vld [vmem:[#allocation2 + $0x4] sm:$0x3]  ;;  %v36_v13 = vld [vmem:[#allocation2 + $0x6] sm:$0x3] }
   0xd   :  { %v28_v14 = vld [vmem:[#allocation2 + $0x4] sm:$0x3]  ;;  %v33_v15 = vmax.f32 %v29_v8, %v31_v12  ;;  %v32_v17 = vld [vmem:[#allocation2 + $0x6] sm:$0x3]  ;;  %v63_v30 = vld [vmem:[#allocation3 + $0x4] sm:$0x3] }
   0xe   :  { %v30_v16 = vmax.f32 %v25_v9, %v28_v14  ;;  %73 = vst [vmem:[#allocation2 + $0x4] sm:$0x3] %v188_v0  ;;  %74 = vst [vmem:[#allocation2 + $0x6] sm:$0x3] %v188_v0  ;;  %v50_v31 = vld [vmem:[#allocation3 + $0x8] sm:$0x3] }
   0xf   :  { %v38_v18 = vmax.f32 %v33_v15, %v36_v13  ;;  %v64_v36 = vld [vmem:[#allocation3 + $0xc] sm:$0x3] }
  0x10   :  { %v34_v19 = vmax.f32 %v30_v16, %v32_v17  ;;  %v79_v22 = vld [vmem:[#allocation2] sm:$0x3] }
  0x11   :  { %v43_v20 = vmax.f32 %v38_v18, %v41_v7  ;;  %v81_v23 = vld [vmem:[#allocation2 + $0x2] sm:$0x3]  ;;  %123 = vst [vmem:[#allocation2] sm:$0x3] %v188_v0 }
  0x12   :  { %v39_v21 = vmax.f32 %v34_v19, %v37_v10  ;;  %v80_v24 = vld [vmem:[#allocation2 + $0x2] sm:$0x3]  ;;  %v94_v28 = vld [vmem:[#allocation2 + $0xa] sm:$0x3]  ;;  %v83_v49 = vmax.f32 %v79_v22, %v81_v23 }
  0x13   :  { %47 = vst [vmem:[#allocation3 + $0x2] sm:$0x3] %v43_v20  ;;  %v93_v26 = vld [vmem:[#allocation2 + $0x8] sm:$0x3]  ;;  %124 = vst [vmem:[#allocation2 + $0x2] sm:$0x3] %v188_v0 }
  0x14   :  { %v44_v25 = vmax.f32 %v39_v21, %v42_v11  ;;  %v90_v27 = vld [vmem:[#allocation2 + $0x8] sm:$0x3]  ;;  %128 = vst [vmem:[#allocation2 + $0xa] sm:$0x3] %v188_v0 }
  0x15   :  { %127 = vst [vmem:[#allocation2 + $0x8] sm:$0x3] %v188_v0 }
  0x16   :  { %48 = vst [vmem:[#allocation3 + $0xa] sm:$0x3] %v44_v25 }
  0x18   :  { %v131_v17 = vld [vmem:[#allocation2] sm:$0x3] }
  0x1a   :  { %v51_v32 = vld [vmem:[#allocation3 + $0x1] sm:$0x3]  ;;  %v59_v34 = vld [vmem:[#allocation3 + $0x3] sm:$0x3]  ;;  %v133_v18 = vld [vmem:[#allocation2 + $0x2] sm:$0x3] }
  0x1b   :  { %v55_v33 = vld [vmem:[#allocation3 + $0x2] sm:$0x3]  ;;  %v53_v35 = vmax.f32 %v49_v29, %v51_v32  ;;  %v135_v20 = vmax.f32 %v131_v17, %v133_v18 }
  0x1c   :  { %97 = vst [vmem:[#allocation3] sm:$0x3f] %v188_v0  ;;  %v142_v23 = vld [vmem:[#allocation2 + $0x8] sm:$0x3] }
  0x1d   :  { %v52_v37 = vld [vmem:[#allocation3 + $0x9] sm:$0x3]  ;;  %v60_v39 = vld [vmem:[#allocation3 + $0xb] sm:$0x3]  ;;  %v57_v40 = vmax.f32 %v53_v35, %v55_v33 }
  0x1e   :  { %v56_v38 = vld [vmem:[#allocation3 + $0xa] sm:$0x3]  ;;  %v54_v41 = vmax.f32 %v50_v31, %v52_v37  ;;  %v146_v31 = vld [vmem:[#allocation2 + $0xa] sm:$0x3] }
  0x1f   :  { %98 = vst [vmem:[#allocation3 + $0x8] sm:$0x3f] %v188_v0  ;;  %v61_v42 = vmax.f32 %v57_v40, %v59_v34 }
  0x20   :  { %v58_v43 = vmax.f32 %v54_v41, %v56_v38 }
  0x21   :  { %v65_v44 = vmax.f32 %v61_v42, %v63_v30 }
  0x22   :  { %v62_v45 = vmax.f32 %v58_v43, %v60_v39 }
  0x23   :  { %77 = vst [vmem:[#allocation2 + $0x4] sm:$0x3] %v65_v44  ;;  %v67_v46 = vpack.c.bf16 %v65_v44, %v65_v44  ;;  %v101_v61 = vld [vmem:[#allocation3] sm:$0x3]  ;;  %v115_v62 = vld [vmem:[#allocation3 + $0x4] sm:$0x3] }
  0x24   :  { %v66_v47 = vmax.f32 %v62_v45, %v64_v36 }
  0x25   :  { %69 = vst [vmem:[%s258_s1] sm:$0x1] %v67_v46 }
  0x26   :  { %78 = vst [vmem:[#allocation2 + $0x6] sm:$0x3] %v66_v47  ;;  %v68_v48 = vpack.c.bf16 %v66_v47, %v66_v47  ;;  %v102_v63 = vld [vmem:[#allocation3 + $0x8] sm:$0x3]  ;;  %v116_v5 = vld [vmem:[#allocation3 + $0xc] sm:$0x3] }
  0x28   :  { %70 = vst [vmem:[%s258_s1 + $0x1] sm:$0x1] %v68_v48 }
  0x2a   :  { %v85_v50 = vld [vmem:[#allocation2 + $0x4] sm:$0x3] }
  0x2b   :  { %v82_v51 = vld [vmem:[#allocation2 + $0x4] sm:$0x3]  ;;  %v87_v52 = vmax.f32 %v83_v49, %v85_v50 }
  0x2c   :  { %v84_v53 = vmax.f32 %v80_v24, %v82_v51  ;;  %125 = vst [vmem:[#allocation2 + $0x4] sm:$0x3] %v188_v0 }
  0x2d   :  { %v89_v54 = vld [vmem:[#allocation2 + $0x6] sm:$0x3] }
  0x2e   :  { %v86_v55 = vld [vmem:[#allocation2 + $0x6] sm:$0x3]  ;;  %v91_v56 = vmax.f32 %v87_v52, %v89_v54 }
  0x2f   :  { %v88_v57 = vmax.f32 %v84_v53, %v86_v55  ;;  %126 = vst [vmem:[#allocation2 + $0x6] sm:$0x3] %v188_v0 }
  0x30   :  { %v95_v58 = vmax.f32 %v91_v56, %v93_v26  ;;  %v145_v26 = vld [vmem:[#allocation2 + $0x8] sm:$0x3] }
  0x31   :  { %v92_v59 = vmax.f32 %v88_v57, %v90_v27 }
  0x32   :  { %99 = vst [vmem:[#allocation3 + $0x2] sm:$0x3] %v95_v58 }
  0x33   :  { %v96_v60 = vmax.f32 %v92_v59, %v94_v28 }
  0x35   :  { %100 = vst [vmem:[#allocation3 + $0xa] sm:$0x3] %v96_v60 }
  0x39   :  { %v103_v1 = vld [vmem:[#allocation3 + $0x1] sm:$0x3]  ;;  %v111_v3 = vld [vmem:[#allocation3 + $0x3] sm:$0x3] }
  0x3a   :  { %v107_v2 = vld [vmem:[#allocation3 + $0x2] sm:$0x3]  ;;  %v105_v4 = vmax.f32 %v101_v61, %v103_v1 }
  0x3b   :  { %149 = vst [vmem:[#allocation3] sm:$0x3f] %v188_v0 }
  0x3c   :  { %v104_v6 = vld [vmem:[#allocation3 + $0x9] sm:$0x3]  ;;  %v112_v8 = vld [vmem:[#allocation3 + $0xb] sm:$0x3]  ;;  %v109_v9 = vmax.f32 %v105_v4, %v107_v2 }
  0x3d   :  { %v108_v7 = vld [vmem:[#allocation3 + $0xa] sm:$0x3]  ;;  %v106_v10 = vmax.f32 %v102_v63, %v104_v6 }
  0x3e   :  { %150 = vst [vmem:[#allocation3 + $0x8] sm:$0x3f] %v188_v0  ;;  %v113_v11 = vmax.f32 %v109_v9, %v111_v3  ;;  %v132_v0 = vld [vmem:[#allocation2 + $0x2] sm:$0x3] }
  0x3f   :  { %v110_v12 = vmax.f32 %v106_v10, %v108_v7 }
  0x40   :  { %v117_v13 = vmax.f32 %v113_v11, %v115_v62 }
  0x41   :  { %v114_v14 = vmax.f32 %v110_v12, %v112_v8 }
  0x42   :  { %129 = vst [vmem:[#allocation2 + $0x4] sm:$0x3] %v117_v13  ;;  %v119_v15 = vpack.c.bf16 %v117_v13, %v117_v13  ;;  %v153_v35 = vld [vmem:[#allocation3] sm:$0x3]  ;;  %v167_v47 = vld [vmem:[#allocation3 + $0x4] sm:$0x3] }
  0x43   :  { %v118_v16 = vmax.f32 %v114_v14, %v116_v5 }
  0x44   :  { %121 = vst [vmem:[%s259_s2] sm:$0x1] %v119_v15 }
  0x45   :  { %130 = vst [vmem:[#allocation2 + $0x6] sm:$0x3] %v118_v16  ;;  %v120_v19 = vpack.c.bf16 %v118_v16, %v118_v16  ;;  %v154_v37 = vld [vmem:[#allocation3 + $0x8] sm:$0x3]  ;;  %v168_v51 = vld [vmem:[#allocation3 + $0xc] sm:$0x3] }
  0x47   :  { %122 = vst [vmem:[%s259_s2 + $0x1] sm:$0x1] %v120_v19 }
  0x49   :  { %v134_v21 = vld [vmem:[#allocation2 + $0x4] sm:$0x3] }
  0x4a   :  { %v137_v22 = vld [vmem:[#allocation2 + $0x4] sm:$0x3]  ;;  %v136_v24 = vmax.f32 %v132_v0, %v134_v21 }
  0x4b   :  { %v139_v25 = vmax.f32 %v135_v20, %v137_v22 }
  0x4c   :  { %v138_v27 = vld [vmem:[#allocation2 + $0x6] sm:$0x3] }
  0x4d   :  { %v141_v28 = vld [vmem:[#allocation2 + $0x6] sm:$0x3]  ;;  %v140_v29 = vmax.f32 %v136_v24, %v138_v27 }
  0x4e   :  { %v143_v30 = vmax.f32 %v139_v25, %v141_v28 }
  0x4f   :  { %v144_v32 = vmax.f32 %v140_v29, %v142_v23 }
  0x50   :  { %v147_v33 = vmax.f32 %v143_v30, %v145_v26 }
  0x51   :  { %v148_v34 = vmax.f32 %v144_v32, %v146_v31 }
  0x52   :  { %151 = vst [vmem:[#allocation3 + $0x2] sm:$0x3] %v147_v33 }
  0x53   :  { %152 = vst [vmem:[#allocation3 + $0xa] sm:$0x3] %v148_v34 }
  0x59   :  { %v155_v36 = vld [vmem:[#allocation3 + $0x1] sm:$0x3]  ;;  %v163_v43 = vld [vmem:[#allocation3 + $0x3] sm:$0x3] }
  0x5a   :  { %v157_v38 = vmax.f32 %v153_v35, %v155_v36  ;;  %v159_v39 = vld [vmem:[#allocation3 + $0x2] sm:$0x3]  ;;  %v156_v40 = vld [vmem:[#allocation3 + $0x9] sm:$0x3]  ;;  %v164_v48 = vld [vmem:[#allocation3 + $0xb] sm:$0x3] }
  0x5b   :  { %v158_v42 = vmax.f32 %v154_v37, %v156_v40  ;;  %v160_v44 = vld [vmem:[#allocation3 + $0xa] sm:$0x3] }
  0x5c   :  { %v161_v41 = vmax.f32 %v157_v38, %v159_v39 }
  0x5d   :  { %v162_v46 = vmax.f32 %v158_v42, %v160_v44 }
  0x5e   :  { %v165_v45 = vmax.f32 %v161_v41, %v163_v43 }
  0x5f   :  { %v166_v50 = vmax.f32 %v162_v46, %v164_v48 }
  0x60   :  { %v169_v49 = vmax.f32 %v165_v45, %v167_v47 }
  0x61   :  { %v170_v53 = vmax.f32 %v166_v50, %v168_v51 }
  0x62   :  { %v171_v52 = vpack.c.bf16 %v169_v49, %v169_v49 }
  0x63   :  { %v172_v54 = vpack.c.bf16 %v170_v53, %v170_v53 }
  0x64   :  { %173 = vst [vmem:[%s260_s3] sm:$0x1] %v171_v52 }
  0x65   :  { %174 = vst [vmem:[%s260_s3 + $0x1] sm:$0x1] %v172_v54 }

// kernel: _lambda_.31
= control target key start
LH: loop header
LB: loop body
LE: loop exit
PB: predicated region body
PF: predicated region fallthrough
CT: control target
= control target key end

     0   :  { %v804_v1 = vmov 0   ;;  %s1069_s5 = inlined_call_operand.vmem [shape: bf16[128,256], index: 5, kind: input, shape index: {}]   ;;  %s1070_s4 = inlined_call_operand.vmem [shape: bf16[128,256], index: 4, kind: input, shape index: {}]   ;;  %s1071_s6 = inlined_call_operand.vmem [shape: bf16[128,256], index: 6, kind: input, shape index: {}]   ;;  %s1072_s7 = inlined_call_operand.vmem [shape: bf16[128,256], index: 7, kind: input, shape index: {}]   ;;  %s1073_s1 = inlined_call_operand.vmem [shape: bf16[4,128], index: 1, kind: input, shape index: {}]   ;;  %s1074_s0 = inlined_call_operand.vmem [shape: bf16[4,128], index: 0, kind: input, shape index: {}]   ;;  %s1075_s2 = inlined_call_operand.vmem [shape: bf16[4,128], index: 2, kind: input, shape index: {}]   ;;  %s1076_s3 = inlined_call_operand.vmem [shape: bf16[4,128], index: 3, kind: input, shape index: {}]   ;;  %s1077_s8 = inlined_call_operand.vmem [shape: f32[1,256], index: 8, kind: input, shape index: {}]   ;;  %s1078_s9 = inlined_call_operand.vmem [shape: bf16[4,256], index: 9, kind: output, shape index: {}]  }
   0x1   :  { %v700_v0 = vld [vmem:[%s1069_s5 + $0x4] ss:$8 sps:$4 sm:$0xff]   ;;  %179 = vmatprep.mubr.bf16.mxu0 %v804_v1  ;;  %300 = vmatprep.mubr.bf16.mxu1 %v804_v1  ;;  %v704_v3 = vld [vmem:[%s1069_s5] ss:$8 sps:$4 sm:$0xff]   ;;  %v706_v5 = vld [vmem:[%s1069_s5 + $0x14] ss:$8 sps:$4 sm:$0xff]  }
   0x2   :  { %v702_v2 = vld [vmem:[%s1070_s4 + $0x4] ss:$8 sps:$4 sm:$0xff]   ;;  %147 = vmatprep.subr.bf16.mxu0 %v700_v0  ;;  %v705_v4 = vld [vmem:[%s1070_s4] ss:$8 sps:$4 sm:$0xff]   ;;  %v708_v6 = vld [vmem:[%s1070_s4 + $0x14] ss:$8 sps:$4 sm:$0xff]  }
   0x3   :  { %268 = vmatprep.subr.bf16.mxu1 %v702_v2  ;;  %148 = vmatpush1.bf16.msra.mxu0 %v704_v3  ;;  %v710_v7 = vld [vmem:[%s1069_s5 + $0x10] ss:$8 sps:$4 sm:$0xff]   ;;  %v712_v9 = vld [vmem:[%s1069_s5 + $0x24] ss:$8 sps:$4 sm:$0xff]   ;;  %v716_v11 = vld [vmem:[%s1069_s5 + $0x20] ss:$8 sps:$4 sm:$0xff]  }
   0x4   :  { %269 = vmatpush1.bf16.msra.mxu1 %v705_v4  ;;  %149 = vmatprep.subr.bf16.mxu0 %v706_v5  ;;  %v711_v8 = vld [vmem:[%s1070_s4 + $0x10] ss:$8 sps:$4 sm:$0xff]   ;;  %v714_v10 = vld [vmem:[%s1070_s4 + $0x24] ss:$8 sps:$4 sm:$0xff]   ;;  %v717_v12 = vld [vmem:[%s1070_s4 + $0x20] ss:$8 sps:$4 sm:$0xff]  }
   0x5   :  { %270 = vmatprep.subr.bf16.mxu1 %v708_v6  ;;  %v718_v13 = vld [vmem:[%s1069_s5 + $0x34] ss:$8 sps:$4 sm:$0xff]   ;;  %v722_v15 = vld [vmem:[%s1069_s5 + $0x30] ss:$8 sps:$4 sm:$0xff]   ;;  %v724_v17 = vld [vmem:[%s1069_s5 + $0x44] ss:$8 sps:$4 sm:$0xff]  }
   0x6   :  { %v720_v14 = vld [vmem:[%s1070_s4 + $0x34] ss:$8 sps:$4 sm:$0xff]   ;;  %v723_v16 = vld [vmem:[%s1070_s4 + $0x30] ss:$8 sps:$4 sm:$0xff]   ;;  %v726_v18 = vld [vmem:[%s1070_s4 + $0x44] ss:$8 sps:$4 sm:$0xff]  }
   0x7   :  { %150 = vmatpush1.bf16.msra.mxu0 %v710_v7  ;;  %v728_v19 = vld [vmem:[%s1069_s5 + $0x40] ss:$8 sps:$4 sm:$0xff]   ;;  %v730_v21 = vld [vmem:[%s1069_s5 + $0x54] ss:$8 sps:$4 sm:$0xff]   ;;  %v734_v23 = vld [vmem:[%s1069_s5 + $0x50] ss:$8 sps:$4 sm:$0xff]  }
   0x8   :  { %271 = vmatpush1.bf16.msra.mxu1 %v711_v8  ;;  %151 = vmatprep.subr.bf16.mxu0 %v712_v9  ;;  %v729_v20 = vld [vmem:[%s1070_s4 + $0x40] ss:$8 sps:$4 sm:$0xff]   ;;  %v732_v22 = vld [vmem:[%s1070_s4 + $0x54] ss:$8 sps:$4 sm:$0xff]   ;;  %v735_v24 = vld [vmem:[%s1070_s4 + $0x50] ss:$8 sps:$4 sm:$0xff]  }
   0x9   :  { %272 = vmatprep.subr.bf16.mxu1 %v714_v10  ;;  %v736_v25 = vld [vmem:[%s1069_s5 + $0x64] ss:$8 sps:$4 sm:$0xff]   ;;  %v740_v27 = vld [vmem:[%s1069_s5 + $0x60] ss:$8 sps:$4 sm:$0xff]   ;;  %v742_v29 = vld [vmem:[%s1069_s5 + $0x74] ss:$8 sps:$4 sm:$0xff]  }
   0xa   :  { %v738_v26 = vld [vmem:[%s1070_s4 + $0x64] ss:$8 sps:$4 sm:$0xff]   ;;  %v741_v28 = vld [vmem:[%s1070_s4 + $0x60] ss:$8 sps:$4 sm:$0xff]   ;;  %v744_v30 = vld [vmem:[%s1070_s4 + $0x74] ss:$8 sps:$4 sm:$0xff]  }
   0xb   :  { %152 = vmatpush1.bf16.msra.mxu0 %v716_v11  ;;  %v746_v31 = vld [vmem:[%s1069_s5 + $0x70] ss:$8 sps:$4 sm:$0xff]   ;;  %v750_v33 = vld [vmem:[%s1071_s6 + $0x4] ss:$8 sps:$4 sm:$0xff]   ;;  %v50_v35 = vld [vmem:[%s1073_s1] sm:$0x3] }
   0xc   :  { %273 = vmatpush1.bf16.msra.mxu1 %v717_v12  ;;  %153 = vmatprep.subr.bf16.mxu0 %v718_v13  ;;  %v747_v32 = vld [vmem:[%s1070_s4 + $0x70] ss:$8 sps:$4 sm:$0xff]   ;;  %v753_v34 = vld [vmem:[%s1072_s7 + $0x4] ss:$8 sps:$4 sm:$0xff]   ;;  %v33_v36 = vld [vmem:[%s1074_s0] sm:$0x3] }
   0xd   :  { %274 = vmatprep.subr.bf16.mxu1 %v720_v14  ;;  %v748_v37 = vld [vmem:[%s1071_s6] ss:$8 sps:$4 sm:$0xff]   ;;  %v756_v39 = vld [vmem:[%s1071_s6 + $0x14] ss:$8 sps:$4 sm:$0xff]   ;;  %v754_v41 = vld [vmem:[%s1071_s6 + $0x10] ss:$8 sps:$4 sm:$0xff]  }
   0xe   :  { %v751_v38 = vld [vmem:[%s1072_s7] ss:$8 sps:$4 sm:$0xff]   ;;  %v759_v40 = vld [vmem:[%s1072_s7 + $0x14] ss:$8 sps:$4 sm:$0xff]   ;;  %v757_v42 = vld [vmem:[%s1072_s7 + $0x10] ss:$8 sps:$4 sm:$0xff]  }
   0xf   :  { %154 = vmatpush1.bf16.msra.mxu0 %v722_v15  ;;  %v762_v43 = vld [vmem:[%s1071_s6 + $0x24] ss:$8 sps:$4 sm:$0xff]   ;;  %v760_v45 = vld [vmem:[%s1071_s6 + $0x20] ss:$8 sps:$4 sm:$0xff]   ;;  %v768_v47 = vld [vmem:[%s1071_s6 + $0x34] ss:$8 sps:$4 sm:$0xff]   ;;  %v591_v15 = vlaneseq }
  0x10   :  { %275 = vmatpush1.bf16.msra.mxu1 %v723_v16  ;;  %155 = vmatprep.subr.bf16.mxu0 %v724_v17  ;;  %v765_v44 = vld [vmem:[%s1072_s7 + $0x24] ss:$8 sps:$4 sm:$0xff]   ;;  %v763_v46 = vld [vmem:[%s1072_s7 + $0x20] ss:$8 sps:$4 sm:$0xff]   ;;  %v771_v48 = vld [vmem:[%s1072_s7 + $0x34] ss:$8 sps:$4 sm:$0xff]  }
  0x11   :  { %276 = vmatprep.subr.bf16.mxu1 %v726_v18  ;;  %v766_v49 = vld [vmem:[%s1071_s6 + $0x30] ss:$8 sps:$4 sm:$0xff]   ;;  %v774_v51 = vld [vmem:[%s1071_s6 + $0x44] ss:$8 sps:$4 sm:$0xff]   ;;  %v772_v53 = vld [vmem:[%s1071_s6 + $0x40] ss:$8 sps:$4 sm:$0xff]  }
  0x12   :  { %v769_v50 = vld [vmem:[%s1072_s7 + $0x30] ss:$8 sps:$4 sm:$0xff]   ;;  %v777_v52 = vld [vmem:[%s1072_s7 + $0x44] ss:$8 sps:$4 sm:$0xff]   ;;  %v775_v54 = vld [vmem:[%s1072_s7 + $0x40] ss:$8 sps:$4 sm:$0xff]  }
  0x13   :  { %156 = vmatpush1.bf16.msra.mxu0 %v728_v19  ;;  %v780_v55 = vld [vmem:[%s1071_s6 + $0x54] ss:$8 sps:$4 sm:$0xff]   ;;  %v778_v57 = vld [vmem:[%s1071_s6 + $0x50] ss:$8 sps:$4 sm:$0xff]   ;;  %v786_v59 = vld [vmem:[%s1071_s6 + $0x64] ss:$8 sps:$4 sm:$0xff]  }
  0x14   :  { %277 = vmatpush1.bf16.msra.mxu1 %v729_v20  ;;  %157 = vmatprep.subr.bf16.mxu0 %v730_v21  ;;  %v783_v56 = vld [vmem:[%s1072_s7 + $0x54] ss:$8 sps:$4 sm:$0xff]   ;;  %v781_v58 = vld [vmem:[%s1072_s7 + $0x50] ss:$8 sps:$4 sm:$0xff]   ;;  %v789_v60 = vld [vmem:[%s1072_s7 + $0x64] ss:$8 sps:$4 sm:$0xff]  }
  0x15   :  { %278 = vmatprep.subr.bf16.mxu1 %v732_v22  ;;  %v784_v61 = vld [vmem:[%s1071_s6 + $0x60] ss:$8 sps:$4 sm:$0xff]   ;;  %v792_v63 = vld [vmem:[%s1071_s6 + $0x74] ss:$8 sps:$4 sm:$0xff]   ;;  %v793_v2 = vld [vmem:[%s1072_s7 + $0x70] ss:$8 sps:$4 sm:$0xff]  }
  0x16   :  { %v787_v62 = vld [vmem:[%s1072_s7 + $0x60] ss:$8 sps:$4 sm:$0xff]   ;;  %v795_v0 = vld [vmem:[%s1072_s7 + $0x74] ss:$8 sps:$4 sm:$0xff]   ;;  %v592_v16 = vshrl.u32 %v591_v15, 7 }
  0x17   :  { %158 = vmatpush1.bf16.msra.mxu0 %v734_v23  ;;  %v309_v3 = vld [vmem:[%s1075_s2] sm:$0x3] }
  0x18   :  { %279 = vmatpush1.bf16.msra.mxu1 %v735_v24  ;;  %159 = vmatprep.subr.bf16.mxu0 %v736_v25  ;;  %v449_v4 = vld [vmem:[%s1076_s3] sm:$0x3]  ;;  %v593_v17 = vsub.s32 0, %v592_v16  ;;  %v597_v19 = vsub.s32 1, %v592_v16 }
  0x19   :  { %280 = vmatprep.subr.bf16.mxu1 %v738_v26  ;;  %v589_v18 = vld [vmem:[%s1077_s8] sm:$0x3] }
  0x1a   :  { %v594_v23 = vrot.slane %v589_v18, %v593_v17 }
  0x1b   :  { %160 = vmatpush1.bf16.msra.mxu0 %v740_v27  ;;  %v598_v27 = vrot.slane %v589_v18, %v597_v19 }
  0x1c   :  { %281 = vmatpush1.bf16.msra.mxu1 %v741_v28  ;;  %161 = vmatprep.subr.bf16.mxu0 %v742_v29 }
  0x1d   :  { %282 = vmatprep.subr.bf16.mxu1 %v744_v30 }
  0x1f   :  { %162 = vmatpush1.bf16.msra.mxu0 %v746_v31 }
  0x20   :  { %283 = vmatpush1.bf16.msra.mxu1 %v747_v32  ;;  %406 = vmatprep.subr.bf16.mxu0 %v750_v33 }
  0x21   :  { %546 = vmatprep.subr.bf16.mxu1 %v753_v34 }
  0x22   :  { %180 = vmatmul.mubr.bf16.vlgmr.msra.gmra.mrb[0].mxu0 %v50_v35 }
  0x23   :  { %301 = vmatmul.mubr.bf16.vlgmr.msra.gmra.mrb[0].mxu1 %v33_v36  ;;  %407 = vmatpush1.bf16.msra.mxu0 %v748_v37 }
  0x24   :  { %547 = vmatpush1.bf16.msra.mxu1 %v751_v38  ;;  %408 = vmatprep.subr.bf16.mxu0 %v756_v39 }
  0x25   :  { %548 = vmatprep.subr.bf16.mxu1 %v759_v40  ;;  %438 = vmatprep.mubr.bf16.mxu0 %v804_v1 }
  0x26   :  { %578 = vmatprep.mubr.bf16.mxu1 %v804_v1  ;;  %v790_v1 = vld [vmem:[%s1071_s6 + $0x70] ss:$8 sps:$4 sm:$0xff]  }
  0x27   :  { %409 = vmatpush1.bf16.msra.mxu0 %v754_v41 }
  0x28   :  { %549 = vmatpush1.bf16.msra.mxu1 %v757_v42  ;;  %410 = vmatprep.subr.bf16.mxu0 %v762_v43 }
  0x29   :  { %550 = vmatprep.subr.bf16.mxu1 %v765_v44 }
  0x2b   :  { %411 = vmatpush1.bf16.msra.mxu0 %v760_v45 }
  0x2c   :  { %551 = vmatpush1.bf16.msra.mxu1 %v763_v46  ;;  %412 = vmatprep.subr.bf16.mxu0 %v768_v47 }
  0x2d   :  { %552 = vmatprep.subr.bf16.mxu1 %v771_v48 }
  0x2f   :  { %413 = vmatpush1.bf16.msra.mxu0 %v766_v49 }
  0x30   :  { %553 = vmatpush1.bf16.msra.mxu1 %v769_v50  ;;  %414 = vmatprep.subr.bf16.mxu0 %v774_v51 }
  0x31   :  { %554 = vmatprep.subr.bf16.mxu1 %v777_v52 }
  0x33   :  { %415 = vmatpush1.bf16.msra.mxu0 %v772_v53 }
  0x34   :  { %555 = vmatpush1.bf16.msra.mxu1 %v775_v54  ;;  %416 = vmatprep.subr.bf16.mxu0 %v780_v55 }
  0x35   :  { %556 = vmatprep.subr.bf16.mxu1 %v783_v56 }
  0x37   :  { %417 = vmatpush1.bf16.msra.mxu0 %v778_v57 }
  0x38   :  { %557 = vmatpush1.bf16.msra.mxu1 %v781_v58  ;;  %418 = vmatprep.subr.bf16.mxu0 %v786_v59 }
  0x39   :  { %558 = vmatprep.subr.bf16.mxu1 %v789_v60 }
  0x3b   :  { %419 = vmatpush1.bf16.msra.mxu0 %v784_v61 }
  0x3c   :  { %559 = vmatpush1.bf16.msra.mxu1 %v787_v62  ;;  %420 = vmatprep.subr.bf16.mxu0 %v792_v63 }
  0x3d   :  { %560 = vmatprep.subr.bf16.mxu1 %v795_v0 }
  0x3f   :  { %421 = vmatpush1.bf16.msra.mxu0 %v790_v1 }
  0x40   :  { %561 = vmatpush1.bf16.msra.mxu1 %v793_v2 }
  0x42   :  { %439 = vmatmul.mubr.bf16.vlgmr.msra.gmra.mrb[4].mxu0 %v309_v3 }
  0x43   :  { %579 = vmatmul.mubr.bf16.vlgmr.msra.gmra.mrb[4].mxu1 %v449_v4 }
  0xf5   :  { %v181_v5 = vpop.f32.mrb[0].mxu0 }
  0xf6   :  { %v302_v6 = vpop.f32.mrb[0].mxu1  ;;  %v183_v8 = vpop.f32.mrb[1].mxu0 }
  0xf7   :  { %v303_v7 = vadd.f32 %v302_v6, %v181_v5  ;;  %v304_v9 = vpop.f32.mrb[1].mxu1  ;;  %v185_v11 = vpop.f32.mrb[2].mxu0 }
  0xf8   :  { %v305_v10 = vadd.f32 %v304_v9, %v183_v8  ;;  %v306_v12 = vpop.f32.mrb[2].mxu1  ;;  %v186_v13 = vpop.f32.mrb[3].mxu0 }
  0xf9   :  { %v307_v14 = vpop.f32.mrb[3].mxu1 }
 0x115   :  { %v440_v20 = vpop.f32.mrb[4].mxu0 }
 0x116   :  { %v580_v21 = vpop.f32.mrb[4].mxu1  ;;  %v447_v22 = vadd.f32 %v440_v20, %v303_v7  ;;  %v442_v24 = vpop.f32.mrb[5].mxu0 }
 0x117   :  { %v582_v25 = vpop.f32.mrb[5].mxu1  ;;  %v448_v26 = vadd.f32 %v442_v24, %v305_v10  ;;  %v444_v28 = vpop.f32.mrb[6].mxu0 }
 0x118   :  { %v584_v29 = vpop.f32.mrb[6].mxu1  ;;  %v587_v30 = vadd.f32 %v580_v21, %v447_v22  ;;  %v445_v31 = vpop.f32.mrb[7].mxu0 }
 0x119   :  { %v585_v32 = vpop.f32.mrb[7].mxu1  ;;  %v588_v33 = vadd.f32 %v582_v25, %v448_v26 }
 0x11a   :  { %v601_v34 = vadd.f32 %v594_v23, %v587_v30 }
 0x11b   :  { %v602_v35 = vadd.f32 %v598_v27, %v588_v33 }
 0x11c   :  { %v603_v36 = vsub.f32 0.0, %v601_v34 }
 0x11d   :  { %v604_v37 = vsub.f32 0.0, %v602_v35 }
 0x11e   :  { %v605_v38 = vmul.f32 1.442695, %v603_v36 }
 0x11f   :  { %v607_v39 = vmul.f32 1.442695, %v604_v37 }
 0x120   :  { %796 = vpow2.f32 %v605_v38 }
 0x121   :  { %798 = vpow2.f32 %v607_v39 }
 0x12a   :  { %v797_v40 = vpop.eup %796 }
 0x12b   :  { %v799_v41 = vpop.eup %798  ;;  %v609_v42 = vadd.f32 1.0, %v797_v40 }
 0x12c   :  { %v610_v43 = vadd.f32 1.0, %v799_v41 }
 0x12d   :  { %800 = vrcp.f32 %v609_v42 }
 0x12e   :  { %802 = vrcp.f32 %v610_v43 }
 0x137   :  { %v801_v44 = vpop.eup %800 }
 0x138   :  { %v803_v45 = vpop.eup %802  ;;  %v613_v46 = vmul.f32 %v801_v44, %v601_v34 }
 0x139   :  { %v614_v47 = vmul.f32 %v803_v45, %v602_v35 }
 0x13b   :  { %v697_v48 = vpack.c.bf16 %v614_v47, %v613_v46 }
 0x13d   :  { %698 = vst.sshfl [vmem:[%s1078_s9] sm:$0x33 pattern:$0x76325410] %v697_v48 }

</bundles_post_ra>
